<compile_context>
chip_gen: v7x
topology: tpu7x:2x2x1
jax: 0.10.0
libtpu: 0.0.40
codegen_flags: <defaults>
</compile_context>

<pallas_src>
import functools

import jax
import jax.numpy as jnp
from jax.experimental import pallas as pl
from jax.experimental.pallas import tpu as pltpu

_RESNET34_CFG = ((64, 3, 1), (128, 4, 2), (256, 6, 2), (512, 3, 2))  # (out_ch, n_blocks, stride)
_BN_EPS = 1e-5


@functools.lru_cache(maxsize=None)
def _vmem_limit_bytes():
    """Scoped VMEM limit that is safe on v5e/v6e (128 MiB) and v7x (64 MiB physical)."""
    try:
        cap = int(pltpu.get_tpu_info().vmem_capacity_bytes)
    except Exception:  # conservative fallback if the query is unavailable
        cap = 64 * 1024 * 1024
    return max(16 * 1024 * 1024, min((cap * 3) // 8, 48 * 1024 * 1024))


def _pick_tile(dim, candidates):
    for c in candidates:
        if dim % c == 0:
            return c
    return dim  # fall back to a full-extent block (always legal)


# ----------------------------------------------------------------------------
# Pallas kernels
# ----------------------------------------------------------------------------
def _gemm_bn_act_kernel(x_ref, w_ref, b_ref, *rest, relu, has_res):
    """Tiled GEMM with f32 accumulator; epilogue: +bias (folded BN), +residual, ReLU."""
    if has_res:
        res_ref, o_ref, acc_ref = rest
    else:
        o_ref, acc_ref = rest

    @pl.when(pl.program_id(2) == 0)
    def _():
        acc_ref[...] = jnp.zeros_like(acc_ref)

    # bf16 x bf16 -> f32: native MXU rate, f32 accumulation.
    acc_ref[...] += jnp.dot(x_ref[...], w_ref[...], preferred_element_type=jnp.float32)

    @pl.when(pl.program_id(2) == pl.num_programs(2) - 1)
    def _():
        y = acc_ref[...] + b_ref[...]
        if has_res:
            y = y + res_ref[...]
        if relu:
            y = jnp.maximum(y, 0.0)
        o_ref[...] = y


def _head_kernel(x_ref, w_ref, b_ref, o_ref):
    """Global average pool over spatial dim + Linear(512, 1) as a VPU reduce (no MXU)."""
    pooled = jnp.mean(x_ref[...], axis=1)                                   # (B, C)
    o_ref[...] = jnp.sum(pooled * w_ref[...], axis=-1, keepdims=True) + b_ref[...]


# ----------------------------------------------------------------------------
# Pallas wrappers
# ----------------------------------------------------------------------------
def fused_gemm(x, w, bias, res=None, relu=True):
    """y = x(bf16) @ w(bf16) in f32; + bias; (+ residual); (ReLU).  Tiled + pipelined."""
    M, K = x.shape
    K2, N = w.shape
    assert K == K2
    has_res = res is not None

    tm = _pick_tile(M, (256, 128, 64, 32, 16, 8))
    tn = _pick_tile(N, (256, 128))
    # Prefer 256/512-wide K tiles (v6e/v7x MXU is 2x256^2); K not a multiple of 128
    # (stem 147, layer1 576) uses a single full-K block, avoiding a padded HBM copy.
    tk = _pick_tile(K, (512, 256, 128)) if K % 128 == 0 else K
    grid = (M // tm, N // tn, K // tk)

    kernel = functools.partial(_gemm_bn_act_kernel, relu=relu, has_res=has_res)
    args = [x, w, bias.reshape(1, N)]
    in_specs = [
        pl.BlockSpec((tm, tk), lambda i, j, k: (i, k)),
        pl.BlockSpec((tk, tn), lambda i, j, k: (k, j)),
        pl.BlockSpec((1, tn), lambda i, j, k: (0, j)),
    ]
    if has_res:
        args.append(res)
        in_specs.append(pl.BlockSpec((tm, tn), lambda i, j, k: (i, j)))

    bytes_accessed = int(
        x.size * x.dtype.itemsize + w.size * w.dtype.itemsize + 4 * N
        + 4 * M * N * (2 if has_res else 1)
    )
    return pl.pallas_call(
        kernel,
        grid=grid,
        in_specs=in_specs,
        out_specs=pl.BlockSpec((tm, tn), lambda i, j, k: (i, j)),
        out_shape=jax.ShapeDtypeStruct((M, N), jnp.float32),
        scratch_shapes=[pltpu.VMEM((tm, tn), jnp.float32)],
        compiler_params=pltpu.CompilerParams(
            dimension_semantics=("parallel", "parallel", "arbitrary"),
            vmem_limit_bytes=_vmem_limit_bytes(),
        ),
        cost_estimate=pl.CostEstimate(
            flops=2 * M * N * K, transcendentals=0, bytes_accessed=bytes_accessed
        ),
    )(*args)


def _im2col(x, kh, kw, stride, pad):
    """x: (N,H,W,C) -> patches (N*Ho*Wo, kh*kw*C), ordered (ki, kj, c)."""
    N, H, W, C = x.shape
    xp = jnp.pad(x, ((0, 0), (pad, pad), (pad, pad), (0, 0)))
    Ho = (H + 2 * pad - kh) // stride + 1
    Wo = (W + 2 * pad - kw) // stride + 1
    cols = []
    for i in range(kh):
        for j in range(kw):
            cols.append(
                jax.lax.slice(
                    xp,
                    (0, i, j, 0),
                    (N, i + (Ho - 1) * stride + 1, j + (Wo - 1) * stride + 1, C),
                    (1, stride, stride, 1),
                )
            )
    patches = jnp.stack(cols, axis=3)  # (N, Ho, Wo, kh*kw, C)
    return patches.reshape(N * Ho * Wo, kh * kw * C), Ho, Wo


def conv_bn(x, params, stride, pad, relu=True, res=None):
    """Conv (im2col + tiled Pallas GEMM) with BN folded into weights/bias."""
    w, bias = params  # w: (kh, kw, Cin, Cout) bf16 with BN scale folded; bias: (Cout,) f32
    kh, kw, cin, cout = w.shape
    N = x.shape[0]
    # bf16 patches: halves im2col HBM traffic and feeds the MXU at native rate.
    cols, Ho, Wo = _im2col(x.astype(jnp.bfloat16), kh, kw, stride, pad)
    res_flat = None if res is None else res.reshape(N * Ho * Wo, cout)
    y = fused_gemm(cols, w.reshape(kh * kw * cin, cout), bias, res=res_flat, relu=relu)
    return y.reshape(N, Ho, Wo, cout)


def maxpool_3x3_s2(x):
    """3x3, stride 2, pad 1 max-pool (padding acts as -inf, matching PyTorch).

    Done as a chained jnp.maximum over 9 strided views: XLA fuses this into a single
    memory-bound loop, avoiding the 9x-sized stacked HBM intermediate of a separate kernel.
    """
    N, H, W, C = x.shape
    xp = jnp.pad(x, ((0, 0), (1, 1), (1, 1), (0, 0)), constant_values=-jnp.inf)
    Ho = (H + 2 - 3) // 2 + 1
    Wo = (W + 2 - 3) // 2 + 1
    out = None
    for i in range(3):
        for j in range(3):
            v = jax.lax.slice(
                xp,
                (0, i, j, 0),
                (N, i + (Ho - 1) * 2 + 1, j + (Wo - 1) * 2 + 1, C),
                (1, 2, 2, 1),
            )
            out = v if out is None else jnp.maximum(out, v)
    return out


def avgpool_fc(x, fc_w, fc_b):
    """Global average pool over spatial dims + Linear(512, 1), fused in one Pallas kernel."""
    N, H, W, C = x.shape
    feat = x.reshape(N, H * W, C)
    return pl.pallas_call(
        _head_kernel,
        grid=(1,),
        in_specs=[
            pl.BlockSpec((N, H * W, C), lambda i: (0, 0, 0)),
            pl.BlockSpec((1, C), lambda i: (0, 0)),
            pl.BlockSpec((1, 1), lambda i: (0, 0)),
        ],
        out_specs=pl.BlockSpec((N, 1), lambda i: (0, 0)),
        out_shape=jax.ShapeDtypeStruct((N, 1), jnp.float32),
        compiler_params=pltpu.CompilerParams(vmem_limit_bytes=_vmem_limit_bytes()),
    )(feat, fc_w, fc_b)


# ----------------------------------------------------------------------------
# Parameter construction (deterministic, synthetic — no checkpoint)
# ----------------------------------------------------------------------------
def _conv_bn_params(key, kh, kw, cin, cout):
    k1, k2, k3 = jax.random.split(key, 3)
    fan_in = kh * kw * cin
    w = jax.random.normal(k1, (kh, kw, cin, cout), jnp.float32) * jnp.sqrt(2.0 / fan_in)
    gamma = 1.0 + 0.1 * jax.random.normal(k2, (cout,), jnp.float32)
    beta = 0.1 * jax.random.normal(k3, (cout,), jnp.float32)
    running_mean = jnp.zeros((cout,), jnp.float32)
    running_var = jnp.ones((cout,), jnp.float32)
    scale = gamma / jnp.sqrt(running_var + _BN_EPS)  # folded eval-mode BN
    bias = beta - running_mean * scale
    # Fold BN scale into the conv weights and pre-cast to bf16 for the MXU.
    w_folded = (w * scale).astype(jnp.bfloat16)
    return (w_folded, bias)


def build_resnet34_params(key):
    params = {}
    key, k = jax.random.split(key)
    params["stem"] = _conv_bn_params(k, 7, 7, 3, 64)
    in_ch = 64
    layers = []
    for out_ch, n_blocks, stride in _RESNET34_CFG:
        stage = []
        for bi in range(n_blocks):
            s = stride if bi == 0 else 1
            blk = {}
            key, k1 = jax.random.split(key)
            blk["conv1"] = _conv_bn_params(k1, 3, 3, in_ch, out_ch)
            key, k2 = jax.random.split(key)
            blk["conv2"] = _conv_bn_params(k2, 3, 3, out_ch, out_ch)
            if s != 1 or in_ch != out_ch:
                key, k3 = jax.random.split(key)
                blk["down"] = _conv_bn_params(k3, 1, 1, in_ch, out_ch)
            stage.append(blk)
            in_ch = out_ch
        layers.append(stage)
    params["layers"] = layers
    key, kw, _ = jax.random.split(key, 3)
    params["fc_w"] = jax.random.normal(kw, (1, 512), jnp.float32) / jnp.sqrt(512.0)
    params["fc_b"] = jnp.zeros((1, 1), jnp.float32)
    return params


# ----------------------------------------------------------------------------
# Forward pass (== frontal_cls.forward)
# ----------------------------------------------------------------------------
def basic_block(x, blk, stride):
    identity = x
    out = conv_bn(x, blk["conv1"], stride=stride, pad=1, relu=True)
    if "down" in blk:
        identity = conv_bn(x, blk["down"], stride=stride, pad=0, relu=False)
    # conv2 + bn2 + residual add + relu, all fused in one Pallas GEMM kernel.
    out = conv_bn(out, blk["conv2"], stride=1, pad=1, relu=True, res=identity)
    return out


def frontal_cls_forward(params, x_nchw):
    x = jnp.transpose(x_nchw, (0, 2, 3, 1))  # NCHW -> NHWC
    x = conv_bn(x, params["stem"], stride=2, pad=3, relu=True)
    x = maxpool_3x3_s2(x)
    for stage, (_, _, stride) in zip(params["layers"], _RESNET34_CFG):
        for bi, blk in enumerate(stage):
            x = basic_block(x, blk, stride if bi == 0 else 1)
    return avgpool_fc(x, params["fc_w"], params["fc_b"])  # (B, 1)


# TODO(synk): pretrained=True ImageNet weight loading has no Pallas equivalent; weights are
#             deterministic synthetic Kaiming init instead.

if __name__ == "__main__":
    key = jax.random.PRNGKey(0)
    pkey, xkey = jax.random.split(key)
    params = build_resnet34_params(pkey)
    # NCHW input, like the PyTorch module (small spatial size: 64x64).
    x = jax.random.normal(xkey, (2, 3, 64, 64), jnp.float32)
    out = jax.jit(frontal_cls_forward)(params, x)
    out = jax.block_until_ready(out)
    assert out.shape == (2, 1) and out.dtype == jnp.float32
    print("KERNEL_OK")
</pallas_src>

<mosaic_0001>
module attributes {stable_mosaic.version = 11 : i64} {
  func.func @_gemm_bn_act_kernel(%arg0: i32, %arg1: i32, %arg2: i32, %arg3: memref<256x147xbf16, #tpu.memory_space<vmem>>, %arg4: memref<147x64xbf16, #tpu.memory_space<vmem>>, %arg5: memref<1x64xf32, #tpu.memory_space<vmem>>, %arg6: memref<256x64xf32, #tpu.memory_space<vmem>>, %arg7: memref<256x64xf32, #tpu.memory_space<vmem>>) attributes {dimension_semantics = [#tpu.dimension_semantics<parallel>, #tpu.dimension_semantics<parallel>, #tpu.dimension_semantics<arbitrary>], iteration_bounds = array<i64: 8, 1, 1>, scalar_prefetch = 0 : i64, scratch_operands = 1 : i64, tpu.core_type = #tpu.core_type<tc>, window_params = [{transform_indices = @transform_0, window_bounds = array<i64: 256, 147>}, {transform_indices = @transform_1, window_bounds = array<i64: 147, 64>}, {transform_indices = @transform_2, window_bounds = array<i64: 1, 64>}, {transform_indices = @transform_3, window_bounds = array<i64: 256, 64>}]} {
    %c0_i32 = arith.constant 0 : i32
    %0 = arith.cmpi eq, %arg2, %c0_i32 : i32
    %1 = arith.extui %0 : i1 to i32
    %c0_i32_0 = arith.constant 0 : i32
    %2 = arith.cmpi ne, %1, %c0_i32_0 : i32
    scf.if %2 {
      %cst_10 = arith.constant 0.000000e+00 : f32
      %12 = vector.broadcast %cst_10 : f32 to vector<256x64xf32>
      %c0_11 = arith.constant 0 : index
      %c0_12 = arith.constant 0 : index
      %13 = vector.load %arg7[%c0_11, %c0_12] : memref<256x64xf32, #tpu.memory_space<vmem>>, vector<256x64xf32>
      tpu.vector_store %arg7[%c0_11, %c0_12], %12 {strides = array<i32>} : memref<256x64xf32, #tpu.memory_space<vmem>>, vector<256x64xf32>,
    } else {
    }
    %c0 = arith.constant 0 : index
    %c0_1 = arith.constant 0 : index
    %3 = vector.load %arg7[%c0, %c0_1] : memref<256x64xf32, #tpu.memory_space<vmem>>, vector<256x64xf32>
    %c0_2 = arith.constant 0 : index
    %c0_3 = arith.constant 0 : index
    %4 = vector.load %arg3[%c0_2, %c0_3] : memref<256x147xbf16, #tpu.memory_space<vmem>>, vector<256x147xbf16>
    %c0_4 = arith.constant 0 : index
    %c0_5 = arith.constant 0 : index
    %5 = vector.load %arg4[%c0_4, %c0_5] : memref<147x64xbf16, #tpu.memory_space<vmem>>, vector<147x64xbf16>
    %cst = arith.constant dense<0.000000e+00> : vector<256x64xf32>
    %6 = tpu.matmul %4, %5, %cst {dimension_numbers = #tpu.dot_dimension_numbers<[1], [0], [0], [1], [0, 0, 1, 1], [], []>} : vector<256x147xbf16>, vector<147x64xbf16>, vector<256x64xf32> -> vector<256x64xf32>
    %7 = arith.addf %3, %6 : vector<256x64xf32>
    %c0_6 = arith.constant 0 : index
    %c0_7 = arith.constant 0 : index
    %8 = vector.load %arg7[%c0_6, %c0_7] : memref<256x64xf32, #tpu.memory_space<vmem>>, vector<256x64xf32>
    tpu.vector_store %arg7[%c0_6, %c0_7], %7 {strides = array<i32>} : memref<256x64xf32, #tpu.memory_space<vmem>>, vector<256x64xf32>,
    %c0_i32_8 = arith.constant 0 : i32
    %9 = arith.cmpi eq, %arg2, %c0_i32_8 : i32
    %10 = arith.extui %9 : i1 to i32
    %c0_i32_9 = arith.constant 0 : i32
    %11 = arith.cmpi ne, %10, %c0_i32_9 : i32
    scf.if %11 {
      %c0_10 = arith.constant 0 : index
      %c0_11 = arith.constant 0 : index
      %12 = vector.load %arg7[%c0_10, %c0_11] : memref<256x64xf32, #tpu.memory_space<vmem>>, vector<256x64xf32>
      %c0_12 = arith.constant 0 : index
      %c0_13 = arith.constant 0 : index
      %13 = vector.load %arg5[%c0_12, %c0_13] : memref<1x64xf32, #tpu.memory_space<vmem>>, vector<1x64xf32>
      %14 = vector.broadcast %13 : vector<1x64xf32> to vector<256x64xf32>
      %15 = arith.addf %12, %14 : vector<256x64xf32>
      %cst_14 = arith.constant 0.000000e+00 : f32
      %16 = vector.broadcast %cst_14 : f32 to vector<256x64xf32>
      %17 = arith.maximumf %15, %16 : vector<256x64xf32>
      %c0_15 = arith.constant 0 : index
      %c0_16 = arith.constant 0 : index
      %18 = vector.load %arg6[%c0_15, %c0_16] : memref<256x64xf32, #tpu.memory_space<vmem>>, vector<256x64xf32>
      tpu.vector_store %arg6[%c0_15, %c0_16], %17 {strides = array<i32>} : memref<256x64xf32, #tpu.memory_space<vmem>>, vector<256x64xf32>,
    } else {
    }
    return
  }
  func.func @transform_0(%arg0: i32, %arg1: i32, %arg2: i32) -> (i32, i32) {
    %c0_i32 = arith.constant 0 : i32
    return %arg0, %arg2 : i32, i32
  }
  func.func @transform_1(%arg0: i32, %arg1: i32, %arg2: i32) -> (i32, i32) {
    %c0_i32 = arith.constant 0 : i32
    return %arg2, %arg1 : i32, i32
  }
  func.func @transform_2(%arg0: i32, %arg1: i32, %arg2: i32) -> (i32, i32) {
    %c0_i32 = arith.constant 0 : i32
    %c0_i32_0 = arith.constant 0 : i32
    return %c0_i32, %arg1 : i32, i32
  }
  func.func @transform_3(%arg0: i32, %arg1: i32, %arg2: i32) -> (i32, i32) {
    %c0_i32 = arith.constant 0 : i32
    return %arg0, %arg1 : i32, i32
  }
}

module attributes {stable_mosaic.version = 11 : i64} {
  func.func @_gemm_bn_act_kernel(%arg0: i32, %arg1: i32, %arg2: i32, %arg3: memref<256x576xbf16, #tpu.memory_space<vmem>>, %arg4: memref<576x64xbf16, #tpu.memory_space<vmem>>, %arg5: memref<1x64xf32, #tpu.memory_space<vmem>>, %arg6: memref<256x64xf32, #tpu.memory_space<vmem>>, %arg7: memref<256x64xf32, #tpu.memory_space<vmem>>) attributes {dimension_semantics = [#tpu.dimension_semantics<parallel>, #tpu.dimension_semantics<parallel>, #tpu.dimension_semantics<arbitrary>], iteration_bounds = array<i64: 2, 1, 1>, scalar_prefetch = 0 : i64, scratch_operands = 1 : i64, tpu.core_type = #tpu.core_type<tc>, window_params = [{transform_indices = @transform_0, window_bounds = array<i64: 256, 576>}, {transform_indices = @transform_1, window_bounds = array<i64: 576, 64>}, {transform_indices = @transform_2, window_bounds = array<i64: 1, 64>}, {transform_indices = @transform_3, window_bounds = array<i64: 256, 64>}]} {
    %c0_i32 = arith.constant 0 : i32
    %0 = arith.cmpi eq, %arg2, %c0_i32 : i32
    %1 = arith.extui %0 : i1 to i32
    %c0_i32_0 = arith.constant 0 : i32
    %2 = arith.cmpi ne, %1, %c0_i32_0 : i32
    scf.if %2 {
      %cst_10 = arith.constant 0.000000e+00 : f32
      %12 = vector.broadcast %cst_10 : f32 to vector<256x64xf32>
      %c0_11 = arith.constant 0 : index
      %c0_12 = arith.constant 0 : index
      %13 = vector.load %arg7[%c0_11, %c0_12] : memref<256x64xf32, #tpu.memory_space<vmem>>, vector<256x64xf32>
      tpu.vector_store %arg7[%c0_11, %c0_12], %12 {strides = array<i32>} : memref<256x64xf32, #tpu.memory_space<vmem>>, vector<256x64xf32>,
    } else {
    }
    %c0 = arith.constant 0 : index
    %c0_1 = arith.constant 0 : index
    %3 = vector.load %arg7[%c0, %c0_1] : memref<256x64xf32, #tpu.memory_space<vmem>>, vector<256x64xf32>
    %c0_2 = arith.constant 0 : index
    %c0_3 = arith.constant 0 : index
    %4 = vector.load %arg3[%c0_2, %c0_3] : memref<256x576xbf16, #tpu.memory_space<vmem>>, vector<256x576xbf16>
    %c0_4 = arith.constant 0 : index
    %c0_5 = arith.constant 0 : index
    %5 = vector.load %arg4[%c0_4, %c0_5] : memref<576x64xbf16, #tpu.memory_space<vmem>>, vector<576x64xbf16>
    %cst = arith.constant dense<0.000000e+00> : vector<256x64xf32>
    %6 = tpu.matmul %4, %5, %cst {dimension_numbers = #tpu.dot_dimension_numbers<[1], [0], [0], [1], [0, 0, 1, 1], [], []>} : vector<256x576xbf16>, vector<576x64xbf16>, vector<256x64xf32> -> vector<256x64xf32>
    %7 = arith.addf %3, %6 : vector<256x64xf32>
    %c0_6 = arith.constant 0 : index
    %c0_7 = arith.constant 0 : index
    %8 = vector.load %arg7[%c0_6, %c0_7] : memref<256x64xf32, #tpu.memory_space<vmem>>, vector<256x64xf32>
    tpu.vector_store %arg7[%c0_6, %c0_7], %7 {strides = array<i32>} : memref<256x64xf32, #tpu.memory_space<vmem>>, vector<256x64xf32>,
    %c0_i32_8 = arith.constant 0 : i32
    %9 = arith.cmpi eq, %arg2, %c0_i32_8 : i32
    %10 = arith.extui %9 : i1 to i32
    %c0_i32_9 = arith.constant 0 : i32
    %11 = arith.cmpi ne, %10, %c0_i32_9 : i32
    scf.if %11 {
      %c0_10 = arith.constant 0 : index
      %c0_11 = arith.constant 0 : index
      %12 = vector.load %arg7[%c0_10, %c0_11] : memref<256x64xf32, #tpu.memory_space<vmem>>, vector<256x64xf32>
      %c0_12 = arith.constant 0 : index
      %c0_13 = arith.constant 0 : index
      %13 = vector.load %arg5[%c0_12, %c0_13] : memref<1x64xf32, #tpu.memory_space<vmem>>, vector<1x64xf32>
      %14 = vector.broadcast %13 : vector<1x64xf32> to vector<256x64xf32>
      %15 = arith.addf %12, %14 : vector<256x64xf32>
      %cst_14 = arith.constant 0.000000e+00 : f32
      %16 = vector.broadcast %cst_14 : f32 to vector<256x64xf32>
      %17 = arith.maximumf %15, %16 : vector<256x64xf32>
      %c0_15 = arith.constant 0 : index
      %c0_16 = arith.constant 0 : index
      %18 = vector.load %arg6[%c0_15, %c0_16] : memref<256x64xf32, #tpu.memory_space<vmem>>, vector<256x64xf32>
      tpu.vector_store %arg6[%c0_15, %c0_16], %17 {strides = array<i32>} : memref<256x64xf32, #tpu.memory_space<vmem>>, vector<256x64xf32>,
    } else {
    }
    return
  }
  func.func @transform_0(%arg0: i32, %arg1: i32, %arg2: i32) -> (i32, i32) {
    %c0_i32 = arith.constant 0 : i32
    return %arg0, %arg2 : i32, i32
  }
  func.func @transform_1(%arg0: i32, %arg1: i32, %arg2: i32) -> (i32, i32) {
    %c0_i32 = arith.constant 0 : i32
    return %arg2, %arg1 : i32, i32
  }
  func.func @transform_2(%arg0: i32, %arg1: i32, %arg2: i32) -> (i32, i32) {
    %c0_i32 = arith.constant 0 : i32
    %c0_i32_0 = arith.constant 0 : i32
    return %c0_i32, %arg1 : i32, i32
  }
  func.func @transform_3(%arg0: i32, %arg1: i32, %arg2: i32) -> (i32, i32) {
    %c0_i32 = arith.constant 0 : i32
    return %arg0, %arg1 : i32, i32
  }
}

module attributes {stable_mosaic.version = 11 : i64} {
  func.func @_gemm_bn_act_kernel(%arg0: i32, %arg1: i32, %arg2: i32, %arg3: memref<256x576xbf16, #tpu.memory_space<vmem>>, %arg4: memref<576x64xbf16, #tpu.memory_space<vmem>>, %arg5: memref<1x64xf32, #tpu.memory_space<vmem>>, %arg6: memref<256x64xf32, #tpu.memory_space<vmem>>, %arg7: memref<256x64xf32, #tpu.memory_space<vmem>>, %arg8: memref<256x64xf32, #tpu.memory_space<vmem>>) attributes {dimension_semantics = [#tpu.dimension_semantics<parallel>, #tpu.dimension_semantics<parallel>, #tpu.dimension_semantics<arbitrary>], iteration_bounds = array<i64: 2, 1, 1>, scalar_prefetch = 0 : i64, scratch_operands = 1 : i64, tpu.core_type = #tpu.core_type<tc>, window_params = [{transform_indices = @transform_0, window_bounds = array<i64: 256, 576>}, {transform_indices = @transform_1, window_bounds = array<i64: 576, 64>}, {transform_indices = @transform_2, window_bounds = array<i64: 1, 64>}, {transform_indices = @transform_3, window_bounds = array<i64: 256, 64>}, {transform_indices = @transform_4, window_bounds = array<i64: 256, 64>}]} {
    %c0_i32 = arith.constant 0 : i32
    %0 = arith.cmpi eq, %arg2, %c0_i32 : i32
    %1 = arith.extui %0 : i1 to i32
    %c0_i32_0 = arith.constant 0 : i32
    %2 = arith.cmpi ne, %1, %c0_i32_0 : i32
    scf.if %2 {
      %cst_10 = arith.constant 0.000000e+00 : f32
      %12 = vector.broadcast %cst_10 : f32 to vector<256x64xf32>
      %c0_11 = arith.constant 0 : index
      %c0_12 = arith.constant 0 : index
      %13 = vector.load %arg8[%c0_11, %c0_12] : memref<256x64xf32, #tpu.memory_space<vmem>>, vector<256x64xf32>
      tpu.vector_store %arg8[%c0_11, %c0_12], %12 {strides = array<i32>} : memref<256x64xf32, #tpu.memory_space<vmem>>, vector<256x64xf32>,
    } else {
    }
    %c0 = arith.constant 0 : index
    %c0_1 = arith.constant 0 : index
    %3 = vector.load %arg8[%c0, %c0_1] : memref<256x64xf32, #tpu.memory_space<vmem>>, vector<256x64xf32>
    %c0_2 = arith.constant 0 : index
    %c0_3 = arith.constant 0 : index
    %4 = vector.load %arg3[%c0_2, %c0_3] : memref<256x576xbf16, #tpu.memory_space<vmem>>, vector<256x576xbf16>
    %c0_4 = arith.constant 0 : index
    %c0_5 = arith.constant 0 : index
    %5 = vector.load %arg4[%c0_4, %c0_5] : memref<576x64xbf16, #tpu.memory_space<vmem>>, vector<576x64xbf16>
    %cst = arith.constant dense<0.000000e+00> : vector<256x64xf32>
    %6 = tpu.matmul %4, %5, %cst {dimension_numbers = #tpu.dot_dimension_numbers<[1], [0], [0], [1], [0, 0, 1, 1], [], []>} : vector<256x576xbf16>, vector<576x64xbf16>, vector<256x64xf32> -> vector<256x64xf32>
    %7 = arith.addf %3, %6 : vector<256x64xf32>
    %c0_6 = arith.constant 0 : index
    %c0_7 = arith.constant 0 : index
    %8 = vector.load %arg8[%c0_6, %c0_7] : memref<256x64xf32, #tpu.memory_space<vmem>>, vector<256x64xf32>
    tpu.vector_store %arg8[%c0_6, %c0_7], %7 {strides = array<i32>} : memref<256x64xf32, #tpu.memory_space<vmem>>, vector<256x64xf32>,
    %c0_i32_8 = arith.constant 0 : i32
    %9 = arith.cmpi eq, %arg2, %c0_i32_8 : i32
    %10 = arith.extui %9 : i1 to i32
    %c0_i32_9 = arith.constant 0 : i32
    %11 = arith.cmpi ne, %10, %c0_i32_9 : i32
    scf.if %11 {
      %c0_10 = arith.constant 0 : index
      %c0_11 = arith.constant 0 : index
      %12 = vector.load %arg8[%c0_10, %c0_11] : memref<256x64xf32, #tpu.memory_space<vmem>>, vector<256x64xf32>
      %c0_12 = arith.constant 0 : index
      %c0_13 = arith.constant 0 : index
      %13 = vector.load %arg5[%c0_12, %c0_13] : memref<1x64xf32, #tpu.memory_space<vmem>>, vector<1x64xf32>
      %14 = vector.broadcast %13 : vector<1x64xf32> to vector<256x64xf32>
      %15 = arith.addf %12, %14 : vector<256x64xf32>
      %c0_14 = arith.constant 0 : index
      %c0_15 = arith.constant 0 : index
      %16 = vector.load %arg6[%c0_14, %c0_15] : memref<256x64xf32, #tpu.memory_space<vmem>>, vector<256x64xf32>
      %17 = arith.addf %15, %16 : vector<256x64xf32>
      %cst_16 = arith.constant 0.000000e+00 : f32
      %18 = vector.broadcast %cst_16 : f32 to vector<256x64xf32>
      %19 = arith.maximumf %17, %18 : vector<256x64xf32>
      %c0_17 = arith.constant 0 : index
      %c0_18 = arith.constant 0 : index
      %20 = vector.load %arg7[%c0_17, %c0_18] : memref<256x64xf32, #tpu.memory_space<vmem>>, vector<256x64xf32>
      tpu.vector_store %arg7[%c0_17, %c0_18], %19 {strides = array<i32>} : memref<256x64xf32, #tpu.memory_space<vmem>>, vector<256x64xf32>,
    } else {
    }
    return
  }
  func.func @transform_0(%arg0: i32, %arg1: i32, %arg2: i32) -> (i32, i32) {
    %c0_i32 = arith.constant 0 : i32
    return %arg0, %arg2 : i32, i32
  }
  func.func @transform_1(%arg0: i32, %arg1: i32, %arg2: i32) -> (i32, i32) {
    %c0_i32 = arith.constant 0 : i32
    return %arg2, %arg1 : i32, i32
  }
  func.func @transform_2(%arg0: i32, %arg1: i32, %arg2: i32) -> (i32, i32) {
    %c0_i32 = arith.constant 0 : i32
    %c0_i32_0 = arith.constant 0 : i32
    return %c0_i32, %arg1 : i32, i32
  }
  func.func @transform_3(%arg0: i32, %arg1: i32, %arg2: i32) -> (i32, i32) {
    %c0_i32 = arith.constant 0 : i32
    return %arg0, %arg1 : i32, i32
  }
  func.func @transform_4(%arg0: i32, %arg1: i32, %arg2: i32) -> (i32, i32) {
    %c0_i32 = arith.constant 0 : i32
    return %arg0, %arg1 : i32, i32
  }
}

module attributes {stable_mosaic.version = 11 : i64} {
  func.func @_gemm_bn_act_kernel(%arg0: i32, %arg1: i32, %arg2: i32, %arg3: memref<128x576xbf16, #tpu.memory_space<vmem>>, %arg4: memref<576x128xbf16, #tpu.memory_space<vmem>>, %arg5: memref<1x128xf32, #tpu.memory_space<vmem>>, %arg6: memref<128x128xf32, #tpu.memory_space<vmem>>, %arg7: memref<128x128xf32, #tpu.memory_space<vmem>>) attributes {dimension_semantics = [#tpu.dimension_semantics<parallel>, #tpu.dimension_semantics<parallel>, #tpu.dimension_semantics<arbitrary>], iteration_bounds = array<i64: 1, 1, 1>, scalar_prefetch = 0 : i64, scratch_operands = 1 : i64, tpu.core_type = #tpu.core_type<tc>, window_params = [{transform_indices = @transform_0, window_bounds = array<i64: 128, 576>}, {transform_indices = @transform_1, window_bounds = array<i64: 576, 128>}, {transform_indices = @transform_2, window_bounds = array<i64: 1, 128>}, {transform_indices = @transform_3, window_bounds = array<i64: 128, 128>}]} {
    %c0_i32 = arith.constant 0 : i32
    %0 = arith.cmpi eq, %arg2, %c0_i32 : i32
    %1 = arith.extui %0 : i1 to i32
    %c0_i32_0 = arith.constant 0 : i32
    %2 = arith.cmpi ne, %1, %c0_i32_0 : i32
    scf.if %2 {
      %cst_10 = arith.constant 0.000000e+00 : f32
      %12 = vector.broadcast %cst_10 : f32 to vector<128x128xf32>
      %c0_11 = arith.constant 0 : index
      %c0_12 = arith.constant 0 : index
      %13 = vector.load %arg7[%c0_11, %c0_12] : memref<128x128xf32, #tpu.memory_space<vmem>>, vector<128x128xf32>
      tpu.vector_store %arg7[%c0_11, %c0_12], %12 {strides = array<i32>} : memref<128x128xf32, #tpu.memory_space<vmem>>, vector<128x128xf32>,
    } else {
    }
    %c0 = arith.constant 0 : index
    %c0_1 = arith.constant 0 : index
    %3 = vector.load %arg7[%c0, %c0_1] : memref<128x128xf32, #tpu.memory_space<vmem>>, vector<128x128xf32>
    %c0_2 = arith.constant 0 : index
    %c0_3 = arith.constant 0 : index
    %4 = vector.load %arg3[%c0_2, %c0_3] : memref<128x576xbf16, #tpu.memory_space<vmem>>, vector<128x576xbf16>
    %c0_4 = arith.constant 0 : index
    %c0_5 = arith.constant 0 : index
    %5 = vector.load %arg4[%c0_4, %c0_5] : memref<576x128xbf16, #tpu.memory_space<vmem>>, vector<576x128xbf16>
    %cst = arith.constant dense<0.000000e+00> : vector<128x128xf32>
    %6 = tpu.matmul %4, %5, %cst {dimension_numbers = #tpu.dot_dimension_numbers<[1], [0], [0], [1], [0, 0, 1, 1], [], []>} : vector<128x576xbf16>, vector<576x128xbf16>, vector<128x128xf32> -> vector<128x128xf32>
    %7 = arith.addf %3, %6 : vector<128x128xf32>
    %c0_6 = arith.constant 0 : index
    %c0_7 = arith.constant 0 : index
    %8 = vector.load %arg7[%c0_6, %c0_7] : memref<128x128xf32, #tpu.memory_space<vmem>>, vector<128x128xf32>
    tpu.vector_store %arg7[%c0_6, %c0_7], %7 {strides = array<i32>} : memref<128x128xf32, #tpu.memory_space<vmem>>, vector<128x128xf32>,
    %c0_i32_8 = arith.constant 0 : i32
    %9 = arith.cmpi eq, %arg2, %c0_i32_8 : i32
    %10 = arith.extui %9 : i1 to i32
    %c0_i32_9 = arith.constant 0 : i32
    %11 = arith.cmpi ne, %10, %c0_i32_9 : i32
    scf.if %11 {
      %c0_10 = arith.constant 0 : index
      %c0_11 = arith.constant 0 : index
      %12 = vector.load %arg7[%c0_10, %c0_11] : memref<128x128xf32, #tpu.memory_space<vmem>>, vector<128x128xf32>
      %c0_12 = arith.constant 0 : index
      %c0_13 = arith.constant 0 : index
      %13 = vector.load %arg5[%c0_12, %c0_13] : memref<1x128xf32, #tpu.memory_space<vmem>>, vector<1x128xf32>
      %14 = vector.broadcast %13 : vector<1x128xf32> to vector<128x128xf32>
      %15 = arith.addf %12, %14 : vector<128x128xf32>
      %cst_14 = arith.constant 0.000000e+00 : f32
      %16 = vector.broadcast %cst_14 : f32 to vector<128x128xf32>
      %17 = arith.maximumf %15, %16 : vector<128x128xf32>
      %c0_15 = arith.constant 0 : index
      %c0_16 = arith.constant 0 : index
      %18 = vector.load %arg6[%c0_15, %c0_16] : memref<128x128xf32, #tpu.memory_space<vmem>>, vector<128x128xf32>
      tpu.vector_store %arg6[%c0_15, %c0_16], %17 {strides = array<i32>} : memref<128x128xf32, #tpu.memory_space<vmem>>, vector<128x128xf32>,
    } else {
    }
    return
  }
  func.func @transform_0(%arg0: i32, %arg1: i32, %arg2: i32) -> (i32, i32) {
    %c0_i32 = arith.constant 0 : i32
    return %arg0, %arg2 : i32, i32
  }
  func.func @transform_1(%arg0: i32, %arg1: i32, %arg2: i32) -> (i32, i32) {
    %c0_i32 = arith.constant 0 : i32
    return %arg2, %arg1 : i32, i32
  }
  func.func @transform_2(%arg0: i32, %arg1: i32, %arg2: i32) -> (i32, i32) {
    %c0_i32 = arith.constant 0 : i32
    %c0_i32_0 = arith.constant 0 : i32
    return %c0_i32, %arg1 : i32, i32
  }
  func.func @transform_3(%arg0: i32, %arg1: i32, %arg2: i32) -> (i32, i32) {
    %c0_i32 = arith.constant 0 : i32
    return %arg0, %arg1 : i32, i32
  }
}

module attributes {stable_mosaic.version = 11 : i64} {
  func.func @_gemm_bn_act_kernel(%arg0: i32, %arg1: i32, %arg2: i32, %arg3: memref<128x64xbf16, #tpu.memory_space<vmem>>, %arg4: memref<64x128xbf16, #tpu.memory_space<vmem>>, %arg5: memref<1x128xf32, #tpu.memory_space<vmem>>, %arg6: memref<128x128xf32, #tpu.memory_space<vmem>>, %arg7: memref<128x128xf32, #tpu.memory_space<vmem>>) attributes {dimension_semantics = [#tpu.dimension_semantics<parallel>, #tpu.dimension_semantics<parallel>, #tpu.dimension_semantics<arbitrary>], iteration_bounds = array<i64: 1, 1, 1>, scalar_prefetch = 0 : i64, scratch_operands = 1 : i64, tpu.core_type = #tpu.core_type<tc>, window_params = [{transform_indices = @transform_0, window_bounds = array<i64: 128, 64>}, {transform_indices = @transform_1, window_bounds = array<i64: 64, 128>}, {transform_indices = @transform_2, window_bounds = array<i64: 1, 128>}, {transform_indices = @transform_3, window_bounds = array<i64: 128, 128>}]} {
    %c0_i32 = arith.constant 0 : i32
    %0 = arith.cmpi eq, %arg2, %c0_i32 : i32
    %1 = arith.extui %0 : i1 to i32
    %c0_i32_0 = arith.constant 0 : i32
    %2 = arith.cmpi ne, %1, %c0_i32_0 : i32
    scf.if %2 {
      %cst_10 = arith.constant 0.000000e+00 : f32
      %12 = vector.broadcast %cst_10 : f32 to vector<128x128xf32>
      %c0_11 = arith.constant 0 : index
      %c0_12 = arith.constant 0 : index
      %13 = vector.load %arg7[%c0_11, %c0_12] : memref<128x128xf32, #tpu.memory_space<vmem>>, vector<128x128xf32>
      tpu.vector_store %arg7[%c0_11, %c0_12], %12 {strides = array<i32>} : memref<128x128xf32, #tpu.memory_space<vmem>>, vector<128x128xf32>,
    } else {
    }
    %c0 = arith.constant 0 : index
    %c0_1 = arith.constant 0 : index
    %3 = vector.load %arg7[%c0, %c0_1] : memref<128x128xf32, #tpu.memory_space<vmem>>, vector<128x128xf32>
    %c0_2 = arith.constant 0 : index
    %c0_3 = arith.constant 0 : index
    %4 = vector.load %arg3[%c0_2, %c0_3] : memref<128x64xbf16, #tpu.memory_space<vmem>>, vector<128x64xbf16>
    %c0_4 = arith.constant 0 : index
    %c0_5 = arith.constant 0 : index
    %5 = vector.load %arg4[%c0_4, %c0_5] : memref<64x128xbf16, #tpu.memory_space<vmem>>, vector<64x128xbf16>
    %cst = arith.constant dense<0.000000e+00> : vector<128x128xf32>
    %6 = tpu.matmul %4, %5, %cst {dimension_numbers = #tpu.dot_dimension_numbers<[1], [0], [0], [1], [0, 0, 1, 1], [], []>} : vector<128x64xbf16>, vector<64x128xbf16>, vector<128x128xf32> -> vector<128x128xf32>
    %7 = arith.addf %3, %6 : vector<128x128xf32>
    %c0_6 = arith.constant 0 : index
    %c0_7 = arith.constant 0 : index
    %8 = vector.load %arg7[%c0_6, %c0_7] : memref<128x128xf32, #tpu.memory_space<vmem>>, vector<128x128xf32>
    tpu.vector_store %arg7[%c0_6, %c0_7], %7 {strides = array<i32>} : memref<128x128xf32, #tpu.memory_space<vmem>>, vector<128x128xf32>,
    %c0_i32_8 = arith.constant 0 : i32
    %9 = arith.cmpi eq, %arg2, %c0_i32_8 : i32
    %10 = arith.extui %9 : i1 to i32
    %c0_i32_9 = arith.constant 0 : i32
    %11 = arith.cmpi ne, %10, %c0_i32_9 : i32
    scf.if %11 {
      %c0_10 = arith.constant 0 : index
      %c0_11 = arith.constant 0 : index
      %12 = vector.load %arg7[%c0_10, %c0_11] : memref<128x128xf32, #tpu.memory_space<vmem>>, vector<128x128xf32>
      %c0_12 = arith.constant 0 : index
      %c0_13 = arith.constant 0 : index
      %13 = vector.load %arg5[%c0_12, %c0_13] : memref<1x128xf32, #tpu.memory_space<vmem>>, vector<1x128xf32>
      %14 = vector.broadcast %13 : vector<1x128xf32> to vector<128x128xf32>
      %15 = arith.addf %12, %14 : vector<128x128xf32>
      %c0_14 = arith.constant 0 : index
      %c0_15 = arith.constant 0 : index
      %16 = vector.load %arg6[%c0_14, %c0_15] : memref<128x128xf32, #tpu.memory_space<vmem>>, vector<128x128xf32>
      tpu.vector_store %arg6[%c0_14, %c0_15], %15 {strides = array<i32>} : memref<128x128xf32, #tpu.memory_space<vmem>>, vector<128x128xf32>,
    } else {
    }
    return
  }
  func.func @transform_0(%arg0: i32, %arg1: i32, %arg2: i32) -> (i32, i32) {
    %c0_i32 = arith.constant 0 : i32
    return %arg0, %arg2 : i32, i32
  }
  func.func @transform_1(%arg0: i32, %arg1: i32, %arg2: i32) -> (i32, i32) {
    %c0_i32 = arith.constant 0 : i32
    return %arg2, %arg1 : i32, i32
  }
  func.func @transform_2(%arg0: i32, %arg1: i32, %arg2: i32) -> (i32, i32) {
    %c0_i32 = arith.constant 0 : i32
    %c0_i32_0 = arith.constant 0 : i32
    return %c0_i32, %arg1 : i32, i32
  }
  func.func @transform_3(%arg0: i32, %arg1: i32, %arg2: i32) -> (i32, i32) {
    %c0_i32 = arith.constant 0 : i32
    return %arg0, %arg1 : i32, i32
  }
}

module attributes {stable_mosaic.version = 11 : i64} {
  func.func @_gemm_bn_act_kernel(%arg0: i32, %arg1: i32, %arg2: i32, %arg3: memref<128x128xbf16, #tpu.memory_space<vmem>>, %arg4: memref<128x128xbf16, #tpu.memory_space<vmem>>, %arg5: memref<1x128xf32, #tpu.memory_space<vmem>>, %arg6: memref<128x128xf32, #tpu.memory_space<vmem>>, %arg7: memref<128x128xf32, #tpu.memory_space<vmem>>, %arg8: memref<128x128xf32, #tpu.memory_space<vmem>>) attributes {dimension_semantics = [#tpu.dimension_semantics<parallel>, #tpu.dimension_semantics<parallel>, #tpu.dimension_semantics<arbitrary>], iteration_bounds = array<i64: 1, 1, 9>, scalar_prefetch = 0 : i64, scratch_operands = 1 : i64, tpu.core_type = #tpu.core_type<tc>, window_params = [{transform_indices = @transform_0, window_bounds = array<i64: 128, 128>}, {transform_indices = @transform_1, window_bounds = array<i64: 128, 128>}, {transform_indices = @transform_2, window_bounds = array<i64: 1, 128>}, {transform_indices = @transform_3, window_bounds = array<i64: 128, 128>}, {transform_indices = @transform_4, window_bounds = array<i64: 128, 128>}]} {
    %c0_i32 = arith.constant 0 : i32
    %0 = arith.cmpi eq, %arg2, %c0_i32 : i32
    %1 = arith.extui %0 : i1 to i32
    %c0_i32_0 = arith.constant 0 : i32
    %2 = arith.cmpi ne, %1, %c0_i32_0 : i32
    scf.if %2 {
      %cst_9 = arith.constant 0.000000e+00 : f32
      %12 = vector.broadcast %cst_9 : f32 to vector<128x128xf32>
      %c0_10 = arith.constant 0 : index
      %c0_11 = arith.constant 0 : index
      %13 = vector.load %arg8[%c0_10, %c0_11] : memref<128x128xf32, #tpu.memory_space<vmem>>, vector<128x128xf32>
      tpu.vector_store %arg8[%c0_10, %c0_11], %12 {strides = array<i32>} : memref<128x128xf32, #tpu.memory_space<vmem>>, vector<128x128xf32>,
    } else {
    }
    %c0 = arith.constant 0 : index
    %c0_1 = arith.constant 0 : index
    %3 = vector.load %arg8[%c0, %c0_1] : memref<128x128xf32, #tpu.memory_space<vmem>>, vector<128x128xf32>
    %c0_2 = arith.constant 0 : index
    %c0_3 = arith.constant 0 : index
    %4 = vector.load %arg3[%c0_2, %c0_3] : memref<128x128xbf16, #tpu.memory_space<vmem>>, vector<128x128xbf16>
    %c0_4 = arith.constant 0 : index
    %c0_5 = arith.constant 0 : index
    %5 = vector.load %arg4[%c0_4, %c0_5] : memref<128x128xbf16, #tpu.memory_space<vmem>>, vector<128x128xbf16>
    %cst = arith.constant dense<0.000000e+00> : vector<128x128xf32>
    %6 = tpu.matmul %4, %5, %cst {dimension_numbers = #tpu.dot_dimension_numbers<[1], [0], [0], [1], [0, 0, 1, 1], [], []>} : vector<128x128xbf16>, vector<128x128xbf16>, vector<128x128xf32> -> vector<128x128xf32>
    %7 = arith.addf %3, %6 : vector<128x128xf32>
    %c0_6 = arith.constant 0 : index
    %c0_7 = arith.constant 0 : index
    %8 = vector.load %arg8[%c0_6, %c0_7] : memref<128x128xf32, #tpu.memory_space<vmem>>, vector<128x128xf32>
    tpu.vector_store %arg8[%c0_6, %c0_7], %7 {strides = array<i32>} : memref<128x128xf32, #tpu.memory_space<vmem>>, vector<128x128xf32>,
    %c8_i32 = arith.constant 8 : i32
    %9 = arith.cmpi eq, %arg2, %c8_i32 : i32
    %10 = arith.extui %9 : i1 to i32
    %c0_i32_8 = arith.constant 0 : i32
    %11 = arith.cmpi ne, %10, %c0_i32_8 : i32
    scf.if %11 {
      %c0_9 = arith.constant 0 : index
      %c0_10 = arith.constant 0 : index
      %12 = vector.load %arg8[%c0_9, %c0_10] : memref<128x128xf32, #tpu.memory_space<vmem>>, vector<128x128xf32>
      %c0_11 = arith.constant 0 : index
      %c0_12 = arith.constant 0 : index
      %13 = vector.load %arg5[%c0_11, %c0_12] : memref<1x128xf32, #tpu.memory_space<vmem>>, vector<1x128xf32>
      %14 = vector.broadcast %13 : vector<1x128xf32> to vector<128x128xf32>
      %15 = arith.addf %12, %14 : vector<128x128xf32>
      %c0_13 = arith.constant 0 : index
      %c0_14 = arith.constant 0 : index
      %16 = vector.load %arg6[%c0_13, %c0_14] : memref<128x128xf32, #tpu.memory_space<vmem>>, vector<128x128xf32>
      %17 = arith.addf %15, %16 : vector<128x128xf32>
      %cst_15 = arith.constant 0.000000e+00 : f32
      %18 = vector.broadcast %cst_15 : f32 to vector<128x128xf32>
      %19 = arith.maximumf %17, %18 : vector<128x128xf32>
      %c0_16 = arith.constant 0 : index
      %c0_17 = arith.constant 0 : index
      %20 = vector.load %arg7[%c0_16, %c0_17] : memref<128x128xf32, #tpu.memory_space<vmem>>, vector<128x128xf32>
      tpu.vector_store %arg7[%c0_16, %c0_17], %19 {strides = array<i32>} : memref<128x128xf32, #tpu.memory_space<vmem>>, vector<128x128xf32>,
    } else {
    }
    return
  }
  func.func @transform_0(%arg0: i32, %arg1: i32, %arg2: i32) -> (i32, i32) {
    %c0_i32 = arith.constant 0 : i32
    return %arg0, %arg2 : i32, i32
  }
  func.func @transform_1(%arg0: i32, %arg1: i32, %arg2: i32) -> (i32, i32) {
    %c0_i32 = arith.constant 0 : i32
    return %arg2, %arg1 : i32, i32
  }
  func.func @transform_2(%arg0: i32, %arg1: i32, %arg2: i32) -> (i32, i32) {
    %c0_i32 = arith.constant 0 : i32
    %c0_i32_0 = arith.constant 0 : i32
    return %c0_i32, %arg1 : i32, i32
  }
  func.func @transform_3(%arg0: i32, %arg1: i32, %arg2: i32) -> (i32, i32) {
    %c0_i32 = arith.constant 0 : i32
    return %arg0, %arg1 : i32, i32
  }
  func.func @transform_4(%arg0: i32, %arg1: i32, %arg2: i32) -> (i32, i32) {
    %c0_i32 = arith.constant 0 : i32
    return %arg0, %arg1 : i32, i32
  }
}

module attributes {stable_mosaic.version = 11 : i64} {
  func.func @_gemm_bn_act_kernel(%arg0: i32, %arg1: i32, %arg2: i32, %arg3: memref<128x128xbf16, #tpu.memory_space<vmem>>, %arg4: memref<128x128xbf16, #tpu.memory_space<vmem>>, %arg5: memref<1x128xf32, #tpu.memory_space<vmem>>, %arg6: memref<128x128xf32, #tpu.memory_space<vmem>>, %arg7: memref<128x128xf32, #tpu.memory_space<vmem>>) attributes {dimension_semantics = [#tpu.dimension_semantics<parallel>, #tpu.dimension_semantics<parallel>, #tpu.dimension_semantics<arbitrary>], iteration_bounds = array<i64: 1, 1, 9>, scalar_prefetch = 0 : i64, scratch_operands = 1 : i64, tpu.core_type = #tpu.core_type<tc>, window_params = [{transform_indices = @transform_0, window_bounds = array<i64: 128, 128>}, {transform_indices = @transform_1, window_bounds = array<i64: 128, 128>}, {transform_indices = @transform_2, window_bounds = array<i64: 1, 128>}, {transform_indices = @transform_3, window_bounds = array<i64: 128, 128>}]} {
    %c0_i32 = arith.constant 0 : i32
    %0 = arith.cmpi eq, %arg2, %c0_i32 : i32
    %1 = arith.extui %0 : i1 to i32
    %c0_i32_0 = arith.constant 0 : i32
    %2 = arith.cmpi ne, %1, %c0_i32_0 : i32
    scf.if %2 {
      %cst_9 = arith.constant 0.000000e+00 : f32
      %12 = vector.broadcast %cst_9 : f32 to vector<128x128xf32>
      %c0_10 = arith.constant 0 : index
      %c0_11 = arith.constant 0 : index
      %13 = vector.load %arg7[%c0_10, %c0_11] : memref<128x128xf32, #tpu.memory_space<vmem>>, vector<128x128xf32>
      tpu.vector_store %arg7[%c0_10, %c0_11], %12 {strides = array<i32>} : memref<128x128xf32, #tpu.memory_space<vmem>>, vector<128x128xf32>,
    } else {
    }
    %c0 = arith.constant 0 : index
    %c0_1 = arith.constant 0 : index
    %3 = vector.load %arg7[%c0, %c0_1] : memref<128x128xf32, #tpu.memory_space<vmem>>, vector<128x128xf32>
    %c0_2 = arith.constant 0 : index
    %c0_3 = arith.constant 0 : index
    %4 = vector.load %arg3[%c0_2, %c0_3] : memref<128x128xbf16, #tpu.memory_space<vmem>>, vector<128x128xbf16>
    %c0_4 = arith.constant 0 : index
    %c0_5 = arith.constant 0 : index
    %5 = vector.load %arg4[%c0_4, %c0_5] : memref<128x128xbf16, #tpu.memory_space<vmem>>, vector<128x128xbf16>
    %cst = arith.constant dense<0.000000e+00> : vector<128x128xf32>
    %6 = tpu.matmul %4, %5, %cst {dimension_numbers = #tpu.dot_dimension_numbers<[1], [0], [0], [1], [0, 0, 1, 1], [], []>} : vector<128x128xbf16>, vector<128x128xbf16>, vector<128x128xf32> -> vector<128x128xf32>
    %7 = arith.addf %3, %6 : vector<128x128xf32>
    %c0_6 = arith.constant 0 : index
    %c0_7 = arith.constant 0 : index
    %8 = vector.load %arg7[%c0_6, %c0_7] : memref<128x128xf32, #tpu.memory_space<vmem>>, vector<128x128xf32>
    tpu.vector_store %arg7[%c0_6, %c0_7], %7 {strides = array<i32>} : memref<128x128xf32, #tpu.memory_space<vmem>>, vector<128x128xf32>,
    %c8_i32 = arith.constant 8 : i32
    %9 = arith.cmpi eq, %arg2, %c8_i32 : i32
    %10 = arith.extui %9 : i1 to i32
    %c0_i32_8 = arith.constant 0 : i32
    %11 = arith.cmpi ne, %10, %c0_i32_8 : i32
    scf.if %11 {
      %c0_9 = arith.constant 0 : index
      %c0_10 = arith.constant 0 : index
      %12 = vector.load %arg7[%c0_9, %c0_10] : memref<128x128xf32, #tpu.memory_space<vmem>>, vector<128x128xf32>
      %c0_11 = arith.constant 0 : index
      %c0_12 = arith.constant 0 : index
      %13 = vector.load %arg5[%c0_11, %c0_12] : memref<1x128xf32, #tpu.memory_space<vmem>>, vector<1x128xf32>
      %14 = vector.broadcast %13 : vector<1x128xf32> to vector<128x128xf32>
      %15 = arith.addf %12, %14 : vector<128x128xf32>
      %cst_13 = arith.constant 0.000000e+00 : f32
      %16 = vector.broadcast %cst_13 : f32 to vector<128x128xf32>
      %17 = arith.maximumf %15, %16 : vector<128x128xf32>
      %c0_14 = arith.constant 0 : index
      %c0_15 = arith.constant 0 : index
      %18 = vector.load %arg6[%c0_14, %c0_15] : memref<128x128xf32, #tpu.memory_space<vmem>>, vector<128x128xf32>
      tpu.vector_store %arg6[%c0_14, %c0_15], %17 {strides = array<i32>} : memref<128x128xf32, #tpu.memory_space<vmem>>, vector<128x128xf32>,
    } else {
    }
    return
  }
  func.func @transform_0(%arg0: i32, %arg1: i32, %arg2: i32) -> (i32, i32) {
    %c0_i32 = arith.constant 0 : i32
    return %arg0, %arg2 : i32, i32
  }
  func.func @transform_1(%arg0: i32, %arg1: i32, %arg2: i32) -> (i32, i32) {
    %c0_i32 = arith.constant 0 : i32
    return %arg2, %arg1 : i32, i32
  }
  func.func @transform_2(%arg0: i32, %arg1: i32, %arg2: i32) -> (i32, i32) {
    %c0_i32 = arith.constant 0 : i32
    %c0_i32_0 = arith.constant 0 : i32
    return %c0_i32, %arg1 : i32, i32
  }
  func.func @transform_3(%arg0: i32, %arg1: i32, %arg2: i32) -> (i32, i32) {
    %c0_i32 = arith.constant 0 : i32
    return %arg0, %arg1 : i32, i32
  }
}

module attributes {stable_mosaic.version = 11 : i64} {
  func.func @_gemm_bn_act_kernel(%arg0: i32, %arg1: i32, %arg2: i32, %arg3: memref<32x128xbf16, #tpu.memory_space<vmem>>, %arg4: memref<128x256xbf16, #tpu.memory_space<vmem>>, %arg5: memref<1x256xf32, #tpu.memory_space<vmem>>, %arg6: memref<32x256xf32, #tpu.memory_space<vmem>>, %arg7: memref<32x256xf32, #tpu.memory_space<vmem>>) attributes {dimension_semantics = [#tpu.dimension_semantics<parallel>, #tpu.dimension_semantics<parallel>, #tpu.dimension_semantics<arbitrary>], iteration_bounds = array<i64: 1, 1, 9>, scalar_prefetch = 0 : i64, scratch_operands = 1 : i64, tpu.core_type = #tpu.core_type<tc>, window_params = [{transform_indices = @transform_0, window_bounds = array<i64: 32, 128>}, {transform_indices = @transform_1, window_bounds = array<i64: 128, 256>}, {transform_indices = @transform_2, window_bounds = array<i64: 1, 256>}, {transform_indices = @transform_3, window_bounds = array<i64: 32, 256>}]} {
    %c0_i32 = arith.constant 0 : i32
    %0 = arith.cmpi eq, %arg2, %c0_i32 : i32
    %1 = arith.extui %0 : i1 to i32
    %c0_i32_0 = arith.constant 0 : i32
    %2 = arith.cmpi ne, %1, %c0_i32_0 : i32
    scf.if %2 {
      %cst_9 = arith.constant 0.000000e+00 : f32
      %12 = vector.broadcast %cst_9 : f32 to vector<32x256xf32>
      %c0_10 = arith.constant 0 : index
      %c0_11 = arith.constant 0 : index
      %13 = vector.load %arg7[%c0_10, %c0_11] : memref<32x256xf32, #tpu.memory_space<vmem>>, vector<32x256xf32>
      tpu.vector_store %arg7[%c0_10, %c0_11], %12 {strides = array<i32>} : memref<32x256xf32, #tpu.memory_space<vmem>>, vector<32x256xf32>,
    } else {
    }
    %c0 = arith.constant 0 : index
    %c0_1 = arith.constant 0 : index
    %3 = vector.load %arg7[%c0, %c0_1] : memref<32x256xf32, #tpu.memory_space<vmem>>, vector<32x256xf32>
    %c0_2 = arith.constant 0 : index
    %c0_3 = arith.constant 0 : index
    %4 = vector.load %arg3[%c0_2, %c0_3] : memref<32x128xbf16, #tpu.memory_space<vmem>>, vector<32x128xbf16>
    %c0_4 = arith.constant 0 : index
    %c0_5 = arith.constant 0 : index
    %5 = vector.load %arg4[%c0_4, %c0_5] : memref<128x256xbf16, #tpu.memory_space<vmem>>, vector<128x256xbf16>
    %cst = arith.constant dense<0.000000e+00> : vector<32x256xf32>
    %6 = tpu.matmul %4, %5, %cst {dimension_numbers = #tpu.dot_dimension_numbers<[1], [0], [0], [1], [0, 0, 1, 1], [], []>} : vector<32x128xbf16>, vector<128x256xbf16>, vector<32x256xf32> -> vector<32x256xf32>
    %7 = arith.addf %3, %6 : vector<32x256xf32>
    %c0_6 = arith.constant 0 : index
    %c0_7 = arith.constant 0 : index
    %8 = vector.load %arg7[%c0_6, %c0_7] : memref<32x256xf32, #tpu.memory_space<vmem>>, vector<32x256xf32>
    tpu.vector_store %arg7[%c0_6, %c0_7], %7 {strides = array<i32>} : memref<32x256xf32, #tpu.memory_space<vmem>>, vector<32x256xf32>,
    %c8_i32 = arith.constant 8 : i32
    %9 = arith.cmpi eq, %arg2, %c8_i32 : i32
    %10 = arith.extui %9 : i1 to i32
    %c0_i32_8 = arith.constant 0 : i32
    %11 = arith.cmpi ne, %10, %c0_i32_8 : i32
    scf.if %11 {
      %c0_9 = arith.constant 0 : index
      %c0_10 = arith.constant 0 : index
      %12 = vector.load %arg7[%c0_9, %c0_10] : memref<32x256xf32, #tpu.memory_space<vmem>>, vector<32x256xf32>
      %c0_11 = arith.constant 0 : index
      %c0_12 = arith.constant 0 : index
      %13 = vector.load %arg5[%c0_11, %c0_12] : memref<1x256xf32, #tpu.memory_space<vmem>>, vector<1x256xf32>
      %14 = vector.broadcast %13 : vector<1x256xf32> to vector<32x256xf32>
      %15 = arith.addf %12, %14 : vector<32x256xf32>
      %cst_13 = arith.constant 0.000000e+00 : f32
      %16 = vector.broadcast %cst_13 : f32 to vector<32x256xf32>
      %17 = arith.maximumf %15, %16 : vector<32x256xf32>
      %c0_14 = arith.constant 0 : index
      %c0_15 = arith.constant 0 : index
      %18 = vector.load %arg6[%c0_14, %c0_15] : memref<32x256xf32, #tpu.memory_space<vmem>>, vector<32x256xf32>
      tpu.vector_store %arg6[%c0_14, %c0_15], %17 {strides = array<i32>} : memref<32x256xf32, #tpu.memory_space<vmem>>, vector<32x256xf32>,
    } else {
    }
    return
  }
  func.func @transform_0(%arg0: i32, %arg1: i32, %arg2: i32) -> (i32, i32) {
    %c0_i32 = arith.constant 0 : i32
    return %arg0, %arg2 : i32, i32
  }
  func.func @transform_1(%arg0: i32, %arg1: i32, %arg2: i32) -> (i32, i32) {
    %c0_i32 = arith.constant 0 : i32
    return %arg2, %arg1 : i32, i32
  }
  func.func @transform_2(%arg0: i32, %arg1: i32, %arg2: i32) -> (i32, i32) {
    %c0_i32 = arith.constant 0 : i32
    %c0_i32_0 = arith.constant 0 : i32
    return %c0_i32, %arg1 : i32, i32
  }
  func.func @transform_3(%arg0: i32, %arg1: i32, %arg2: i32) -> (i32, i32) {
    %c0_i32 = arith.constant 0 : i32
    return %arg0, %arg1 : i32, i32
  }
}

module attributes {stable_mosaic.version = 11 : i64} {
  func.func @_gemm_bn_act_kernel(%arg0: i32, %arg1: i32, %arg2: i32, %arg3: memref<32x128xbf16, #tpu.memory_space<vmem>>, %arg4: memref<128x256xbf16, #tpu.memory_space<vmem>>, %arg5: memref<1x256xf32, #tpu.memory_space<vmem>>, %arg6: memref<32x256xf32, #tpu.memory_space<vmem>>, %arg7: memref<32x256xf32, #tpu.memory_space<vmem>>) attributes {dimension_semantics = [#tpu.dimension_semantics<parallel>, #tpu.dimension_semantics<parallel>, #tpu.dimension_semantics<arbitrary>], iteration_bounds = array<i64: 1, 1, 1>, scalar_prefetch = 0 : i64, scratch_operands = 1 : i64, tpu.core_type = #tpu.core_type<tc>, window_params = [{transform_indices = @transform_0, window_bounds = array<i64: 32, 128>}, {transform_indices = @transform_1, window_bounds = array<i64: 128, 256>}, {transform_indices = @transform_2, window_bounds = array<i64: 1, 256>}, {transform_indices = @transform_3, window_bounds = array<i64: 32, 256>}]} {
    %c0_i32 = arith.constant 0 : i32
    %0 = arith.cmpi eq, %arg2, %c0_i32 : i32
    %1 = arith.extui %0 : i1 to i32
    %c0_i32_0 = arith.constant 0 : i32
    %2 = arith.cmpi ne, %1, %c0_i32_0 : i32
    scf.if %2 {
      %cst_10 = arith.constant 0.000000e+00 : f32
      %12 = vector.broadcast %cst_10 : f32 to vector<32x256xf32>
      %c0_11 = arith.constant 0 : index
      %c0_12 = arith.constant 0 : index
      %13 = vector.load %arg7[%c0_11, %c0_12] : memref<32x256xf32, #tpu.memory_space<vmem>>, vector<32x256xf32>
      tpu.vector_store %arg7[%c0_11, %c0_12], %12 {strides = array<i32>} : memref<32x256xf32, #tpu.memory_space<vmem>>, vector<32x256xf32>,
    } else {
    }
    %c0 = arith.constant 0 : index
    %c0_1 = arith.constant 0 : index
    %3 = vector.load %arg7[%c0, %c0_1] : memref<32x256xf32, #tpu.memory_space<vmem>>, vector<32x256xf32>
    %c0_2 = arith.constant 0 : index
    %c0_3 = arith.constant 0 : index
    %4 = vector.load %arg3[%c0_2, %c0_3] : memref<32x128xbf16, #tpu.memory_space<vmem>>, vector<32x128xbf16>
    %c0_4 = arith.constant 0 : index
    %c0_5 = arith.constant 0 : index
    %5 = vector.load %arg4[%c0_4, %c0_5] : memref<128x256xbf16, #tpu.memory_space<vmem>>, vector<128x256xbf16>
    %cst = arith.constant dense<0.000000e+00> : vector<32x256xf32>
    %6 = tpu.matmul %4, %5, %cst {dimension_numbers = #tpu.dot_dimension_numbers<[1], [0], [0], [1], [0, 0, 1, 1], [], []>} : vector<32x128xbf16>, vector<128x256xbf16>, vector<32x256xf32> -> vector<32x256xf32>
    %7 = arith.addf %3, %6 : vector<32x256xf32>
    %c0_6 = arith.constant 0 : index
    %c0_7 = arith.constant 0 : index
    %8 = vector.load %arg7[%c0_6, %c0_7] : memref<32x256xf32, #tpu.memory_space<vmem>>, vector<32x256xf32>
    tpu.vector_store %arg7[%c0_6, %c0_7], %7 {strides = array<i32>} : memref<32x256xf32, #tpu.memory_space<vmem>>, vector<32x256xf32>,
    %c0_i32_8 = arith.constant 0 : i32
    %9 = arith.cmpi eq, %arg2, %c0_i32_8 : i32
    %10 = arith.extui %9 : i1 to i32
    %c0_i32_9 = arith.constant 0 : i32
    %11 = arith.cmpi ne, %10, %c0_i32_9 : i32
    scf.if %11 {
      %c0_10 = arith.constant 0 : index
      %c0_11 = arith.constant 0 : index
      %12 = vector.load %arg7[%c0_10, %c0_11] : memref<32x256xf32, #tpu.memory_space<vmem>>, vector<32x256xf32>
      %c0_12 = arith.constant 0 : index
      %c0_13 = arith.constant 0 : index
      %13 = vector.load %arg5[%c0_12, %c0_13] : memref<1x256xf32, #tpu.memory_space<vmem>>, vector<1x256xf32>
      %14 = vector.broadcast %13 : vector<1x256xf32> to vector<32x256xf32>
      %15 = arith.addf %12, %14 : vector<32x256xf32>
      %c0_14 = arith.constant 0 : index
      %c0_15 = arith.constant 0 : index
      %16 = vector.load %arg6[%c0_14, %c0_15] : memref<32x256xf32, #tpu.memory_space<vmem>>, vector<32x256xf32>
      tpu.vector_store %arg6[%c0_14, %c0_15], %15 {strides = array<i32>} : memref<32x256xf32, #tpu.memory_space<vmem>>, vector<32x256xf32>,
    } else {
    }
    return
  }
  func.func @transform_0(%arg0: i32, %arg1: i32, %arg2: i32) -> (i32, i32) {
    %c0_i32 = arith.constant 0 : i32
    return %arg0, %arg2 : i32, i32
  }
  func.func @transform_1(%arg0: i32, %arg1: i32, %arg2: i32) -> (i32, i32) {
    %c0_i32 = arith.constant 0 : i32
    return %arg2, %arg1 : i32, i32
  }
  func.func @transform_2(%arg0: i32, %arg1: i32, %arg2: i32) -> (i32, i32) {
    %c0_i32 = arith.constant 0 : i32
    %c0_i32_0 = arith.constant 0 : i32
    return %c0_i32, %arg1 : i32, i32
  }
  func.func @transform_3(%arg0: i32, %arg1: i32, %arg2: i32) -> (i32, i32) {
    %c0_i32 = arith.constant 0 : i32
    return %arg0, %arg1 : i32, i32
  }
}

module attributes {stable_mosaic.version = 11 : i64} {
  func.func @_gemm_bn_act_kernel(%arg0: i32, %arg1: i32, %arg2: i32, %arg3: memref<32x256xbf16, #tpu.memory_space<vmem>>, %arg4: memref<256x256xbf16, #tpu.memory_space<vmem>>, %arg5: memref<1x256xf32, #tpu.memory_space<vmem>>, %arg6: memref<32x256xf32, #tpu.memory_space<vmem>>, %arg7: memref<32x256xf32, #tpu.memory_space<vmem>>, %arg8: memref<32x256xf32, #tpu.memory_space<vmem>>) attributes {dimension_semantics = [#tpu.dimension_semantics<parallel>, #tpu.dimension_semantics<parallel>, #tpu.dimension_semantics<arbitrary>], iteration_bounds = array<i64: 1, 1, 9>, scalar_prefetch = 0 : i64, scratch_operands = 1 : i64, tpu.core_type = #tpu.core_type<tc>, window_params = [{transform_indices = @transform_0, window_bounds = array<i64: 32, 256>}, {transform_indices = @transform_1, window_bounds = array<i64: 256, 256>}, {transform_indices = @transform_2, window_bounds = array<i64: 1, 256>}, {transform_indices = @transform_3, window_bounds = array<i64: 32, 256>}, {transform_indices = @transform_4, window_bounds = array<i64: 32, 256>}]} {
    %c0_i32 = arith.constant 0 : i32
    %0 = arith.cmpi eq, %arg2, %c0_i32 : i32
    %1 = arith.extui %0 : i1 to i32
    %c0_i32_0 = arith.constant 0 : i32
    %2 = arith.cmpi ne, %1, %c0_i32_0 : i32
    scf.if %2 {
      %cst_9 = arith.constant 0.000000e+00 : f32
      %12 = vector.broadcast %cst_9 : f32 to vector<32x256xf32>
      %c0_10 = arith.constant 0 : index
      %c0_11 = arith.constant 0 : index
      %13 = vector.load %arg8[%c0_10, %c0_11] : memref<32x256xf32, #tpu.memory_space<vmem>>, vector<32x256xf32>
      tpu.vector_store %arg8[%c0_10, %c0_11], %12 {strides = array<i32>} : memref<32x256xf32, #tpu.memory_space<vmem>>, vector<32x256xf32>,
    } else {
    }
    %c0 = arith.constant 0 : index
    %c0_1 = arith.constant 0 : index
    %3 = vector.load %arg8[%c0, %c0_1] : memref<32x256xf32, #tpu.memory_space<vmem>>, vector<32x256xf32>
    %c0_2 = arith.constant 0 : index
    %c0_3 = arith.constant 0 : index
    %4 = vector.load %arg3[%c0_2, %c0_3] : memref<32x256xbf16, #tpu.memory_space<vmem>>, vector<32x256xbf16>
    %c0_4 = arith.constant 0 : index
    %c0_5 = arith.constant 0 : index
    %5 = vector.load %arg4[%c0_4, %c0_5] : memref<256x256xbf16, #tpu.memory_space<vmem>>, vector<256x256xbf16>
    %cst = arith.constant dense<0.000000e+00> : vector<32x256xf32>
    %6 = tpu.matmul %4, %5, %cst {dimension_numbers = #tpu.dot_dimension_numbers<[1], [0], [0], [1], [0, 0, 1, 1], [], []>} : vector<32x256xbf16>, vector<256x256xbf16>, vector<32x256xf32> -> vector<32x256xf32>
    %7 = arith.addf %3, %6 : vector<32x256xf32>
    %c0_6 = arith.constant 0 : index
    %c0_7 = arith.constant 0 : index
    %8 = vector.load %arg8[%c0_6, %c0_7] : memref<32x256xf32, #tpu.memory_space<vmem>>, vector<32x256xf32>
    tpu.vector_store %arg8[%c0_6, %c0_7], %7 {strides = array<i32>} : memref<32x256xf32, #tpu.memory_space<vmem>>, vector<32x256xf32>,
    %c8_i32 = arith.constant 8 : i32
    %9 = arith.cmpi eq, %arg2, %c8_i32 : i32
    %10 = arith.extui %9 : i1 to i32
    %c0_i32_8 = arith.constant 0 : i32
    %11 = arith.cmpi ne, %10, %c0_i32_8 : i32
    scf.if %11 {
      %c0_9 = arith.constant 0 : index
      %c0_10 = arith.constant 0 : index
      %12 = vector.load %arg8[%c0_9, %c0_10] : memref<32x256xf32, #tpu.memory_space<vmem>>, vector<32x256xf32>
      %c0_11 = arith.constant 0 : index
      %c0_12 = arith.constant 0 : index
      %13 = vector.load %arg5[%c0_11, %c0_12] : memref<1x256xf32, #tpu.memory_space<vmem>>, vector<1x256xf32>
      %14 = vector.broadcast %13 : vector<1x256xf32> to vector<32x256xf32>
      %15 = arith.addf %12, %14 : vector<32x256xf32>
      %c0_13 = arith.constant 0 : index
      %c0_14 = arith.constant 0 : index
      %16 = vector.load %arg6[%c0_13, %c0_14] : memref<32x256xf32, #tpu.memory_space<vmem>>, vector<32x256xf32>
      %17 = arith.addf %15, %16 : vector<32x256xf32>
      %cst_15 = arith.constant 0.000000e+00 : f32
      %18 = vector.broadcast %cst_15 : f32 to vector<32x256xf32>
      %19 = arith.maximumf %17, %18 : vector<32x256xf32>
      %c0_16 = arith.constant 0 : index
      %c0_17 = arith.constant 0 : index
      %20 = vector.load %arg7[%c0_16, %c0_17] : memref<32x256xf32, #tpu.memory_space<vmem>>, vector<32x256xf32>
      tpu.vector_store %arg7[%c0_16, %c0_17], %19 {strides = array<i32>} : memref<32x256xf32, #tpu.memory_space<vmem>>, vector<32x256xf32>,
    } else {
    }
    return
  }
  func.func @transform_0(%arg0: i32, %arg1: i32, %arg2: i32) -> (i32, i32) {
    %c0_i32 = arith.constant 0 : i32
    return %arg0, %arg2 : i32, i32
  }
  func.func @transform_1(%arg0: i32, %arg1: i32, %arg2: i32) -> (i32, i32) {
    %c0_i32 = arith.constant 0 : i32
    return %arg2, %arg1 : i32, i32
  }
  func.func @transform_2(%arg0: i32, %arg1: i32, %arg2: i32) -> (i32, i32) {
    %c0_i32 = arith.constant 0 : i32
    %c0_i32_0 = arith.constant 0 : i32
    return %c0_i32, %arg1 : i32, i32
  }
  func.func @transform_3(%arg0: i32, %arg1: i32, %arg2: i32) -> (i32, i32) {
    %c0_i32 = arith.constant 0 : i32
    return %arg0, %arg1 : i32, i32
  }
  func.func @transform_4(%arg0: i32, %arg1: i32, %arg2: i32) -> (i32, i32) {
    %c0_i32 = arith.constant 0 : i32
    return %arg0, %arg1 : i32, i32
  }
}

module attributes {stable_mosaic.version = 11 : i64} {
  func.func @_gemm_bn_act_kernel(%arg0: i32, %arg1: i32, %arg2: i32, %arg3: memref<32x256xbf16, #tpu.memory_space<vmem>>, %arg4: memref<256x256xbf16, #tpu.memory_space<vmem>>, %arg5: memref<1x256xf32, #tpu.memory_space<vmem>>, %arg6: memref<32x256xf32, #tpu.memory_space<vmem>>, %arg7: memref<32x256xf32, #tpu.memory_space<vmem>>) attributes {dimension_semantics = [#tpu.dimension_semantics<parallel>, #tpu.dimension_semantics<parallel>, #tpu.dimension_semantics<arbitrary>], iteration_bounds = array<i64: 1, 1, 9>, scalar_prefetch = 0 : i64, scratch_operands = 1 : i64, tpu.core_type = #tpu.core_type<tc>, window_params = [{transform_indices = @transform_0, window_bounds = array<i64: 32, 256>}, {transform_indices = @transform_1, window_bounds = array<i64: 256, 256>}, {transform_indices = @transform_2, window_bounds = array<i64: 1, 256>}, {transform_indices = @transform_3, window_bounds = array<i64: 32, 256>}]} {
    %c0_i32 = arith.constant 0 : i32
    %0 = arith.cmpi eq, %arg2, %c0_i32 : i32
    %1 = arith.extui %0 : i1 to i32
    %c0_i32_0 = arith.constant 0 : i32
    %2 = arith.cmpi ne, %1, %c0_i32_0 : i32
    scf.if %2 {
      %cst_9 = arith.constant 0.000000e+00 : f32
      %12 = vector.broadcast %cst_9 : f32 to vector<32x256xf32>
      %c0_10 = arith.constant 0 : index
      %c0_11 = arith.constant 0 : index
      %13 = vector.load %arg7[%c0_10, %c0_11] : memref<32x256xf32, #tpu.memory_space<vmem>>, vector<32x256xf32>
      tpu.vector_store %arg7[%c0_10, %c0_11], %12 {strides = array<i32>} : memref<32x256xf32, #tpu.memory_space<vmem>>, vector<32x256xf32>,
    } else {
    }
    %c0 = arith.constant 0 : index
    %c0_1 = arith.constant 0 : index
    %3 = vector.load %arg7[%c0, %c0_1] : memref<32x256xf32, #tpu.memory_space<vmem>>, vector<32x256xf32>
    %c0_2 = arith.constant 0 : index
    %c0_3 = arith.constant 0 : index
    %4 = vector.load %arg3[%c0_2, %c0_3] : memref<32x256xbf16, #tpu.memory_space<vmem>>, vector<32x256xbf16>
    %c0_4 = arith.constant 0 : index
    %c0_5 = arith.constant 0 : index
    %5 = vector.load %arg4[%c0_4, %c0_5] : memref<256x256xbf16, #tpu.memory_space<vmem>>, vector<256x256xbf16>
    %cst = arith.constant dense<0.000000e+00> : vector<32x256xf32>
    %6 = tpu.matmul %4, %5, %cst {dimension_numbers = #tpu.dot_dimension_numbers<[1], [0], [0], [1], [0, 0, 1, 1], [], []>} : vector<32x256xbf16>, vector<256x256xbf16>, vector<32x256xf32> -> vector<32x256xf32>
    %7 = arith.addf %3, %6 : vector<32x256xf32>
    %c0_6 = arith.constant 0 : index
    %c0_7 = arith.constant 0 : index
    %8 = vector.load %arg7[%c0_6, %c0_7] : memref<32x256xf32, #tpu.memory_space<vmem>>, vector<32x256xf32>
    tpu.vector_store %arg7[%c0_6, %c0_7], %7 {strides = array<i32>} : memref<32x256xf32, #tpu.memory_space<vmem>>, vector<32x256xf32>,
    %c8_i32 = arith.constant 8 : i32
    %9 = arith.cmpi eq, %arg2, %c8_i32 : i32
    %10 = arith.extui %9 : i1 to i32
    %c0_i32_8 = arith.constant 0 : i32
    %11 = arith.cmpi ne, %10, %c0_i32_8 : i32
    scf.if %11 {
      %c0_9 = arith.constant 0 : index
      %c0_10 = arith.constant 0 : index
      %12 = vector.load %arg7[%c0_9, %c0_10] : memref<32x256xf32, #tpu.memory_space<vmem>>, vector<32x256xf32>
      %c0_11 = arith.constant 0 : index
      %c0_12 = arith.constant 0 : index
      %13 = vector.load %arg5[%c0_11, %c0_12] : memref<1x256xf32, #tpu.memory_space<vmem>>, vector<1x256xf32>
      %14 = vector.broadcast %13 : vector<1x256xf32> to vector<32x256xf32>
      %15 = arith.addf %12, %14 : vector<32x256xf32>
      %cst_13 = arith.constant 0.000000e+00 : f32
      %16 = vector.broadcast %cst_13 : f32 to vector<32x256xf32>
      %17 = arith.maximumf %15, %16 : vector<32x256xf32>
      %c0_14 = arith.constant 0 : index
      %c0_15 = arith.constant 0 : index
      %18 = vector.load %arg6[%c0_14, %c0_15] : memref<32x256xf32, #tpu.memory_space<vmem>>, vector<32x256xf32>
      tpu.vector_store %arg6[%c0_14, %c0_15], %17 {strides = array<i32>} : memref<32x256xf32, #tpu.memory_space<vmem>>, vector<32x256xf32>,
    } else {
    }
    return
  }
  func.func @transform_0(%arg0: i32, %arg1: i32, %arg2: i32) -> (i32, i32) {
    %c0_i32 = arith.constant 0 : i32
    return %arg0, %arg2 : i32, i32
  }
  func.func @transform_1(%arg0: i32, %arg1: i32, %arg2: i32) -> (i32, i32) {
    %c0_i32 = arith.constant 0 : i32
    return %arg2, %arg1 : i32, i32
  }
  func.func @transform_2(%arg0: i32, %arg1: i32, %arg2: i32) -> (i32, i32) {
    %c0_i32 = arith.constant 0 : i32
    %c0_i32_0 = arith.constant 0 : i32
    return %c0_i32, %arg1 : i32, i32
  }
  func.func @transform_3(%arg0: i32, %arg1: i32, %arg2: i32) -> (i32, i32) {
    %c0_i32 = arith.constant 0 : i32
    return %arg0, %arg1 : i32, i32
  }
}

module attributes {stable_mosaic.version = 11 : i64} {
  func.func @_gemm_bn_act_kernel(%arg0: i32, %arg1: i32, %arg2: i32, %arg3: memref<8x256xbf16, #tpu.memory_space<vmem>>, %arg4: memref<256x256xbf16, #tpu.memory_space<vmem>>, %arg5: memref<1x256xf32, #tpu.memory_space<vmem>>, %arg6: memref<8x256xf32, #tpu.memory_space<vmem>>, %arg7: memref<8x256xf32, #tpu.memory_space<vmem>>) attributes {dimension_semantics = [#tpu.dimension_semantics<parallel>, #tpu.dimension_semantics<parallel>, #tpu.dimension_semantics<arbitrary>], iteration_bounds = array<i64: 1, 2, 9>, scalar_prefetch = 0 : i64, scratch_operands = 1 : i64, tpu.core_type = #tpu.core_type<tc>, window_params = [{transform_indices = @transform_0, window_bounds = array<i64: 8, 256>}, {transform_indices = @transform_1, window_bounds = array<i64: 256, 256>}, {transform_indices = @transform_2, window_bounds = array<i64: 1, 256>}, {transform_indices = @transform_3, window_bounds = array<i64: 8, 256>}]} {
    %c0_i32 = arith.constant 0 : i32
    %0 = arith.cmpi eq, %arg2, %c0_i32 : i32
    %1 = arith.extui %0 : i1 to i32
    %c0_i32_0 = arith.constant 0 : i32
    %2 = arith.cmpi ne, %1, %c0_i32_0 : i32
    scf.if %2 {
      %cst_9 = arith.constant 0.000000e+00 : f32
      %12 = vector.broadcast %cst_9 : f32 to vector<8x256xf32>
      %c0_10 = arith.constant 0 : index
      %c0_11 = arith.constant 0 : index
      %13 = vector.load %arg7[%c0_10, %c0_11] : memref<8x256xf32, #tpu.memory_space<vmem>>, vector<8x256xf32>
      tpu.vector_store %arg7[%c0_10, %c0_11], %12 {strides = array<i32>} : memref<8x256xf32, #tpu.memory_space<vmem>>, vector<8x256xf32>,
    } else {
    }
    %c0 = arith.constant 0 : index
    %c0_1 = arith.constant 0 : index
    %3 = vector.load %arg7[%c0, %c0_1] : memref<8x256xf32, #tpu.memory_space<vmem>>, vector<8x256xf32>
    %c0_2 = arith.constant 0 : index
    %c0_3 = arith.constant 0 : index
    %4 = vector.load %arg3[%c0_2, %c0_3] : memref<8x256xbf16, #tpu.memory_space<vmem>>, vector<8x256xbf16>
    %c0_4 = arith.constant 0 : index
    %c0_5 = arith.constant 0 : index
    %5 = vector.load %arg4[%c0_4, %c0_5] : memref<256x256xbf16, #tpu.memory_space<vmem>>, vector<256x256xbf16>
    %cst = arith.constant dense<0.000000e+00> : vector<8x256xf32>
    %6 = tpu.matmul %4, %5, %cst {dimension_numbers = #tpu.dot_dimension_numbers<[1], [0], [0], [1], [0, 0, 1, 1], [], []>} : vector<8x256xbf16>, vector<256x256xbf16>, vector<8x256xf32> -> vector<8x256xf32>
    %7 = arith.addf %3, %6 : vector<8x256xf32>
    %c0_6 = arith.constant 0 : index
    %c0_7 = arith.constant 0 : index
    %8 = vector.load %arg7[%c0_6, %c0_7] : memref<8x256xf32, #tpu.memory_space<vmem>>, vector<8x256xf32>
    tpu.vector_store %arg7[%c0_6, %c0_7], %7 {strides = array<i32>} : memref<8x256xf32, #tpu.memory_space<vmem>>, vector<8x256xf32>,
    %c8_i32 = arith.constant 8 : i32
    %9 = arith.cmpi eq, %arg2, %c8_i32 : i32
    %10 = arith.extui %9 : i1 to i32
    %c0_i32_8 = arith.constant 0 : i32
    %11 = arith.cmpi ne, %10, %c0_i32_8 : i32
    scf.if %11 {
      %c0_9 = arith.constant 0 : index
      %c0_10 = arith.constant 0 : index
      %12 = vector.load %arg7[%c0_9, %c0_10] : memref<8x256xf32, #tpu.memory_space<vmem>>, vector<8x256xf32>
      %c0_11 = arith.constant 0 : index
      %c0_12 = arith.constant 0 : index
      %13 = vector.load %arg5[%c0_11, %c0_12] : memref<1x256xf32, #tpu.memory_space<vmem>>, vector<1x256xf32>
      %14 = vector.broadcast %13 : vector<1x256xf32> to vector<8x256xf32>
      %15 = arith.addf %12, %14 : vector<8x256xf32>
      %cst_13 = arith.constant 0.000000e+00 : f32
      %16 = vector.broadcast %cst_13 : f32 to vector<8x256xf32>
      %17 = arith.maximumf %15, %16 : vector<8x256xf32>
      %c0_14 = arith.constant 0 : index
      %c0_15 = arith.constant 0 : index
      %18 = vector.load %arg6[%c0_14, %c0_15] : memref<8x256xf32, #tpu.memory_space<vmem>>, vector<8x256xf32>
      tpu.vector_store %arg6[%c0_14, %c0_15], %17 {strides = array<i32>} : memref<8x256xf32, #tpu.memory_space<vmem>>, vector<8x256xf32>,
    } else {
    }
    return
  }
  func.func @transform_0(%arg0: i32, %arg1: i32, %arg2: i32) -> (i32, i32) {
    %c0_i32 = arith.constant 0 : i32
    return %arg0, %arg2 : i32, i32
  }
  func.func @transform_1(%arg0: i32, %arg1: i32, %arg2: i32) -> (i32, i32) {
    %c0_i32 = arith.constant 0 : i32
    return %arg2, %arg1 : i32, i32
  }
  func.func @transform_2(%arg0: i32, %arg1: i32, %arg2: i32) -> (i32, i32) {
    %c0_i32 = arith.constant 0 : i32
    %c0_i32_0 = arith.constant 0 : i32
    return %c0_i32, %arg1 : i32, i32
  }
  func.func @transform_3(%arg0: i32, %arg1: i32, %arg2: i32) -> (i32, i32) {
    %c0_i32 = arith.constant 0 : i32
    return %arg0, %arg1 : i32, i32
  }
}

module attributes {stable_mosaic.version = 11 : i64} {
  func.func @_gemm_bn_act_kernel(%arg0: i32, %arg1: i32, %arg2: i32, %arg3: memref<8x512xbf16, #tpu.memory_space<vmem>>, %arg4: memref<512x256xbf16, #tpu.memory_space<vmem>>, %arg5: memref<1x256xf32, #tpu.memory_space<vmem>>, %arg6: memref<8x256xf32, #tpu.memory_space<vmem>>, %arg7: memref<8x256xf32, #tpu.memory_space<vmem>>, %arg8: memref<8x256xf32, #tpu.memory_space<vmem>>) attributes {dimension_semantics = [#tpu.dimension_semantics<parallel>, #tpu.dimension_semantics<parallel>, #tpu.dimension_semantics<arbitrary>], iteration_bounds = array<i64: 1, 2, 9>, scalar_prefetch = 0 : i64, scratch_operands = 1 : i64, tpu.core_type = #tpu.core_type<tc>, window_params = [{transform_indices = @transform_0, window_bounds = array<i64: 8, 512>}, {transform_indices = @transform_1, window_bounds = array<i64: 512, 256>}, {transform_indices = @transform_2, window_bounds = array<i64: 1, 256>}, {transform_indices = @transform_3, window_bounds = array<i64: 8, 256>}, {transform_indices = @transform_4, window_bounds = array<i64: 8, 256>}]} {
    %c0_i32 = arith.constant 0 : i32
    %0 = arith.cmpi eq, %arg2, %c0_i32 : i32
    %1 = arith.extui %0 : i1 to i32
    %c0_i32_0 = arith.constant 0 : i32
    %2 = arith.cmpi ne, %1, %c0_i32_0 : i32
    scf.if %2 {
      %cst_9 = arith.constant 0.000000e+00 : f32
      %12 = vector.broadcast %cst_9 : f32 to vector<8x256xf32>
      %c0_10 = arith.constant 0 : index
      %c0_11 = arith.constant 0 : index
      %13 = vector.load %arg8[%c0_10, %c0_11] : memref<8x256xf32, #tpu.memory_space<vmem>>, vector<8x256xf32>
      tpu.vector_store %arg8[%c0_10, %c0_11], %12 {strides = array<i32>} : memref<8x256xf32, #tpu.memory_space<vmem>>, vector<8x256xf32>,
    } else {
    }
    %c0 = arith.constant 0 : index
    %c0_1 = arith.constant 0 : index
    %3 = vector.load %arg8[%c0, %c0_1] : memref<8x256xf32, #tpu.memory_space<vmem>>, vector<8x256xf32>
    %c0_2 = arith.constant 0 : index
    %c0_3 = arith.constant 0 : index
    %4 = vector.load %arg3[%c0_2, %c0_3] : memref<8x512xbf16, #tpu.memory_space<vmem>>, vector<8x512xbf16>
    %c0_4 = arith.constant 0 : index
    %c0_5 = arith.constant 0 : index
    %5 = vector.load %arg4[%c0_4, %c0_5] : memref<512x256xbf16, #tpu.memory_space<vmem>>, vector<512x256xbf16>
    %cst = arith.constant dense<0.000000e+00> : vector<8x256xf32>
    %6 = tpu.matmul %4, %5, %cst {dimension_numbers = #tpu.dot_dimension_numbers<[1], [0], [0], [1], [0, 0, 1, 1], [], []>} : vector<8x512xbf16>, vector<512x256xbf16>, vector<8x256xf32> -> vector<8x256xf32>
    %7 = arith.addf %3, %6 : vector<8x256xf32>
    %c0_6 = arith.constant 0 : index
    %c0_7 = arith.constant 0 : index
    %8 = vector.load %arg8[%c0_6, %c0_7] : memref<8x256xf32, #tpu.memory_space<vmem>>, vector<8x256xf32>
    tpu.vector_store %arg8[%c0_6, %c0_7], %7 {strides = array<i32>} : memref<8x256xf32, #tpu.memory_space<vmem>>, vector<8x256xf32>,
    %c8_i32 = arith.constant 8 : i32
    %9 = arith.cmpi eq, %arg2, %c8_i32 : i32
    %10 = arith.extui %9 : i1 to i32
    %c0_i32_8 = arith.constant 0 : i32
    %11 = arith.cmpi ne, %10, %c0_i32_8 : i32
    scf.if %11 {
      %c0_9 = arith.constant 0 : index
      %c0_10 = arith.constant 0 : index
      %12 = vector.load %arg8[%c0_9, %c0_10] : memref<8x256xf32, #tpu.memory_space<vmem>>, vector<8x256xf32>
      %c0_11 = arith.constant 0 : index
      %c0_12 = arith.constant 0 : index
      %13 = vector.load %arg5[%c0_11, %c0_12] : memref<1x256xf32, #tpu.memory_space<vmem>>, vector<1x256xf32>
      %14 = vector.broadcast %13 : vector<1x256xf32> to vector<8x256xf32>
      %15 = arith.addf %12, %14 : vector<8x256xf32>
      %c0_13 = arith.constant 0 : index
      %c0_14 = arith.constant 0 : index
      %16 = vector.load %arg6[%c0_13, %c0_14] : memref<8x256xf32, #tpu.memory_space<vmem>>, vector<8x256xf32>
      %17 = arith.addf %15, %16 : vector<8x256xf32>
      %cst_15 = arith.constant 0.000000e+00 : f32
      %18 = vector.broadcast %cst_15 : f32 to vector<8x256xf32>
      %19 = arith.maximumf %17, %18 : vector<8x256xf32>
      %c0_16 = arith.constant 0 : index
      %c0_17 = arith.constant 0 : index
      %20 = vector.load %arg7[%c0_16, %c0_17] : memref<8x256xf32, #tpu.memory_space<vmem>>, vector<8x256xf32>
      tpu.vector_store %arg7[%c0_16, %c0_17], %19 {strides = array<i32>} : memref<8x256xf32, #tpu.memory_space<vmem>>, vector<8x256xf32>,
    } else {
    }
    return
  }
  func.func @transform_0(%arg0: i32, %arg1: i32, %arg2: i32) -> (i32, i32) {
    %c0_i32 = arith.constant 0 : i32
    return %arg0, %arg2 : i32, i32
  }
  func.func @transform_1(%arg0: i32, %arg1: i32, %arg2: i32) -> (i32, i32) {
    %c0_i32 = arith.constant 0 : i32
    return %arg2, %arg1 : i32, i32
  }
  func.func @transform_2(%arg0: i32, %arg1: i32, %arg2: i32) -> (i32, i32) {
    %c0_i32 = arith.constant 0 : i32
    %c0_i32_0 = arith.constant 0 : i32
    return %c0_i32, %arg1 : i32, i32
  }
  func.func @transform_3(%arg0: i32, %arg1: i32, %arg2: i32) -> (i32, i32) {
    %c0_i32 = arith.constant 0 : i32
    return %arg0, %arg1 : i32, i32
  }
  func.func @transform_4(%arg0: i32, %arg1: i32, %arg2: i32) -> (i32, i32) {
    %c0_i32 = arith.constant 0 : i32
    return %arg0, %arg1 : i32, i32
  }
}

module attributes {stable_mosaic.version = 11 : i64} {
  func.func @_gemm_bn_act_kernel(%arg0: i32, %arg1: i32, %arg2: i32, %arg3: memref<8x256xbf16, #tpu.memory_space<vmem>>, %arg4: memref<256x256xbf16, #tpu.memory_space<vmem>>, %arg5: memref<1x256xf32, #tpu.memory_space<vmem>>, %arg6: memref<8x256xf32, #tpu.memory_space<vmem>>, %arg7: memref<8x256xf32, #tpu.memory_space<vmem>>) attributes {dimension_semantics = [#tpu.dimension_semantics<parallel>, #tpu.dimension_semantics<parallel>, #tpu.dimension_semantics<arbitrary>], iteration_bounds = array<i64: 1, 2, 1>, scalar_prefetch = 0 : i64, scratch_operands = 1 : i64, tpu.core_type = #tpu.core_type<tc>, window_params = [{transform_indices = @transform_0, window_bounds = array<i64: 8, 256>}, {transform_indices = @transform_1, window_bounds = array<i64: 256, 256>}, {transform_indices = @transform_2, window_bounds = array<i64: 1, 256>}, {transform_indices = @transform_3, window_bounds = array<i64: 8, 256>}]} {
    %c0_i32 = arith.constant 0 : i32
    %0 = arith.cmpi eq, %arg2, %c0_i32 : i32
    %1 = arith.extui %0 : i1 to i32
    %c0_i32_0 = arith.constant 0 : i32
    %2 = arith.cmpi ne, %1, %c0_i32_0 : i32
    scf.if %2 {
      %cst_10 = arith.constant 0.000000e+00 : f32
      %12 = vector.broadcast %cst_10 : f32 to vector<8x256xf32>
      %c0_11 = arith.constant 0 : index
      %c0_12 = arith.constant 0 : index
      %13 = vector.load %arg7[%c0_11, %c0_12] : memref<8x256xf32, #tpu.memory_space<vmem>>, vector<8x256xf32>
      tpu.vector_store %arg7[%c0_11, %c0_12], %12 {strides = array<i32>} : memref<8x256xf32, #tpu.memory_space<vmem>>, vector<8x256xf32>,
    } else {
    }
    %c0 = arith.constant 0 : index
    %c0_1 = arith.constant 0 : index
    %3 = vector.load %arg7[%c0, %c0_1] : memref<8x256xf32, #tpu.memory_space<vmem>>, vector<8x256xf32>
    %c0_2 = arith.constant 0 : index
    %c0_3 = arith.constant 0 : index
    %4 = vector.load %arg3[%c0_2, %c0_3] : memref<8x256xbf16, #tpu.memory_space<vmem>>, vector<8x256xbf16>
    %c0_4 = arith.constant 0 : index
    %c0_5 = arith.constant 0 : index
    %5 = vector.load %arg4[%c0_4, %c0_5] : memref<256x256xbf16, #tpu.memory_space<vmem>>, vector<256x256xbf16>
    %cst = arith.constant dense<0.000000e+00> : vector<8x256xf32>
    %6 = tpu.matmul %4, %5, %cst {dimension_numbers = #tpu.dot_dimension_numbers<[1], [0], [0], [1], [0, 0, 1, 1], [], []>} : vector<8x256xbf16>, vector<256x256xbf16>, vector<8x256xf32> -> vector<8x256xf32>
    %7 = arith.addf %3, %6 : vector<8x256xf32>
    %c0_6 = arith.constant 0 : index
    %c0_7 = arith.constant 0 : index
    %8 = vector.load %arg7[%c0_6, %c0_7] : memref<8x256xf32, #tpu.memory_space<vmem>>, vector<8x256xf32>
    tpu.vector_store %arg7[%c0_6, %c0_7], %7 {strides = array<i32>} : memref<8x256xf32, #tpu.memory_space<vmem>>, vector<8x256xf32>,
    %c0_i32_8 = arith.constant 0 : i32
    %9 = arith.cmpi eq, %arg2, %c0_i32_8 : i32
    %10 = arith.extui %9 : i1 to i32
    %c0_i32_9 = arith.constant 0 : i32
    %11 = arith.cmpi ne, %10, %c0_i32_9 : i32
    scf.if %11 {
      %c0_10 = arith.constant 0 : index
      %c0_11 = arith.constant 0 : index
      %12 = vector.load %arg7[%c0_10, %c0_11] : memref<8x256xf32, #tpu.memory_space<vmem>>, vector<8x256xf32>
      %c0_12 = arith.constant 0 : index
      %c0_13 = arith.constant 0 : index
      %13 = vector.load %arg5[%c0_12, %c0_13] : memref<1x256xf32, #tpu.memory_space<vmem>>, vector<1x256xf32>
      %14 = vector.broadcast %13 : vector<1x256xf32> to vector<8x256xf32>
      %15 = arith.addf %12, %14 : vector<8x256xf32>
      %c0_14 = arith.constant 0 : index
      %c0_15 = arith.constant 0 : index
      %16 = vector.load %arg6[%c0_14, %c0_15] : memref<8x256xf32, #tpu.memory_space<vmem>>, vector<8x256xf32>
      tpu.vector_store %arg6[%c0_14, %c0_15], %15 {strides = array<i32>} : memref<8x256xf32, #tpu.memory_space<vmem>>, vector<8x256xf32>,
    } else {
    }
    return
  }
  func.func @transform_0(%arg0: i32, %arg1: i32, %arg2: i32) -> (i32, i32) {
    %c0_i32 = arith.constant 0 : i32
    return %arg0, %arg2 : i32, i32
  }
  func.func @transform_1(%arg0: i32, %arg1: i32, %arg2: i32) -> (i32, i32) {
    %c0_i32 = arith.constant 0 : i32
    return %arg2, %arg1 : i32, i32
  }
  func.func @transform_2(%arg0: i32, %arg1: i32, %arg2: i32) -> (i32, i32) {
    %c0_i32 = arith.constant 0 : i32
    %c0_i32_0 = arith.constant 0 : i32
    return %c0_i32, %arg1 : i32, i32
  }
  func.func @transform_3(%arg0: i32, %arg1: i32, %arg2: i32) -> (i32, i32) {
    %c0_i32 = arith.constant 0 : i32
    return %arg0, %arg1 : i32, i32
  }
}

module attributes {stable_mosaic.version = 11 : i64} {
  func.func @_gemm_bn_act_kernel(%arg0: i32, %arg1: i32, %arg2: i32, %arg3: memref<8x512xbf16, #tpu.memory_space<vmem>>, %arg4: memref<512x256xbf16, #tpu.memory_space<vmem>>, %arg5: memref<1x256xf32, #tpu.memory_space<vmem>>, %arg6: memref<8x256xf32, #tpu.memory_space<vmem>>, %arg7: memref<8x256xf32, #tpu.memory_space<vmem>>) attributes {dimension_semantics = [#tpu.dimension_semantics<parallel>, #tpu.dimension_semantics<parallel>, #tpu.dimension_semantics<arbitrary>], iteration_bounds = array<i64: 1, 2, 9>, scalar_prefetch = 0 : i64, scratch_operands = 1 : i64, tpu.core_type = #tpu.core_type<tc>, window_params = [{transform_indices = @transform_0, window_bounds = array<i64: 8, 512>}, {transform_indices = @transform_1, window_bounds = array<i64: 512, 256>}, {transform_indices = @transform_2, window_bounds = array<i64: 1, 256>}, {transform_indices = @transform_3, window_bounds = array<i64: 8, 256>}]} {
    %c0_i32 = arith.constant 0 : i32
    %0 = arith.cmpi eq, %arg2, %c0_i32 : i32
    %1 = arith.extui %0 : i1 to i32
    %c0_i32_0 = arith.constant 0 : i32
    %2 = arith.cmpi ne, %1, %c0_i32_0 : i32
    scf.if %2 {
      %cst_9 = arith.constant 0.000000e+00 : f32
      %12 = vector.broadcast %cst_9 : f32 to vector<8x256xf32>
      %c0_10 = arith.constant 0 : index
      %c0_11 = arith.constant 0 : index
      %13 = vector.load %arg7[%c0_10, %c0_11] : memref<8x256xf32, #tpu.memory_space<vmem>>, vector<8x256xf32>
      tpu.vector_store %arg7[%c0_10, %c0_11], %12 {strides = array<i32>} : memref<8x256xf32, #tpu.memory_space<vmem>>, vector<8x256xf32>,
    } else {
    }
    %c0 = arith.constant 0 : index
    %c0_1 = arith.constant 0 : index
    %3 = vector.load %arg7[%c0, %c0_1] : memref<8x256xf32, #tpu.memory_space<vmem>>, vector<8x256xf32>
    %c0_2 = arith.constant 0 : index
    %c0_3 = arith.constant 0 : index
    %4 = vector.load %arg3[%c0_2, %c0_3] : memref<8x512xbf16, #tpu.memory_space<vmem>>, vector<8x512xbf16>
    %c0_4 = arith.constant 0 : index
    %c0_5 = arith.constant 0 : index
    %5 = vector.load %arg4[%c0_4, %c0_5] : memref<512x256xbf16, #tpu.memory_space<vmem>>, vector<512x256xbf16>
    %cst = arith.constant dense<0.000000e+00> : vector<8x256xf32>
    %6 = tpu.matmul %4, %5, %cst {dimension_numbers = #tpu.dot_dimension_numbers<[1], [0], [0], [1], [0, 0, 1, 1], [], []>} : vector<8x512xbf16>, vector<512x256xbf16>, vector<8x256xf32> -> vector<8x256xf32>
    %7 = arith.addf %3, %6 : vector<8x256xf32>
    %c0_6 = arith.constant 0 : index
    %c0_7 = arith.constant 0 : index
    %8 = vector.load %arg7[%c0_6, %c0_7] : memref<8x256xf32, #tpu.memory_space<vmem>>, vector<8x256xf32>
    tpu.vector_store %arg7[%c0_6, %c0_7], %7 {strides = array<i32>} : memref<8x256xf32, #tpu.memory_space<vmem>>, vector<8x256xf32>,
    %c8_i32 = arith.constant 8 : i32
    %9 = arith.cmpi eq, %arg2, %c8_i32 : i32
    %10 = arith.extui %9 : i1 to i32
    %c0_i32_8 = arith.constant 0 : i32
    %11 = arith.cmpi ne, %10, %c0_i32_8 : i32
    scf.if %11 {
      %c0_9 = arith.constant 0 : index
      %c0_10 = arith.constant 0 : index
      %12 = vector.load %arg7[%c0_9, %c0_10] : memref<8x256xf32, #tpu.memory_space<vmem>>, vector<8x256xf32>
      %c0_11 = arith.constant 0 : index
      %c0_12 = arith.constant 0 : index
      %13 = vector.load %arg5[%c0_11, %c0_12] : memref<1x256xf32, #tpu.memory_space<vmem>>, vector<1x256xf32>
      %14 = vector.broadcast %13 : vector<1x256xf32> to vector<8x256xf32>
      %15 = arith.addf %12, %14 : vector<8x256xf32>
      %cst_13 = arith.constant 0.000000e+00 : f32
      %16 = vector.broadcast %cst_13 : f32 to vector<8x256xf32>
      %17 = arith.maximumf %15, %16 : vector<8x256xf32>
      %c0_14 = arith.constant 0 : index
      %c0_15 = arith.constant 0 : index
      %18 = vector.load %arg6[%c0_14, %c0_15] : memref<8x256xf32, #tpu.memory_space<vmem>>, vector<8x256xf32>
      tpu.vector_store %arg6[%c0_14, %c0_15], %17 {strides = array<i32>} : memref<8x256xf32, #tpu.memory_space<vmem>>, vector<8x256xf32>,
    } else {
    }
    return
  }
  func.func @transform_0(%arg0: i32, %arg1: i32, %arg2: i32) -> (i32, i32) {
    %c0_i32 = arith.constant 0 : i32
    return %arg0, %arg2 : i32, i32
  }
  func.func @transform_1(%arg0: i32, %arg1: i32, %arg2: i32) -> (i32, i32) {
    %c0_i32 = arith.constant 0 : i32
    return %arg2, %arg1 : i32, i32
  }
  func.func @transform_2(%arg0: i32, %arg1: i32, %arg2: i32) -> (i32, i32) {
    %c0_i32 = arith.constant 0 : i32
    %c0_i32_0 = arith.constant 0 : i32
    return %c0_i32, %arg1 : i32, i32
  }
  func.func @transform_3(%arg0: i32, %arg1: i32, %arg2: i32) -> (i32, i32) {
    %c0_i32 = arith.constant 0 : i32
    return %arg0, %arg1 : i32, i32
  }
}

module attributes {stable_mosaic.version = 11 : i64} {
  func.func @_head_kernel(%arg0: i32, %arg1: memref<2x4x512xf32, #tpu.memory_space<vmem>>, %arg2: memref<1x512xf32, #tpu.memory_space<vmem>>, %arg3: memref<1x1xf32, #tpu.memory_space<vmem>>, %arg4: memref<2x1xf32, #tpu.memory_space<vmem>>) attributes {dimension_semantics = [#tpu.dimension_semantics<arbitrary>], iteration_bounds = array<i64: 1>, scalar_prefetch = 0 : i64, scratch_operands = 0 : i64, tpu.core_type = #tpu.core_type<tc>, window_params = [{pipeline_mode = #tpu.pipeline_mode<synchronous>, transform_indices = @transform_0, window_bounds = array<i64: 2, 4, 512>}, {pipeline_mode = #tpu.pipeline_mode<synchronous>, transform_indices = @transform_1, window_bounds = array<i64: 1, 512>}, {pipeline_mode = #tpu.pipeline_mode<synchronous>, transform_indices = @transform_2, window_bounds = array<i64: 1, 1>}, {pipeline_mode = #tpu.pipeline_mode<synchronous>, transform_indices = @transform_3, window_bounds = array<i64: 2, 1>}]} {
    %c0 = arith.constant 0 : index
    %c0_0 = arith.constant 0 : index
    %c0_1 = arith.constant 0 : index
    %0 = vector.load %arg1[%c0, %c0_0, %c0_1] : memref<2x4x512xf32, #tpu.memory_space<vmem>>, vector<2x4x512xf32>
    %cst = arith.constant dense<0.000000e+00> : vector<2x512xf32>
    %1 = vector.multi_reduction <add>, %0, %cst [1] : vector<2x4x512xf32> to vector<2x512xf32>
    %cst_2 = arith.constant 4.000000e+00 : f32
    %2 = vector.broadcast %cst_2 : f32 to vector<2x512xf32>
    %3 = arith.divf %1, %2 : vector<2x512xf32>
    %c0_3 = arith.constant 0 : index
    %c0_4 = arith.constant 0 : index
    %4 = vector.load %arg2[%c0_3, %c0_4] : memref<1x512xf32, #tpu.memory_space<vmem>>, vector<1x512xf32>
    %5 = vector.broadcast %4 : vector<1x512xf32> to vector<2x512xf32>
    %6 = arith.mulf %3, %5 : vector<2x512xf32>
    %cst_5 = arith.constant dense<0.000000e+00> : vector<2xf32>
    %7 = vector.multi_reduction <add>, %6, %cst_5 [1] : vector<2x512xf32> to vector<2xf32>
    %8 = vector.shape_cast %7 : vector<2xf32> to vector<2x1xf32>
    %c0_6 = arith.constant 0 : index
    %c0_7 = arith.constant 0 : index
    %9 = vector.load %arg3[%c0_6, %c0_7] : memref<1x1xf32, #tpu.memory_space<vmem>>, vector<1x1xf32>
    %10 = vector.broadcast %9 : vector<1x1xf32> to vector<2x1xf32>
    %11 = arith.addf %8, %10 : vector<2x1xf32>
    %c0_8 = arith.constant 0 : index
    %c0_9 = arith.constant 0 : index
    %12 = vector.load %arg4[%c0_8, %c0_9] : memref<2x1xf32, #tpu.memory_space<vmem>>, vector<2x1xf32>
    tpu.vector_store %arg4[%c0_8, %c0_9], %11 {strides = array<i32>} : memref<2x1xf32, #tpu.memory_space<vmem>>, vector<2x1xf32>,
    return
  }
  func.func @transform_0(%arg0: i32) -> (i32, i32, i32) {
    %c0_i32 = arith.constant 0 : i32
    %c0_i32_0 = arith.constant 0 : i32
    %c0_i32_1 = arith.constant 0 : i32
    %c0_i32_2 = arith.constant 0 : i32
    return %c0_i32, %c0_i32_0, %c0_i32_1 : i32, i32, i32
  }
  func.func @transform_1(%arg0: i32) -> (i32, i32) {
    %c0_i32 = arith.constant 0 : i32
    %c0_i32_0 = arith.constant 0 : i32
    %c0_i32_1 = arith.constant 0 : i32
    return %c0_i32, %c0_i32_0 : i32, i32
  }
  func.func @transform_2(%arg0: i32) -> (i32, i32) {
    %c0_i32 = arith.constant 0 : i32
    %c0_i32_0 = arith.constant 0 : i32
    %c0_i32_1 = arith.constant 0 : i32
    return %c0_i32, %c0_i32_0 : i32, i32
  }
  func.func @transform_3(%arg0: i32) -> (i32, i32) {
    %c0_i32 = arith.constant 0 : i32
    %c0_i32_0 = arith.constant 0 : i32
    %c0_i32_1 = arith.constant 0 : i32
    return %c0_i32, %c0_i32_0 : i32, i32
  }
}

</mosaic_0001>

<bundles_post_ra>
// kernel: frontal_cls_forward.37
= control target key start
LH: loop header
LB: loop body
LE: loop exit
PB: predicated region body
PF: predicated region fallthrough
CT: control target
= control target key end

     0   :  { %s1349_s12 = smov 0   ;;  %s1351_s13 = smov 0   ;;  %s1656_s0 = inlined_call_operand.vmem [shape: bf16[2048,147], index: 0, kind: input, shape index: {}]   ;;  %s1657_s1 = inlined_call_operand.vmem [shape: bf16[147,64], index: 1, kind: input, shape index: {}]   ;;  %s1658_s2 = inlined_call_operand.vmem [shape: f32[1,64], index: 2, kind: input, shape index: {}]   ;;  %s1659_s3 = inlined_call_operand.vmem [shape: f32[2048,64], index: 3, kind: output, shape index: {}]  }
   0x1   :  { %s1353_s14 = smov 0  }
   0x2 LB: > { %s32_s15 = sadd.s32 1, %s1320_s13  ;;  %p1129_p0 = scmp.ge.s32.totalorder %s1324_s14, 1  ;;  %s1324_s14 = sphi %s1353_s14, %s13_s14   ;;  %s1320_s13 = sphi %s1351_s13, %s1661_s13   ;;  %s1316_s12 = sphi %s1349_s12, %s1660_s12  }
   0x3   : > { %p34_p1 = scmp.ge.s32.totalorder %s32_s15, 8  ;;  %p191_p2 = scmp.lt.s32.totalorder %s1324_s14, 9 }
   0x5   : > { %s1663_s15 = smov (%p34_p1, %s32_s15), 0  ;;  %p192_p3 = pnand %p1129_p0, %p191_p2 }
   0x6   : > { %v1244_v0 = vld [vmem:[%s1657_s1] sm:$0xff] (!%p192_p3)   ;;  %v1326_v1 = vmov (!%p192_p3), 0   ;;  %v1245_v2 = vld [vmem:[%s1657_s1 + $0x8] sm:$0xff] (!%p192_p3)   ;;  %v1246_v3 = vld [vmem:[%s1657_s1 + $0x10] sm:$0xff] (!%p192_p3)   ;;  %s1130_s22 = sshll.u32 (!%p192_p3), %s1316_s12, 5  ;;  %vm272_vm0 = vcmask (!%p192_p3), 523264  }
   0x7   : > { %195 = sbr.rel (%p192_p3) target bundleno = 333 (0x14d), region = 32  ;;  %645 = vmatprep.subr.bf16.mxu0 (!%p192_p3), %v1326_v1  ;;  %1197 = vmatprep.subr.bf16.mxu1 (!%p192_p3), %v1326_v1  ;;  %p236_p4 = scmp.lt.s32.totalorder (!%p192_p3), %s1130_s22, 255  ;;  %v1247_v4 = vld [vmem:[%s1657_s1 + $0x18] sm:$0xff] (!%p192_p3)   ;;  %v1327_v5 = vmov (!%p192_p3), 0.0   ;;  %v1248_v6 = vld [vmem:[%s1657_s1 + $0x20] sm:$0xff] (!%p192_p3)   ;;  %vm589_vm1 = vcmask (!%p192_p3), 154624  }
   0x8   : > { %646 = vmatpush1.bf16.msra.mxu0 (!%p192_p3), %v1244_v0  ;;  %1207 = vmatpush1.bf16.msra.mxu1 (!%p192_p3), %v1244_v0  ;;  %273 = vst.msk [vmem:[#allocation2] sm:$0xff] (!%p192_p3), %vm272_vm0, %v1327_v5  ;;  %274 = vst.msk [vmem:[#allocation2 + $0x8] sm:$0xff] (!%p192_p3), %vm272_vm0, %v1327_v5  ;;  %v1249_v9 = vld [vmem:[%s1657_s1 + $0x28] sm:$0xff] (!%p192_p3)   ;;  %v1250_v10 = vld [vmem:[%s1657_s1 + $0x30] sm:$0xff] (!%p192_p3)   ;;  %vm638_vm2 = vcmask (!%p192_p3), 1040384   ;;  %vm639_vm3 = vcmask (!%p192_p3), 1041408  }
   0x9   : > { %647 = vmatprep.subr.bf16.mxu0 (!%p192_p3), %v1326_v1  ;;  %1198 = vmatprep.subr.bf16.mxu1 (!%p192_p3), %v1326_v1  ;;  %275 = vst.msk [vmem:[#allocation2 + $0x10] sm:$0xff] (!%p192_p3), %vm272_vm0, %v1327_v5  ;;  %276 = vst.msk [vmem:[#allocation2 + $0x18] sm:$0xff] (!%p192_p3), %vm272_vm0, %v1327_v5  ;;  %v1251_v11 = vld [vmem:[%s1657_s1 + $0x38] sm:$0xff] (!%p192_p3)   ;;  %v1328_v12 = vmov (!%p192_p3), 65535   ;;  %v1252_v14 = vld [vmem:[%s1657_s1 + $0x40] sm:$0xff] (!%p192_p3)  }
   0xa   : > { %277 = vst.msk [vmem:[#allocation2 + $0x20] sm:$0xff] (!%p192_p3), %vm272_vm0, %v1327_v5  ;;  %278 = vst.msk [vmem:[#allocation2 + $0x28] sm:$0xff] (!%p192_p3), %vm272_vm0, %v1327_v5  ;;  %v640_v13 = vsel (!%p192_p3), %vm638_vm2, 4294967295, %v1328_v12  ;;  %v1253_v15 = vld [vmem:[%s1657_s1 + $0x48] ss:$0 sps:$4 sm:$0x33] (!%p192_p3)  }
   0xb   : > { %279 = vst.msk [vmem:[#allocation2 + $0x30] sm:$0xff] (!%p192_p3), %vm272_vm0, %v1327_v5  ;;  %280 = vst.msk [vmem:[#allocation2 + $0x38] sm:$0xff] (!%p192_p3), %vm272_vm0, %v1327_v5  ;;  %v641_v16 = vsel (!%p192_p3), %vm639_vm3, %v640_v13, 0 }
   0xc   : > { %648 = vmatpush1.bf16.msra.mxu0 (!%p192_p3), %v1245_v2  ;;  %1208 = vmatpush1.bf16.msra.mxu1 (!%p192_p3), %v1245_v2  ;;  %281 = vst.msk [vmem:[#allocation2 + $0x40] sm:$0xff] (!%p192_p3), %vm272_vm0, %v1327_v5  ;;  %282 = vst.msk [vmem:[#allocation2 + $0x48] sm:$0xff] (!%p192_p3), %vm272_vm0, %v1327_v5  ;;  %v643_v17 = vand.u32 (!%p192_p3), %v1253_v15, %v641_v16  ;;  %v1514_v2 = vld [vmem:[%s1658_s2] ss:$0 sm:$0xff] (!%p192_p3) }
   0xd   : > { %649 = vmatprep.subr.bf16.mxu0 (!%p192_p3), %v1326_v1  ;;  %1199 = vmatprep.subr.bf16.mxu1 (!%p192_p3), %v1326_v1  ;;  %283 = vst.msk [vmem:[#allocation2 + $0x50] sm:$0xff] (!%p192_p3), %vm272_vm0, %v1327_v5  ;;  %284 = vst.msk [vmem:[#allocation2 + $0x58] sm:$0xff] (!%p192_p3), %vm272_vm0, %v1327_v5 }
   0xe   : > { %s1665_s22 = smov (!%p236_p4, %s1130_s22), 255  ;;  %285 = vst.msk [vmem:[#allocation2 + $0x60] sm:$0xff] %vm272_vm0, %v1327_v5  ;;  %286 = vst.msk [vmem:[#allocation2 + $0x68] sm:$0xff] %vm272_vm0, %v1327_v5 }
   0xf   : > { %s1196_s25 = sshll.u32 %s1665_s22, 3  ;;  %287 = vst.msk [vmem:[#allocation2 + $0x70] sm:$0xff] %vm272_vm0, %v1327_v5  ;;  %288 = vst.msk [vmem:[#allocation2 + $0x78] sm:$0xff] %vm272_vm0, %v1327_v5  ;;  %v305_v48 = vld [vmem:[#allocation2] sm:$0xff]  ;;  %v306_v52 = vld [vmem:[#allocation2 + $0x8] sm:$0xff] }
  0x10   : > { %650 = vmatpush1.bf16.msra.mxu0 %v1246_v3  ;;  %1209 = vmatpush1.bf16.msra.mxu1 %v1246_v3  ;;  %289 = vst.msk [vmem:[#allocation2 + $0x80] sm:$0xff] %vm272_vm0, %v1327_v5  ;;  %290 = vst.msk [vmem:[#allocation2 + $0x88] sm:$0xff] %vm272_vm0, %v1327_v5  ;;  %s1427_s28 = scalar_lea.vmem %s1656_s0, %s1196_s25  ;;  %v307_v0 = vld [vmem:[#allocation2 + $0x10] sm:$0xff]  ;;  %s1525_s21 = scalar_lea.vmem %s1659_s3, %s1196_s25 }
  0x11   : > { %651 = vmatprep.subr.bf16.mxu0 %v1326_v1  ;;  %1200 = vmatprep.subr.bf16.mxu1 %v1326_v1  ;;  %291 = vst.msk [vmem:[#allocation2 + $0x90] sm:$0xff] %vm272_vm0, %v1327_v5  ;;  %292 = vst.msk [vmem:[#allocation2 + $0x98] sm:$0xff] %vm272_vm0, %v1327_v5  ;;  %v1256_v7 = vld [vmem:[%s1427_s28 + $0x4] ss:$8 sps:$4 sm:$0xff]   ;;  %v1254_v18 = vld [vmem:[%s1427_s28] ss:$8 sps:$4 sm:$0xff]  }
  0x12   : > { %293 = vst.msk [vmem:[#allocation2 + $0xa0] sm:$0xff] %vm272_vm0, %v1327_v5  ;;  %294 = vst.msk [vmem:[#allocation2 + $0xa8] sm:$0xff] %vm272_vm0, %v1327_v5  ;;  %v1259_v8 = vld [vmem:[%s1427_s28 + $0x84] ss:$8 sps:$4 sm:$0xff]   ;;  %1177 = vmatprep.mubr.msk.bf16.mxu0 %vm589_vm1, %v1256_v7  ;;  %v1257_v19 = vld [vmem:[%s1427_s28 + $0x80] ss:$8 sps:$4 sm:$0xff]  }
  0x13   : > { %295 = vst.msk [vmem:[#allocation2 + $0xb0] sm:$0xff] %vm272_vm0, %v1327_v5  ;;  %296 = vst.msk [vmem:[#allocation2 + $0xb8] sm:$0xff] %vm272_vm0, %v1327_v5  ;;  %1185 = vmatprep.mubr.msk.bf16.mxu1 %vm589_vm1, %v1259_v8  ;;  %v1260_v20 = vld [vmem:[%s1427_s28 + $0x14] ss:$8 sps:$4 sm:$0xff]   ;;  %v1264_v22 = vld [vmem:[%s1427_s28 + $0x10] ss:$8 sps:$4 sm:$0xff]  }
  0x14   : > { %297 = vst.msk [vmem:[#allocation2 + $0xc0] sm:$0xff] %vm272_vm0, %v1327_v5  ;;  %298 = vst.msk [vmem:[#allocation2 + $0xc8] sm:$0xff] %vm272_vm0, %v1327_v5  ;;  %652 = vmatpush1.bf16.msra.mxu0 %v1247_v4  ;;  %1210 = vmatpush1.bf16.msra.mxu1 %v1247_v4  ;;  %v1262_v21 = vld [vmem:[%s1427_s28 + $0x94] ss:$8 sps:$4 sm:$0xff]   ;;  %v1265_v23 = vld [vmem:[%s1427_s28 + $0x90] ss:$8 sps:$4 sm:$0xff]  }
  0x15   : > { %299 = vst.msk [vmem:[#allocation2 + $0xd0] sm:$0xff] %vm272_vm0, %v1327_v5  ;;  %300 = vst.msk [vmem:[#allocation2 + $0xd8] sm:$0xff] %vm272_vm0, %v1327_v5  ;;  %653 = vmatprep.subr.bf16.mxu0 %v1326_v1  ;;  %1201 = vmatprep.subr.bf16.mxu1 %v1326_v1  ;;  %v1266_v24 = vld [vmem:[%s1427_s28 + $0x24] ss:$8 sps:$4 sm:$0xff]   ;;  %v1270_v26 = vld [vmem:[%s1427_s28 + $0x20] ss:$8 sps:$4 sm:$0xff]  }
  0x16   : > { %301 = vst.msk [vmem:[#allocation2 + $0xe0] sm:$0xff] %vm272_vm0, %v1327_v5  ;;  %302 = vst.msk [vmem:[#allocation2 + $0xe8] sm:$0xff] %vm272_vm0, %v1327_v5  ;;  %v1268_v25 = vld [vmem:[%s1427_s28 + $0xa4] ss:$8 sps:$4 sm:$0xff]   ;;  %v1271_v27 = vld [vmem:[%s1427_s28 + $0xa0] ss:$8 sps:$4 sm:$0xff]  }
  0x17   : > { %303 = vst.msk [vmem:[#allocation2 + $0xf0] sm:$0xff] %vm272_vm0, %v1327_v5  ;;  %304 = vst.msk [vmem:[#allocation2 + $0xf8] sm:$0xff] %vm272_vm0, %v1327_v5  ;;  %v1272_v28 = vld [vmem:[%s1427_s28 + $0x34] ss:$8 sps:$4 sm:$0xff]   ;;  %v1276_v30 = vld [vmem:[%s1427_s28 + $0x30] ss:$8 sps:$4 sm:$0xff]  }
  0x18   : > { %654 = vmatpush1.bf16.msra.mxu0 %v1248_v6  ;;  %1211 = vmatpush1.bf16.msra.mxu1 %v1248_v6  ;;  %v1274_v29 = vld [vmem:[%s1427_s28 + $0xb4] ss:$8 sps:$4 sm:$0xff]   ;;  %v1277_v31 = vld [vmem:[%s1427_s28 + $0xb0] ss:$8 sps:$4 sm:$0xff]   ;;  %v1278_v32 = vld [vmem:[%s1427_s28 + $0x44] ss:$8 sps:$4 sm:$0xff]  }
  0x19   : > { %655 = vmatprep.subr.bf16.mxu0 %v1326_v1  ;;  %1202 = vmatprep.subr.bf16.mxu1 %v1326_v1  ;;  %v1280_v33 = vld [vmem:[%s1427_s28 + $0xc4] ss:$8 sps:$4 sm:$0xff]   ;;  %v1282_v34 = vld [vmem:[%s1427_s28 + $0x40] ss:$8 sps:$4 sm:$0xff]   ;;  %v1284_v36 = vld [vmem:[%s1427_s28 + $0x54] ss:$8 sps:$4 sm:$0xff]  }
  0x1a   : > { %v1283_v35 = vld [vmem:[%s1427_s28 + $0xc0] ss:$8 sps:$4 sm:$0xff]   ;;  %v1286_v37 = vld [vmem:[%s1427_s28 + $0xd4] ss:$8 sps:$4 sm:$0xff]   ;;  %v1288_v38 = vld [vmem:[%s1427_s28 + $0x50] ss:$8 sps:$4 sm:$0xff]  }
  0x1b   : > { %v1289_v39 = vld [vmem:[%s1427_s28 + $0xd0] ss:$8 sps:$4 sm:$0xff]   ;;  %v1290_v40 = vld [vmem:[%s1427_s28 + $0x64] ss:$8 sps:$4 sm:$0xff]   ;;  %v1294_v42 = vld [vmem:[%s1427_s28 + $0x60] ss:$8 sps:$4 sm:$0xff]  }
  0x1c   : > { %656 = vmatpush1.bf16.msra.mxu0 %v1249_v9  ;;  %1212 = vmatpush1.bf16.msra.mxu1 %v1249_v9  ;;  %v1292_v41 = vld [vmem:[%s1427_s28 + $0xe4] ss:$8 sps:$4 sm:$0xff]   ;;  %v1295_v43 = vld [vmem:[%s1427_s28 + $0xe0] ss:$8 sps:$4 sm:$0xff]   ;;  %v1296_v44 = vld [vmem:[%s1427_s28 + $0x74] ss:$8 sps:$4 sm:$0xff]  }
  0x1d   : > { %657 = vmatprep.subr.bf16.mxu0 %v1326_v1  ;;  %1203 = vmatprep.subr.bf16.mxu1 %v1326_v1  ;;  %v1298_v45 = vld [vmem:[%s1427_s28 + $0xf4] ss:$8 sps:$4 sm:$0xff]   ;;  %v1300_v46 = vld [vmem:[%s1427_s28 + $0x70] ss:$8 sps:$4 sm:$0xff]   ;;  %v321_v49 = vld [vmem:[#allocation2 + $0x80] sm:$0xff] }
  0x1e   : > { %v1301_v47 = vld [vmem:[%s1427_s28 + $0xf0] ss:$8 sps:$4 sm:$0xff]   ;;  %v322_v53 = vld [vmem:[#allocation2 + $0x88] sm:$0xff] }
  0x1f   : > { %v308_v5 = vld [vmem:[#allocation2 + $0x18] sm:$0xff] }
  0x20   : > { %658 = vmatpush1.bf16.msra.mxu0 %v1250_v10  ;;  %1213 = vmatpush1.bf16.msra.mxu1 %v1250_v10  ;;  %v324_v6 = vld [vmem:[#allocation2 + $0x98] sm:$0xff] }
  0x21   : > { %659 = vmatprep.subr.bf16.mxu0 %v1326_v1  ;;  %1204 = vmatprep.subr.bf16.mxu1 %v1326_v1 }
  0x24   : > { %660 = vmatpush1.bf16.msra.mxu0 %v1251_v11  ;;  %1214 = vmatpush1.bf16.msra.mxu1 %v1251_v11 }
  0x25   : > { %661 = vmatprep.subr.bf16.mxu0 %v1326_v1  ;;  %1205 = vmatprep.subr.bf16.mxu1 %v1326_v1 }
  0x28   : > { %662 = vmatpush1.bf16.msra.mxu0 %v1252_v14  ;;  %1215 = vmatpush1.bf16.msra.mxu1 %v1252_v14 }
  0x29   : > { %663 = vmatprep.subr.bf16.mxu0 %v1326_v1  ;;  %1206 = vmatprep.subr.bf16.mxu1 %v1326_v1  ;;  %v323_v1 = vld [vmem:[#allocation2 + $0x90] sm:$0xff] }
  0x2c   : > { %664 = vmatpush1.bf16.msra.mxu0 %v643_v17  ;;  %1216 = vmatpush1.bf16.msra.mxu1 %v643_v17 }
  0x2f   : > { %678 = vmatmul.mubr.bf16.vlgmr.msra.gmra.mrb[0].mxu0 %v1254_v18  ;;  %742 = vmatmul.mubr.bf16.vlgmr.msra.gmra.mrb[0].mxu1 %v1257_v19 }
  0x30   : > { %1178 = vmatprep.mubr.msk.bf16.mxu0 %vm589_vm1, %v1260_v20  ;;  %1186 = vmatprep.mubr.msk.bf16.mxu1 %vm589_vm1, %v1262_v21 }
  0x37   : > { %686 = vmatmul.mubr.bf16.gmra.mrb[4].mxu0 %v1264_v22  ;;  %750 = vmatmul.mubr.bf16.gmra.mrb[4].mxu1 %v1265_v23 }
  0x38   : > { %1179 = vmatprep.mubr.msk.bf16.mxu0 %vm589_vm1, %v1266_v24  ;;  %1187 = vmatprep.mubr.msk.bf16.mxu1 %vm589_vm1, %v1268_v25 }
  0x3f   : > { %694 = vmatmul.mubr.bf16.gmra.mrb[8].mxu0 %v1270_v26  ;;  %758 = vmatmul.mubr.bf16.gmra.mrb[8].mxu1 %v1271_v27  ;;  %v309_v27 = vld [vmem:[#allocation2 + $0x20] sm:$0xff] }
  0x40   : > { %1180 = vmatprep.mubr.msk.bf16.mxu0 %vm589_vm1, %v1272_v28  ;;  %1188 = vmatprep.mubr.msk.bf16.mxu1 %vm589_vm1, %v1274_v29  ;;  %v325_v28 = vld [vmem:[#allocation2 + $0xa0] sm:$0xff] }
  0x47   : > { %702 = vmatmul.mubr.bf16.gmra.mrb[12].mxu0 %v1276_v30  ;;  %766 = vmatmul.mubr.bf16.gmra.mrb[12].mxu1 %v1277_v31 }
  0x48   : > { %1181 = vmatprep.mubr.msk.bf16.mxu0 %vm589_vm1, %v1278_v32  ;;  %1189 = vmatprep.mubr.msk.bf16.mxu1 %vm589_vm1, %v1280_v33  ;;  %v310_v33 = vld [vmem:[#allocation2 + $0x28] sm:$0xff] }
  0x4f   : > { %710 = vmatmul.mubr.bf16.gmra.mrb[16].mxu0 %v1282_v34  ;;  %774 = vmatmul.mubr.bf16.gmra.mrb[16].mxu1 %v1283_v35  ;;  %v326_v34 = vld [vmem:[#allocation2 + $0xa8] sm:$0xff] }
  0x50   : > { %1182 = vmatprep.mubr.msk.bf16.mxu0 %vm589_vm1, %v1284_v36  ;;  %1190 = vmatprep.mubr.msk.bf16.mxu1 %vm589_vm1, %v1286_v37 }
  0x57   : > { %718 = vmatmul.mubr.bf16.gmra.mrb[20].mxu0 %v1288_v38  ;;  %782 = vmatmul.mubr.bf16.gmra.mrb[20].mxu1 %v1289_v39 }
  0x58   : > { %1183 = vmatprep.mubr.msk.bf16.mxu0 %vm589_vm1, %v1290_v40  ;;  %1191 = vmatprep.mubr.msk.bf16.mxu1 %vm589_vm1, %v1292_v41 }
  0x5f   : > { %726 = vmatmul.mubr.bf16.gmra.mrb[24].mxu0 %v1294_v42  ;;  %790 = vmatmul.mubr.bf16.gmra.mrb[24].mxu1 %v1295_v43 }
  0x60   : > { %1184 = vmatprep.mubr.msk.bf16.mxu0 %vm589_vm1, %v1296_v44  ;;  %1192 = vmatprep.mubr.msk.bf16.mxu1 %vm589_vm1, %v1298_v45 }
  0x67   : > { %734 = vmatmul.mubr.bf16.gmra.mrb[28].mxu0 %v1300_v46  ;;  %798 = vmatmul.mubr.bf16.gmra.mrb[28].mxu1 %v1301_v47 }
 0x102   : > { %v679_v50 = vpop.f32.mrb[0].mxu0  ;;  %v743_v51 = vpop.f32.mrb[0].mxu1 }
 0x103   : > { %v806_v54 = vadd.f32 %v679_v50, %v305_v48  ;;  %v822_v55 = vadd.f32 %v743_v51, %v321_v49  ;;  %v681_v56 = vpop.f32.mrb[1].mxu0  ;;  %v745_v57 = vpop.f32.mrb[1].mxu1 }
 0x104   : > { %v682_v58 = vpop.f32.mrb[2].mxu0  ;;  %v746_v59 = vpop.f32.mrb[2].mxu1  ;;  %v327_v56 = vld [vmem:[#allocation2 + $0xb0] sm:$0xff] }
 0x105   : > { %839 = vst.msk [vmem:[#allocation2] sm:$0xff] %vm272_vm0, %v806_v54  ;;  %855 = vst.msk [vmem:[#allocation2 + $0x80] sm:$0xff] %vm272_vm0, %v822_v55  ;;  %v807_v60 = vadd.f32 %v682_v58, %v306_v52  ;;  %v823_v61 = vadd.f32 %v746_v59, %v322_v53  ;;  %v684_v62 = vpop.f32.mrb[3].mxu0  ;;  %v748_v63 = vpop.f32.mrb[3].mxu1  ;;  %v311_v55 = vld [vmem:[#allocation2 + $0x30] sm:$0xff] }
 0x106   : > { %v328_v62 = vld [vmem:[#allocation2 + $0xb8] sm:$0xff] }
 0x107   : > { %840 = vst.msk [vmem:[#allocation2 + $0x8] sm:$0xff] %vm272_vm0, %v807_v60  ;;  %856 = vst.msk [vmem:[#allocation2 + $0x88] sm:$0xff] %vm272_vm0, %v823_v61  ;;  %v312_v61 = vld [vmem:[#allocation2 + $0x38] sm:$0xff] }
 0x10a   : > { %v687_v3 = vpop.f32.mrb[4].mxu0  ;;  %v751_v4 = vpop.f32.mrb[4].mxu1 }
 0x10b   : > { %v808_v7 = vadd.f32 %v687_v3, %v307_v0  ;;  %v824_v8 = vadd.f32 %v751_v4, %v323_v1  ;;  %v689_v9 = vpop.f32.mrb[5].mxu0  ;;  %v753_v10 = vpop.f32.mrb[5].mxu1 }
 0x10c   : > { %v874_v11 = vld [vmem:[#allocation2] sm:$0xff]  ;;  %v690_v13 = vpop.f32.mrb[6].mxu0  ;;  %v754_v14 = vpop.f32.mrb[6].mxu1 }
 0x10d   : > { %v890_v12 = vld [vmem:[#allocation2 + $0x80] sm:$0xff]  ;;  %v913_v15 = vadd.f32 %v1514_v2, %v874_v11  ;;  %841 = vst.msk [vmem:[#allocation2 + $0x10] sm:$0xff] %vm272_vm0, %v808_v7  ;;  %857 = vst.msk [vmem:[#allocation2 + $0x90] sm:$0xff] %vm272_vm0, %v824_v8  ;;  %v809_v17 = vadd.f32 %v690_v13, %v308_v5  ;;  %v825_v18 = vadd.f32 %v754_v14, %v324_v6  ;;  %v692_v19 = vpop.f32.mrb[7].mxu0  ;;  %v756_v20 = vpop.f32.mrb[7].mxu1 }
 0x10e   : > { %v929_v16 = vadd.f32 %v1514_v2, %v890_v12  ;;  %v875_v21 = vld [vmem:[#allocation2 + $0x8] sm:$0xff]  ;;  %v313_v20 = vld [vmem:[#allocation2 + $0x40] sm:$0xff] }
 0x10f   : > { %v891_v22 = vld [vmem:[#allocation2 + $0x88] sm:$0xff]  ;;  %v945_v23 = vmax.f32 %v913_v15, 0.0  ;;  %v914_v25 = vadd.f32 %v1514_v2, %v875_v21  ;;  %842 = vst.msk [vmem:[#allocation2 + $0x18] sm:$0xff] %vm272_vm0, %v809_v17  ;;  %858 = vst.msk [vmem:[#allocation2 + $0x98] sm:$0xff] %vm272_vm0, %v825_v18  ;;  %v329_v21 = vld [vmem:[#allocation2 + $0xc0] sm:$0xff] }
 0x110   : > { %v961_v24 = vmax.f32 %v929_v16, 0.0  ;;  %v930_v26 = vadd.f32 %v1514_v2, %v891_v22 }
 0x111   : > { %977 = vst.msk [vmem:[%s1525_s21] sm:$0xff] %vm272_vm0, %v945_v23  ;;  %v946_v29 = vmax.f32 %v914_v25, 0.0 }
 0x112   : > { %993 = vst.msk [vmem:[%s1525_s21 + $0x80] sm:$0xff] %vm272_vm0, %v961_v24  ;;  %v962_v30 = vmax.f32 %v930_v26, 0.0  ;;  %v695_v31 = vpop.f32.mrb[8].mxu0  ;;  %v759_v32 = vpop.f32.mrb[8].mxu1  ;;  %v314_v26 = vld [vmem:[#allocation2 + $0x48] sm:$0xff] }
 0x113   : > { %978 = vst.msk [vmem:[%s1525_s21 + $0x8] sm:$0xff] %vm272_vm0, %v946_v29  ;;  %v810_v35 = vadd.f32 %v695_v31, %v309_v27  ;;  %v826_v36 = vadd.f32 %v759_v32, %v325_v28  ;;  %v697_v37 = vpop.f32.mrb[9].mxu0  ;;  %v761_v38 = vpop.f32.mrb[9].mxu1  ;;  %v330_v27 = vld [vmem:[#allocation2 + $0xc8] sm:$0xff] }
 0x114   : > { %994 = vst.msk [vmem:[%s1525_s21 + $0x88] sm:$0xff] %vm272_vm0, %v962_v30  ;;  %v876_v39 = vld [vmem:[#allocation2 + $0x10] sm:$0xff]  ;;  %v698_v41 = vpop.f32.mrb[10].mxu0  ;;  %v762_v42 = vpop.f32.mrb[10].mxu1 }
 0x115   : > { %v892_v40 = vld [vmem:[#allocation2 + $0x90] sm:$0xff]  ;;  %v915_v43 = vadd.f32 %v1514_v2, %v876_v39  ;;  %843 = vst.msk [vmem:[#allocation2 + $0x20] sm:$0xff] %vm272_vm0, %v810_v35  ;;  %859 = vst.msk [vmem:[#allocation2 + $0xa0] sm:$0xff] %vm272_vm0, %v826_v36  ;;  %v811_v45 = vadd.f32 %v698_v41, %v310_v33  ;;  %v827_v46 = vadd.f32 %v762_v42, %v326_v34  ;;  %v700_v47 = vpop.f32.mrb[11].mxu0  ;;  %v764_v48 = vpop.f32.mrb[11].mxu1 }
 0x116   : > { %v931_v44 = vadd.f32 %v1514_v2, %v892_v40  ;;  %v877_v49 = vld [vmem:[#allocation2 + $0x18] sm:$0xff]  ;;  %v315_v48 = vld [vmem:[#allocation2 + $0x50] sm:$0xff] }
 0x117   : > { %v893_v50 = vld [vmem:[#allocation2 + $0x98] sm:$0xff]  ;;  %v947_v51 = vmax.f32 %v915_v43, 0.0  ;;  %v916_v53 = vadd.f32 %v1514_v2, %v877_v49  ;;  %844 = vst.msk [vmem:[#allocation2 + $0x28] sm:$0xff] %vm272_vm0, %v811_v45  ;;  %860 = vst.msk [vmem:[#allocation2 + $0xa8] sm:$0xff] %vm272_vm0, %v827_v46  ;;  %v331_v49 = vld [vmem:[#allocation2 + $0xd0] sm:$0xff] }
 0x118   : > { %v963_v52 = vmax.f32 %v931_v44, 0.0  ;;  %v932_v54 = vadd.f32 %v1514_v2, %v893_v50 }
 0x119   : > { %979 = vst.msk [vmem:[%s1525_s21 + $0x10] sm:$0xff] %vm272_vm0, %v947_v51  ;;  %v948_v57 = vmax.f32 %v916_v53, 0.0 }
 0x11a   : > { %995 = vst.msk [vmem:[%s1525_s21 + $0x90] sm:$0xff] %vm272_vm0, %v963_v52  ;;  %v964_v58 = vmax.f32 %v932_v54, 0.0  ;;  %v703_v59 = vpop.f32.mrb[12].mxu0  ;;  %v767_v60 = vpop.f32.mrb[12].mxu1  ;;  %v316_v54 = vld [vmem:[#allocation2 + $0x58] sm:$0xff] }
 0x11b   : > { %980 = vst.msk [vmem:[%s1525_s21 + $0x18] sm:$0xff] %vm272_vm0, %v948_v57  ;;  %v812_v63 = vadd.f32 %v703_v59, %v311_v55  ;;  %v828_v0 = vadd.f32 %v767_v60, %v327_v56  ;;  %v705_v1 = vpop.f32.mrb[13].mxu0  ;;  %v769_v3 = vpop.f32.mrb[13].mxu1  ;;  %v332_v55 = vld [vmem:[#allocation2 + $0xd8] sm:$0xff] }
 0x11c   : > { %996 = vst.msk [vmem:[%s1525_s21 + $0x98] sm:$0xff] %vm272_vm0, %v964_v58  ;;  %v878_v4 = vld [vmem:[#allocation2 + $0x20] sm:$0xff]  ;;  %v706_v6 = vpop.f32.mrb[14].mxu0  ;;  %v770_v7 = vpop.f32.mrb[14].mxu1 }
 0x11d   : > { %v894_v5 = vld [vmem:[#allocation2 + $0xa0] sm:$0xff]  ;;  %v917_v8 = vadd.f32 %v1514_v2, %v878_v4  ;;  %845 = vst.msk [vmem:[#allocation2 + $0x30] sm:$0xff] %vm272_vm0, %v812_v63  ;;  %861 = vst.msk [vmem:[#allocation2 + $0xb0] sm:$0xff] %vm272_vm0, %v828_v0  ;;  %v813_v10 = vadd.f32 %v706_v6, %v312_v61  ;;  %v829_v11 = vadd.f32 %v770_v7, %v328_v62  ;;  %v708_v12 = vpop.f32.mrb[15].mxu0  ;;  %v772_v13 = vpop.f32.mrb[15].mxu1 }
 0x11e   : > { %v933_v9 = vadd.f32 %v1514_v2, %v894_v5  ;;  %v879_v14 = vld [vmem:[#allocation2 + $0x28] sm:$0xff]  ;;  %v317_v13 = vld [vmem:[#allocation2 + $0x60] sm:$0xff] }
 0x11f   : > { %v895_v15 = vld [vmem:[#allocation2 + $0xa8] sm:$0xff]  ;;  %v949_v16 = vmax.f32 %v917_v8, 0.0  ;;  %v918_v18 = vadd.f32 %v1514_v2, %v879_v14  ;;  %846 = vst.msk [vmem:[#allocation2 + $0x38] sm:$0xff] %vm272_vm0, %v813_v10  ;;  %862 = vst.msk [vmem:[#allocation2 + $0xb8] sm:$0xff] %vm272_vm0, %v829_v11  ;;  %v333_v14 = vld [vmem:[#allocation2 + $0xe0] sm:$0xff] }
 0x120   : > { %v965_v17 = vmax.f32 %v933_v9, 0.0  ;;  %v934_v19 = vadd.f32 %v1514_v2, %v895_v15 }
 0x121   : > { %981 = vst.msk [vmem:[%s1525_s21 + $0x20] sm:$0xff] %vm272_vm0, %v949_v16  ;;  %v950_v22 = vmax.f32 %v918_v18, 0.0 }
 0x122   : > { %997 = vst.msk [vmem:[%s1525_s21 + $0xa0] sm:$0xff] %vm272_vm0, %v965_v17  ;;  %v966_v23 = vmax.f32 %v934_v19, 0.0  ;;  %v711_v24 = vpop.f32.mrb[16].mxu0  ;;  %v775_v25 = vpop.f32.mrb[16].mxu1  ;;  %v318_v19 = vld [vmem:[#allocation2 + $0x68] sm:$0xff] }
 0x123   : > { %982 = vst.msk [vmem:[%s1525_s21 + $0x28] sm:$0xff] %vm272_vm0, %v950_v22  ;;  %v814_v28 = vadd.f32 %v711_v24, %v313_v20  ;;  %v830_v29 = vadd.f32 %v775_v25, %v329_v21  ;;  %v713_v30 = vpop.f32.mrb[17].mxu0  ;;  %v777_v31 = vpop.f32.mrb[17].mxu1  ;;  %v334_v20 = vld [vmem:[#allocation2 + $0xe8] sm:$0xff] }
 0x124   : > { %998 = vst.msk [vmem:[%s1525_s21 + $0xa8] sm:$0xff] %vm272_vm0, %v966_v23  ;;  %v880_v32 = vld [vmem:[#allocation2 + $0x30] sm:$0xff]  ;;  %v714_v34 = vpop.f32.mrb[18].mxu0  ;;  %v778_v35 = vpop.f32.mrb[18].mxu1 }
 0x125   : > { %v896_v33 = vld [vmem:[#allocation2 + $0xb0] sm:$0xff]  ;;  %v919_v36 = vadd.f32 %v1514_v2, %v880_v32  ;;  %847 = vst.msk [vmem:[#allocation2 + $0x40] sm:$0xff] %vm272_vm0, %v814_v28  ;;  %863 = vst.msk [vmem:[#allocation2 + $0xc0] sm:$0xff] %vm272_vm0, %v830_v29  ;;  %v815_v38 = vadd.f32 %v714_v34, %v314_v26  ;;  %v831_v39 = vadd.f32 %v778_v35, %v330_v27  ;;  %v716_v40 = vpop.f32.mrb[19].mxu0  ;;  %v780_v41 = vpop.f32.mrb[19].mxu1 }
 0x126   : > { %v935_v37 = vadd.f32 %v1514_v2, %v896_v33  ;;  %v881_v42 = vld [vmem:[#allocation2 + $0x38] sm:$0xff]  ;;  %v319_v41 = vld [vmem:[#allocation2 + $0x70] sm:$0xff] }
 0x127   : > { %v897_v43 = vld [vmem:[#allocation2 + $0xb8] sm:$0xff]  ;;  %v951_v44 = vmax.f32 %v919_v36, 0.0  ;;  %v920_v46 = vadd.f32 %v1514_v2, %v881_v42  ;;  %848 = vst.msk [vmem:[#allocation2 + $0x48] sm:$0xff] %vm272_vm0, %v815_v38  ;;  %864 = vst.msk [vmem:[#allocation2 + $0xc8] sm:$0xff] %vm272_vm0, %v831_v39  ;;  %v335_v42 = vld [vmem:[#allocation2 + $0xf0] sm:$0xff] }
 0x128   : > { %v967_v45 = vmax.f32 %v935_v37, 0.0  ;;  %v936_v47 = vadd.f32 %v1514_v2, %v897_v43 }
 0x129   : > { %983 = vst.msk [vmem:[%s1525_s21 + $0x30] sm:$0xff] %vm272_vm0, %v951_v44  ;;  %v952_v50 = vmax.f32 %v920_v46, 0.0 }
 0x12a   : > { %999 = vst.msk [vmem:[%s1525_s21 + $0xb0] sm:$0xff] %vm272_vm0, %v967_v45  ;;  %v968_v51 = vmax.f32 %v936_v47, 0.0  ;;  %v719_v52 = vpop.f32.mrb[20].mxu0  ;;  %v783_v53 = vpop.f32.mrb[20].mxu1  ;;  %v320_v47 = vld [vmem:[#allocation2 + $0x78] sm:$0xff] }
 0x12b   : > { %984 = vst.msk [vmem:[%s1525_s21 + $0x38] sm:$0xff] %vm272_vm0, %v952_v50  ;;  %v816_v56 = vadd.f32 %v719_v52, %v315_v48  ;;  %v832_v57 = vadd.f32 %v783_v53, %v331_v49  ;;  %v721_v58 = vpop.f32.mrb[21].mxu0  ;;  %v785_v59 = vpop.f32.mrb[21].mxu1  ;;  %v336_v48 = vld [vmem:[#allocation2 + $0xf8] sm:$0xff] }
 0x12c   : > { %1000 = vst.msk [vmem:[%s1525_s21 + $0xb8] sm:$0xff] %vm272_vm0, %v968_v51  ;;  %v882_v60 = vld [vmem:[#allocation2 + $0x40] sm:$0xff]  ;;  %v722_v62 = vpop.f32.mrb[22].mxu0  ;;  %v786_v63 = vpop.f32.mrb[22].mxu1 }
 0x12d   : > { %v898_v61 = vld [vmem:[#allocation2 + $0xc0] sm:$0xff]  ;;  %v921_v0 = vadd.f32 %v1514_v2, %v882_v60  ;;  %849 = vst.msk [vmem:[#allocation2 + $0x50] sm:$0xff] %vm272_vm0, %v816_v56  ;;  %865 = vst.msk [vmem:[#allocation2 + $0xd0] sm:$0xff] %vm272_vm0, %v832_v57  ;;  %v817_v3 = vadd.f32 %v722_v62, %v316_v54  ;;  %v833_v4 = vadd.f32 %v786_v63, %v332_v55  ;;  %v724_v5 = vpop.f32.mrb[23].mxu0  ;;  %v788_v6 = vpop.f32.mrb[23].mxu1 }
 0x12e   : > { %v937_v1 = vadd.f32 %v1514_v2, %v898_v61  ;;  %v883_v7 = vld [vmem:[#allocation2 + $0x48] sm:$0xff] }
 0x12f   : > { %v899_v8 = vld [vmem:[#allocation2 + $0xc8] sm:$0xff]  ;;  %v953_v9 = vmax.f32 %v921_v0, 0.0  ;;  %v922_v11 = vadd.f32 %v1514_v2, %v883_v7  ;;  %850 = vst.msk [vmem:[#allocation2 + $0x58] sm:$0xff] %vm272_vm0, %v817_v3  ;;  %866 = vst.msk [vmem:[#allocation2 + $0xd8] sm:$0xff] %vm272_vm0, %v833_v4 }
 0x130   : > { %v969_v10 = vmax.f32 %v937_v1, 0.0  ;;  %v938_v12 = vadd.f32 %v1514_v2, %v899_v8 }
 0x131   : > { %985 = vst.msk [vmem:[%s1525_s21 + $0x40] sm:$0xff] %vm272_vm0, %v953_v9  ;;  %v954_v15 = vmax.f32 %v922_v11, 0.0 }
 0x132   : > { %1001 = vst.msk [vmem:[%s1525_s21 + $0xc0] sm:$0xff] %vm272_vm0, %v969_v10  ;;  %v970_v16 = vmax.f32 %v938_v12, 0.0  ;;  %v727_v17 = vpop.f32.mrb[24].mxu0  ;;  %v791_v18 = vpop.f32.mrb[24].mxu1 }
 0x133   : > { %986 = vst.msk [vmem:[%s1525_s21 + $0x48] sm:$0xff] %vm272_vm0, %v954_v15  ;;  %v818_v21 = vadd.f32 %v727_v17, %v317_v13  ;;  %v834_v22 = vadd.f32 %v791_v18, %v333_v14  ;;  %v729_v23 = vpop.f32.mrb[25].mxu0  ;;  %v793_v24 = vpop.f32.mrb[25].mxu1 }
 0x134   : > { %1002 = vst.msk [vmem:[%s1525_s21 + $0xc8] sm:$0xff] %vm272_vm0, %v970_v16  ;;  %v884_v25 = vld [vmem:[#allocation2 + $0x50] sm:$0xff]  ;;  %v730_v27 = vpop.f32.mrb[26].mxu0  ;;  %v794_v28 = vpop.f32.mrb[26].mxu1 }
 0x135   : > { %v900_v26 = vld [vmem:[#allocation2 + $0xd0] sm:$0xff]  ;;  %v923_v29 = vadd.f32 %v1514_v2, %v884_v25  ;;  %851 = vst.msk [vmem:[#allocation2 + $0x60] sm:$0xff] %vm272_vm0, %v818_v21  ;;  %867 = vst.msk [vmem:[#allocation2 + $0xe0] sm:$0xff] %vm272_vm0, %v834_v22  ;;  %v819_v31 = vadd.f32 %v730_v27, %v318_v19  ;;  %v835_v32 = vadd.f32 %v794_v28, %v334_v20  ;;  %v732_v33 = vpop.f32.mrb[27].mxu0  ;;  %v796_v34 = vpop.f32.mrb[27].mxu1 }
 0x136   : > { %v939_v30 = vadd.f32 %v1514_v2, %v900_v26  ;;  %v885_v35 = vld [vmem:[#allocation2 + $0x58] sm:$0xff] }
 0x137   : > { %v901_v36 = vld [vmem:[#allocation2 + $0xd8] sm:$0xff]  ;;  %v955_v37 = vmax.f32 %v923_v29, 0.0  ;;  %v924_v39 = vadd.f32 %v1514_v2, %v885_v35  ;;  %852 = vst.msk [vmem:[#allocation2 + $0x68] sm:$0xff] %vm272_vm0, %v819_v31  ;;  %868 = vst.msk [vmem:[#allocation2 + $0xe8] sm:$0xff] %vm272_vm0, %v835_v32 }
 0x138   : > { %v971_v38 = vmax.f32 %v939_v30, 0.0  ;;  %v940_v40 = vadd.f32 %v1514_v2, %v901_v36 }
 0x139   : > { %987 = vst.msk [vmem:[%s1525_s21 + $0x50] sm:$0xff] %vm272_vm0, %v955_v37  ;;  %v956_v43 = vmax.f32 %v924_v39, 0.0 }
 0x13a   : > { %1003 = vst.msk [vmem:[%s1525_s21 + $0xd0] sm:$0xff] %vm272_vm0, %v971_v38  ;;  %v972_v44 = vmax.f32 %v940_v40, 0.0  ;;  %v735_v45 = vpop.f32.mrb[28].mxu0  ;;  %v799_v46 = vpop.f32.mrb[28].mxu1 }
 0x13b   : > { %988 = vst.msk [vmem:[%s1525_s21 + $0x58] sm:$0xff] %vm272_vm0, %v956_v43  ;;  %v820_v49 = vadd.f32 %v735_v45, %v319_v41  ;;  %v836_v50 = vadd.f32 %v799_v46, %v335_v42  ;;  %v737_v51 = vpop.f32.mrb[29].mxu0  ;;  %v801_v52 = vpop.f32.mrb[29].mxu1 }
 0x13c   : > { %1004 = vst.msk [vmem:[%s1525_s21 + $0xd8] sm:$0xff] %vm272_vm0, %v972_v44  ;;  %v886_v53 = vld [vmem:[#allocation2 + $0x60] sm:$0xff]  ;;  %v738_v55 = vpop.f32.mrb[30].mxu0  ;;  %v802_v56 = vpop.f32.mrb[30].mxu1 }
 0x13d   : > { %v902_v54 = vld [vmem:[#allocation2 + $0xe0] sm:$0xff]  ;;  %v925_v57 = vadd.f32 %v1514_v2, %v886_v53  ;;  %853 = vst.msk [vmem:[#allocation2 + $0x70] sm:$0xff] %vm272_vm0, %v820_v49  ;;  %869 = vst.msk [vmem:[#allocation2 + $0xf0] sm:$0xff] %vm272_vm0, %v836_v50  ;;  %v821_v59 = vadd.f32 %v738_v55, %v320_v47  ;;  %v837_v60 = vadd.f32 %v802_v56, %v336_v48  ;;  %v740_v61 = vpop.f32.mrb[31].mxu0  ;;  %v804_v62 = vpop.f32.mrb[31].mxu1 }
 0x13e   : > { %v941_v58 = vadd.f32 %v1514_v2, %v902_v54  ;;  %v887_v63 = vld [vmem:[#allocation2 + $0x68] sm:$0xff] }
 0x13f   : > { %v903_v0 = vld [vmem:[#allocation2 + $0xe8] sm:$0xff]  ;;  %v957_v1 = vmax.f32 %v925_v57, 0.0  ;;  %v926_v4 = vadd.f32 %v1514_v2, %v887_v63  ;;  %854 = vst.msk [vmem:[#allocation2 + $0x78] sm:$0xff] %vm272_vm0, %v821_v59  ;;  %870 = vst.msk [vmem:[#allocation2 + $0xf8] sm:$0xff] %vm272_vm0, %v837_v60 }
 0x140   : > { %v973_v3 = vmax.f32 %v941_v58, 0.0  ;;  %v942_v5 = vadd.f32 %v1514_v2, %v903_v0 }
 0x141   : > { %989 = vst.msk [vmem:[%s1525_s21 + $0x60] sm:$0xff] %vm272_vm0, %v957_v1  ;;  %v958_v6 = vmax.f32 %v926_v4, 0.0 }
 0x142   : > { %1005 = vst.msk [vmem:[%s1525_s21 + $0xe0] sm:$0xff] %vm272_vm0, %v973_v3  ;;  %v974_v7 = vmax.f32 %v942_v5, 0.0 }
 0x143   : > { %990 = vst.msk [vmem:[%s1525_s21 + $0x68] sm:$0xff] %vm272_vm0, %v958_v6 }
 0x144   : > { %1006 = vst.msk [vmem:[%s1525_s21 + $0xe8] sm:$0xff] %vm272_vm0, %v974_v7  ;;  %v888_v8 = vld [vmem:[#allocation2 + $0x70] sm:$0xff] }
 0x145   : > { %v904_v9 = vld [vmem:[#allocation2 + $0xf0] sm:$0xff]  ;;  %v927_v10 = vadd.f32 %v1514_v2, %v888_v8 }
 0x146   : > { %v943_v11 = vadd.f32 %v1514_v2, %v904_v9  ;;  %v889_v12 = vld [vmem:[#allocation2 + $0x78] sm:$0xff] }
 0x147   : > { %v905_v13 = vld [vmem:[#allocation2 + $0xf8] sm:$0xff]  ;;  %v959_v14 = vmax.f32 %v927_v10, 0.0  ;;  %v928_v16 = vadd.f32 %v1514_v2, %v889_v12 }
 0x148   : > { %v975_v15 = vmax.f32 %v943_v11, 0.0  ;;  %v944_v17 = vadd.f32 %v1514_v2, %v905_v13 }
 0x149   : > { %991 = vst.msk [vmem:[%s1525_s21 + $0x70] sm:$0xff] %vm272_vm0, %v959_v14  ;;  %v960_v18 = vmax.f32 %v928_v16, 0.0 }
 0x14a   : > { %1007 = vst.msk [vmem:[%s1525_s21 + $0xf0] sm:$0xff] %vm272_vm0, %v975_v15  ;;  %v976_v19 = vmax.f32 %v944_v17, 0.0 }
 0x14b   : > { %992 = vst.msk [vmem:[%s1525_s21 + $0x78] sm:$0xff] %vm272_vm0, %v960_v18 }
 0x14c   : > { %1008 = vst.msk [vmem:[%s1525_s21 + $0xf8] sm:$0xff] %vm272_vm0, %v976_v19 }
 0x14d PF: > { %s13_s14 = sadd.s32 1, %s1324_s14   ;;  %s1660_s12 = smov %s1320_s13 }
 0x14e   : > { %p10_p5 = scmp.ge.s32.totalorder %s13_s14, 10   ;;  %s1661_s13 = smov %s1663_s15 }
 0x150   :  { %12 = sbr.rel (!%p10_p5) target bundleno = 2 (0x2), region = 76 }

// kernel: frontal_cls_forward.38
= control target key start
LH: loop header
LB: loop body
LE: loop exit
PB: predicated region body
PF: predicated region fallthrough
CT: control target
= control target key end

     0   :  { %s2634_s12 = smov 0   ;;  %s2636_s13 = smov 0   ;;  %s3170_s0 = inlined_call_operand.vmem [shape: bf16[512,576], index: 0, kind: input, shape index: {}]   ;;  %s3171_s1 = inlined_call_operand.vmem [shape: bf16[576,64], index: 1, kind: input, shape index: {}]   ;;  %s3172_s2 = inlined_call_operand.vmem [shape: f32[1,64], index: 2, kind: input, shape index: {}]   ;;  %s3173_s3 = inlined_call_operand.vmem [shape: f32[512,64], index: 3, kind: output, shape index: {}]  }
   0x1   :  { %s2638_s14 = smov 0  }
   0x2 LB: > { %s32_s15 = sadd.s32 1, %s2607_s13  ;;  %p1975_p0 = scmp.ge.s32.totalorder %s2611_s14, 1  ;;  %s2611_s14 = sphi %s2638_s14, %s13_s14   ;;  %s2607_s13 = sphi %s2636_s13, %s3175_s13   ;;  %s2603_s12 = sphi %s2634_s12, %s3174_s12  }
   0x3   : > { %p34_p1 = scmp.ge.s32.totalorder %s32_s15, 2  ;;  %p191_p2 = scmp.lt.s32.totalorder %s2611_s14, 3 }
   0x5   : > { %s3177_s15 = smov (%p34_p1, %s32_s15), 0  ;;  %p192_p3 = pnand %p1975_p0, %p191_p2 }
   0x6   : > { %v2441_v0 = vld [vmem:[%s3171_s1 + $0x40] sm:$0xff] (!%p192_p3)   ;;  %s1976_s18 = sshll.u32 (!%p192_p3), %s2603_s12, 5  ;;  %v2443_v2 = vld [vmem:[%s3171_s1 + $0x48] sm:$0xff] (!%p192_p3)   ;;  %v2445_v4 = vld [vmem:[%s3171_s1 + $0x50] sm:$0xff] (!%p192_p3)   ;;  %vm272_vm0 = vcmask (!%p192_p3), 523264  }
   0x7   : > { %195 = sbr.rel (%p192_p3) target bundleno = 427 (0x1ab), region = 32  ;;  %v2442_v1 = vld [vmem:[%s3171_s1] sm:$0xff] (!%p192_p3)   ;;  %2115 = vmatprep.subr.bf16.mxu0 (!%p192_p3), %v2441_v0  ;;  %2399 = vmatprep.subr.bf16.mxu1 (!%p192_p3), %v2441_v0  ;;  %p236_p4 = scmp.lt.s32.totalorder (!%p192_p3), %s1976_s18, 63  ;;  %v2444_v3 = vld [vmem:[%s3171_s1 + $0x8] sm:$0xff] (!%p192_p3)   ;;  %v2446_v5 = vld [vmem:[%s3171_s1 + $0x10] sm:$0xff] (!%p192_p3)  }
   0x8   : > { %2116 = vmatpush3.bf16.msra.mxu0 (!%p192_p3), %v2442_v1  ;;  %2407 = vmatpush3.bf16.msra.mxu1 (!%p192_p3), %v2442_v1  ;;  %v2447_v6 = vld [vmem:[%s3171_s1 + $0x58] sm:$0xff] (!%p192_p3)   ;;  %v2449_v8 = vld [vmem:[%s3171_s1 + $0x60] sm:$0xff] (!%p192_p3)   ;;  %v2451_v10 = vld [vmem:[%s3171_s1 + $0x68] sm:$0xff] (!%p192_p3)  }
   0x9   : > { %2117 = vmatprep.subr.bf16.mxu0 (!%p192_p3), %v2443_v2  ;;  %2400 = vmatprep.subr.bf16.mxu1 (!%p192_p3), %v2443_v2  ;;  %v2448_v7 = vld [vmem:[%s3171_s1 + $0x18] sm:$0xff] (!%p192_p3)   ;;  %v2450_v9 = vld [vmem:[%s3171_s1 + $0x20] sm:$0xff] (!%p192_p3)   ;;  %v2452_v13 = vld [vmem:[%s3171_s1 + $0x28] sm:$0xff] (!%p192_p3)  }
   0xa   : > { %v2453_v14 = vld [vmem:[%s3171_s1 + $0x70] sm:$0xff] (!%p192_p3)   ;;  %v2455_v16 = vld [vmem:[%s3171_s1 + $0x78] sm:$0xff] (!%p192_p3)   ;;  %v2463_v18 = vld [vmem:[%s3171_s1 + $0xc0] sm:$0xff] (!%p192_p3)  }
   0xb   : > { %v2454_v15 = vld [vmem:[%s3171_s1 + $0x30] sm:$0xff] (!%p192_p3)   ;;  %v2456_v17 = vld [vmem:[%s3171_s1 + $0x38] sm:$0xff] (!%p192_p3)   ;;  %v2466_v19 = vld [vmem:[%s3171_s1 + $0x100] sm:$0xff] (!%p192_p3)  }
   0xc   : > { %2118 = vmatpush3.bf16.msra.mxu0 (!%p192_p3), %v2444_v3  ;;  %2408 = vmatpush3.bf16.msra.mxu1 (!%p192_p3), %v2444_v3  ;;  %v2464_v22 = vld [vmem:[%s3171_s1 + $0x80] sm:$0xff] (!%p192_p3)   ;;  %v2465_v23 = vld [vmem:[%s3171_s1 + $0xc8] sm:$0xff] (!%p192_p3)   ;;  %v2474_v28 = vld [vmem:[%s3171_s1 + $0xd0] sm:$0xff] (!%p192_p3)  }
   0xd   : > { %2119 = vmatprep.subr.bf16.mxu0 (!%p192_p3), %v2445_v4  ;;  %2401 = vmatprep.subr.bf16.mxu1 (!%p192_p3), %v2445_v4  ;;  %v2467_v26 = vld [vmem:[%s3171_s1 + $0x88] sm:$0xff] (!%p192_p3)   ;;  %v2475_v30 = vld [vmem:[%s3171_s1 + $0x90] sm:$0xff] (!%p192_p3)   ;;  %v2476_v31 = vld [vmem:[%s3171_s1 + $0xd8] sm:$0xff] (!%p192_p3)  }
   0xe   : > { %s3179_s18 = smov (!%p236_p4, %s1976_s18), 63  ;;  %v2477_v34 = vld [vmem:[%s3171_s1 + $0x98] sm:$0xff]   ;;  %v2497_v35 = vld [vmem:[%s3171_s1 + $0x108] sm:$0xff]   ;;  %v2484_v37 = vld [vmem:[%s3171_s1 + $0xe0] sm:$0xff]  }
   0xf   : > { %s2415_s4 = smul.u32 20, %s3179_s18  ;;  %v2485_v39 = vld [vmem:[%s3171_s1 + $0xa0] sm:$0xff]   ;;  %v2486_v40 = vld [vmem:[%s3171_s1 + $0xe8] sm:$0xff]   ;;  %v2494_v46 = vld [vmem:[%s3171_s1 + $0xf0] sm:$0xff]   ;;  %s1979_s27 = sshll.u32 %s3179_s18, 3 }
  0x10   : > { %2120 = vmatpush3.bf16.msra.mxu0 %v2446_v5  ;;  %2409 = vmatpush3.bf16.msra.mxu1 %v2446_v5  ;;  %v2487_v43 = vld [vmem:[%s3171_s1 + $0xa8] sm:$0xff]   ;;  %v2517_v47 = vld [vmem:[%s3171_s1 + $0x110] sm:$0xff]   ;;  %v2496_v49 = vld [vmem:[%s3171_s1 + $0xf8] sm:$0xff]   ;;  %s2992_s29 = scalar_lea.vmem %s3173_s3, %s1979_s27 }
  0x11   : > { %2121 = vmatprep.subr.bf16.mxu0 %v2447_v6  ;;  %2402 = vmatprep.subr.bf16.mxu1 %v2447_v6  ;;  %s2685_s11 = scalar_lea.vmem %s3170_s0, %s2415_s4  ;;  %v2495_v48 = vld [vmem:[%s3171_s1 + $0xb0] sm:$0xff]   ;;  %v2498_v52 = vld [vmem:[%s3171_s1 + $0xb8] sm:$0xff]  }
  0x12   : > { %v2459_v11 = vld [vmem:[%s2685_s11 + $0x4] ss:$20 sps:$4 sm:$0xff]   ;;  %v2457_v20 = vld [vmem:[%s2685_s11] ss:$20 sps:$4 sm:$0xff]   ;;  %v2472_v27 = vld [vmem:[%s2685_s11 + $0x28] ss:$20 sps:$4 sm:$0xff]  }
  0x13   : > { %v2462_v12 = vld [vmem:[%s2685_s11 + $0x1e4] ss:$20 sps:$4 sm:$0xff]   ;;  %1202 = vmatprep.mubr.bf16.mxu0 %v2459_v11  ;;  %v2460_v21 = vld [vmem:[%s2685_s11 + $0x1e0] ss:$20 sps:$4 sm:$0xff]   ;;  %v2473_v29 = vld [vmem:[%s2685_s11 + $0x208] ss:$20 sps:$4 sm:$0xff]  }
  0x14   : > { %2122 = vmatpush3.bf16.msra.mxu0 %v2448_v7  ;;  %2410 = vmatpush3.bf16.msra.mxu1 %v2448_v7  ;;  %v2468_v24 = vld [vmem:[%s2685_s11 + $0x2c] ss:$20 sps:$4 sm:$0xff]   ;;  %v2478_v32 = vld [vmem:[%s2685_s11 + $0x54] ss:$20 sps:$4 sm:$0xff]   ;;  %v2482_v36 = vld [vmem:[%s2685_s11 + $0x50] ss:$20 sps:$4 sm:$0xff]  }
  0x15   : > { %2123 = vmatprep.subr.bf16.mxu0 %v2449_v8  ;;  %2403 = vmatprep.subr.bf16.mxu1 %v2449_v8  ;;  %v2470_v25 = vld [vmem:[%s2685_s11 + $0x20c] ss:$20 sps:$4 sm:$0xff]   ;;  %v2480_v33 = vld [vmem:[%s2685_s11 + $0x234] ss:$20 sps:$4 sm:$0xff]   ;;  %v2483_v38 = vld [vmem:[%s2685_s11 + $0x230] ss:$20 sps:$4 sm:$0xff]  }
  0x16   : > { %1298 = vmatprep.mubr.bf16.mxu1 %v2462_v12  ;;  %v2488_v41 = vld [vmem:[%s2685_s11 + $0x7c] ss:$20 sps:$4 sm:$0xff]   ;;  %v2492_v44 = vld [vmem:[%s2685_s11 + $0x78] ss:$20 sps:$4 sm:$0xff]   ;;  %v2504_v54 = vld [vmem:[%s2685_s11 + $0xa0] ss:$20 sps:$4 sm:$0xff]  }
  0x17   : > { %v2490_v42 = vld [vmem:[%s2685_s11 + $0x25c] ss:$20 sps:$4 sm:$0xff]   ;;  %v2493_v45 = vld [vmem:[%s2685_s11 + $0x258] ss:$20 sps:$4 sm:$0xff]   ;;  %v2507_v57 = vld [vmem:[%s2685_s11 + $0x34] ss:$20 sps:$4 sm:$0xff]  }
  0x18   : > { %2124 = vmatpush3.bf16.msra.mxu0 %v2450_v9  ;;  %2411 = vmatpush3.bf16.msra.mxu1 %v2450_v9  ;;  %v2499_v50 = vld [vmem:[%s2685_s11 + $0xa4] ss:$20 sps:$4 sm:$0xff]   ;;  %v2503_v51 = vld [vmem:[%s2685_s11 + $0xc] ss:$20 sps:$4 sm:$0xff]   ;;  %v2501_v53 = vld [vmem:[%s2685_s11 + $0x8] ss:$20 sps:$4 sm:$0xff]  }
  0x19   : > { %2125 = vmatprep.subr.bf16.mxu0 %v2451_v10  ;;  %2404 = vmatprep.subr.bf16.mxu1 %v2451_v10  ;;  %v2505_v55 = vld [vmem:[%s2685_s11 + $0xcc] ss:$20 sps:$4 sm:$0xff]   ;;  %v2536_v56 = vld [vmem:[%s3171_s1 + $0x118] sm:$0xff]   ;;  %v2510_v59 = vld [vmem:[%s2685_s11 + $0x30] ss:$20 sps:$4 sm:$0xff]  }
  0x1a   : > { %v2509_v58 = vld [vmem:[%s2685_s11 + $0xc8] ss:$20 sps:$4 sm:$0xff]   ;;  %v2515_v62 = vld [vmem:[%s2685_s11 + $0xf0] ss:$20 sps:$4 sm:$0xff]   ;;  %v2516_v63 = vld [vmem:[%s2685_s11 + $0x58] ss:$20 sps:$4 sm:$0xff]  }
  0x1b   : > { %v2511_v60 = vld [vmem:[%s2685_s11 + $0xf4] ss:$20 sps:$4 sm:$0xff]   ;;  %v2513_v61 = vld [vmem:[%s2685_s11 + $0x5c] ss:$20 sps:$4 sm:$0xff]   ;;  %v2520_v1 = vld [vmem:[%s2685_s11 + $0x84] ss:$20 sps:$4 sm:$0xff]  }
  0x1c   : > { %2126 = vmatpush3.bf16.msra.mxu0 %v2452_v13  ;;  %2412 = vmatpush3.bf16.msra.mxu1 %v2452_v13  ;;  %v2518_v0 = vld [vmem:[%s2685_s11 + $0x11c] ss:$20 sps:$4 sm:$0xff]   ;;  %v2522_v2 = vld [vmem:[%s2685_s11 + $0x118] ss:$20 sps:$4 sm:$0xff]   ;;  %v2523_v3 = vld [vmem:[%s2685_s11 + $0x80] ss:$20 sps:$4 sm:$0xff]  }
  0x1d   : > { %2127 = vmatprep.subr.bf16.mxu0 %v2453_v14  ;;  %2405 = vmatprep.subr.bf16.mxu1 %v2453_v14  ;;  %v2524_v4 = vld [vmem:[%s2685_s11 + $0x144] ss:$20 sps:$4 sm:$0xff]   ;;  %v2526_v5 = vld [vmem:[%s2685_s11 + $0xac] ss:$20 sps:$4 sm:$0xff]   ;;  %v2529_v7 = vld [vmem:[%s2685_s11 + $0xa8] ss:$20 sps:$4 sm:$0xff]  }
  0x1e   : > { %v2528_v6 = vld [vmem:[%s2685_s11 + $0x140] ss:$20 sps:$4 sm:$0xff]   ;;  %v2534_v10 = vld [vmem:[%s2685_s11 + $0x168] ss:$20 sps:$4 sm:$0xff]   ;;  %v2535_v11 = vld [vmem:[%s2685_s11 + $0xd0] ss:$20 sps:$4 sm:$0xff]  }
  0x1f   : > { %v2530_v8 = vld [vmem:[%s2685_s11 + $0x16c] ss:$20 sps:$4 sm:$0xff]   ;;  %v2532_v9 = vld [vmem:[%s2685_s11 + $0xd4] ss:$20 sps:$4 sm:$0xff]   ;;  %v2539_v13 = vld [vmem:[%s2685_s11 + $0xfc] ss:$20 sps:$4 sm:$0xff]  }
  0x20   : > { %2128 = vmatpush3.bf16.msra.mxu0 %v2454_v15  ;;  %2413 = vmatpush3.bf16.msra.mxu1 %v2454_v15  ;;  %v2537_v12 = vld [vmem:[%s2685_s11 + $0x194] ss:$20 sps:$4 sm:$0xff]   ;;  %v2541_v14 = vld [vmem:[%s2685_s11 + $0x190] ss:$20 sps:$4 sm:$0xff]   ;;  %v2542_v15 = vld [vmem:[%s2685_s11 + $0xf8] ss:$20 sps:$4 sm:$0xff]  }
  0x21   : > { %2129 = vmatprep.subr.bf16.mxu0 %v2455_v16  ;;  %2406 = vmatprep.subr.bf16.mxu1 %v2455_v16  ;;  %v2543_v16 = vld [vmem:[%s2685_s11 + $0x1bc] ss:$20 sps:$4 sm:$0xff]  }
  0x24   : > { %2130 = vmatpush3.bf16.msra.mxu0 %v2456_v17  ;;  %2414 = vmatpush3.bf16.msra.mxu1 %v2456_v17  ;;  %v2545_v17 = vld [vmem:[%s2685_s11 + $0x124] ss:$20 sps:$4 sm:$0xff]  }
  0x25   : > { %2227 = vmatprep.subr.bf16.mxu1 %v2463_v18  ;;  %2359 = vmatprep.subr.bf16.mxu0 %v2466_v19  ;;  %v2547_v18 = vld [vmem:[%s2685_s11 + $0x1b8] ss:$20 sps:$4 sm:$0xff]  }
  0x27   : > { %1203 = vmatmul.mubr.bf16.vlgmr.msra.gmra.mrb[0].mxu0 %v2457_v20  ;;  %1299 = vmatmul.mubr.bf16.vlgmr.msra.gmra.mrb[0].mxu1 %v2460_v21  ;;  %v2549_v20 = vld [vmem:[%s2685_s11 + $0x14c] ss:$20 sps:$4 sm:$0xff]   ;;  %v2551_v21 = vld [vmem:[%s2685_s11 + $0x10] ss:$20 sps:$4 sm:$0xff]  }
  0x28   : > { %2228 = vmatpush3.bf16.msra.mxu1 %v2464_v22  ;;  %2360 = vmatpush3.bf16.msra.mxu0 %v2466_v19  ;;  %v2548_v19 = vld [vmem:[%s2685_s11 + $0x120] ss:$20 sps:$4 sm:$0xff]   ;;  %v2552_v22 = vld [vmem:[%s2685_s11 + $0x148] ss:$20 sps:$4 sm:$0xff]  }
  0x29   : > { %2229 = vmatprep.subr.bf16.mxu1 %v2465_v23  ;;  %1210 = vmatprep.mubr.bf16.mxu0 %v2468_v24  ;;  %v2553_v23 = vld [vmem:[%s2685_s11 + $0x38] ss:$20 sps:$4 sm:$0xff]   ;;  %v2554_v24 = vld [vmem:[%s2685_s11 + $0x174] ss:$20 sps:$4 sm:$0xff]  }
  0x2a   : > { %1306 = vmatprep.mubr.bf16.mxu1 %v2470_v25  ;;  %2361 = vmatprep.subr.bf16.mxu0 %v2497_v35  ;;  %v2556_v25 = vld [vmem:[%s2685_s11 + $0x60] ss:$20 sps:$4 sm:$0xff]  }
  0x2c   : > { %2230 = vmatpush3.bf16.msra.mxu1 %v2467_v26  ;;  %2362 = vmatpush3.bf16.msra.mxu0 %v2497_v35  ;;  %v2557_v26 = vld [vmem:[%s2685_s11 + $0x170] ss:$20 sps:$4 sm:$0xff]   ;;  %v2568_v35 = vld [vmem:[%s2685_s11 + $0x128] ss:$20 sps:$4 sm:$0xff]  }
  0x2d   : > { %2231 = vmatprep.subr.bf16.mxu1 %v2474_v28  ;;  %2363 = vmatprep.subr.bf16.mxu0 %v2517_v47  ;;  %v2559_v28 = vld [vmem:[%s2685_s11 + $0x19c] ss:$20 sps:$4 sm:$0xff]  }
  0x2f   : > { %1211 = vmatmul.mubr.bf16.gmra.mrb[4].mxu0 %v2472_v27  ;;  %1307 = vmatmul.mubr.bf16.gmra.mrb[4].mxu1 %v2473_v29  ;;  %v2558_v27 = vld [vmem:[%s2685_s11 + $0x88] ss:$20 sps:$4 sm:$0xff]   ;;  %v2561_v29 = vld [vmem:[%s2685_s11 + $0xb0] ss:$20 sps:$4 sm:$0xff]  }
  0x30   : > { %2232 = vmatpush3.bf16.msra.mxu1 %v2475_v30  ;;  %1218 = vmatprep.mubr.bf16.mxu0 %v2478_v32  ;;  %v2562_v30 = vld [vmem:[%s2685_s11 + $0x198] ss:$20 sps:$4 sm:$0xff]  }
  0x31   : > { %2233 = vmatprep.subr.bf16.mxu1 %v2476_v31  ;;  %1314 = vmatprep.mubr.bf16.mxu1 %v2480_v33  ;;  %v2563_v31 = vld [vmem:[%s2685_s11 + $0xd8] ss:$20 sps:$4 sm:$0xff]   ;;  %v2566_v33 = vld [vmem:[%s2685_s11 + $0x100] ss:$20 sps:$4 sm:$0xff]  }
  0x32   : > { %2364 = vmatpush3.bf16.msra.mxu0 %v2517_v47  ;;  %v2564_v32 = vld [vmem:[%s2685_s11 + $0x1c4] ss:$20 sps:$4 sm:$0xff]  }
  0x33   : > { %2365 = vmatprep.subr.bf16.mxu0 %v2536_v56  ;;  %v2583_v47 = vld [vmem:[%s2685_s11 + $0x218] ss:$20 sps:$4 sm:$0xff]  }
  0x34   : > { %2234 = vmatpush3.bf16.msra.mxu1 %v2477_v34  ;;  %v2567_v34 = vld [vmem:[%s2685_s11 + $0x1c0] ss:$20 sps:$4 sm:$0xff]  }
  0x35   : > { %2235 = vmatprep.subr.bf16.mxu1 %v2484_v37  ;;  %v2571_v37 = vld [vmem:[%s2685_s11 + $0x150] ss:$20 sps:$4 sm:$0xff]  }
  0x36   : > { %2366 = vmatpush3.bf16.msra.mxu0 %v2536_v56 }
  0x37   : > { %1219 = vmatmul.mubr.bf16.gmra.mrb[8].mxu0 %v2482_v36  ;;  %1315 = vmatmul.mubr.bf16.gmra.mrb[8].mxu1 %v2483_v38  ;;  %v2569_v36 = vld [vmem:[%s2685_s11 + $0x1ec] ss:$20 sps:$4 sm:$0xff]   ;;  %v2572_v38 = vld [vmem:[%s2685_s11 + $0x1e8] ss:$20 sps:$4 sm:$0xff]  }
  0x38   : > { %2236 = vmatpush3.bf16.msra.mxu1 %v2485_v39  ;;  %1226 = vmatprep.mubr.bf16.mxu0 %v2488_v41  ;;  %v2573_v39 = vld [vmem:[%s2685_s11 + $0x178] ss:$20 sps:$4 sm:$0xff]   ;;  %v2576_v41 = vld [vmem:[%s2685_s11 + $0x1a0] ss:$20 sps:$4 sm:$0xff]  }
  0x39   : > { %2237 = vmatprep.subr.bf16.mxu1 %v2486_v40  ;;  %1322 = vmatprep.mubr.bf16.mxu1 %v2490_v42  ;;  %v2574_v40 = vld [vmem:[%s2685_s11 + $0x214] ss:$20 sps:$4 sm:$0xff]   ;;  %v2577_v42 = vld [vmem:[%s2685_s11 + $0x210] ss:$20 sps:$4 sm:$0xff]  }
  0x3c   : > { %2238 = vmatpush3.bf16.msra.mxu1 %v2487_v43  ;;  %v2578_v43 = vld [vmem:[%s2685_s11 + $0x1c8] ss:$20 sps:$4 sm:$0xff]  }
  0x3d   : > { %2239 = vmatprep.subr.bf16.mxu1 %v2494_v46  ;;  %v2582_v46 = vld [vmem:[%s2685_s11 + $0x238] ss:$20 sps:$4 sm:$0xff]  }
  0x3f   : > { %1227 = vmatmul.mubr.bf16.gmra.mrb[12].mxu0 %v2492_v44  ;;  %1323 = vmatmul.mubr.bf16.gmra.mrb[12].mxu1 %v2493_v45  ;;  %v2579_v44 = vld [vmem:[%s2685_s11 + $0x23c] ss:$20 sps:$4 sm:$0xff]  }
  0x40   : > { %2240 = vmatpush3.bf16.msra.mxu1 %v2495_v48  ;;  %1234 = vmatprep.mubr.bf16.mxu0 %v2499_v50  ;;  %v2581_v45 = vld [vmem:[%s2685_s11 + $0x1f0] ss:$20 sps:$4 sm:$0xff]   ;;  %v2587_v50 = vld [vmem:[%s2685_s11 + $0x260] ss:$20 sps:$4 sm:$0xff]  }
  0x41   : > { %2241 = vmatprep.subr.bf16.mxu1 %v2496_v49  ;;  %1363 = vmatprep.mubr.bf16.mxu1 %v2503_v51  ;;  %v2584_v48 = vld [vmem:[%s2685_s11 + $0x264] ss:$20 sps:$4 sm:$0xff]   ;;  %v2586_v49 = vld [vmem:[%s2685_s11 + $0x240] ss:$20 sps:$4 sm:$0xff]   ;;  %v2588_v51 = vld [vmem:[%s2685_s11 + $0x268] ss:$20 sps:$4 sm:$0xff]  }
  0x44   : > { %2242 = vmatpush3.bf16.msra.mxu1 %v2498_v52  ;;  %v2613_v52 = vmov 0.0  }
  0x45   : > { %275 = vst.msk [vmem:[#allocation2 + $0x10] sm:$0xff] %vm272_vm0, %v2613_v52  ;;  %273 = vst.msk [vmem:[#allocation2] sm:$0xff] %vm272_vm0, %v2613_v52 }
  0x46   : > { %274 = vst.msk [vmem:[#allocation2 + $0x8] sm:$0xff] %vm272_vm0, %v2613_v52  ;;  %276 = vst.msk [vmem:[#allocation2 + $0x18] sm:$0xff] %vm272_vm0, %v2613_v52 }
  0x47   : > { %1235 = vmatmul.mubr.bf16.gmra.mrb[16].mxu0 %v2504_v54  ;;  %1364 = vmatmul.mubr.bf16.vlgmr.msra.gmra.mrb[16].mxu1 %v2501_v53  ;;  %277 = vst.msk [vmem:[#allocation2 + $0x20] sm:$0xff] %vm272_vm0, %v2613_v52  ;;  %278 = vst.msk [vmem:[#allocation2 + $0x28] sm:$0xff] %vm272_vm0, %v2613_v52 }
  0x48   : > { %1242 = vmatprep.mubr.bf16.mxu0 %v2505_v55  ;;  %1371 = vmatprep.mubr.bf16.mxu1 %v2507_v57  ;;  %279 = vst.msk [vmem:[#allocation2 + $0x30] sm:$0xff] %vm272_vm0, %v2613_v52  ;;  %280 = vst.msk [vmem:[#allocation2 + $0x38] sm:$0xff] %vm272_vm0, %v2613_v52 }
  0x49   : > { %281 = vst.msk [vmem:[#allocation2 + $0x40] sm:$0xff] %vm272_vm0, %v2613_v52  ;;  %282 = vst.msk [vmem:[#allocation2 + $0x48] sm:$0xff] %vm272_vm0, %v2613_v52 }
  0x4a   : > { %283 = vst.msk [vmem:[#allocation2 + $0x50] sm:$0xff] %vm272_vm0, %v2613_v52  ;;  %284 = vst.msk [vmem:[#allocation2 + $0x58] sm:$0xff] %vm272_vm0, %v2613_v52 }
  0x4b   : > { %285 = vst.msk [vmem:[#allocation2 + $0x60] sm:$0xff] %vm272_vm0, %v2613_v52  ;;  %286 = vst.msk [vmem:[#allocation2 + $0x68] sm:$0xff] %vm272_vm0, %v2613_v52 }
  0x4c   : > { %287 = vst.msk [vmem:[#allocation2 + $0x70] sm:$0xff] %vm272_vm0, %v2613_v52  ;;  %288 = vst.msk [vmem:[#allocation2 + $0x78] sm:$0xff] %vm272_vm0, %v2613_v52 }
  0x4d   : > { %289 = vst.msk [vmem:[#allocation2 + $0x80] sm:$0xff] %vm272_vm0, %v2613_v52  ;;  %290 = vst.msk [vmem:[#allocation2 + $0x88] sm:$0xff] %vm272_vm0, %v2613_v52 }
  0x4e   : > { %291 = vst.msk [vmem:[#allocation2 + $0x90] sm:$0xff] %vm272_vm0, %v2613_v52  ;;  %292 = vst.msk [vmem:[#allocation2 + $0x98] sm:$0xff] %vm272_vm0, %v2613_v52 }
  0x4f   : > { %1243 = vmatmul.mubr.bf16.gmra.mrb[20].mxu0 %v2509_v58  ;;  %1372 = vmatmul.mubr.bf16.gmra.mrb[20].mxu1 %v2510_v59  ;;  %293 = vst.msk [vmem:[#allocation2 + $0xa0] sm:$0xff] %vm272_vm0, %v2613_v52  ;;  %294 = vst.msk [vmem:[#allocation2 + $0xa8] sm:$0xff] %vm272_vm0, %v2613_v52 }
  0x50   : > { %1250 = vmatprep.mubr.bf16.mxu0 %v2511_v60  ;;  %1379 = vmatprep.mubr.bf16.mxu1 %v2513_v61  ;;  %295 = vst.msk [vmem:[#allocation2 + $0xb0] sm:$0xff] %vm272_vm0, %v2613_v52  ;;  %296 = vst.msk [vmem:[#allocation2 + $0xb8] sm:$0xff] %vm272_vm0, %v2613_v52 }
  0x51   : > { %297 = vst.msk [vmem:[#allocation2 + $0xc0] sm:$0xff] %vm272_vm0, %v2613_v52  ;;  %298 = vst.msk [vmem:[#allocation2 + $0xc8] sm:$0xff] %vm272_vm0, %v2613_v52 }
  0x52   : > { %299 = vst.msk [vmem:[#allocation2 + $0xd0] sm:$0xff] %vm272_vm0, %v2613_v52  ;;  %300 = vst.msk [vmem:[#allocation2 + $0xd8] sm:$0xff] %vm272_vm0, %v2613_v52 }
  0x53   : > { %301 = vst.msk [vmem:[#allocation2 + $0xe0] sm:$0xff] %vm272_vm0, %v2613_v52  ;;  %302 = vst.msk [vmem:[#allocation2 + $0xe8] sm:$0xff] %vm272_vm0, %v2613_v52 }
  0x54   : > { %303 = vst.msk [vmem:[#allocation2 + $0xf0] sm:$0xff] %vm272_vm0, %v2613_v52  ;;  %304 = vst.msk [vmem:[#allocation2 + $0xf8] sm:$0xff] %vm272_vm0, %v2613_v52 }
  0x57   : > { %1251 = vmatmul.mubr.bf16.gmra.mrb[24].mxu0 %v2515_v62  ;;  %1380 = vmatmul.mubr.bf16.gmra.mrb[24].mxu1 %v2516_v63 }
  0x58   : > { %1258 = vmatprep.mubr.bf16.mxu0 %v2518_v0  ;;  %1387 = vmatprep.mubr.bf16.mxu1 %v2520_v1 }
  0x5f   : > { %1259 = vmatmul.mubr.bf16.gmra.mrb[28].mxu0 %v2522_v2  ;;  %1388 = vmatmul.mubr.bf16.gmra.mrb[28].mxu1 %v2523_v3 }
  0x60   : > { %1266 = vmatprep.mubr.bf16.mxu0 %v2524_v4  ;;  %1395 = vmatprep.mubr.bf16.mxu1 %v2526_v5 }
  0x67   : > { %1267 = vmatmul.mubr.bf16.gmra.mrb[32].mxu0 %v2528_v6  ;;  %1396 = vmatmul.mubr.bf16.gmra.mrb[32].mxu1 %v2529_v7 }
  0x68   : > { %1274 = vmatprep.mubr.bf16.mxu0 %v2530_v8  ;;  %1403 = vmatprep.mubr.bf16.mxu1 %v2532_v9 }
  0x6f   : > { %1275 = vmatmul.mubr.bf16.gmra.mrb[36].mxu0 %v2534_v10  ;;  %1404 = vmatmul.mubr.bf16.gmra.mrb[36].mxu1 %v2535_v11 }
  0x70   : > { %1282 = vmatprep.mubr.bf16.mxu0 %v2537_v12  ;;  %1411 = vmatprep.mubr.bf16.mxu1 %v2539_v13 }
  0x77   : > { %1283 = vmatmul.mubr.bf16.gmra.mrb[40].mxu0 %v2541_v14  ;;  %1412 = vmatmul.mubr.bf16.gmra.mrb[40].mxu1 %v2542_v15 }
  0x78   : > { %1290 = vmatprep.mubr.bf16.mxu0 %v2543_v16  ;;  %1419 = vmatprep.mubr.bf16.mxu1 %v2545_v17 }
  0x7f   : > { %1291 = vmatmul.mubr.bf16.gmra.mrb[44].mxu0 %v2547_v18  ;;  %1420 = vmatmul.mubr.bf16.gmra.mrb[44].mxu1 %v2548_v19 }
  0x80   : > { %1427 = vmatprep.mubr.bf16.mxu1 %v2549_v20  ;;  %2367 = vmatprep.mubr.msk.bf16.mxu0 %vm272_vm0, %v2551_v21 }
  0x87   : > { %1428 = vmatmul.mubr.bf16.gmra.mrb[48].mxu1 %v2552_v22  ;;  %2368 = vmatmul.mubr.msk.bf16.vlgmr.msra.gmra.mrb[48].mxu0 %vm272_vm0, %v2553_v23 }
  0x88   : > { %1435 = vmatprep.mubr.bf16.mxu1 %v2554_v24  ;;  %2371 = vmatprep.mubr.msk.bf16.mxu0 %vm272_vm0, %v2556_v25 }
  0x8f   : > { %1436 = vmatmul.mubr.bf16.gmra.mrb[52].mxu1 %v2557_v26  ;;  %2372 = vmatmul.mubr.msk.bf16.gmra.mrb[52].mxu0 %vm272_vm0, %v2558_v27 }
  0x90   : > { %1443 = vmatprep.mubr.bf16.mxu1 %v2559_v28  ;;  %2375 = vmatprep.mubr.msk.bf16.mxu0 %vm272_vm0, %v2561_v29 }
  0x97   : > { %1444 = vmatmul.mubr.bf16.gmra.mrb[56].mxu1 %v2562_v30  ;;  %2376 = vmatmul.mubr.msk.bf16.gmra.mrb[56].mxu0 %vm272_vm0, %v2563_v31 }
  0x98   : > { %1451 = vmatprep.mubr.bf16.mxu1 %v2564_v32  ;;  %2379 = vmatprep.mubr.msk.bf16.mxu0 %vm272_vm0, %v2566_v33 }
  0x9f   : > { %1452 = vmatmul.mubr.bf16.gmra.mrb[60].mxu1 %v2567_v34  ;;  %2380 = vmatmul.mubr.msk.bf16.gmra.mrb[60].mxu0 %vm272_vm0, %v2568_v35 }
  0xa0   : > { %1459 = vmatprep.mubr.bf16.mxu1 %v2569_v36  ;;  %2383 = vmatprep.mubr.msk.bf16.mxu0 %vm272_vm0, %v2571_v37 }
  0xa7   : > { %1460 = vmatmul.mubr.bf16.gmra.mrb[64].mxu1 %v2572_v38  ;;  %2384 = vmatmul.mubr.msk.bf16.gmra.mrb[64].mxu0 %vm272_vm0, %v2573_v39 }
  0xa8   : > { %1467 = vmatprep.mubr.bf16.mxu1 %v2574_v40  ;;  %2387 = vmatprep.mubr.msk.bf16.mxu0 %vm272_vm0, %v2576_v41 }
  0xaf   : > { %1468 = vmatmul.mubr.bf16.gmra.mrb[68].mxu1 %v2577_v42  ;;  %2388 = vmatmul.mubr.msk.bf16.gmra.mrb[68].mxu0 %vm272_vm0, %v2578_v43 }
  0xb0   : > { %1475 = vmatprep.mubr.bf16.mxu1 %v2579_v44  ;;  %2391 = vmatprep.mubr.msk.bf16.mxu0 %vm272_vm0, %v2581_v45 }
  0xb7   : > { %1476 = vmatmul.mubr.bf16.gmra.mrb[72].mxu1 %v2582_v46  ;;  %2392 = vmatmul.mubr.msk.bf16.gmra.mrb[72].mxu0 %vm272_vm0, %v2583_v47 }
  0xb8   : > { %1483 = vmatprep.mubr.bf16.mxu1 %v2584_v48  ;;  %2395 = vmatprep.mubr.msk.bf16.mxu0 %vm272_vm0, %v2586_v49 }
  0xbf   : > { %1484 = vmatmul.mubr.bf16.gmra.mrb[76].mxu1 %v2587_v50  ;;  %2396 = vmatmul.mubr.msk.bf16.gmra.mrb[76].mxu0 %vm272_vm0, %v2588_v51 }
  0xfa   : > { %v2203_v53 = vpop.f32.mrb[0].mxu1  ;;  %v2131_v54 = vpop.f32.mrb[0].mxu0 }
  0xfb   : > { %v2204_v55 = vpop.f32.mrb[1].mxu1  ;;  %v2132_v56 = vpop.f32.mrb[1].mxu0 }
  0xfc   : > { %v2896_v57 = vadd.f32 %v2204_v55, %v2203_v53  ;;  %v2206_v58 = vpop.f32.mrb[2].mxu1  ;;  %v2133_v59 = vadd.f32 %v2132_v56, %v2131_v54  ;;  %v2134_v60 = vpop.f32.mrb[2].mxu0 }
  0xfd   : > { %v2207_v61 = vpop.f32.mrb[3].mxu1  ;;  %v2135_v62 = vpop.f32.mrb[3].mxu0 }
  0xfe   : > { %v2898_v63 = vadd.f32 %v2207_v61, %v2206_v58  ;;  %v2136_v0 = vadd.f32 %v2135_v62, %v2134_v60 }
 0x102   : > { %v2209_v1 = vpop.f32.mrb[4].mxu1  ;;  %v2137_v2 = vpop.f32.mrb[4].mxu0 }
 0x103   : > { %v2210_v3 = vpop.f32.mrb[5].mxu1  ;;  %v2138_v4 = vpop.f32.mrb[5].mxu0 }
 0x104   : > { %v2900_v5 = vadd.f32 %v2210_v3, %v2209_v1  ;;  %v2212_v6 = vpop.f32.mrb[6].mxu1  ;;  %v2139_v7 = vadd.f32 %v2138_v4, %v2137_v2  ;;  %v2140_v8 = vpop.f32.mrb[6].mxu0 }
 0x105   : > { %v2213_v9 = vpop.f32.mrb[7].mxu1  ;;  %v2141_v10 = vpop.f32.mrb[7].mxu0 }
 0x106   : > { %v2902_v11 = vadd.f32 %v2213_v9, %v2212_v6  ;;  %v2142_v12 = vadd.f32 %v2141_v10, %v2140_v8 }
 0x10a   : > { %v2215_v13 = vpop.f32.mrb[8].mxu1  ;;  %v2143_v14 = vpop.f32.mrb[8].mxu0 }
 0x10b   : > { %v2216_v15 = vpop.f32.mrb[9].mxu1  ;;  %v2144_v16 = vpop.f32.mrb[9].mxu0 }
 0x10c   : > { %v2904_v17 = vadd.f32 %v2216_v15, %v2215_v13  ;;  %v2218_v18 = vpop.f32.mrb[10].mxu1  ;;  %v2145_v19 = vadd.f32 %v2144_v16, %v2143_v14  ;;  %v2146_v20 = vpop.f32.mrb[10].mxu0 }
 0x10d   : > { %v2219_v21 = vpop.f32.mrb[11].mxu1  ;;  %v2147_v22 = vpop.f32.mrb[11].mxu0 }
 0x10e   : > { %v2906_v23 = vadd.f32 %v2219_v21, %v2218_v18  ;;  %v2148_v24 = vadd.f32 %v2147_v22, %v2146_v20 }
 0x112   : > { %v2221_v25 = vpop.f32.mrb[12].mxu1  ;;  %v2149_v26 = vpop.f32.mrb[12].mxu0 }
 0x113   : > { %v2222_v27 = vpop.f32.mrb[13].mxu1  ;;  %v2150_v28 = vpop.f32.mrb[13].mxu0 }
 0x114   : > { %v2908_v29 = vadd.f32 %v2222_v27, %v2221_v25  ;;  %v2224_v30 = vpop.f32.mrb[14].mxu1  ;;  %v2151_v31 = vadd.f32 %v2150_v28, %v2149_v26  ;;  %v2152_v32 = vpop.f32.mrb[14].mxu0 }
 0x115   : > { %v2225_v33 = vpop.f32.mrb[15].mxu1  ;;  %v2153_v34 = vpop.f32.mrb[15].mxu0 }
 0x116   : > { %v2910_v35 = vadd.f32 %v2225_v33, %v2224_v30  ;;  %v2154_v36 = vadd.f32 %v2153_v34, %v2152_v32 }
 0x11a   : > { %v2243_v37 = vpop.f32.mrb[16].mxu1  ;;  %v2155_v38 = vpop.f32.mrb[16].mxu0 }
 0x11b   : > { %v2244_v39 = vpop.f32.mrb[17].mxu1  ;;  %v2156_v40 = vpop.f32.mrb[17].mxu0 }
 0x11c   : > { %v2245_v41 = vadd.f32 %v2244_v39, %v2243_v37  ;;  %v2246_v42 = vpop.f32.mrb[18].mxu1  ;;  %v2157_v43 = vadd.f32 %v2156_v40, %v2155_v38  ;;  %v2158_v44 = vpop.f32.mrb[18].mxu0 }
 0x11d   : > { %v2247_v45 = vpop.f32.mrb[19].mxu1  ;;  %v2159_v46 = vpop.f32.mrb[19].mxu0 }
 0x11e   : > { %v2248_v47 = vadd.f32 %v2247_v45, %v2246_v42  ;;  %v2160_v48 = vadd.f32 %v2159_v46, %v2158_v44  ;;  %v2912_v49 = vadd.f32 %v2245_v41, %v2133_v59 }
 0x120   : > { %v2914_v50 = vadd.f32 %v2248_v47, %v2136_v0 }
 0x122   : > { %v2249_v51 = vpop.f32.mrb[20].mxu1  ;;  %v2161_v52 = vpop.f32.mrb[20].mxu0 }
 0x123   : > { %v2250_v53 = vpop.f32.mrb[21].mxu1  ;;  %v2162_v54 = vpop.f32.mrb[21].mxu0 }
 0x124   : > { %v2251_v55 = vadd.f32 %v2250_v53, %v2249_v51  ;;  %v2252_v56 = vpop.f32.mrb[22].mxu1  ;;  %v2163_v58 = vadd.f32 %v2162_v54, %v2161_v52  ;;  %v2164_v60 = vpop.f32.mrb[22].mxu0 }
 0x125   : > { %v2253_v61 = vpop.f32.mrb[23].mxu1  ;;  %v2165_v62 = vpop.f32.mrb[23].mxu0 }
 0x126   : > { %v2254_v1 = vadd.f32 %v2253_v61, %v2252_v56  ;;  %v2166_v2 = vadd.f32 %v2165_v62, %v2164_v60  ;;  %v2916_v3 = vadd.f32 %v2251_v55, %v2139_v7 }
 0x128   : > { %v2918_v4 = vadd.f32 %v2254_v1, %v2142_v12 }
 0x12a   : > { %v2255_v59 = vpop.f32.mrb[24].mxu1  ;;  %v2167_v6 = vpop.f32.mrb[24].mxu0 }
 0x12b   : > { %v2256_v0 = vpop.f32.mrb[25].mxu1  ;;  %v2168_v8 = vpop.f32.mrb[25].mxu0 }
 0x12c   : > { %v2257_v9 = vadd.f32 %v2256_v0, %v2255_v59  ;;  %v2258_v10 = vpop.f32.mrb[26].mxu1  ;;  %v2169_v13 = vadd.f32 %v2168_v8, %v2167_v6  ;;  %v2170_v14 = vpop.f32.mrb[26].mxu0 }
 0x12d   : > { %v2259_v15 = vpop.f32.mrb[27].mxu1  ;;  %v2171_v16 = vpop.f32.mrb[27].mxu0 }
 0x12e   : > { %v2260_v18 = vadd.f32 %v2259_v15, %v2258_v10  ;;  %v2172_v20 = vadd.f32 %v2171_v16, %v2170_v14  ;;  %v2920_v21 = vadd.f32 %v2257_v9, %v2145_v19 }
 0x130   : > { %v2922_v22 = vadd.f32 %v2260_v18, %v2148_v24 }
 0x132   : > { %v2261_v7 = vpop.f32.mrb[28].mxu1  ;;  %v2173_v25 = vpop.f32.mrb[28].mxu0 }
 0x133   : > { %v2262_v12 = vpop.f32.mrb[29].mxu1  ;;  %v2174_v26 = vpop.f32.mrb[29].mxu0 }
 0x134   : > { %v2263_v27 = vadd.f32 %v2262_v12, %v2261_v7  ;;  %v2264_v28 = vpop.f32.mrb[30].mxu1  ;;  %v2175_v30 = vadd.f32 %v2174_v26, %v2173_v25  ;;  %v2176_v32 = vpop.f32.mrb[30].mxu0 }
 0x135   : > { %v2265_v33 = vpop.f32.mrb[31].mxu1  ;;  %v2177_v34 = vpop.f32.mrb[31].mxu0 }
 0x136   : > { %v2266_v37 = vadd.f32 %v2265_v33, %v2264_v28  ;;  %v2178_v38 = vadd.f32 %v2177_v34, %v2176_v32  ;;  %v2924_v39 = vadd.f32 %v2263_v27, %v2151_v31 }
 0x138   : > { %v2926_v40 = vadd.f32 %v2266_v37, %v2154_v36 }
 0x13a   : > { %v2267_v19 = vpop.f32.mrb[32].mxu1  ;;  %v2179_v41 = vpop.f32.mrb[32].mxu0 }
 0x13b   : > { %v2268_v24 = vpop.f32.mrb[33].mxu1  ;;  %v2180_v42 = vpop.f32.mrb[33].mxu0 }
 0x13c   : > { %v2269_v44 = vadd.f32 %v2268_v24, %v2267_v19  ;;  %v2270_v45 = vpop.f32.mrb[34].mxu1  ;;  %v2928_v46 = vadd.f32 %v2180_v42, %v2179_v41  ;;  %v2182_v47 = vpop.f32.mrb[34].mxu0 }
 0x13d   : > { %v2271_v51 = vpop.f32.mrb[35].mxu1  ;;  %v2183_v52 = vpop.f32.mrb[35].mxu0 }
 0x13e   : > { %v2272_v53 = vadd.f32 %v2271_v51, %v2270_v45  ;;  %v2930_v54 = vadd.f32 %v2183_v52, %v2182_v47  ;;  %v2932_v55 = vadd.f32 %v2269_v44, %v2157_v43 }
 0x140   : > { %v2934_v31 = vadd.f32 %v2272_v53, %v2160_v48 }
 0x142   : > { %v2273_v36 = vpop.f32.mrb[36].mxu1  ;;  %v2185_v56 = vpop.f32.mrb[36].mxu0 }
 0x143   : > { %v2274_v60 = vpop.f32.mrb[37].mxu1  ;;  %v2186_v61 = vpop.f32.mrb[37].mxu0 }
 0x144   : > { %v2275_v62 = vadd.f32 %v2274_v60, %v2273_v36  ;;  %v2276_v1 = vpop.f32.mrb[38].mxu1  ;;  %v2936_v59 = vadd.f32 %v2186_v61, %v2185_v56  ;;  %v2188_v6 = vpop.f32.mrb[38].mxu0  ;;  %v307_v56 = vld [vmem:[#allocation2 + $0x10] sm:$0xff] }
 0x145   : > { %v2277_v0 = vpop.f32.mrb[39].mxu1  ;;  %v2189_v8 = vpop.f32.mrb[39].mxu0 }
 0x146   : > { %v2278_v9 = vadd.f32 %v2277_v0, %v2276_v1  ;;  %v2938_v10 = vadd.f32 %v2189_v8, %v2188_v6  ;;  %v2940_v14 = vadd.f32 %v2275_v62, %v2163_v58  ;;  %v305_v1 = vld [vmem:[#allocation2] sm:$0xff] }
 0x148   : > { %v2942_v43 = vadd.f32 %v2278_v9, %v2166_v2 }
 0x14a   : > { %v2279_v48 = vpop.f32.mrb[40].mxu1  ;;  %v2191_v15 = vpop.f32.mrb[40].mxu0 }
 0x14b   : > { %v2280_v16 = vpop.f32.mrb[41].mxu1  ;;  %v2192_v18 = vpop.f32.mrb[41].mxu0 }
 0x14c   : > { %v2281_v7 = vadd.f32 %v2280_v16, %v2279_v48  ;;  %v2282_v25 = vpop.f32.mrb[42].mxu1  ;;  %v2944_v12 = vadd.f32 %v2192_v18, %v2191_v15  ;;  %v2194_v26 = vpop.f32.mrb[42].mxu0  ;;  %v308_v48 = vld [vmem:[#allocation2 + $0x18] sm:$0xff] }
 0x14d   : > { %v2283_v27 = vpop.f32.mrb[43].mxu1  ;;  %v2195_v28 = vpop.f32.mrb[43].mxu0 }
 0x14e   : > { %v2284_v32 = vadd.f32 %v2283_v27, %v2282_v25  ;;  %v2946_v33 = vadd.f32 %v2195_v28, %v2194_v26  ;;  %v2948_v34 = vadd.f32 %v2281_v7, %v2169_v13 }
 0x150   : > { %v2950_v58 = vadd.f32 %v2284_v32, %v2172_v20 }
 0x152   : > { %v2285_v2 = vpop.f32.mrb[44].mxu1  ;;  %v2197_v37 = vpop.f32.mrb[44].mxu0 }
 0x153   : > { %v2286_v19 = vpop.f32.mrb[45].mxu1  ;;  %v2198_v41 = vpop.f32.mrb[45].mxu0 }
 0x154   : > { %v2287_v24 = vadd.f32 %v2286_v19, %v2285_v2  ;;  %v2288_v42 = vpop.f32.mrb[46].mxu1  ;;  %v2952_v44 = vadd.f32 %v2198_v41, %v2197_v37  ;;  %v2200_v45 = vpop.f32.mrb[46].mxu0  ;;  %v311_v2 = vld [vmem:[#allocation2 + $0x30] sm:$0xff]  ;;  %v309_v19 = vld [vmem:[#allocation2 + $0x20] sm:$0xff] }
 0x155   : > { %v2289_v47 = vpop.f32.mrb[47].mxu1  ;;  %v2201_v51 = vpop.f32.mrb[47].mxu0 }
 0x156   : > { %v2290_v52 = vadd.f32 %v2289_v47, %v2288_v42  ;;  %v2954_v53 = vadd.f32 %v2201_v51, %v2200_v45  ;;  %v2956_v36 = vadd.f32 %v2287_v24, %v2175_v30  ;;  %v2978_v24 = vld [vmem:[%s3172_s2] ss:$0 sm:$0xff]  ;;  %v312_v47 = vld [vmem:[#allocation2 + $0x38] sm:$0xff] }
 0x158   : > { %v2958_v13 = vadd.f32 %v2290_v52, %v2178_v38  ;;  %v306_v38 = vld [vmem:[#allocation2 + $0x8] sm:$0xff] }
 0x15a   : > { %v2291_v20 = vpop.f32.mrb[48].mxu1  ;;  %v2369_v60 = vpop.f32.mrb[48].mxu0 }
 0x15b   : > { %v1535_v61 = vadd.f32 %v2369_v60, %v2916_v3  ;;  %v2292_v62 = vpop.f32.mrb[49].mxu1  ;;  %v1526_v6 = vpop.f32.mrb[49].mxu0 }
 0x15c   : > { %v2293_v0 = vadd.f32 %v2292_v62, %v2291_v20  ;;  %v1527_v8 = vadd.f32 %v1526_v6, %v2912_v49  ;;  %v2294_v9 = vpop.f32.mrb[50].mxu1  ;;  %v2370_v15 = vpop.f32.mrb[50].mxu0 }
 0x15d   : > { %v1655_v16 = vadd.f32 %v1535_v61, %v307_v56  ;;  %v1538_v30 = vadd.f32 %v2370_v15, %v2918_v4  ;;  %v2295_v18 = vpop.f32.mrb[51].mxu1  ;;  %v1529_v7 = vpop.f32.mrb[51].mxu0 }
 0x15e   : > { %v1653_v25 = vadd.f32 %v1527_v8, %v305_v1  ;;  %v2296_v26 = vadd.f32 %v2295_v18, %v2294_v9  ;;  %v1530_v27 = vadd.f32 %v1529_v7, %v2914_v50  ;;  %v2965_v3 = vadd.f32 %v2293_v0, %v2928_v46 }
 0x15f   : > { %1687 = vst.msk [vmem:[#allocation2 + $0x10] sm:$0xff] %vm272_vm0, %v1655_v16  ;;  %v1656_v28 = vadd.f32 %v1538_v30, %v308_v48 }
 0x160   : > { %1685 = vst.msk [vmem:[#allocation2] sm:$0xff] %vm272_vm0, %v1653_v25  ;;  %v1654_v49 = vadd.f32 %v1530_v27, %v306_v38  ;;  %v2970_v32 = vadd.f32 %v2296_v26, %v2930_v54  ;;  %v315_v25 = vld [vmem:[#allocation2 + $0x50] sm:$0xff] }
 0x161   : > { %1688 = vst.msk [vmem:[#allocation2 + $0x18] sm:$0xff] %vm272_vm0, %v1656_v28 }
 0x162   : > { %1686 = vst.msk [vmem:[#allocation2 + $0x8] sm:$0xff] %vm272_vm0, %v1654_v49  ;;  %v2297_v4 = vpop.f32.mrb[52].mxu1  ;;  %v2373_v50 = vpop.f32.mrb[52].mxu0  ;;  %v313_v49 = vld [vmem:[#allocation2 + $0x40] sm:$0xff] }
 0x163   : > { %v1551_v46 = vadd.f32 %v2373_v50, %v2924_v39  ;;  %v2298_v37 = vpop.f32.mrb[53].mxu1  ;;  %v1542_v41 = vpop.f32.mrb[53].mxu0  ;;  %v310_v39 = vld [vmem:[#allocation2 + $0x28] sm:$0xff] }
 0x164   : > { %v2299_v54 = vadd.f32 %v2298_v37, %v2297_v4  ;;  %v1543_v42 = vadd.f32 %v1542_v41, %v2920_v21  ;;  %v2300_v45 = vpop.f32.mrb[54].mxu1  ;;  %v2374_v51 = vpop.f32.mrb[54].mxu0 }
 0x165   : > { %v1659_v52 = vadd.f32 %v1551_v46, %v311_v2  ;;  %v1554_v20 = vadd.f32 %v2374_v51, %v2926_v40  ;;  %v2301_v56 = vpop.f32.mrb[55].mxu1  ;;  %v1545_v60 = vpop.f32.mrb[55].mxu0 }
 0x166   : > { %v1722_v61 = vld [vmem:[#allocation2 + $0x10] sm:$0xff]  ;;  %v1657_v62 = vadd.f32 %v1543_v42, %v309_v19  ;;  %v2302_v1 = vadd.f32 %v2301_v56, %v2300_v45  ;;  %v1546_v6 = vadd.f32 %v1545_v60, %v2922_v22  ;;  %v2985_v0 = vadd.f32 %v2299_v54, %v2936_v59  ;;  %v316_v19 = vld [vmem:[#allocation2 + $0x58] sm:$0xff] }
 0x167   : > { %v1761_v21 = vadd.f32 %v2978_v24, %v1722_v61  ;;  %v1720_v8 = vld [vmem:[#allocation2] sm:$0xff]  ;;  %1691 = vst.msk [vmem:[#allocation2 + $0x30] sm:$0xff] %vm272_vm0, %v1659_v52  ;;  %v1660_v9 = vadd.f32 %v1554_v20, %v312_v47 }
 0x168   : > { %v1759_v40 = vadd.f32 %v2978_v24, %v1720_v8  ;;  %v1723_v48 = vld [vmem:[#allocation2 + $0x18] sm:$0xff]  ;;  %1689 = vst.msk [vmem:[#allocation2 + $0x20] sm:$0xff] %vm272_vm0, %v1657_v62  ;;  %v1658_v22 = vadd.f32 %v1546_v6, %v310_v39  ;;  %v2997_v59 = vadd.f32 %v2302_v1, %v2938_v10 }
 0x169   : > { %v1793_v15 = vmax.f32 %v1761_v21, 0.0  ;;  %v1762_v16 = vadd.f32 %v2978_v24, %v1723_v48  ;;  %v1721_v30 = vld [vmem:[#allocation2 + $0x8] sm:$0xff]  ;;  %1692 = vst.msk [vmem:[#allocation2 + $0x38] sm:$0xff] %vm272_vm0, %v1660_v9  ;;  %v319_v48 = vld [vmem:[#allocation2 + $0x70] sm:$0xff] }
 0x16a   : > { %v1791_v18 = vmax.f32 %v1759_v40, 0.0  ;;  %v1760_v38 = vadd.f32 %v2978_v24, %v1721_v30  ;;  %1690 = vst.msk [vmem:[#allocation2 + $0x28] sm:$0xff] %vm272_vm0, %v1658_v22  ;;  %v2303_v7 = vpop.f32.mrb[56].mxu1  ;;  %v2377_v26 = vpop.f32.mrb[56].mxu0  ;;  %v317_v30 = vld [vmem:[#allocation2 + $0x60] sm:$0xff] }
 0x16b   : > { %1825 = vst.msk [vmem:[%s2992_s29 + $0x10] sm:$0xff] %vm272_vm0, %v1793_v15  ;;  %v1794_v10 = vmax.f32 %v1762_v16, 0.0  ;;  %v1567_v27 = vadd.f32 %v2377_v26, %v2940_v14  ;;  %v2304_v28 = vpop.f32.mrb[57].mxu1  ;;  %v1558_v4 = vpop.f32.mrb[57].mxu0  ;;  %v314_v14 = vld [vmem:[#allocation2 + $0x48] sm:$0xff] }
 0x16c   : > { %1823 = vst.msk [vmem:[%s2992_s29] sm:$0xff] %vm272_vm0, %v1791_v18  ;;  %v1792_v2 = vmax.f32 %v1760_v38, 0.0  ;;  %v2305_v50 = vadd.f32 %v2304_v28, %v2303_v7  ;;  %v1559_v46 = vadd.f32 %v1558_v4, %v2932_v55  ;;  %v2306_v37 = vpop.f32.mrb[58].mxu1  ;;  %v2378_v41 = vpop.f32.mrb[58].mxu0 }
 0x16d   : > { %1826 = vst.msk [vmem:[%s2992_s29 + $0x18] sm:$0xff] %vm272_vm0, %v1794_v10  ;;  %v1663_v54 = vadd.f32 %v1567_v27, %v315_v25  ;;  %v1570_v42 = vadd.f32 %v2378_v41, %v2942_v43  ;;  %v2307_v45 = vpop.f32.mrb[59].mxu1  ;;  %v1561_v47 = vpop.f32.mrb[59].mxu0  ;;  %v320_v10 = vld [vmem:[#allocation2 + $0x78] sm:$0xff] }
 0x16e   : > { %1824 = vst.msk [vmem:[%s2992_s29 + $0x8] sm:$0xff] %vm272_vm0, %v1792_v2  ;;  %v1726_v51 = vld [vmem:[#allocation2 + $0x30] sm:$0xff]  ;;  %v1661_v52 = vadd.f32 %v1559_v46, %v313_v49  ;;  %v2308_v20 = vadd.f32 %v2307_v45, %v2306_v37  ;;  %v1562_v56 = vadd.f32 %v1561_v47, %v2934_v31  ;;  %v3016_v55 = vadd.f32 %v2305_v50, %v2944_v12 }
 0x16f   : > { %v1765_v39 = vadd.f32 %v2978_v24, %v1726_v51  ;;  %v1724_v60 = vld [vmem:[#allocation2 + $0x20] sm:$0xff]  ;;  %1695 = vst.msk [vmem:[#allocation2 + $0x50] sm:$0xff] %vm272_vm0, %v1663_v54  ;;  %v1664_v61 = vadd.f32 %v1570_v42, %v316_v19 }
 0x170   : > { %v1763_v43 = vadd.f32 %v2978_v24, %v1724_v60  ;;  %v1727_v62 = vld [vmem:[#allocation2 + $0x38] sm:$0xff]  ;;  %1693 = vst.msk [vmem:[#allocation2 + $0x40] sm:$0xff] %vm272_vm0, %v1661_v52  ;;  %v1662_v1 = vadd.f32 %v1562_v56, %v314_v14  ;;  %v3023_v6 = vadd.f32 %v2308_v20, %v2946_v33 }
 0x171   : > { %v1797_v31 = vmax.f32 %v1765_v39, 0.0  ;;  %v1766_v12 = vadd.f32 %v2978_v24, %v1727_v62  ;;  %v1725_v21 = vld [vmem:[#allocation2 + $0x28] sm:$0xff]  ;;  %1696 = vst.msk [vmem:[#allocation2 + $0x58] sm:$0xff] %vm272_vm0, %v1664_v61  ;;  %v323_v39 = vld [vmem:[#allocation2 + $0x90] sm:$0xff]  ;;  %v321_v62 = vld [vmem:[#allocation2 + $0x80] sm:$0xff] }
 0x172   : > { %v1795_v8 = vmax.f32 %v1763_v43, 0.0  ;;  %v1764_v9 = vadd.f32 %v2978_v24, %v1725_v21  ;;  %1694 = vst.msk [vmem:[#allocation2 + $0x48] sm:$0xff] %vm272_vm0, %v1662_v1  ;;  %v2309_v40 = vpop.f32.mrb[60].mxu1  ;;  %v2381_v22 = vpop.f32.mrb[60].mxu0 }
 0x173   : > { %1829 = vst.msk [vmem:[%s2992_s29 + $0x30] sm:$0xff] %vm272_vm0, %v1797_v31  ;;  %v1798_v33 = vmax.f32 %v1766_v12, 0.0  ;;  %v1583_v15 = vadd.f32 %v2381_v22, %v2956_v36  ;;  %v2310_v16 = vpop.f32.mrb[61].mxu1  ;;  %v1574_v18 = vpop.f32.mrb[61].mxu0  ;;  %v318_v36 = vld [vmem:[#allocation2 + $0x68] sm:$0xff] }
 0x174   : > { %1827 = vst.msk [vmem:[%s2992_s29 + $0x20] sm:$0xff] %vm272_vm0, %v1795_v8  ;;  %v1796_v38 = vmax.f32 %v1764_v9, 0.0  ;;  %v2311_v7 = vadd.f32 %v2310_v16, %v2309_v40  ;;  %v1575_v25 = vadd.f32 %v1574_v18, %v2948_v34  ;;  %v2312_v26 = vpop.f32.mrb[62].mxu1  ;;  %v2382_v27 = vpop.f32.mrb[62].mxu0  ;;  %v324_v9 = vld [vmem:[#allocation2 + $0x98] sm:$0xff] }
 0x175   : > { %1830 = vst.msk [vmem:[%s2992_s29 + $0x38] sm:$0xff] %vm272_vm0, %v1798_v33  ;;  %v1667_v28 = vadd.f32 %v1583_v15, %v319_v48  ;;  %v1586_v49 = vadd.f32 %v2382_v27, %v2958_v13  ;;  %v2313_v4 = vpop.f32.mrb[63].mxu1  ;;  %v1577_v2 = vpop.f32.mrb[63].mxu0 }
 0x176   : > { %1828 = vst.msk [vmem:[%s2992_s29 + $0x28] sm:$0xff] %vm272_vm0, %v1796_v38  ;;  %v1730_v50 = vld [vmem:[#allocation2 + $0x50] sm:$0xff]  ;;  %v1665_v46 = vadd.f32 %v1575_v25, %v317_v30  ;;  %v2314_v37 = vadd.f32 %v2313_v4, %v2312_v26  ;;  %v1578_v19 = vadd.f32 %v1577_v2, %v2950_v58  ;;  %v3042_v34 = vadd.f32 %v2311_v7, %v2952_v44 }
 0x177   : > { %v1769_v41 = vadd.f32 %v2978_v24, %v1730_v50  ;;  %v1728_v54 = vld [vmem:[#allocation2 + $0x40] sm:$0xff]  ;;  %1699 = vst.msk [vmem:[#allocation2 + $0x70] sm:$0xff] %vm272_vm0, %v1667_v28  ;;  %v1668_v42 = vadd.f32 %v1586_v49, %v320_v10  ;;  %v327_v50 = vld [vmem:[#allocation2 + $0xb0] sm:$0xff] }
 0x178   : > { %v1767_v13 = vadd.f32 %v2978_v24, %v1728_v54  ;;  %v1731_v45 = vld [vmem:[#allocation2 + $0x58] sm:$0xff]  ;;  %1697 = vst.msk [vmem:[#allocation2 + $0x60] sm:$0xff] %vm272_vm0, %v1665_v46  ;;  %v1666_v14 = vadd.f32 %v1578_v19, %v318_v36  ;;  %v3049_v47 = vadd.f32 %v2314_v37, %v2954_v53 }
 0x179   : > { %v1801_v58 = vmax.f32 %v1769_v41, 0.0  ;;  %v1770_v44 = vadd.f32 %v2978_v24, %v1731_v45  ;;  %v1729_v51 = vld [vmem:[#allocation2 + $0x48] sm:$0xff]  ;;  %1700 = vst.msk [vmem:[#allocation2 + $0x78] sm:$0xff] %vm272_vm0, %v1668_v42  ;;  %v325_v41 = vld [vmem:[#allocation2 + $0xa0] sm:$0xff] }
 0x17a   : > { %v1799_v52 = vmax.f32 %v1767_v13, 0.0  ;;  %v1768_v20 = vadd.f32 %v2978_v24, %v1729_v51  ;;  %1698 = vst.msk [vmem:[#allocation2 + $0x68] sm:$0xff] %vm272_vm0, %v1666_v14  ;;  %v2315_v56 = vpop.f32.mrb[64].mxu1  ;;  %v2385_v60 = vpop.f32.mrb[64].mxu0 }
 0x17b   : > { %1833 = vst.msk [vmem:[%s2992_s29 + $0x50] sm:$0xff] %vm272_vm0, %v1801_v58  ;;  %v1802_v53 = vmax.f32 %v1770_v44, 0.0  ;;  %v1599_v61 = vadd.f32 %v2385_v60, %v2985_v0  ;;  %v2316_v43 = vpop.f32.mrb[65].mxu1  ;;  %v1590_v1 = vpop.f32.mrb[65].mxu0  ;;  %v322_v0 = vld [vmem:[#allocation2 + $0x88] sm:$0xff]  ;;  %v328_v58 = vld [vmem:[#allocation2 + $0xb8] sm:$0xff] }
 0x17c   : > { %1831 = vst.msk [vmem:[%s2992_s29 + $0x40] sm:$0xff] %vm272_vm0, %v1799_v52  ;;  %v1800_v31 = vmax.f32 %v1768_v20, 0.0  ;;  %v2317_v12 = vadd.f32 %v2316_v43, %v2315_v56  ;;  %v1591_v21 = vadd.f32 %v1590_v1, %v2965_v3  ;;  %v2318_v8 = vpop.f32.mrb[66].mxu1  ;;  %v2386_v40 = vpop.f32.mrb[66].mxu0 }
 0x17d   : > { %1834 = vst.msk [vmem:[%s2992_s29 + $0x58] sm:$0xff] %vm272_vm0, %v1802_v53  ;;  %v1671_v48 = vadd.f32 %v1599_v61, %v323_v39  ;;  %v1602_v22 = vadd.f32 %v2386_v40, %v2997_v59  ;;  %v2319_v33 = vpop.f32.mrb[67].mxu1  ;;  %v1593_v15 = vpop.f32.mrb[67].mxu0 }
 0x17e   : > { %1832 = vst.msk [vmem:[%s2992_s29 + $0x48] sm:$0xff] %vm272_vm0, %v1800_v31  ;;  %v1734_v16 = vld [vmem:[#allocation2 + $0x70] sm:$0xff]  ;;  %v1669_v30 = vadd.f32 %v1591_v21, %v321_v62  ;;  %v2320_v18 = vadd.f32 %v2319_v33, %v2318_v8  ;;  %v1594_v38 = vadd.f32 %v1593_v15, %v2970_v32  ;;  %v3068_v3 = vadd.f32 %v2317_v12, %v2896_v57 }
 0x17f   : > { %v1773_v7 = vadd.f32 %v2978_v24, %v1734_v16  ;;  %v1732_v25 = vld [vmem:[#allocation2 + $0x60] sm:$0xff]  ;;  %1703 = vst.msk [vmem:[#allocation2 + $0x90] sm:$0xff] %vm272_vm0, %v1671_v48  ;;  %v1672_v26 = vadd.f32 %v1602_v22, %v324_v9  ;;  %v331_v22 = vld [vmem:[#allocation2 + $0xd0] sm:$0xff] }
 0x180   : > { %v1771_v59 = vadd.f32 %v2978_v24, %v1732_v25  ;;  %v1735_v10 = vld [vmem:[#allocation2 + $0x78] sm:$0xff]  ;;  %1701 = vst.msk [vmem:[#allocation2 + $0x80] sm:$0xff] %vm272_vm0, %v1669_v30  ;;  %v1670_v27 = vadd.f32 %v1594_v38, %v322_v0  ;;  %v3075_v28 = vadd.f32 %v2320_v18, %v2898_v63  ;;  %v329_v16 = vld [vmem:[#allocation2 + $0xc0] sm:$0xff] }
 0x181   : > { %v1805_v32 = vmax.f32 %v1773_v7, 0.0  ;;  %v1774_v57 = vadd.f32 %v2978_v24, %v1735_v10  ;;  %v1733_v49 = vld [vmem:[#allocation2 + $0x68] sm:$0xff]  ;;  %1704 = vst.msk [vmem:[#allocation2 + $0x98] sm:$0xff] %vm272_vm0, %v1672_v26  ;;  %v332_v26 = vld [vmem:[#allocation2 + $0xd8] sm:$0xff] }
 0x182   : > { %v1803_v4 = vmax.f32 %v1771_v59, 0.0  ;;  %v1772_v36 = vadd.f32 %v2978_v24, %v1733_v49  ;;  %1702 = vst.msk [vmem:[#allocation2 + $0x88] sm:$0xff] %vm272_vm0, %v1670_v27  ;;  %v2321_v2 = vpop.f32.mrb[68].mxu1  ;;  %v2389_v46 = vpop.f32.mrb[68].mxu0 }
 0x183   : > { %1837 = vst.msk [vmem:[%s2992_s29 + $0x70] sm:$0xff] %vm272_vm0, %v1805_v32  ;;  %v1806_v63 = vmax.f32 %v1774_v57, 0.0  ;;  %v1615_v37 = vadd.f32 %v2389_v46, %v3042_v34  ;;  %v2322_v19 = vpop.f32.mrb[69].mxu1  ;;  %v1606_v54 = vpop.f32.mrb[69].mxu0  ;;  %v326_v34 = vld [vmem:[#allocation2 + $0xa8] sm:$0xff] }
 0x184   : > { %1835 = vst.msk [vmem:[%s2992_s29 + $0x60] sm:$0xff] %vm272_vm0, %v1803_v4  ;;  %v1804_v42 = vmax.f32 %v1772_v36, 0.0  ;;  %v2323_v13 = vadd.f32 %v2322_v19, %v2321_v2  ;;  %v1607_v45 = vadd.f32 %v1606_v54, %v3016_v55  ;;  %v2324_v14 = vpop.f32.mrb[70].mxu1  ;;  %v2390_v44 = vpop.f32.mrb[70].mxu0  ;;  %v330_v57 = vld [vmem:[#allocation2 + $0xc8] sm:$0xff] }
 0x185   : > { %1838 = vst.msk [vmem:[%s2992_s29 + $0x78] sm:$0xff] %vm272_vm0, %v1806_v63  ;;  %v1675_v51 = vadd.f32 %v1615_v37, %v327_v50  ;;  %v1618_v52 = vadd.f32 %v2390_v44, %v3049_v47  ;;  %v2325_v20 = vpop.f32.mrb[71].mxu1  ;;  %v1609_v56 = vpop.f32.mrb[71].mxu0 }
 0x186   : > { %1836 = vst.msk [vmem:[%s2992_s29 + $0x68] sm:$0xff] %vm272_vm0, %v1804_v42  ;;  %v1738_v39 = vld [vmem:[#allocation2 + $0x90] sm:$0xff]  ;;  %v1673_v60 = vadd.f32 %v1607_v45, %v325_v41  ;;  %v2326_v53 = vadd.f32 %v2325_v20, %v2324_v14  ;;  %v1610_v61 = vadd.f32 %v1609_v56, %v3023_v6  ;;  %v1470_v55 = vadd.f32 %v2323_v13, %v2900_v5 }
 0x187   : > { %v1777_v43 = vadd.f32 %v2978_v24, %v1738_v39  ;;  %v1736_v62 = vld [vmem:[#allocation2 + $0x80] sm:$0xff]  ;;  %1707 = vst.msk [vmem:[#allocation2 + $0xb0] sm:$0xff] %vm272_vm0, %v1675_v51  ;;  %v1676_v1 = vadd.f32 %v1618_v52, %v328_v58 }
 0x188   : > { %v1775_v47 = vadd.f32 %v2978_v24, %v1736_v62  ;;  %v1739_v31 = vld [vmem:[#allocation2 + $0x98] sm:$0xff]  ;;  %1705 = vst.msk [vmem:[#allocation2 + $0xa0] sm:$0xff] %vm272_vm0, %v1673_v60  ;;  %v1674_v12 = vadd.f32 %v1610_v61, %v326_v34  ;;  %v1473_v21 = vadd.f32 %v2326_v53, %v2902_v11 }
 0x189   : > { %v1809_v8 = vmax.f32 %v1777_v43, 0.0  ;;  %v1778_v6 = vadd.f32 %v2978_v24, %v1739_v31  ;;  %v1737_v5 = vld [vmem:[#allocation2 + $0x88] sm:$0xff]  ;;  %1708 = vst.msk [vmem:[#allocation2 + $0xb8] sm:$0xff] %vm272_vm0, %v1676_v1 }
 0x18a   : > { %v1807_v9 = vmax.f32 %v1775_v47, 0.0  ;;  %v1776_v40 = vadd.f32 %v2978_v24, %v1737_v5  ;;  %1706 = vst.msk [vmem:[#allocation2 + $0xa8] sm:$0xff] %vm272_vm0, %v1674_v12  ;;  %v2327_v48 = vpop.f32.mrb[72].mxu1  ;;  %v2393_v33 = vpop.f32.mrb[72].mxu0 }
 0x18b   : > { %1841 = vst.msk [vmem:[%s2992_s29 + $0x90] sm:$0xff] %vm272_vm0, %v1809_v8  ;;  %v1810_v0 = vmax.f32 %v1778_v6, 0.0  ;;  %v1631_v11 = vadd.f32 %v2393_v33, %v1470_v55  ;;  %v2328_v15 = vpop.f32.mrb[73].mxu1  ;;  %v1622_v30 = vpop.f32.mrb[73].mxu0  ;;  %v334_v55 = vld [vmem:[#allocation2 + $0xe8] sm:$0xff]  ;;  %v335_v6 = vld [vmem:[#allocation2 + $0xf0] sm:$0xff] }
 0x18c   : > { %1839 = vst.msk [vmem:[%s2992_s29 + $0x80] sm:$0xff] %vm272_vm0, %v1807_v9  ;;  %v1808_v18 = vmax.f32 %v1776_v40, 0.0  ;;  %v2329_v38 = vadd.f32 %v2328_v15, %v2327_v48  ;;  %v1623_v7 = vadd.f32 %v1622_v30, %v3068_v3  ;;  %v2330_v25 = vpop.f32.mrb[74].mxu1  ;;  %v2394_v59 = vpop.f32.mrb[74].mxu0 }
 0x18d   : > { %1842 = vst.msk [vmem:[%s2992_s29 + $0x98] sm:$0xff] %vm272_vm0, %v1810_v0  ;;  %v1679_v10 = vadd.f32 %v1631_v11, %v331_v22  ;;  %v1634_v27 = vadd.f32 %v2394_v59, %v1473_v21  ;;  %v2331_v32 = vpop.f32.mrb[75].mxu1  ;;  %v1625_v49 = vpop.f32.mrb[75].mxu0  ;;  %v336_v11 = vld [vmem:[#allocation2 + $0xf8] sm:$0xff] }
 0x18e   : > { %1840 = vst.msk [vmem:[%s2992_s29 + $0x88] sm:$0xff] %vm272_vm0, %v1808_v18  ;;  %v1742_v4 = vld [vmem:[#allocation2 + $0xb0] sm:$0xff]  ;;  %v1677_v36 = vadd.f32 %v1623_v7, %v329_v16  ;;  %v2332_v2 = vadd.f32 %v2331_v32, %v2330_v25  ;;  %v1626_v50 = vadd.f32 %v1625_v49, %v3075_v28  ;;  %v1478_v46 = vadd.f32 %v2329_v38, %v2904_v17 }
 0x18f   : > { %v1781_v3 = vadd.f32 %v2978_v24, %v1742_v4  ;;  %v1740_v63 = vld [vmem:[#allocation2 + $0xa0] sm:$0xff]  ;;  %1711 = vst.msk [vmem:[#allocation2 + $0xd0] sm:$0xff] %vm272_vm0, %v1679_v10  ;;  %v1680_v37 = vadd.f32 %v1634_v27, %v332_v26 }
 0x190   : > { %v1779_v19 = vadd.f32 %v2978_v24, %v1740_v63  ;;  %v1743_v41 = vld [vmem:[#allocation2 + $0xb8] sm:$0xff]  ;;  %1709 = vst.msk [vmem:[#allocation2 + $0xc0] sm:$0xff] %vm272_vm0, %v1677_v36  ;;  %v1678_v54 = vadd.f32 %v1626_v50, %v330_v57  ;;  %v1481_v42 = vadd.f32 %v2332_v2, %v2906_v23  ;;  %v333_v23 = vld [vmem:[#allocation2 + $0xe0] sm:$0xff] }
 0x191   : > { %v1813_v13 = vmax.f32 %v1781_v3, 0.0  ;;  %v1782_v28 = vadd.f32 %v2978_v24, %v1743_v41  ;;  %v1741_v17 = vld [vmem:[#allocation2 + $0xa8] sm:$0xff]  ;;  %1712 = vst.msk [vmem:[#allocation2 + $0xd8] sm:$0xff] %vm272_vm0, %v1680_v37 }
 0x192   : > { %v1811_v45 = vmax.f32 %v1779_v19, 0.0  ;;  %v1780_v14 = vadd.f32 %v2978_v24, %v1741_v17  ;;  %1710 = vst.msk [vmem:[#allocation2 + $0xc8] sm:$0xff] %vm272_vm0, %v1678_v54  ;;  %v2333_v58 = vpop.f32.mrb[76].mxu1  ;;  %v2397_v44 = vpop.f32.mrb[76].mxu0 }
 0x193   : > { %1845 = vst.msk [vmem:[%s2992_s29 + $0xb0] sm:$0xff] %vm272_vm0, %v1813_v13  ;;  %v1814_v51 = vmax.f32 %v1782_v28, 0.0  ;;  %v2334_v52 = vpop.f32.mrb[77].mxu1  ;;  %v1638_v20 = vpop.f32.mrb[77].mxu0 }
 0x194   : > { %1843 = vst.msk [vmem:[%s2992_s29 + $0xa0] sm:$0xff] %vm272_vm0, %v1811_v45  ;;  %v1812_v34 = vmax.f32 %v1780_v14, 0.0  ;;  %v2335_v56 = vadd.f32 %v2334_v52, %v2333_v58  ;;  %v1639_v39 = vadd.f32 %v1638_v20, %v1478_v46  ;;  %v2336_v60 = vpop.f32.mrb[78].mxu1  ;;  %v2398_v53 = vpop.f32.mrb[78].mxu0 }
 0x195   : > { %1846 = vst.msk [vmem:[%s2992_s29 + $0xb8] sm:$0xff] %vm272_vm0, %v1814_v51  ;;  %v2337_v61 = vpop.f32.mrb[79].mxu1  ;;  %v1641_v43 = vpop.f32.mrb[79].mxu0 }
 0x196   : > { %1844 = vst.msk [vmem:[%s2992_s29 + $0xa8] sm:$0xff] %vm272_vm0, %v1812_v34  ;;  %v1746_v62 = vld [vmem:[#allocation2 + $0xd0] sm:$0xff]  ;;  %v1486_v1 = vadd.f32 %v2335_v56, %v2908_v29  ;;  %v1681_v47 = vadd.f32 %v1639_v39, %v333_v23  ;;  %v2338_v31 = vadd.f32 %v2337_v61, %v2336_v60  ;;  %v1642_v12 = vadd.f32 %v1641_v43, %v1481_v42 }
 0x197   : > { %v1785_v21 = vadd.f32 %v2978_v24, %v1746_v62  ;;  %v1744_v8 = vld [vmem:[#allocation2 + $0xc0] sm:$0xff] }
 0x198   : > { %v1783_v5 = vadd.f32 %v2978_v24, %v1744_v8  ;;  %v1747_v9 = vld [vmem:[#allocation2 + $0xd8] sm:$0xff]  ;;  %v1647_v40 = vadd.f32 %v2397_v44, %v1486_v1  ;;  %1713 = vst.msk [vmem:[#allocation2 + $0xe0] sm:$0xff] %vm272_vm0, %v1681_v47  ;;  %v1489_v48 = vadd.f32 %v2338_v31, %v2910_v35  ;;  %v1682_v22 = vadd.f32 %v1642_v12, %v334_v55 }
 0x199   : > { %v1817_v29 = vmax.f32 %v1785_v21, 0.0  ;;  %v1786_v33 = vadd.f32 %v2978_v24, %v1747_v9  ;;  %v1745_v0 = vld [vmem:[#allocation2 + $0xc8] sm:$0xff] }
 0x19a   : > { %v1815_v15 = vmax.f32 %v1783_v5, 0.0  ;;  %v1784_v16 = vadd.f32 %v2978_v24, %v1745_v0  ;;  %v1683_v30 = vadd.f32 %v1647_v40, %v335_v6  ;;  %v1650_v18 = vadd.f32 %v2398_v53, %v1489_v48  ;;  %1714 = vst.msk [vmem:[#allocation2 + $0xe8] sm:$0xff] %vm272_vm0, %v1682_v22 }
 0x19b   : > { %1849 = vst.msk [vmem:[%s2992_s29 + $0xd0] sm:$0xff] %vm272_vm0, %v1817_v29  ;;  %v1818_v38 = vmax.f32 %v1786_v33, 0.0 }
 0x19c   : > { %1847 = vst.msk [vmem:[%s2992_s29 + $0xc0] sm:$0xff] %vm272_vm0, %v1815_v15  ;;  %v1816_v35 = vmax.f32 %v1784_v16, 0.0  ;;  %1715 = vst.msk [vmem:[#allocation2 + $0xf0] sm:$0xff] %vm272_vm0, %v1683_v30  ;;  %v1684_v7 = vadd.f32 %v1650_v18, %v336_v11 }
 0x19d   : > { %1850 = vst.msk [vmem:[%s2992_s29 + $0xd8] sm:$0xff] %vm272_vm0, %v1818_v38 }
 0x19e   : > { %1848 = vst.msk [vmem:[%s2992_s29 + $0xc8] sm:$0xff] %vm272_vm0, %v1816_v35  ;;  %1716 = vst.msk [vmem:[#allocation2 + $0xf8] sm:$0xff] %vm272_vm0, %v1684_v7 }
 0x19f   : > { %v1748_v25 = vld [vmem:[#allocation2 + $0xe0] sm:$0xff] }
 0x1a0   : > { %v1787_v26 = vadd.f32 %v2978_v24, %v1748_v25 }
 0x1a1   : > { %v1749_v59 = vld [vmem:[#allocation2 + $0xe8] sm:$0xff] }
 0x1a2   : > { %v1819_v10 = vmax.f32 %v1787_v26, 0.0  ;;  %v1788_v27 = vadd.f32 %v2978_v24, %v1749_v59 }
 0x1a3   : > { %v1750_v32 = vld [vmem:[#allocation2 + $0xf0] sm:$0xff] }
 0x1a4   : > { %v1789_v57 = vadd.f32 %v2978_v24, %v1750_v32  ;;  %1851 = vst.msk [vmem:[%s2992_s29 + $0xe0] sm:$0xff] %vm272_vm0, %v1819_v10  ;;  %v1820_v49 = vmax.f32 %v1788_v27, 0.0 }
 0x1a5   : > { %v1751_v4 = vld [vmem:[#allocation2 + $0xf8] sm:$0xff] }
 0x1a6   : > { %v1821_v36 = vmax.f32 %v1789_v57, 0.0  ;;  %v1790_v2 = vadd.f32 %v2978_v24, %v1751_v4  ;;  %1852 = vst.msk [vmem:[%s2992_s29 + $0xe8] sm:$0xff] %vm272_vm0, %v1820_v49 }
 0x1a8   : > { %1853 = vst.msk [vmem:[%s2992_s29 + $0xf0] sm:$0xff] %vm272_vm0, %v1821_v36  ;;  %v1822_v50 = vmax.f32 %v1790_v2, 0.0 }
 0x1aa   : > { %1854 = vst.msk [vmem:[%s2992_s29 + $0xf8] sm:$0xff] %vm272_vm0, %v1822_v50 }
 0x1ab PF: > { %s13_s14 = sadd.s32 1, %s2611_s14   ;;  %s3174_s12 = smov %s2607_s13 }
 0x1ac   : > { %p10_p5 = scmp.ge.s32.totalorder %s13_s14, 4   ;;  %s3175_s13 = smov %s3177_s15 }
 0x1ae   :  { %12 = sbr.rel (!%p10_p5) target bundleno = 2 (0x2), region = 76 }

// kernel: frontal_cls_forward.39
= control target key start
LH: loop header
LB: loop body
LE: loop exit
PB: predicated region body
PF: predicated region fallthrough
CT: control target
= control target key end

     0   :  { %s2780_s15 = smov 0   ;;  %s2782_s16 = smov 0   ;;  %s3357_s0 = inlined_call_operand.vmem [shape: bf16[512,576], index: 0, kind: input, shape index: {}]   ;;  %s3358_s1 = inlined_call_operand.vmem [shape: bf16[576,64], index: 1, kind: input, shape index: {}]   ;;  %s3359_s2 = inlined_call_operand.vmem [shape: f32[1,64], index: 2, kind: input, shape index: {}]   ;;  %s3360_s3 = inlined_call_operand.vmem [shape: f32[512,64], index: 3, kind: input, shape index: {}]   ;;  %s3361_s4 = inlined_call_operand.vmem [shape: f32[512,64], index: 4, kind: output, shape index: {}]  }
   0x1   :  { %s2784_s17 = smov 0  }
   0x2 LB: > { %s33_s18 = sadd.s32 1, %s2748_s16  ;;  %p2114_p0 = scmp.ge.s32.totalorder %s2752_s17, 1  ;;  %s2752_s17 = sphi %s2784_s17, %s14_s17   ;;  %s2748_s16 = sphi %s2782_s16, %s3363_s16   ;;  %s2744_s15 = sphi %s2780_s15, %s3362_s15  }
   0x3   : > { %p35_p1 = scmp.ge.s32.totalorder %s33_s18, 2  ;;  %p232_p2 = scmp.lt.s32.totalorder %s2752_s17, 3 }
   0x5   : > { %s3365_s18 = smov (%p35_p1, %s33_s18), 0  ;;  %p233_p3 = pnand %p2114_p0, %p232_p2 }
   0x6   : > { %v2582_v0 = vld [vmem:[%s3358_s1 + $0x40] sm:$0xff] (!%p233_p3)   ;;  %s2115_s21 = sshll.u32 (!%p233_p3), %s2744_s15, 5  ;;  %v2584_v2 = vld [vmem:[%s3358_s1 + $0x48] sm:$0xff] (!%p233_p3)   ;;  %v2586_v4 = vld [vmem:[%s3358_s1 + $0x50] sm:$0xff] (!%p233_p3)   ;;  %vm332_vm0 = vcmask (!%p233_p3), 523264  }
   0x7   : > { %236 = sbr.rel (%p233_p3) target bundleno = 429 (0x1ad), region = 36  ;;  %v2583_v1 = vld [vmem:[%s3358_s1] sm:$0xff] (!%p233_p3)   ;;  %2256 = vmatprep.subr.bf16.mxu0 (!%p233_p3), %v2582_v0  ;;  %2540 = vmatprep.subr.bf16.mxu1 (!%p233_p3), %v2582_v0  ;;  %p287_p4 = scmp.lt.s32.totalorder (!%p233_p3), %s2115_s21, 63  ;;  %v2585_v3 = vld [vmem:[%s3358_s1 + $0x8] sm:$0xff] (!%p233_p3)   ;;  %v2587_v5 = vld [vmem:[%s3358_s1 + $0x10] sm:$0xff] (!%p233_p3)  }
   0x8   : > { %2257 = vmatpush3.bf16.msra.mxu0 (!%p233_p3), %v2583_v1  ;;  %2548 = vmatpush3.bf16.msra.mxu1 (!%p233_p3), %v2583_v1  ;;  %v2588_v6 = vld [vmem:[%s3358_s1 + $0x58] sm:$0xff] (!%p233_p3)   ;;  %v2590_v8 = vld [vmem:[%s3358_s1 + $0x60] sm:$0xff] (!%p233_p3)   ;;  %v2592_v10 = vld [vmem:[%s3358_s1 + $0x68] sm:$0xff] (!%p233_p3)  }
   0x9   : > { %2258 = vmatprep.subr.bf16.mxu0 (!%p233_p3), %v2584_v2  ;;  %2541 = vmatprep.subr.bf16.mxu1 (!%p233_p3), %v2584_v2  ;;  %v2589_v7 = vld [vmem:[%s3358_s1 + $0x18] sm:$0xff] (!%p233_p3)   ;;  %v2591_v9 = vld [vmem:[%s3358_s1 + $0x20] sm:$0xff] (!%p233_p3)   ;;  %v2593_v13 = vld [vmem:[%s3358_s1 + $0x28] sm:$0xff] (!%p233_p3)  }
   0xa   : > { %v2594_v14 = vld [vmem:[%s3358_s1 + $0x70] sm:$0xff] (!%p233_p3)   ;;  %v2596_v16 = vld [vmem:[%s3358_s1 + $0x78] sm:$0xff] (!%p233_p3)   ;;  %v2604_v18 = vld [vmem:[%s3358_s1 + $0xc0] sm:$0xff] (!%p233_p3)  }
   0xb   : > { %v2595_v15 = vld [vmem:[%s3358_s1 + $0x30] sm:$0xff] (!%p233_p3)   ;;  %v2597_v17 = vld [vmem:[%s3358_s1 + $0x38] sm:$0xff] (!%p233_p3)   ;;  %v2607_v19 = vld [vmem:[%s3358_s1 + $0x100] sm:$0xff] (!%p233_p3)  }
   0xc   : > { %2259 = vmatpush3.bf16.msra.mxu0 (!%p233_p3), %v2585_v3  ;;  %2549 = vmatpush3.bf16.msra.mxu1 (!%p233_p3), %v2585_v3  ;;  %v2605_v22 = vld [vmem:[%s3358_s1 + $0x80] sm:$0xff] (!%p233_p3)   ;;  %v2606_v23 = vld [vmem:[%s3358_s1 + $0xc8] sm:$0xff] (!%p233_p3)   ;;  %v2615_v28 = vld [vmem:[%s3358_s1 + $0xd0] sm:$0xff] (!%p233_p3)  }
   0xd   : > { %2260 = vmatprep.subr.bf16.mxu0 (!%p233_p3), %v2586_v4  ;;  %2542 = vmatprep.subr.bf16.mxu1 (!%p233_p3), %v2586_v4  ;;  %v2608_v26 = vld [vmem:[%s3358_s1 + $0x88] sm:$0xff] (!%p233_p3)   ;;  %v2616_v30 = vld [vmem:[%s3358_s1 + $0x90] sm:$0xff] (!%p233_p3)   ;;  %v2617_v31 = vld [vmem:[%s3358_s1 + $0xd8] sm:$0xff] (!%p233_p3)  }
   0xe   : > { %s3367_s21 = smov (!%p287_p4, %s2115_s21), 63  ;;  %v2618_v34 = vld [vmem:[%s3358_s1 + $0x98] sm:$0xff]   ;;  %v2638_v35 = vld [vmem:[%s3358_s1 + $0x108] sm:$0xff]   ;;  %v2625_v37 = vld [vmem:[%s3358_s1 + $0xe0] sm:$0xff]  }
   0xf   : > { %s2556_s8 = smul.u32 20, %s3367_s21  ;;  %v2626_v39 = vld [vmem:[%s3358_s1 + $0xa0] sm:$0xff]   ;;  %v2627_v40 = vld [vmem:[%s3358_s1 + $0xe8] sm:$0xff]   ;;  %v2635_v46 = vld [vmem:[%s3358_s1 + $0xf0] sm:$0xff]  }
  0x10   : > { %2261 = vmatpush3.bf16.msra.mxu0 %v2587_v5  ;;  %2550 = vmatpush3.bf16.msra.mxu1 %v2587_v5  ;;  %v2628_v43 = vld [vmem:[%s3358_s1 + $0xa8] sm:$0xff]   ;;  %v2658_v47 = vld [vmem:[%s3358_s1 + $0x110] sm:$0xff]   ;;  %v2637_v49 = vld [vmem:[%s3358_s1 + $0xf8] sm:$0xff]  }
  0x11   : > { %2262 = vmatprep.subr.bf16.mxu0 %v2588_v6  ;;  %2543 = vmatprep.subr.bf16.mxu1 %v2588_v6  ;;  %s2831_s15 = scalar_lea.vmem %s3357_s0, %s2556_s8  ;;  %v2636_v48 = vld [vmem:[%s3358_s1 + $0xb0] sm:$0xff]   ;;  %v2639_v52 = vld [vmem:[%s3358_s1 + $0xb8] sm:$0xff]  }
  0x12   : > { %v2600_v11 = vld [vmem:[%s2831_s15 + $0x4] ss:$20 sps:$4 sm:$0xff]   ;;  %v2598_v20 = vld [vmem:[%s2831_s15] ss:$20 sps:$4 sm:$0xff]   ;;  %v2613_v27 = vld [vmem:[%s2831_s15 + $0x28] ss:$20 sps:$4 sm:$0xff]  }
  0x13   : > { %v2603_v12 = vld [vmem:[%s2831_s15 + $0x1e4] ss:$20 sps:$4 sm:$0xff]   ;;  %1262 = vmatprep.mubr.bf16.mxu0 %v2600_v11  ;;  %v2601_v21 = vld [vmem:[%s2831_s15 + $0x1e0] ss:$20 sps:$4 sm:$0xff]   ;;  %v2614_v29 = vld [vmem:[%s2831_s15 + $0x208] ss:$20 sps:$4 sm:$0xff]  }
  0x14   : > { %2263 = vmatpush3.bf16.msra.mxu0 %v2589_v7  ;;  %2551 = vmatpush3.bf16.msra.mxu1 %v2589_v7  ;;  %v2609_v24 = vld [vmem:[%s2831_s15 + $0x2c] ss:$20 sps:$4 sm:$0xff]   ;;  %v2619_v32 = vld [vmem:[%s2831_s15 + $0x54] ss:$20 sps:$4 sm:$0xff]   ;;  %v2623_v36 = vld [vmem:[%s2831_s15 + $0x50] ss:$20 sps:$4 sm:$0xff]  }
  0x15   : > { %2264 = vmatprep.subr.bf16.mxu0 %v2590_v8  ;;  %2544 = vmatprep.subr.bf16.mxu1 %v2590_v8  ;;  %v2611_v25 = vld [vmem:[%s2831_s15 + $0x20c] ss:$20 sps:$4 sm:$0xff]   ;;  %v2621_v33 = vld [vmem:[%s2831_s15 + $0x234] ss:$20 sps:$4 sm:$0xff]   ;;  %v2624_v38 = vld [vmem:[%s2831_s15 + $0x230] ss:$20 sps:$4 sm:$0xff]  }
  0x16   : > { %1358 = vmatprep.mubr.bf16.mxu1 %v2603_v12  ;;  %v2629_v41 = vld [vmem:[%s2831_s15 + $0x7c] ss:$20 sps:$4 sm:$0xff]   ;;  %v2633_v44 = vld [vmem:[%s2831_s15 + $0x78] ss:$20 sps:$4 sm:$0xff]   ;;  %v2645_v54 = vld [vmem:[%s2831_s15 + $0xa0] ss:$20 sps:$4 sm:$0xff]  }
  0x17   : > { %v2631_v42 = vld [vmem:[%s2831_s15 + $0x25c] ss:$20 sps:$4 sm:$0xff]   ;;  %v2634_v45 = vld [vmem:[%s2831_s15 + $0x258] ss:$20 sps:$4 sm:$0xff]   ;;  %v2648_v57 = vld [vmem:[%s2831_s15 + $0x34] ss:$20 sps:$4 sm:$0xff]  }
  0x18   : > { %2265 = vmatpush3.bf16.msra.mxu0 %v2591_v9  ;;  %2552 = vmatpush3.bf16.msra.mxu1 %v2591_v9  ;;  %v2640_v50 = vld [vmem:[%s2831_s15 + $0xa4] ss:$20 sps:$4 sm:$0xff]   ;;  %v2644_v51 = vld [vmem:[%s2831_s15 + $0xc] ss:$20 sps:$4 sm:$0xff]   ;;  %v2642_v53 = vld [vmem:[%s2831_s15 + $0x8] ss:$20 sps:$4 sm:$0xff]  }
  0x19   : > { %2266 = vmatprep.subr.bf16.mxu0 %v2592_v10  ;;  %2545 = vmatprep.subr.bf16.mxu1 %v2592_v10  ;;  %v2646_v55 = vld [vmem:[%s2831_s15 + $0xcc] ss:$20 sps:$4 sm:$0xff]   ;;  %v2677_v56 = vld [vmem:[%s3358_s1 + $0x118] sm:$0xff]   ;;  %v2651_v59 = vld [vmem:[%s2831_s15 + $0x30] ss:$20 sps:$4 sm:$0xff]  }
  0x1a   : > { %v2650_v58 = vld [vmem:[%s2831_s15 + $0xc8] ss:$20 sps:$4 sm:$0xff]   ;;  %v2656_v62 = vld [vmem:[%s2831_s15 + $0xf0] ss:$20 sps:$4 sm:$0xff]   ;;  %v2657_v63 = vld [vmem:[%s2831_s15 + $0x58] ss:$20 sps:$4 sm:$0xff]  }
  0x1b   : > { %v2652_v60 = vld [vmem:[%s2831_s15 + $0xf4] ss:$20 sps:$4 sm:$0xff]   ;;  %v2654_v61 = vld [vmem:[%s2831_s15 + $0x5c] ss:$20 sps:$4 sm:$0xff]   ;;  %v2661_v1 = vld [vmem:[%s2831_s15 + $0x84] ss:$20 sps:$4 sm:$0xff]  }
  0x1c   : > { %2267 = vmatpush3.bf16.msra.mxu0 %v2593_v13  ;;  %2553 = vmatpush3.bf16.msra.mxu1 %v2593_v13  ;;  %v2659_v0 = vld [vmem:[%s2831_s15 + $0x11c] ss:$20 sps:$4 sm:$0xff]   ;;  %v2663_v2 = vld [vmem:[%s2831_s15 + $0x118] ss:$20 sps:$4 sm:$0xff]   ;;  %v2664_v3 = vld [vmem:[%s2831_s15 + $0x80] ss:$20 sps:$4 sm:$0xff]  }
  0x1d   : > { %2268 = vmatprep.subr.bf16.mxu0 %v2594_v14  ;;  %2546 = vmatprep.subr.bf16.mxu1 %v2594_v14  ;;  %v2665_v4 = vld [vmem:[%s2831_s15 + $0x144] ss:$20 sps:$4 sm:$0xff]   ;;  %v2667_v5 = vld [vmem:[%s2831_s15 + $0xac] ss:$20 sps:$4 sm:$0xff]   ;;  %v2670_v7 = vld [vmem:[%s2831_s15 + $0xa8] ss:$20 sps:$4 sm:$0xff]  }
  0x1e   : > { %v2669_v6 = vld [vmem:[%s2831_s15 + $0x140] ss:$20 sps:$4 sm:$0xff]   ;;  %v2675_v10 = vld [vmem:[%s2831_s15 + $0x168] ss:$20 sps:$4 sm:$0xff]   ;;  %v2676_v11 = vld [vmem:[%s2831_s15 + $0xd0] ss:$20 sps:$4 sm:$0xff]  }
  0x1f   : > { %v2671_v8 = vld [vmem:[%s2831_s15 + $0x16c] ss:$20 sps:$4 sm:$0xff]   ;;  %v2673_v9 = vld [vmem:[%s2831_s15 + $0xd4] ss:$20 sps:$4 sm:$0xff]   ;;  %v2680_v13 = vld [vmem:[%s2831_s15 + $0xfc] ss:$20 sps:$4 sm:$0xff]  }
  0x20   : > { %2269 = vmatpush3.bf16.msra.mxu0 %v2595_v15  ;;  %2554 = vmatpush3.bf16.msra.mxu1 %v2595_v15  ;;  %v2678_v12 = vld [vmem:[%s2831_s15 + $0x194] ss:$20 sps:$4 sm:$0xff]   ;;  %v2682_v14 = vld [vmem:[%s2831_s15 + $0x190] ss:$20 sps:$4 sm:$0xff]   ;;  %v2683_v15 = vld [vmem:[%s2831_s15 + $0xf8] ss:$20 sps:$4 sm:$0xff]  }
  0x21   : > { %2270 = vmatprep.subr.bf16.mxu0 %v2596_v16  ;;  %2547 = vmatprep.subr.bf16.mxu1 %v2596_v16  ;;  %v2684_v16 = vld [vmem:[%s2831_s15 + $0x1bc] ss:$20 sps:$4 sm:$0xff]  }
  0x24   : > { %2271 = vmatpush3.bf16.msra.mxu0 %v2597_v17  ;;  %2555 = vmatpush3.bf16.msra.mxu1 %v2597_v17  ;;  %v2686_v17 = vld [vmem:[%s2831_s15 + $0x124] ss:$20 sps:$4 sm:$0xff]  }
  0x25   : > { %2368 = vmatprep.subr.bf16.mxu1 %v2604_v18  ;;  %2500 = vmatprep.subr.bf16.mxu0 %v2607_v19  ;;  %v2688_v18 = vld [vmem:[%s2831_s15 + $0x1b8] ss:$20 sps:$4 sm:$0xff]  }
  0x27   : > { %1263 = vmatmul.mubr.bf16.vlgmr.msra.gmra.mrb[0].mxu0 %v2598_v20  ;;  %1359 = vmatmul.mubr.bf16.vlgmr.msra.gmra.mrb[0].mxu1 %v2601_v21  ;;  %v2690_v20 = vld [vmem:[%s2831_s15 + $0x14c] ss:$20 sps:$4 sm:$0xff]   ;;  %v2692_v21 = vld [vmem:[%s2831_s15 + $0x10] ss:$20 sps:$4 sm:$0xff]  }
  0x28   : > { %2369 = vmatpush3.bf16.msra.mxu1 %v2605_v22  ;;  %2501 = vmatpush3.bf16.msra.mxu0 %v2607_v19  ;;  %v2689_v19 = vld [vmem:[%s2831_s15 + $0x120] ss:$20 sps:$4 sm:$0xff]   ;;  %v2693_v22 = vld [vmem:[%s2831_s15 + $0x148] ss:$20 sps:$4 sm:$0xff]  }
  0x29   : > { %2370 = vmatprep.subr.bf16.mxu1 %v2606_v23  ;;  %1270 = vmatprep.mubr.bf16.mxu0 %v2609_v24  ;;  %v2694_v23 = vld [vmem:[%s2831_s15 + $0x38] ss:$20 sps:$4 sm:$0xff]   ;;  %v2695_v24 = vld [vmem:[%s2831_s15 + $0x174] ss:$20 sps:$4 sm:$0xff]  }
  0x2a   : > { %1366 = vmatprep.mubr.bf16.mxu1 %v2611_v25  ;;  %2502 = vmatprep.subr.bf16.mxu0 %v2638_v35  ;;  %v2697_v25 = vld [vmem:[%s2831_s15 + $0x60] ss:$20 sps:$4 sm:$0xff]  }
  0x2c   : > { %2371 = vmatpush3.bf16.msra.mxu1 %v2608_v26  ;;  %2503 = vmatpush3.bf16.msra.mxu0 %v2638_v35  ;;  %v2698_v26 = vld [vmem:[%s2831_s15 + $0x170] ss:$20 sps:$4 sm:$0xff]   ;;  %v2709_v35 = vld [vmem:[%s2831_s15 + $0x128] ss:$20 sps:$4 sm:$0xff]  }
  0x2d   : > { %2372 = vmatprep.subr.bf16.mxu1 %v2615_v28  ;;  %2504 = vmatprep.subr.bf16.mxu0 %v2658_v47  ;;  %v2700_v28 = vld [vmem:[%s2831_s15 + $0x19c] ss:$20 sps:$4 sm:$0xff]  }
  0x2f   : > { %1271 = vmatmul.mubr.bf16.gmra.mrb[4].mxu0 %v2613_v27  ;;  %1367 = vmatmul.mubr.bf16.gmra.mrb[4].mxu1 %v2614_v29  ;;  %v2699_v27 = vld [vmem:[%s2831_s15 + $0x88] ss:$20 sps:$4 sm:$0xff]   ;;  %v2702_v29 = vld [vmem:[%s2831_s15 + $0xb0] ss:$20 sps:$4 sm:$0xff]  }
  0x30   : > { %2373 = vmatpush3.bf16.msra.mxu1 %v2616_v30  ;;  %1278 = vmatprep.mubr.bf16.mxu0 %v2619_v32  ;;  %v2703_v30 = vld [vmem:[%s2831_s15 + $0x198] ss:$20 sps:$4 sm:$0xff]  }
  0x31   : > { %2374 = vmatprep.subr.bf16.mxu1 %v2617_v31  ;;  %1374 = vmatprep.mubr.bf16.mxu1 %v2621_v33  ;;  %v2704_v31 = vld [vmem:[%s2831_s15 + $0xd8] ss:$20 sps:$4 sm:$0xff]   ;;  %v2707_v33 = vld [vmem:[%s2831_s15 + $0x100] ss:$20 sps:$4 sm:$0xff]  }
  0x32   : > { %2505 = vmatpush3.bf16.msra.mxu0 %v2658_v47  ;;  %v2705_v32 = vld [vmem:[%s2831_s15 + $0x1c4] ss:$20 sps:$4 sm:$0xff]  }
  0x33   : > { %2506 = vmatprep.subr.bf16.mxu0 %v2677_v56  ;;  %v2724_v47 = vld [vmem:[%s2831_s15 + $0x218] ss:$20 sps:$4 sm:$0xff]  }
  0x34   : > { %2375 = vmatpush3.bf16.msra.mxu1 %v2618_v34  ;;  %v2708_v34 = vld [vmem:[%s2831_s15 + $0x1c0] ss:$20 sps:$4 sm:$0xff]  }
  0x35   : > { %2376 = vmatprep.subr.bf16.mxu1 %v2625_v37  ;;  %v2712_v37 = vld [vmem:[%s2831_s15 + $0x150] ss:$20 sps:$4 sm:$0xff]  }
  0x36   : > { %2507 = vmatpush3.bf16.msra.mxu0 %v2677_v56 }
  0x37   : > { %1279 = vmatmul.mubr.bf16.gmra.mrb[8].mxu0 %v2623_v36  ;;  %1375 = vmatmul.mubr.bf16.gmra.mrb[8].mxu1 %v2624_v38  ;;  %v2710_v36 = vld [vmem:[%s2831_s15 + $0x1ec] ss:$20 sps:$4 sm:$0xff]   ;;  %v2713_v38 = vld [vmem:[%s2831_s15 + $0x1e8] ss:$20 sps:$4 sm:$0xff]  }
  0x38   : > { %2377 = vmatpush3.bf16.msra.mxu1 %v2626_v39  ;;  %1286 = vmatprep.mubr.bf16.mxu0 %v2629_v41  ;;  %v2714_v39 = vld [vmem:[%s2831_s15 + $0x178] ss:$20 sps:$4 sm:$0xff]   ;;  %v2717_v41 = vld [vmem:[%s2831_s15 + $0x1a0] ss:$20 sps:$4 sm:$0xff]  }
  0x39   : > { %2378 = vmatprep.subr.bf16.mxu1 %v2627_v40  ;;  %1382 = vmatprep.mubr.bf16.mxu1 %v2631_v42  ;;  %v2715_v40 = vld [vmem:[%s2831_s15 + $0x214] ss:$20 sps:$4 sm:$0xff]   ;;  %v2718_v42 = vld [vmem:[%s2831_s15 + $0x210] ss:$20 sps:$4 sm:$0xff]  }
  0x3c   : > { %2379 = vmatpush3.bf16.msra.mxu1 %v2628_v43  ;;  %v2719_v43 = vld [vmem:[%s2831_s15 + $0x1c8] ss:$20 sps:$4 sm:$0xff]  }
  0x3d   : > { %2380 = vmatprep.subr.bf16.mxu1 %v2635_v46  ;;  %v2723_v46 = vld [vmem:[%s2831_s15 + $0x238] ss:$20 sps:$4 sm:$0xff]  }
  0x3f   : > { %1287 = vmatmul.mubr.bf16.gmra.mrb[12].mxu0 %v2633_v44  ;;  %1383 = vmatmul.mubr.bf16.gmra.mrb[12].mxu1 %v2634_v45  ;;  %v2720_v44 = vld [vmem:[%s2831_s15 + $0x23c] ss:$20 sps:$4 sm:$0xff]  }
  0x40   : > { %2381 = vmatpush3.bf16.msra.mxu1 %v2636_v48  ;;  %1294 = vmatprep.mubr.bf16.mxu0 %v2640_v50  ;;  %v2722_v45 = vld [vmem:[%s2831_s15 + $0x1f0] ss:$20 sps:$4 sm:$0xff]   ;;  %v2728_v50 = vld [vmem:[%s2831_s15 + $0x260] ss:$20 sps:$4 sm:$0xff]  }
  0x41   : > { %2382 = vmatprep.subr.bf16.mxu1 %v2637_v49  ;;  %1423 = vmatprep.mubr.bf16.mxu1 %v2644_v51  ;;  %v2725_v48 = vld [vmem:[%s2831_s15 + $0x264] ss:$20 sps:$4 sm:$0xff]   ;;  %v2727_v49 = vld [vmem:[%s2831_s15 + $0x240] ss:$20 sps:$4 sm:$0xff]   ;;  %v2729_v51 = vld [vmem:[%s2831_s15 + $0x268] ss:$20 sps:$4 sm:$0xff]  }
  0x42   : > { %s2118_s15 = sshll.u32 %s3367_s21, 3 }
  0x43   : > { %s3126_s8 = scalar_lea.vmem %s3360_s3, %s2118_s15  ;;  %s3158_s13 = scalar_lea.vmem %s3361_s4, %s2118_s15 }
  0x44   : > { %2383 = vmatpush3.bf16.msra.mxu1 %v2639_v52  ;;  %v2754_v52 = vmov 0.0  }
  0x45   : > { %335 = vst.msk [vmem:[#allocation2 + $0x10] sm:$0xff] %vm332_vm0, %v2754_v52  ;;  %333 = vst.msk [vmem:[#allocation2] sm:$0xff] %vm332_vm0, %v2754_v52 }
  0x46   : > { %334 = vst.msk [vmem:[#allocation2 + $0x8] sm:$0xff] %vm332_vm0, %v2754_v52  ;;  %336 = vst.msk [vmem:[#allocation2 + $0x18] sm:$0xff] %vm332_vm0, %v2754_v52 }
  0x47   : > { %1295 = vmatmul.mubr.bf16.gmra.mrb[16].mxu0 %v2645_v54  ;;  %1424 = vmatmul.mubr.bf16.vlgmr.msra.gmra.mrb[16].mxu1 %v2642_v53  ;;  %337 = vst.msk [vmem:[#allocation2 + $0x20] sm:$0xff] %vm332_vm0, %v2754_v52  ;;  %338 = vst.msk [vmem:[#allocation2 + $0x28] sm:$0xff] %vm332_vm0, %v2754_v52 }
  0x48   : > { %1302 = vmatprep.mubr.bf16.mxu0 %v2646_v55  ;;  %1431 = vmatprep.mubr.bf16.mxu1 %v2648_v57  ;;  %339 = vst.msk [vmem:[#allocation2 + $0x30] sm:$0xff] %vm332_vm0, %v2754_v52  ;;  %340 = vst.msk [vmem:[#allocation2 + $0x38] sm:$0xff] %vm332_vm0, %v2754_v52 }
  0x49   : > { %341 = vst.msk [vmem:[#allocation2 + $0x40] sm:$0xff] %vm332_vm0, %v2754_v52  ;;  %342 = vst.msk [vmem:[#allocation2 + $0x48] sm:$0xff] %vm332_vm0, %v2754_v52 }
  0x4a   : > { %343 = vst.msk [vmem:[#allocation2 + $0x50] sm:$0xff] %vm332_vm0, %v2754_v52  ;;  %344 = vst.msk [vmem:[#allocation2 + $0x58] sm:$0xff] %vm332_vm0, %v2754_v52 }
  0x4b   : > { %345 = vst.msk [vmem:[#allocation2 + $0x60] sm:$0xff] %vm332_vm0, %v2754_v52  ;;  %346 = vst.msk [vmem:[#allocation2 + $0x68] sm:$0xff] %vm332_vm0, %v2754_v52 }
  0x4c   : > { %347 = vst.msk [vmem:[#allocation2 + $0x70] sm:$0xff] %vm332_vm0, %v2754_v52  ;;  %348 = vst.msk [vmem:[#allocation2 + $0x78] sm:$0xff] %vm332_vm0, %v2754_v52 }
  0x4d   : > { %349 = vst.msk [vmem:[#allocation2 + $0x80] sm:$0xff] %vm332_vm0, %v2754_v52  ;;  %350 = vst.msk [vmem:[#allocation2 + $0x88] sm:$0xff] %vm332_vm0, %v2754_v52 }
  0x4e   : > { %351 = vst.msk [vmem:[#allocation2 + $0x90] sm:$0xff] %vm332_vm0, %v2754_v52  ;;  %352 = vst.msk [vmem:[#allocation2 + $0x98] sm:$0xff] %vm332_vm0, %v2754_v52 }
  0x4f   : > { %1303 = vmatmul.mubr.bf16.gmra.mrb[20].mxu0 %v2650_v58  ;;  %1432 = vmatmul.mubr.bf16.gmra.mrb[20].mxu1 %v2651_v59  ;;  %353 = vst.msk [vmem:[#allocation2 + $0xa0] sm:$0xff] %vm332_vm0, %v2754_v52  ;;  %354 = vst.msk [vmem:[#allocation2 + $0xa8] sm:$0xff] %vm332_vm0, %v2754_v52 }
  0x50   : > { %1310 = vmatprep.mubr.bf16.mxu0 %v2652_v60  ;;  %1439 = vmatprep.mubr.bf16.mxu1 %v2654_v61  ;;  %355 = vst.msk [vmem:[#allocation2 + $0xb0] sm:$0xff] %vm332_vm0, %v2754_v52  ;;  %356 = vst.msk [vmem:[#allocation2 + $0xb8] sm:$0xff] %vm332_vm0, %v2754_v52 }
  0x51   : > { %357 = vst.msk [vmem:[#allocation2 + $0xc0] sm:$0xff] %vm332_vm0, %v2754_v52  ;;  %358 = vst.msk [vmem:[#allocation2 + $0xc8] sm:$0xff] %vm332_vm0, %v2754_v52 }
  0x52   : > { %359 = vst.msk [vmem:[#allocation2 + $0xd0] sm:$0xff] %vm332_vm0, %v2754_v52  ;;  %360 = vst.msk [vmem:[#allocation2 + $0xd8] sm:$0xff] %vm332_vm0, %v2754_v52 }
  0x53   : > { %361 = vst.msk [vmem:[#allocation2 + $0xe0] sm:$0xff] %vm332_vm0, %v2754_v52  ;;  %362 = vst.msk [vmem:[#allocation2 + $0xe8] sm:$0xff] %vm332_vm0, %v2754_v52 }
  0x54   : > { %363 = vst.msk [vmem:[#allocation2 + $0xf0] sm:$0xff] %vm332_vm0, %v2754_v52  ;;  %364 = vst.msk [vmem:[#allocation2 + $0xf8] sm:$0xff] %vm332_vm0, %v2754_v52 }
  0x57   : > { %1311 = vmatmul.mubr.bf16.gmra.mrb[24].mxu0 %v2656_v62  ;;  %1440 = vmatmul.mubr.bf16.gmra.mrb[24].mxu1 %v2657_v63 }
  0x58   : > { %1318 = vmatprep.mubr.bf16.mxu0 %v2659_v0  ;;  %1447 = vmatprep.mubr.bf16.mxu1 %v2661_v1 }
  0x5f   : > { %1319 = vmatmul.mubr.bf16.gmra.mrb[28].mxu0 %v2663_v2  ;;  %1448 = vmatmul.mubr.bf16.gmra.mrb[28].mxu1 %v2664_v3 }
  0x60   : > { %1326 = vmatprep.mubr.bf16.mxu0 %v2665_v4  ;;  %1455 = vmatprep.mubr.bf16.mxu1 %v2667_v5 }
  0x67   : > { %1327 = vmatmul.mubr.bf16.gmra.mrb[32].mxu0 %v2669_v6  ;;  %1456 = vmatmul.mubr.bf16.gmra.mrb[32].mxu1 %v2670_v7 }
  0x68   : > { %1334 = vmatprep.mubr.bf16.mxu0 %v2671_v8  ;;  %1463 = vmatprep.mubr.bf16.mxu1 %v2673_v9 }
  0x6f   : > { %1335 = vmatmul.mubr.bf16.gmra.mrb[36].mxu0 %v2675_v10  ;;  %1464 = vmatmul.mubr.bf16.gmra.mrb[36].mxu1 %v2676_v11 }
  0x70   : > { %1342 = vmatprep.mubr.bf16.mxu0 %v2678_v12  ;;  %1471 = vmatprep.mubr.bf16.mxu1 %v2680_v13 }
  0x77   : > { %1343 = vmatmul.mubr.bf16.gmra.mrb[40].mxu0 %v2682_v14  ;;  %1472 = vmatmul.mubr.bf16.gmra.mrb[40].mxu1 %v2683_v15 }
  0x78   : > { %1350 = vmatprep.mubr.bf16.mxu0 %v2684_v16  ;;  %1479 = vmatprep.mubr.bf16.mxu1 %v2686_v17 }
  0x7f   : > { %1351 = vmatmul.mubr.bf16.gmra.mrb[44].mxu0 %v2688_v18  ;;  %1480 = vmatmul.mubr.bf16.gmra.mrb[44].mxu1 %v2689_v19 }
  0x80   : > { %1487 = vmatprep.mubr.bf16.mxu1 %v2690_v20  ;;  %2508 = vmatprep.mubr.msk.bf16.mxu0 %vm332_vm0, %v2692_v21 }
  0x87   : > { %1488 = vmatmul.mubr.bf16.gmra.mrb[48].mxu1 %v2693_v22  ;;  %2509 = vmatmul.mubr.msk.bf16.vlgmr.msra.gmra.mrb[48].mxu0 %vm332_vm0, %v2694_v23 }
  0x88   : > { %1495 = vmatprep.mubr.bf16.mxu1 %v2695_v24  ;;  %2512 = vmatprep.mubr.msk.bf16.mxu0 %vm332_vm0, %v2697_v25 }
  0x8f   : > { %1496 = vmatmul.mubr.bf16.gmra.mrb[52].mxu1 %v2698_v26  ;;  %2513 = vmatmul.mubr.msk.bf16.gmra.mrb[52].mxu0 %vm332_vm0, %v2699_v27 }
  0x90   : > { %1503 = vmatprep.mubr.bf16.mxu1 %v2700_v28  ;;  %2516 = vmatprep.mubr.msk.bf16.mxu0 %vm332_vm0, %v2702_v29 }
  0x97   : > { %1504 = vmatmul.mubr.bf16.gmra.mrb[56].mxu1 %v2703_v30  ;;  %2517 = vmatmul.mubr.msk.bf16.gmra.mrb[56].mxu0 %vm332_vm0, %v2704_v31 }
  0x98   : > { %1511 = vmatprep.mubr.bf16.mxu1 %v2705_v32  ;;  %2520 = vmatprep.mubr.msk.bf16.mxu0 %vm332_vm0, %v2707_v33 }
  0x9f   : > { %1512 = vmatmul.mubr.bf16.gmra.mrb[60].mxu1 %v2708_v34  ;;  %2521 = vmatmul.mubr.msk.bf16.gmra.mrb[60].mxu0 %vm332_vm0, %v2709_v35 }
  0xa0   : > { %1519 = vmatprep.mubr.bf16.mxu1 %v2710_v36  ;;  %2524 = vmatprep.mubr.msk.bf16.mxu0 %vm332_vm0, %v2712_v37 }
  0xa7   : > { %1520 = vmatmul.mubr.bf16.gmra.mrb[64].mxu1 %v2713_v38  ;;  %2525 = vmatmul.mubr.msk.bf16.gmra.mrb[64].mxu0 %vm332_vm0, %v2714_v39 }
  0xa8   : > { %1527 = vmatprep.mubr.bf16.mxu1 %v2715_v40  ;;  %2528 = vmatprep.mubr.msk.bf16.mxu0 %vm332_vm0, %v2717_v41 }
  0xaf   : > { %1528 = vmatmul.mubr.bf16.gmra.mrb[68].mxu1 %v2718_v42  ;;  %2529 = vmatmul.mubr.msk.bf16.gmra.mrb[68].mxu0 %vm332_vm0, %v2719_v43 }
  0xb0   : > { %1535 = vmatprep.mubr.bf16.mxu1 %v2720_v44  ;;  %2532 = vmatprep.mubr.msk.bf16.mxu0 %vm332_vm0, %v2722_v45 }
  0xb7   : > { %1536 = vmatmul.mubr.bf16.gmra.mrb[72].mxu1 %v2723_v46  ;;  %2533 = vmatmul.mubr.msk.bf16.gmra.mrb[72].mxu0 %vm332_vm0, %v2724_v47 }
  0xb8   : > { %1543 = vmatprep.mubr.bf16.mxu1 %v2725_v48  ;;  %2536 = vmatprep.mubr.msk.bf16.mxu0 %vm332_vm0, %v2727_v49 }
  0xbf   : > { %1544 = vmatmul.mubr.bf16.gmra.mrb[76].mxu1 %v2728_v50  ;;  %2537 = vmatmul.mubr.msk.bf16.gmra.mrb[76].mxu0 %vm332_vm0, %v2729_v51 }
  0xfa   : > { %v2344_v53 = vpop.f32.mrb[0].mxu1  ;;  %v2272_v54 = vpop.f32.mrb[0].mxu0 }
  0xfb   : > { %v2345_v55 = vpop.f32.mrb[1].mxu1  ;;  %v2273_v56 = vpop.f32.mrb[1].mxu0 }
  0xfc   : > { %v3042_v57 = vadd.f32 %v2345_v55, %v2344_v53  ;;  %v2347_v58 = vpop.f32.mrb[2].mxu1  ;;  %v2274_v59 = vadd.f32 %v2273_v56, %v2272_v54  ;;  %v2275_v60 = vpop.f32.mrb[2].mxu0 }
  0xfd   : > { %v2348_v61 = vpop.f32.mrb[3].mxu1  ;;  %v2276_v62 = vpop.f32.mrb[3].mxu0 }
  0xfe   : > { %v3044_v63 = vadd.f32 %v2348_v61, %v2347_v58  ;;  %v2277_v0 = vadd.f32 %v2276_v62, %v2275_v60 }
 0x102   : > { %v2350_v1 = vpop.f32.mrb[4].mxu1  ;;  %v2278_v2 = vpop.f32.mrb[4].mxu0 }
 0x103   : > { %v2351_v3 = vpop.f32.mrb[5].mxu1  ;;  %v2279_v4 = vpop.f32.mrb[5].mxu0 }
 0x104   : > { %v3046_v5 = vadd.f32 %v2351_v3, %v2350_v1  ;;  %v2353_v6 = vpop.f32.mrb[6].mxu1  ;;  %v2280_v7 = vadd.f32 %v2279_v4, %v2278_v2  ;;  %v2281_v8 = vpop.f32.mrb[6].mxu0 }
 0x105   : > { %v2354_v9 = vpop.f32.mrb[7].mxu1  ;;  %v2282_v10 = vpop.f32.mrb[7].mxu0 }
 0x106   : > { %v3048_v11 = vadd.f32 %v2354_v9, %v2353_v6  ;;  %v2283_v12 = vadd.f32 %v2282_v10, %v2281_v8 }
 0x10a   : > { %v2356_v13 = vpop.f32.mrb[8].mxu1  ;;  %v2284_v14 = vpop.f32.mrb[8].mxu0 }
 0x10b   : > { %v2357_v15 = vpop.f32.mrb[9].mxu1  ;;  %v2285_v16 = vpop.f32.mrb[9].mxu0 }
 0x10c   : > { %v3050_v17 = vadd.f32 %v2357_v15, %v2356_v13  ;;  %v2359_v18 = vpop.f32.mrb[10].mxu1  ;;  %v2286_v19 = vadd.f32 %v2285_v16, %v2284_v14  ;;  %v2287_v20 = vpop.f32.mrb[10].mxu0 }
 0x10d   : > { %v2360_v21 = vpop.f32.mrb[11].mxu1  ;;  %v2288_v22 = vpop.f32.mrb[11].mxu0 }
 0x10e   : > { %v3052_v23 = vadd.f32 %v2360_v21, %v2359_v18  ;;  %v2289_v24 = vadd.f32 %v2288_v22, %v2287_v20 }
 0x112   : > { %v2362_v25 = vpop.f32.mrb[12].mxu1  ;;  %v2290_v26 = vpop.f32.mrb[12].mxu0 }
 0x113   : > { %v2363_v27 = vpop.f32.mrb[13].mxu1  ;;  %v2291_v28 = vpop.f32.mrb[13].mxu0 }
 0x114   : > { %v3054_v29 = vadd.f32 %v2363_v27, %v2362_v25  ;;  %v2365_v30 = vpop.f32.mrb[14].mxu1  ;;  %v2292_v31 = vadd.f32 %v2291_v28, %v2290_v26  ;;  %v2293_v32 = vpop.f32.mrb[14].mxu0 }
 0x115   : > { %v2366_v33 = vpop.f32.mrb[15].mxu1  ;;  %v2294_v34 = vpop.f32.mrb[15].mxu0 }
 0x116   : > { %v3056_v35 = vadd.f32 %v2366_v33, %v2365_v30  ;;  %v2295_v36 = vadd.f32 %v2294_v34, %v2293_v32 }
 0x11a   : > { %v2384_v37 = vpop.f32.mrb[16].mxu1  ;;  %v2296_v38 = vpop.f32.mrb[16].mxu0 }
 0x11b   : > { %v2385_v39 = vpop.f32.mrb[17].mxu1  ;;  %v2297_v40 = vpop.f32.mrb[17].mxu0 }
 0x11c   : > { %v2386_v41 = vadd.f32 %v2385_v39, %v2384_v37  ;;  %v2387_v42 = vpop.f32.mrb[18].mxu1  ;;  %v2298_v43 = vadd.f32 %v2297_v40, %v2296_v38  ;;  %v2299_v44 = vpop.f32.mrb[18].mxu0 }
 0x11d   : > { %v2388_v45 = vpop.f32.mrb[19].mxu1  ;;  %v2300_v46 = vpop.f32.mrb[19].mxu0 }
 0x11e   : > { %v2389_v47 = vadd.f32 %v2388_v45, %v2387_v42  ;;  %v2301_v48 = vadd.f32 %v2300_v46, %v2299_v44  ;;  %v3058_v49 = vadd.f32 %v2386_v41, %v2274_v59 }
 0x120   : > { %v3060_v50 = vadd.f32 %v2389_v47, %v2277_v0 }
 0x122   : > { %v2390_v51 = vpop.f32.mrb[20].mxu1  ;;  %v2302_v52 = vpop.f32.mrb[20].mxu0 }
 0x123   : > { %v2391_v53 = vpop.f32.mrb[21].mxu1  ;;  %v2303_v54 = vpop.f32.mrb[21].mxu0 }
 0x124   : > { %v2392_v55 = vadd.f32 %v2391_v53, %v2390_v51  ;;  %v2393_v56 = vpop.f32.mrb[22].mxu1  ;;  %v2304_v58 = vadd.f32 %v2303_v54, %v2302_v52  ;;  %v2305_v60 = vpop.f32.mrb[22].mxu0 }
 0x125   : > { %v2394_v61 = vpop.f32.mrb[23].mxu1  ;;  %v2306_v62 = vpop.f32.mrb[23].mxu0 }
 0x126   : > { %v2395_v1 = vadd.f32 %v2394_v61, %v2393_v56  ;;  %v2307_v2 = vadd.f32 %v2306_v62, %v2305_v60  ;;  %v3062_v3 = vadd.f32 %v2392_v55, %v2280_v7 }
 0x128   : > { %v3064_v4 = vadd.f32 %v2395_v1, %v2283_v12 }
 0x12a   : > { %v2396_v59 = vpop.f32.mrb[24].mxu1  ;;  %v2308_v6 = vpop.f32.mrb[24].mxu0 }
 0x12b   : > { %v2397_v0 = vpop.f32.mrb[25].mxu1  ;;  %v2309_v8 = vpop.f32.mrb[25].mxu0 }
 0x12c   : > { %v2398_v9 = vadd.f32 %v2397_v0, %v2396_v59  ;;  %v2399_v10 = vpop.f32.mrb[26].mxu1  ;;  %v2310_v13 = vadd.f32 %v2309_v8, %v2308_v6  ;;  %v2311_v14 = vpop.f32.mrb[26].mxu0 }
 0x12d   : > { %v2400_v15 = vpop.f32.mrb[27].mxu1  ;;  %v2312_v16 = vpop.f32.mrb[27].mxu0 }
 0x12e   : > { %v2401_v18 = vadd.f32 %v2400_v15, %v2399_v10  ;;  %v2313_v20 = vadd.f32 %v2312_v16, %v2311_v14  ;;  %v3066_v21 = vadd.f32 %v2398_v9, %v2286_v19 }
 0x130   : > { %v3068_v22 = vadd.f32 %v2401_v18, %v2289_v24 }
 0x132   : > { %v2402_v7 = vpop.f32.mrb[28].mxu1  ;;  %v2314_v25 = vpop.f32.mrb[28].mxu0 }
 0x133   : > { %v2403_v12 = vpop.f32.mrb[29].mxu1  ;;  %v2315_v26 = vpop.f32.mrb[29].mxu0 }
 0x134   : > { %v2404_v27 = vadd.f32 %v2403_v12, %v2402_v7  ;;  %v2405_v28 = vpop.f32.mrb[30].mxu1  ;;  %v2316_v30 = vadd.f32 %v2315_v26, %v2314_v25  ;;  %v2317_v32 = vpop.f32.mrb[30].mxu0 }
 0x135   : > { %v2406_v33 = vpop.f32.mrb[31].mxu1  ;;  %v2318_v34 = vpop.f32.mrb[31].mxu0 }
 0x136   : > { %v2407_v37 = vadd.f32 %v2406_v33, %v2405_v28  ;;  %v2319_v38 = vadd.f32 %v2318_v34, %v2317_v32  ;;  %v3070_v39 = vadd.f32 %v2404_v27, %v2292_v31 }
 0x138   : > { %v3072_v40 = vadd.f32 %v2407_v37, %v2295_v36 }
 0x13a   : > { %v2408_v19 = vpop.f32.mrb[32].mxu1  ;;  %v2320_v41 = vpop.f32.mrb[32].mxu0 }
 0x13b   : > { %v2409_v24 = vpop.f32.mrb[33].mxu1  ;;  %v2321_v42 = vpop.f32.mrb[33].mxu0 }
 0x13c   : > { %v2410_v44 = vadd.f32 %v2409_v24, %v2408_v19  ;;  %v2411_v45 = vpop.f32.mrb[34].mxu1  ;;  %v3074_v46 = vadd.f32 %v2321_v42, %v2320_v41  ;;  %v2323_v47 = vpop.f32.mrb[34].mxu0 }
 0x13d   : > { %v2412_v51 = vpop.f32.mrb[35].mxu1  ;;  %v2324_v52 = vpop.f32.mrb[35].mxu0 }
 0x13e   : > { %v2413_v53 = vadd.f32 %v2412_v51, %v2411_v45  ;;  %v3076_v54 = vadd.f32 %v2324_v52, %v2323_v47  ;;  %v3078_v55 = vadd.f32 %v2410_v44, %v2298_v43 }
 0x140   : > { %v3080_v31 = vadd.f32 %v2413_v53, %v2301_v48 }
 0x142   : > { %v2414_v36 = vpop.f32.mrb[36].mxu1  ;;  %v2326_v56 = vpop.f32.mrb[36].mxu0 }
 0x143   : > { %v2415_v60 = vpop.f32.mrb[37].mxu1  ;;  %v2327_v61 = vpop.f32.mrb[37].mxu0 }
 0x144   : > { %v2416_v62 = vadd.f32 %v2415_v60, %v2414_v36  ;;  %v2417_v1 = vpop.f32.mrb[38].mxu1  ;;  %v3082_v59 = vadd.f32 %v2327_v61, %v2326_v56  ;;  %v2329_v6 = vpop.f32.mrb[38].mxu0  ;;  %v367_v56 = vld [vmem:[#allocation2 + $0x10] sm:$0xff] }
 0x145   : > { %v2418_v0 = vpop.f32.mrb[39].mxu1  ;;  %v2330_v8 = vpop.f32.mrb[39].mxu0 }
 0x146   : > { %v2419_v9 = vadd.f32 %v2418_v0, %v2417_v1  ;;  %v3084_v10 = vadd.f32 %v2330_v8, %v2329_v6  ;;  %v3086_v14 = vadd.f32 %v2416_v62, %v2304_v58  ;;  %v365_v1 = vld [vmem:[#allocation2] sm:$0xff] }
 0x148   : > { %v3088_v43 = vadd.f32 %v2419_v9, %v2307_v2 }
 0x14a   : > { %v2420_v48 = vpop.f32.mrb[40].mxu1  ;;  %v2332_v15 = vpop.f32.mrb[40].mxu0 }
 0x14b   : > { %v2421_v16 = vpop.f32.mrb[41].mxu1  ;;  %v2333_v18 = vpop.f32.mrb[41].mxu0 }
 0x14c   : > { %v2422_v7 = vadd.f32 %v2421_v16, %v2420_v48  ;;  %v2423_v25 = vpop.f32.mrb[42].mxu1  ;;  %v3090_v12 = vadd.f32 %v2333_v18, %v2332_v15  ;;  %v2335_v26 = vpop.f32.mrb[42].mxu0  ;;  %v368_v48 = vld [vmem:[#allocation2 + $0x18] sm:$0xff]  ;;  %v366_v18 = vld [vmem:[#allocation2 + $0x8] sm:$0xff] }
 0x14d   : > { %v2424_v27 = vpop.f32.mrb[43].mxu1  ;;  %v2336_v28 = vpop.f32.mrb[43].mxu0 }
 0x14e   : > { %v2425_v32 = vadd.f32 %v2424_v27, %v2423_v25  ;;  %v3092_v33 = vadd.f32 %v2336_v28, %v2335_v26  ;;  %v3094_v34 = vadd.f32 %v2422_v7, %v2310_v13 }
 0x150   : > { %v3096_v58 = vadd.f32 %v2425_v32, %v2313_v20 }
 0x152   : > { %v2426_v2 = vpop.f32.mrb[44].mxu1  ;;  %v2338_v37 = vpop.f32.mrb[44].mxu0 }
 0x153   : > { %v2427_v19 = vpop.f32.mrb[45].mxu1  ;;  %v2339_v41 = vpop.f32.mrb[45].mxu0 }
 0x154   : > { %v2428_v24 = vadd.f32 %v2427_v19, %v2426_v2  ;;  %v2429_v42 = vpop.f32.mrb[46].mxu1  ;;  %v3098_v44 = vadd.f32 %v2339_v41, %v2338_v37  ;;  %v2341_v45 = vpop.f32.mrb[46].mxu0  ;;  %v371_v2 = vld [vmem:[#allocation2 + $0x30] sm:$0xff]  ;;  %v369_v19 = vld [vmem:[#allocation2 + $0x20] sm:$0xff] }
 0x155   : > { %v2430_v47 = vpop.f32.mrb[47].mxu1  ;;  %v2342_v51 = vpop.f32.mrb[47].mxu0  ;;  %v3132_v41 = vld [vmem:[%s3359_s2] ss:$0 sm:$0xff] }
 0x156   : > { %v2431_v52 = vadd.f32 %v2430_v47, %v2429_v42  ;;  %v3100_v53 = vadd.f32 %v2342_v51, %v2341_v45  ;;  %v3102_v36 = vadd.f32 %v2428_v24, %v2316_v30  ;;  %v372_v47 = vld [vmem:[#allocation2 + $0x38] sm:$0xff] }
 0x158   : > { %v3104_v13 = vadd.f32 %v2431_v52, %v2319_v38 }
 0x15a   : > { %v2432_v20 = vpop.f32.mrb[48].mxu1  ;;  %v2510_v60 = vpop.f32.mrb[48].mxu0 }
 0x15b   : > { %v1595_v61 = vadd.f32 %v2510_v60, %v3062_v3  ;;  %v2433_v62 = vpop.f32.mrb[49].mxu1  ;;  %v1586_v6 = vpop.f32.mrb[49].mxu0 }
 0x15c   : > { %v2434_v0 = vadd.f32 %v2433_v62, %v2432_v20  ;;  %v1587_v8 = vadd.f32 %v1586_v6, %v3058_v49  ;;  %v2435_v9 = vpop.f32.mrb[50].mxu1  ;;  %v2511_v15 = vpop.f32.mrb[50].mxu0  ;;  %v1853_v62 = vld [vmem:[%s3126_s8 + $0x10] sm:$0xff] }
 0x15d   : > { %v1715_v16 = vadd.f32 %v1595_v61, %v367_v56  ;;  %v1598_v30 = vadd.f32 %v2511_v15, %v3064_v4  ;;  %v2436_v38 = vpop.f32.mrb[51].mxu1  ;;  %v1589_v7 = vpop.f32.mrb[51].mxu0  ;;  %v370_v56 = vld [vmem:[#allocation2 + $0x28] sm:$0xff] }
 0x15e   : > { %v1713_v25 = vadd.f32 %v1587_v8, %v365_v1  ;;  %v2437_v26 = vadd.f32 %v2436_v38, %v2435_v9  ;;  %v1590_v3 = vadd.f32 %v1589_v7, %v3060_v50  ;;  %v3111_v27 = vadd.f32 %v2434_v0, %v3074_v46 }
 0x15f   : > { %1747 = vst.msk [vmem:[#allocation2 + $0x10] sm:$0xff] %vm332_vm0, %v1715_v16  ;;  %v1716_v49 = vadd.f32 %v1598_v30, %v368_v48  ;;  %v1851_v48 = vld [vmem:[%s3126_s8] sm:$0xff]  ;;  %v1854_v30 = vld [vmem:[%s3126_s8 + $0x18] sm:$0xff] }
 0x160   : > { %1745 = vst.msk [vmem:[#allocation2] sm:$0xff] %vm332_vm0, %v1713_v25  ;;  %v1714_v28 = vadd.f32 %v1590_v3, %v366_v18  ;;  %v3117_v4 = vadd.f32 %v2437_v26, %v3076_v54  ;;  %v1852_v25 = vld [vmem:[%s3126_s8 + $0x8] sm:$0xff] }
 0x161   : > { %1748 = vst.msk [vmem:[#allocation2 + $0x18] sm:$0xff] %vm332_vm0, %v1716_v49  ;;  %v375_v49 = vld [vmem:[#allocation2 + $0x50] sm:$0xff] }
 0x162   : > { %1746 = vst.msk [vmem:[#allocation2 + $0x8] sm:$0xff] %vm332_vm0, %v1714_v28  ;;  %v2438_v32 = vpop.f32.mrb[52].mxu1  ;;  %v2514_v50 = vpop.f32.mrb[52].mxu0 }
 0x163   : > { %v1611_v46 = vadd.f32 %v2514_v50, %v3070_v39  ;;  %v2439_v37 = vpop.f32.mrb[53].mxu1  ;;  %v1602_v54 = vpop.f32.mrb[53].mxu0 }
 0x164   : > { %v2440_v24 = vadd.f32 %v2439_v37, %v2438_v32  ;;  %v1603_v42 = vadd.f32 %v1602_v54, %v3066_v21  ;;  %v2441_v45 = vpop.f32.mrb[54].mxu1  ;;  %v2515_v51 = vpop.f32.mrb[54].mxu0  ;;  %v373_v37 = vld [vmem:[#allocation2 + $0x40] sm:$0xff] }
 0x165   : > { %v1719_v52 = vadd.f32 %v1611_v46, %v371_v2  ;;  %v1614_v20 = vadd.f32 %v2515_v51, %v3072_v40  ;;  %v2442_v39 = vpop.f32.mrb[55].mxu1  ;;  %v1605_v60 = vpop.f32.mrb[55].mxu0  ;;  %v376_v51 = vld [vmem:[#allocation2 + $0x58] sm:$0xff] }
 0x166   : > { %v1782_v61 = vld [vmem:[#allocation2 + $0x10] sm:$0xff]  ;;  %v1717_v1 = vadd.f32 %v1603_v42, %v369_v19  ;;  %v2443_v6 = vadd.f32 %v2442_v39, %v2441_v45  ;;  %v1606_v0 = vadd.f32 %v1605_v60, %v3068_v22  ;;  %v3139_v21 = vadd.f32 %v2440_v24, %v3082_v59  ;;  %v374_v60 = vld [vmem:[#allocation2 + $0x48] sm:$0xff] }
 0x167   : > { %v1821_v8 = vadd.f32 %v3132_v41, %v1782_v61  ;;  %v1780_v9 = vld [vmem:[#allocation2] sm:$0xff]  ;;  %1751 = vst.msk [vmem:[#allocation2 + $0x30] sm:$0xff] %vm332_vm0, %v1719_v52  ;;  %v1720_v40 = vadd.f32 %v1614_v20, %v372_v47 }
 0x168   : > { %v1819_v15 = vadd.f32 %v3132_v41, %v1780_v9  ;;  %v1783_v16 = vld [vmem:[#allocation2 + $0x18] sm:$0xff]  ;;  %1749 = vst.msk [vmem:[#allocation2 + $0x20] sm:$0xff] %vm332_vm0, %v1717_v1  ;;  %v1718_v38 = vadd.f32 %v1606_v0, %v370_v56  ;;  %v3148_v22 = vadd.f32 %v2443_v6, %v3084_v10  ;;  %v1857_v1 = vld [vmem:[%s3126_s8 + $0x30] sm:$0xff] }
 0x169   : > { %v1885_v59 = vadd.f32 %v1853_v62, %v1821_v8  ;;  %v1822_v18 = vadd.f32 %v3132_v41, %v1783_v16  ;;  %v1781_v7 = vld [vmem:[#allocation2 + $0x8] sm:$0xff]  ;;  %1752 = vst.msk [vmem:[#allocation2 + $0x38] sm:$0xff] %vm332_vm0, %v1720_v40 }
 0x16a   : > { %v1883_v26 = vadd.f32 %v1851_v48, %v1819_v15  ;;  %v1820_v3 = vadd.f32 %v3132_v41, %v1781_v7  ;;  %1750 = vst.msk [vmem:[#allocation2 + $0x28] sm:$0xff] %vm332_vm0, %v1718_v38  ;;  %v2444_v10 = vpop.f32.mrb[56].mxu1  ;;  %v2518_v28 = vpop.f32.mrb[56].mxu0  ;;  %v1855_v48 = vld [vmem:[%s3126_s8 + $0x20] sm:$0xff]  ;;  %v1858_v38 = vld [vmem:[%s3126_s8 + $0x38] sm:$0xff] }
 0x16b   : > { %v1917_v32 = vmax.f32 %v1885_v59, 0.0  ;;  %v1886_v2 = vadd.f32 %v1854_v30, %v1822_v18  ;;  %v1627_v50 = vadd.f32 %v2518_v28, %v3086_v14  ;;  %v2445_v46 = vpop.f32.mrb[57].mxu1  ;;  %v1618_v19 = vpop.f32.mrb[57].mxu0 }
 0x16c   : > { %v1915_v54 = vmax.f32 %v1883_v26, 0.0  ;;  %v1884_v24 = vadd.f32 %v1852_v25, %v1820_v3  ;;  %v2446_v42 = vadd.f32 %v2445_v46, %v2444_v10  ;;  %v1619_v45 = vadd.f32 %v1618_v19, %v3078_v55  ;;  %v2447_v47 = vpop.f32.mrb[58].mxu1  ;;  %v2519_v52 = vpop.f32.mrb[58].mxu0  ;;  %v1856_v26 = vld [vmem:[%s3126_s8 + $0x28] sm:$0xff]  ;;  %v377_v46 = vld [vmem:[#allocation2 + $0x60] sm:$0xff] }
 0x16d   : > { %1949 = vst.msk [vmem:[%s3158_s13 + $0x10] sm:$0xff] %vm332_vm0, %v1917_v32  ;;  %v1918_v20 = vmax.f32 %v1886_v2, 0.0  ;;  %v1723_v39 = vadd.f32 %v1627_v50, %v375_v49  ;;  %v1630_v14 = vadd.f32 %v2519_v52, %v3088_v43  ;;  %v2448_v56 = vpop.f32.mrb[59].mxu1  ;;  %v1621_v61 = vpop.f32.mrb[59].mxu0  ;;  %v379_v49 = vld [vmem:[#allocation2 + $0x70] sm:$0xff] }
 0x16e   : > { %1947 = vst.msk [vmem:[%s3158_s13] sm:$0xff] %vm332_vm0, %v1915_v54  ;;  %v1916_v62 = vmax.f32 %v1884_v24, 0.0  ;;  %v1786_v55 = vld [vmem:[#allocation2 + $0x30] sm:$0xff]  ;;  %v1721_v6 = vadd.f32 %v1619_v45, %v373_v37  ;;  %v2449_v0 = vadd.f32 %v2448_v56, %v2447_v47  ;;  %v1622_v8 = vadd.f32 %v1621_v61, %v3080_v31  ;;  %v380_v47 = vld [vmem:[#allocation2 + $0x78] sm:$0xff] }
 0x16f   : > { %1950 = vst.msk [vmem:[%s3158_s13 + $0x18] sm:$0xff] %vm332_vm0, %v1918_v20  ;;  %v1825_v9 = vadd.f32 %v3132_v41, %v1786_v55  ;;  %v1784_v43 = vld [vmem:[#allocation2 + $0x20] sm:$0xff]  ;;  %1755 = vst.msk [vmem:[#allocation2 + $0x50] sm:$0xff] %vm332_vm0, %v1723_v39  ;;  %v1724_v40 = vadd.f32 %v1630_v14, %v376_v51  ;;  %v3177_v15 = vadd.f32 %v2446_v42, %v3090_v12  ;;  %v378_v14 = vld [vmem:[#allocation2 + $0x68] sm:$0xff] }
 0x170   : > { %1948 = vst.msk [vmem:[%s3158_s13 + $0x8] sm:$0xff] %vm332_vm0, %v1916_v62  ;;  %v1823_v16 = vadd.f32 %v3132_v41, %v1784_v43  ;;  %v1787_v30 = vld [vmem:[#allocation2 + $0x38] sm:$0xff]  ;;  %1753 = vst.msk [vmem:[#allocation2 + $0x40] sm:$0xff] %vm332_vm0, %v1721_v6  ;;  %v1722_v31 = vadd.f32 %v1622_v8, %v374_v60  ;;  %v3185_v59 = vadd.f32 %v2449_v0, %v3092_v33  ;;  %v1861_v61 = vld [vmem:[%s3126_s8 + $0x50] sm:$0xff] }
 0x171   : > { %v1889_v18 = vadd.f32 %v1857_v1, %v1825_v9  ;;  %v1826_v7 = vadd.f32 %v3132_v41, %v1787_v30  ;;  %v1785_v25 = vld [vmem:[#allocation2 + $0x28] sm:$0xff]  ;;  %1756 = vst.msk [vmem:[#allocation2 + $0x58] sm:$0xff] %vm332_vm0, %v1724_v40  ;;  %v1859_v0 = vld [vmem:[%s3126_s8 + $0x40] sm:$0xff]  ;;  %v1862_v40 = vld [vmem:[%s3126_s8 + $0x58] sm:$0xff] }
 0x172   : > { %v1887_v12 = vadd.f32 %v1855_v48, %v1823_v16  ;;  %v1824_v3 = vadd.f32 %v3132_v41, %v1785_v25  ;;  %1754 = vst.msk [vmem:[#allocation2 + $0x48] sm:$0xff] %vm332_vm0, %v1722_v31  ;;  %v2450_v10 = vpop.f32.mrb[60].mxu1  ;;  %v2522_v28 = vpop.f32.mrb[60].mxu0 }
 0x173   : > { %v1921_v32 = vmax.f32 %v1889_v18, 0.0  ;;  %v1890_v2 = vadd.f32 %v1858_v38, %v1826_v7  ;;  %v1643_v33 = vadd.f32 %v2522_v28, %v3102_v36  ;;  %v2451_v50 = vpop.f32.mrb[61].mxu1  ;;  %v1634_v37 = vpop.f32.mrb[61].mxu0  ;;  %v1860_v18 = vld [vmem:[%s3126_s8 + $0x48] sm:$0xff]  ;;  %v381_v28 = vld [vmem:[#allocation2 + $0x80] sm:$0xff] }
 0x174   : > { %v1919_v19 = vmax.f32 %v1887_v12, 0.0  ;;  %v1888_v54 = vadd.f32 %v1856_v26, %v1824_v3  ;;  %v2452_v24 = vadd.f32 %v2451_v50, %v2450_v10  ;;  %v1635_v42 = vadd.f32 %v1634_v37, %v3094_v34  ;;  %v2453_v45 = vpop.f32.mrb[62].mxu1  ;;  %v2523_v51 = vpop.f32.mrb[62].mxu0  ;;  %v383_v26 = vld [vmem:[#allocation2 + $0x90] sm:$0xff] }
 0x175   : > { %1953 = vst.msk [vmem:[%s3158_s13 + $0x30] sm:$0xff] %vm332_vm0, %v1921_v32  ;;  %v1922_v52 = vmax.f32 %v1890_v2, 0.0  ;;  %v1727_v20 = vadd.f32 %v1643_v33, %v379_v49  ;;  %v1646_v36 = vadd.f32 %v2523_v51, %v3104_v13  ;;  %v2454_v39 = vpop.f32.mrb[63].mxu1  ;;  %v1637_v56 = vpop.f32.mrb[63].mxu0 }
 0x176   : > { %1951 = vst.msk [vmem:[%s3158_s13 + $0x20] sm:$0xff] %vm332_vm0, %v1919_v19  ;;  %v1920_v60 = vmax.f32 %v1888_v54, 0.0  ;;  %v1790_v34 = vld [vmem:[#allocation2 + $0x50] sm:$0xff]  ;;  %v1725_v62 = vadd.f32 %v1635_v42, %v377_v46  ;;  %v2455_v55 = vadd.f32 %v2454_v39, %v2453_v45  ;;  %v1638_v1 = vadd.f32 %v1637_v56, %v3096_v58  ;;  %v384_v19 = vld [vmem:[#allocation2 + $0x98] sm:$0xff] }
 0x177   : > { %1954 = vst.msk [vmem:[%s3158_s13 + $0x38] sm:$0xff] %vm332_vm0, %v1922_v52  ;;  %v1829_v6 = vadd.f32 %v3132_v41, %v1790_v34  ;;  %v1788_v13 = vld [vmem:[#allocation2 + $0x40] sm:$0xff]  ;;  %1759 = vst.msk [vmem:[#allocation2 + $0x70] sm:$0xff] %vm332_vm0, %v1727_v20  ;;  %v1728_v8 = vadd.f32 %v1646_v36, %v380_v47  ;;  %v3207_v9 = vadd.f32 %v2452_v24, %v3098_v44  ;;  %v382_v47 = vld [vmem:[#allocation2 + $0x88] sm:$0xff] }
 0x178   : > { %1952 = vst.msk [vmem:[%s3158_s13 + $0x28] sm:$0xff] %vm332_vm0, %v1920_v60  ;;  %v1827_v43 = vadd.f32 %v3132_v41, %v1788_v13  ;;  %v1791_v48 = vld [vmem:[#allocation2 + $0x58] sm:$0xff]  ;;  %1757 = vst.msk [vmem:[#allocation2 + $0x60] sm:$0xff] %vm332_vm0, %v1725_v62  ;;  %v1726_v58 = vadd.f32 %v1638_v1, %v378_v14  ;;  %v3215_v16 = vadd.f32 %v2455_v55, %v3100_v53  ;;  %v1865_v20 = vld [vmem:[%s3126_s8 + $0x70] sm:$0xff] }
 0x179   : > { %v1893_v30 = vadd.f32 %v1861_v61, %v1829_v6  ;;  %v1830_v38 = vadd.f32 %v3132_v41, %v1791_v48  ;;  %v1789_v31 = vld [vmem:[#allocation2 + $0x48] sm:$0xff]  ;;  %1760 = vst.msk [vmem:[#allocation2 + $0x78] sm:$0xff] %vm332_vm0, %v1728_v8  ;;  %v1863_v60 = vld [vmem:[%s3126_s8 + $0x60] sm:$0xff]  ;;  %v1866_v1 = vld [vmem:[%s3126_s8 + $0x78] sm:$0xff] }
 0x17a   : > { %v1891_v44 = vadd.f32 %v1859_v0, %v1827_v43  ;;  %v1828_v7 = vadd.f32 %v3132_v41, %v1789_v31  ;;  %1758 = vst.msk [vmem:[#allocation2 + $0x68] sm:$0xff] %vm332_vm0, %v1726_v58  ;;  %v2456_v25 = vpop.f32.mrb[64].mxu1  ;;  %v2526_v12 = vpop.f32.mrb[64].mxu0  ;;  %v1864_v43 = vld [vmem:[%s3126_s8 + $0x68] sm:$0xff]  ;;  %v387_v58 = vld [vmem:[#allocation2 + $0xb0] sm:$0xff] }
 0x17b   : > { %v1925_v3 = vmax.f32 %v1893_v30, 0.0  ;;  %v1894_v10 = vadd.f32 %v1862_v40, %v1830_v38  ;;  %v1659_v53 = vadd.f32 %v2526_v12, %v3139_v21  ;;  %v2457_v49 = vpop.f32.mrb[65].mxu1  ;;  %v1650_v32 = vpop.f32.mrb[65].mxu0 }
 0x17c   : > { %v1923_v2 = vmax.f32 %v1891_v44, 0.0  ;;  %v1892_v33 = vadd.f32 %v1860_v18, %v1828_v7  ;;  %v2458_v50 = vadd.f32 %v2457_v49, %v2456_v25  ;;  %v1651_v46 = vadd.f32 %v1650_v32, %v3111_v27  ;;  %v2459_v37 = vpop.f32.mrb[66].mxu1  ;;  %v2527_v54 = vpop.f32.mrb[66].mxu0  ;;  %v385_v44 = vld [vmem:[#allocation2 + $0xa0] sm:$0xff] }
 0x17d   : > { %1957 = vst.msk [vmem:[%s3158_s13 + $0x50] sm:$0xff] %vm332_vm0, %v1925_v3  ;;  %v1926_v24 = vmax.f32 %v1894_v10, 0.0  ;;  %v1731_v42 = vadd.f32 %v1659_v53, %v383_v26  ;;  %v1662_v21 = vadd.f32 %v2527_v54, %v3148_v22  ;;  %v2460_v45 = vpop.f32.mrb[67].mxu1  ;;  %v1653_v51 = vpop.f32.mrb[67].mxu0  ;;  %v388_v53 = vld [vmem:[#allocation2 + $0xb8] sm:$0xff] }
 0x17e   : > { %1955 = vst.msk [vmem:[%s3158_s13 + $0x40] sm:$0xff] %vm332_vm0, %v1923_v2  ;;  %v1924_v52 = vmax.f32 %v1892_v33, 0.0  ;;  %v1794_v27 = vld [vmem:[#allocation2 + $0x70] sm:$0xff]  ;;  %v1729_v36 = vadd.f32 %v1651_v46, %v381_v28  ;;  %v2461_v39 = vadd.f32 %v2460_v45, %v2459_v37  ;;  %v1654_v14 = vadd.f32 %v1653_v51, %v3117_v4  ;;  %v386_v33 = vld [vmem:[#allocation2 + $0xa8] sm:$0xff] }
 0x17f   : > { %1958 = vst.msk [vmem:[%s3158_s13 + $0x58] sm:$0xff] %vm332_vm0, %v1926_v24  ;;  %v1833_v56 = vadd.f32 %v3132_v41, %v1794_v27  ;;  %v1792_v22 = vld [vmem:[#allocation2 + $0x60] sm:$0xff]  ;;  %1763 = vst.msk [vmem:[#allocation2 + $0x90] sm:$0xff] %vm332_vm0, %v1731_v42  ;;  %v1732_v34 = vadd.f32 %v1662_v21, %v384_v19  ;;  %v3237_v61 = vadd.f32 %v2458_v50, %v3042_v57  ;;  %v1869_v37 = vld [vmem:[%s3126_s8 + $0x90] sm:$0xff] }
 0x180   : > { %1956 = vst.msk [vmem:[%s3158_s13 + $0x48] sm:$0xff] %vm332_vm0, %v1924_v52  ;;  %v1831_v62 = vadd.f32 %v3132_v41, %v1792_v22  ;;  %v1795_v55 = vld [vmem:[#allocation2 + $0x78] sm:$0xff]  ;;  %1761 = vst.msk [vmem:[#allocation2 + $0x80] sm:$0xff] %vm332_vm0, %v1729_v36  ;;  %v1730_v4 = vadd.f32 %v1654_v14, %v382_v47  ;;  %v3245_v6 = vadd.f32 %v2461_v39, %v3044_v63  ;;  %v1867_v21 = vld [vmem:[%s3126_s8 + $0x80] sm:$0xff] }
 0x181   : > { %v1897_v13 = vadd.f32 %v1865_v20, %v1833_v56  ;;  %v1834_v0 = vadd.f32 %v3132_v41, %v1795_v55  ;;  %v1793_v8 = vld [vmem:[#allocation2 + $0x68] sm:$0xff]  ;;  %1764 = vst.msk [vmem:[#allocation2 + $0x98] sm:$0xff] %vm332_vm0, %v1732_v34  ;;  %v1870_v27 = vld [vmem:[%s3126_s8 + $0x98] sm:$0xff]  ;;  %v391_v34 = vld [vmem:[#allocation2 + $0xd0] sm:$0xff] }
 0x182   : > { %v1895_v57 = vadd.f32 %v1863_v60, %v1831_v62  ;;  %v1832_v48 = vadd.f32 %v3132_v41, %v1793_v8  ;;  %1762 = vst.msk [vmem:[#allocation2 + $0x88] sm:$0xff] %vm332_vm0, %v1730_v4  ;;  %v2462_v40 = vpop.f32.mrb[68].mxu1  ;;  %v2530_v30 = vpop.f32.mrb[68].mxu0  ;;  %v1868_v56 = vld [vmem:[%s3126_s8 + $0x88] sm:$0xff] }
 0x183   : > { %v1929_v38 = vmax.f32 %v1897_v13, 0.0  ;;  %v1898_v31 = vadd.f32 %v1866_v1, %v1834_v0  ;;  %v1675_v63 = vadd.f32 %v2530_v30, %v3207_v9  ;;  %v2463_v18 = vpop.f32.mrb[69].mxu1  ;;  %v1666_v7 = vpop.f32.mrb[69].mxu0  ;;  %v389_v13 = vld [vmem:[#allocation2 + $0xc0] sm:$0xff] }
 0x184   : > { %v1927_v25 = vmax.f32 %v1895_v57, 0.0  ;;  %v1896_v26 = vadd.f32 %v1864_v43, %v1832_v48  ;;  %v2464_v12 = vadd.f32 %v2463_v18, %v2462_v40  ;;  %v1667_v3 = vadd.f32 %v1666_v7, %v3177_v15  ;;  %v2465_v10 = vpop.f32.mrb[70].mxu1  ;;  %v2531_v49 = vpop.f32.mrb[70].mxu0 }
 0x185   : > { %1961 = vst.msk [vmem:[%s3158_s13 + $0x70] sm:$0xff] %vm332_vm0, %v1929_v38  ;;  %v1930_v28 = vmax.f32 %v1898_v31, 0.0  ;;  %v1735_v32 = vadd.f32 %v1675_v63, %v387_v58  ;;  %v1678_v9 = vadd.f32 %v2531_v49, %v3215_v16  ;;  %v2466_v2 = vpop.f32.mrb[71].mxu1  ;;  %v1669_v50 = vpop.f32.mrb[71].mxu0  ;;  %v392_v58 = vld [vmem:[#allocation2 + $0xd8] sm:$0xff] }
 0x186   : > { %1959 = vst.msk [vmem:[%s3158_s13 + $0x60] sm:$0xff] %vm332_vm0, %v1927_v25  ;;  %v1928_v46 = vmax.f32 %v1896_v26, 0.0  ;;  %v1798_v15 = vld [vmem:[#allocation2 + $0x90] sm:$0xff]  ;;  %v1733_v19 = vadd.f32 %v1667_v3, %v385_v44  ;;  %v2467_v54 = vadd.f32 %v2466_v2, %v2465_v10  ;;  %v1670_v24 = vadd.f32 %v1669_v50, %v3185_v59  ;;  %v390_v44 = vld [vmem:[#allocation2 + $0xc8] sm:$0xff]  ;;  %v1874_v50 = vld [vmem:[%s3126_s8 + $0xb8] sm:$0xff] }
 0x187   : > { %1962 = vst.msk [vmem:[%s3158_s13 + $0x78] sm:$0xff] %vm332_vm0, %v1930_v28  ;;  %v1837_v42 = vadd.f32 %v3132_v41, %v1798_v15  ;;  %v1796_v16 = vld [vmem:[#allocation2 + $0x80] sm:$0xff]  ;;  %1767 = vst.msk [vmem:[#allocation2 + $0xb0] sm:$0xff] %vm332_vm0, %v1735_v32  ;;  %v1736_v45 = vadd.f32 %v1678_v9, %v388_v53  ;;  %v1530_v47 = vadd.f32 %v2464_v12, %v3046_v5 }
 0x188   : > { %1960 = vst.msk [vmem:[%s3158_s13 + $0x68] sm:$0xff] %vm332_vm0, %v1928_v46  ;;  %v1835_v51 = vadd.f32 %v3132_v41, %v1796_v16  ;;  %v1799_v52 = vld [vmem:[#allocation2 + $0x98] sm:$0xff]  ;;  %1765 = vst.msk [vmem:[#allocation2 + $0xa0] sm:$0xff] %vm332_vm0, %v1733_v19  ;;  %v1734_v59 = vadd.f32 %v1670_v24, %v386_v33  ;;  %v1533_v20 = vadd.f32 %v2467_v54, %v3048_v11  ;;  %v1871_v28 = vld [vmem:[%s3126_s8 + $0xa0] sm:$0xff] }
 0x189   : > { %v1901_v36 = vadd.f32 %v1869_v37, %v1837_v42  ;;  %v1838_v39 = vadd.f32 %v3132_v41, %v1799_v52  ;;  %v1797_v14 = vld [vmem:[#allocation2 + $0x88] sm:$0xff]  ;;  %1768 = vst.msk [vmem:[#allocation2 + $0xb8] sm:$0xff] %vm332_vm0, %v1736_v45 }
 0x18a   : > { %v1899_v22 = vadd.f32 %v1867_v21, %v1835_v51  ;;  %v1836_v5 = vadd.f32 %v3132_v41, %v1797_v14  ;;  %1766 = vst.msk [vmem:[#allocation2 + $0xa8] sm:$0xff] %vm332_vm0, %v1734_v59  ;;  %v2468_v60 = vpop.f32.mrb[72].mxu1  ;;  %v2534_v62 = vpop.f32.mrb[72].mxu0  ;;  %v1872_v54 = vld [vmem:[%s3126_s8 + $0xa8] sm:$0xff] }
 0x18b   : > { %v1933_v55 = vmax.f32 %v1901_v36, 0.0  ;;  %v1902_v1 = vadd.f32 %v1870_v27, %v1838_v39  ;;  %v1691_v4 = vadd.f32 %v2534_v62, %v1530_v47  ;;  %v2469_v11 = vpop.f32.mrb[73].mxu1  ;;  %v1682_v0 = vpop.f32.mrb[73].mxu0 }
 0x18c   : > { %v1931_v8 = vmax.f32 %v1899_v22, 0.0  ;;  %v1900_v43 = vadd.f32 %v1868_v56, %v1836_v5  ;;  %v2470_v57 = vadd.f32 %v2469_v11, %v2468_v60  ;;  %v1683_v48 = vadd.f32 %v1682_v0, %v3237_v61  ;;  %v2471_v40 = vpop.f32.mrb[74].mxu1  ;;  %v2535_v30 = vpop.f32.mrb[74].mxu0  ;;  %v1873_v61 = vld [vmem:[%s3126_s8 + $0xb0] sm:$0xff]  ;;  %v1875_v0 = vld [vmem:[%s3126_s8 + $0xc0] sm:$0xff] }
 0x18d   : > { %1965 = vst.msk [vmem:[%s3158_s13 + $0x90] sm:$0xff] %vm332_vm0, %v1933_v55  ;;  %v1934_v38 = vmax.f32 %v1902_v1, 0.0  ;;  %v1739_v31 = vadd.f32 %v1691_v4, %v391_v34  ;;  %v1694_v63 = vadd.f32 %v2535_v30, %v1533_v20  ;;  %v2472_v18 = vpop.f32.mrb[75].mxu1  ;;  %v1685_v7 = vpop.f32.mrb[75].mxu0  ;;  %v1877_v34 = vld [vmem:[%s3126_s8 + $0xd0] sm:$0xff]  ;;  %v394_v4 = vld [vmem:[#allocation2 + $0xe8] sm:$0xff] }
 0x18e   : > { %1963 = vst.msk [vmem:[%s3158_s13 + $0x80] sm:$0xff] %vm332_vm0, %v1931_v8  ;;  %v1932_v25 = vmax.f32 %v1900_v43, 0.0  ;;  %v1802_v26 = vld [vmem:[#allocation2 + $0xb0] sm:$0xff]  ;;  %v1737_v12 = vadd.f32 %v1683_v48, %v389_v13  ;;  %v2473_v3 = vadd.f32 %v2472_v18, %v2471_v40  ;;  %v1686_v10 = vadd.f32 %v1685_v7, %v3245_v6  ;;  %v1878_v40 = vld [vmem:[%s3126_s8 + $0xd8] sm:$0xff] }
 0x18f   : > { %1966 = vst.msk [vmem:[%s3158_s13 + $0x98] sm:$0xff] %vm332_vm0, %v1934_v38  ;;  %v1841_v53 = vadd.f32 %v3132_v41, %v1802_v26  ;;  %v1800_v49 = vld [vmem:[#allocation2 + $0xa0] sm:$0xff]  ;;  %1771 = vst.msk [vmem:[#allocation2 + $0xd0] sm:$0xff] %vm332_vm0, %v1739_v31  ;;  %v1740_v32 = vadd.f32 %v1694_v63, %v392_v58  ;;  %v1538_v9 = vadd.f32 %v2470_v57, %v3050_v17  ;;  %v395_v8 = vld [vmem:[#allocation2 + $0xf0] sm:$0xff] }
 0x190   : > { %1964 = vst.msk [vmem:[%s3158_s13 + $0x88] sm:$0xff] %vm332_vm0, %v1932_v25  ;;  %v1839_v2 = vadd.f32 %v3132_v41, %v1800_v49  ;;  %v1803_v33 = vld [vmem:[#allocation2 + $0xb8] sm:$0xff]  ;;  %1769 = vst.msk [vmem:[#allocation2 + $0xc0] sm:$0xff] %vm332_vm0, %v1737_v12  ;;  %v1738_v6 = vadd.f32 %v1686_v10, %v390_v44  ;;  %v1541_v46 = vadd.f32 %v2473_v3, %v3052_v23  ;;  %v393_v23 = vld [vmem:[#allocation2 + $0xe0] sm:$0xff] }
 0x191   : > { %v1905_v15 = vadd.f32 %v1873_v61, %v1841_v53  ;;  %v1842_v37 = vadd.f32 %v3132_v41, %v1803_v33  ;;  %v1801_v19 = vld [vmem:[#allocation2 + $0xa8] sm:$0xff]  ;;  %1772 = vst.msk [vmem:[#allocation2 + $0xd8] sm:$0xff] %vm332_vm0, %v1740_v32  ;;  %v396_v18 = vld [vmem:[#allocation2 + $0xf8] sm:$0xff] }
 0x192   : > { %v1903_v24 = vadd.f32 %v1871_v28, %v1839_v2  ;;  %v1840_v17 = vadd.f32 %v3132_v41, %v1801_v19  ;;  %1770 = vst.msk [vmem:[#allocation2 + $0xc8] sm:$0xff] %vm332_vm0, %v1738_v6  ;;  %v2474_v42 = vpop.f32.mrb[76].mxu1  ;;  %v2538_v16 = vpop.f32.mrb[76].mxu0  ;;  %v1876_v63 = vld [vmem:[%s3126_s8 + $0xc8] sm:$0xff] }
 0x193   : > { %v1937_v21 = vmax.f32 %v1905_v15, 0.0  ;;  %v1906_v45 = vadd.f32 %v1874_v50, %v1842_v37  ;;  %v2475_v47 = vpop.f32.mrb[77].mxu1  ;;  %v1698_v51 = vpop.f32.mrb[77].mxu0  ;;  %v1880_v6 = vld [vmem:[%s3126_s8 + $0xe8] sm:$0xff]  ;;  %v1881_v15 = vld [vmem:[%s3126_s8 + $0xf0] sm:$0xff] }
 0x194   : > { %v1935_v52 = vmax.f32 %v1903_v24, 0.0  ;;  %v1904_v27 = vadd.f32 %v1872_v54, %v1840_v17  ;;  %v2476_v59 = vadd.f32 %v2475_v47, %v2474_v42  ;;  %v1699_v20 = vadd.f32 %v1698_v51, %v1538_v9  ;;  %v2477_v36 = vpop.f32.mrb[78].mxu1  ;;  %v2539_v39 = vpop.f32.mrb[78].mxu0  ;;  %v1879_v9 = vld [vmem:[%s3126_s8 + $0xe0] sm:$0xff]  ;;  %v1882_v17 = vld [vmem:[%s3126_s8 + $0xf8] sm:$0xff] }
 0x195   : > { %1969 = vst.msk [vmem:[%s3158_s13 + $0xb0] sm:$0xff] %vm332_vm0, %v1937_v21  ;;  %v1938_v14 = vmax.f32 %v1906_v45, 0.0  ;;  %v2478_v56 = vpop.f32.mrb[79].mxu1  ;;  %v1701_v22 = vpop.f32.mrb[79].mxu0 }
 0x196   : > { %1967 = vst.msk [vmem:[%s3158_s13 + $0xa0] sm:$0xff] %vm332_vm0, %v1935_v52  ;;  %v1936_v5 = vmax.f32 %v1904_v27, 0.0  ;;  %v1806_v60 = vld [vmem:[#allocation2 + $0xd0] sm:$0xff]  ;;  %v1546_v62 = vadd.f32 %v2476_v59, %v3054_v29  ;;  %v1741_v55 = vadd.f32 %v1699_v20, %v393_v23  ;;  %v2479_v1 = vadd.f32 %v2478_v56, %v2477_v36 }
 0x197   : > { %1970 = vst.msk [vmem:[%s3158_s13 + $0xb8] sm:$0xff] %vm332_vm0, %v1938_v14  ;;  %v1845_v11 = vadd.f32 %v3132_v41, %v1806_v60  ;;  %v1804_v13 = vld [vmem:[#allocation2 + $0xc0] sm:$0xff]  ;;  %v1702_v43 = vadd.f32 %v1701_v22, %v1541_v46 }
 0x198   : > { %1968 = vst.msk [vmem:[%s3158_s13 + $0xa8] sm:$0xff] %vm332_vm0, %v1936_v5  ;;  %v1843_v57 = vadd.f32 %v3132_v41, %v1804_v13  ;;  %v1807_v48 = vld [vmem:[#allocation2 + $0xd8] sm:$0xff]  ;;  %v1707_v58 = vadd.f32 %v2538_v16, %v1546_v62  ;;  %1773 = vst.msk [vmem:[#allocation2 + $0xe0] sm:$0xff] %vm332_vm0, %v1741_v55  ;;  %v1549_v29 = vadd.f32 %v2479_v1, %v3056_v35 }
 0x199   : > { %v1909_v30 = vadd.f32 %v1877_v34, %v1845_v11  ;;  %v1846_v38 = vadd.f32 %v3132_v41, %v1807_v48  ;;  %v1805_v31 = vld [vmem:[#allocation2 + $0xc8] sm:$0xff]  ;;  %v1742_v44 = vadd.f32 %v1702_v43, %v394_v4 }
 0x19a   : > { %v1907_v7 = vadd.f32 %v1875_v0, %v1843_v57  ;;  %v1844_v25 = vadd.f32 %v3132_v41, %v1805_v31  ;;  %v1743_v26 = vadd.f32 %v1707_v58, %v395_v8  ;;  %v1710_v61 = vadd.f32 %v2539_v39, %v1549_v29 }
 0x19b   : > { %v1941_v12 = vmax.f32 %v1909_v30, 0.0  ;;  %v1910_v3 = vadd.f32 %v1878_v40, %v1846_v38  ;;  %1774 = vst.msk [vmem:[#allocation2 + $0xe8] sm:$0xff] %vm332_vm0, %v1742_v44 }
 0x19c   : > { %v1939_v35 = vmax.f32 %v1907_v7, 0.0  ;;  %v1908_v10 = vadd.f32 %v1876_v63, %v1844_v25  ;;  %1775 = vst.msk [vmem:[#allocation2 + $0xf0] sm:$0xff] %vm332_vm0, %v1743_v26  ;;  %v1744_v53 = vadd.f32 %v1710_v61, %v396_v18 }
 0x19d   : > { %1973 = vst.msk [vmem:[%s3158_s13 + $0xd0] sm:$0xff] %vm332_vm0, %v1941_v12  ;;  %v1942_v49 = vmax.f32 %v1910_v3, 0.0 }
 0x19e   : > { %1971 = vst.msk [vmem:[%s3158_s13 + $0xc0] sm:$0xff] %vm332_vm0, %v1939_v35  ;;  %v1940_v28 = vmax.f32 %v1908_v10, 0.0  ;;  %1776 = vst.msk [vmem:[#allocation2 + $0xf8] sm:$0xff] %vm332_vm0, %v1744_v53 }
 0x19f   : > { %1974 = vst.msk [vmem:[%s3158_s13 + $0xd8] sm:$0xff] %vm332_vm0, %v1942_v49  ;;  %v1808_v32 = vld [vmem:[#allocation2 + $0xe0] sm:$0xff] }
 0x1a0   : > { %1972 = vst.msk [vmem:[%s3158_s13 + $0xc8] sm:$0xff] %vm332_vm0, %v1940_v28  ;;  %v1847_v2 = vadd.f32 %v3132_v41, %v1808_v32 }
 0x1a2   : > { %v1911_v33 = vadd.f32 %v1879_v9, %v1847_v2  ;;  %v1809_v50 = vld [vmem:[#allocation2 + $0xe8] sm:$0xff] }
 0x1a3   : > { %v1810_v46 = vld [vmem:[#allocation2 + $0xf0] sm:$0xff]  ;;  %v1848_v37 = vadd.f32 %v3132_v41, %v1809_v50 }
 0x1a4   : > { %v1849_v19 = vadd.f32 %v3132_v41, %v1810_v46  ;;  %v1943_v54 = vmax.f32 %v1911_v33, 0.0 }
 0x1a5   : > { %v1811_v24 = vld [vmem:[#allocation2 + $0xf8] sm:$0xff]  ;;  %v1912_v42 = vadd.f32 %v1880_v6, %v1848_v37 }
 0x1a6   : > { %v1913_v16 = vadd.f32 %v1881_v15, %v1849_v19  ;;  %1975 = vst.msk [vmem:[%s3158_s13 + $0xe0] sm:$0xff] %vm332_vm0, %v1943_v54  ;;  %v1850_v21 = vadd.f32 %v3132_v41, %v1811_v24 }
 0x1a7   : > { %v1944_v45 = vmax.f32 %v1912_v42, 0.0 }
 0x1a8   : > { %v1945_v47 = vmax.f32 %v1913_v16, 0.0  ;;  %v1914_v23 = vadd.f32 %v1882_v17, %v1850_v21 }
 0x1a9   : > { %1976 = vst.msk [vmem:[%s3158_s13 + $0xe8] sm:$0xff] %vm332_vm0, %v1944_v45 }
 0x1aa   : > { %1977 = vst.msk [vmem:[%s3158_s13 + $0xf0] sm:$0xff] %vm332_vm0, %v1945_v47  ;;  %v1946_v51 = vmax.f32 %v1914_v23, 0.0 }
 0x1ac   : > { %1978 = vst.msk [vmem:[%s3158_s13 + $0xf8] sm:$0xff] %vm332_vm0, %v1946_v51 }
 0x1ad PF: > { %s14_s17 = sadd.s32 1, %s2752_s17   ;;  %s3362_s15 = smov %s2748_s16 }
 0x1ae   : > { %p11_p5 = scmp.ge.s32.totalorder %s14_s17, 4   ;;  %s3363_s16 = smov %s3365_s18 }
 0x1b0   :  { %13 = sbr.rel (!%p11_p5) target bundleno = 2 (0x2), region = 83 }

// kernel: frontal_cls_forward.44
= control target key start
LH: loop header
LB: loop body
LE: loop exit
PB: predicated region body
PF: predicated region fallthrough
CT: control target
= control target key end

     0   :  { %vm587_vm0 = vcmask 523264   ;;  %s1720_s1 = inlined_call_operand.vmem [shape: bf16[576,128], index: 1, kind: input, shape index: {}]   ;;  %s1721_s0 = inlined_call_operand.vmem [shape: bf16[128,576], index: 0, kind: input, shape index: {}]   ;;  %s1722_s2 = inlined_call_operand.vmem [shape: f32[1,128], index: 2, kind: input, shape index: {}]   ;;  %s1723_s3 = inlined_call_operand.vmem [shape: f32[128,128], index: 3, kind: output, shape index: {}]  }
   0x1   :  { %v1270_v0 = vld [vmem:[%s1720_s1 + $0x40] sm:$0xff]   ;;  %v1274_v4 = vld [vmem:[%s1720_s1 + $0x48] sm:$0xff]   ;;  %v1278_v8 = vld [vmem:[%s1720_s1 + $0x50] sm:$0xff]  }
   0x2   :  { %v1271_v1 = vld [vmem:[%s1720_s1 + $0xc0] sm:$0xff]   ;;  %1098 = vmatprep.subr.bf16.mxu0 %v1270_v0  ;;  %v1275_v5 = vld [vmem:[%s1720_s1 + $0xc8] sm:$0xff]   ;;  %v1279_v9 = vld [vmem:[%s1720_s1 + $0xd0] sm:$0xff]  }
   0x3   :  { %v1272_v2 = vld [vmem:[%s1720_s1] sm:$0xff]   ;;  %1162 = vmatprep.subr.bf16.mxu1 %v1271_v1  ;;  %v1276_v6 = vld [vmem:[%s1720_s1 + $0x8] sm:$0xff]   ;;  %v1280_v10 = vld [vmem:[%s1720_s1 + $0x10] sm:$0xff]  }
   0x4   :  { %v1273_v3 = vld [vmem:[%s1720_s1 + $0x80] sm:$0xff]   ;;  %1099 = vmatpush3.bf16.msra.mxu0 %v1272_v2  ;;  %v1277_v7 = vld [vmem:[%s1720_s1 + $0x88] sm:$0xff]   ;;  %v1281_v11 = vld [vmem:[%s1720_s1 + $0x90] sm:$0xff]  }
   0x5   :  { %1163 = vmatpush3.bf16.msra.mxu1 %v1273_v3  ;;  %1100 = vmatprep.subr.bf16.mxu0 %v1274_v4  ;;  %v1282_v12 = vld [vmem:[%s1720_s1 + $0x58] sm:$0xff]   ;;  %v1286_v16 = vld [vmem:[%s1720_s1 + $0x60] sm:$0xff]   ;;  %v1290_v20 = vld [vmem:[%s1720_s1 + $0x68] sm:$0xff]  }
   0x6   :  { %1164 = vmatprep.subr.bf16.mxu1 %v1275_v5  ;;  %v1283_v13 = vld [vmem:[%s1720_s1 + $0xd8] sm:$0xff]   ;;  %v1287_v17 = vld [vmem:[%s1720_s1 + $0xe0] sm:$0xff]   ;;  %v1291_v21 = vld [vmem:[%s1720_s1 + $0xe8] sm:$0xff]  }
   0x7   :  { %v1284_v14 = vld [vmem:[%s1720_s1 + $0x18] sm:$0xff]   ;;  %v1288_v18 = vld [vmem:[%s1720_s1 + $0x20] sm:$0xff]   ;;  %v1292_v22 = vld [vmem:[%s1720_s1 + $0x28] sm:$0xff]  }
   0x8   :  { %1101 = vmatpush3.bf16.msra.mxu0 %v1276_v6  ;;  %v1285_v15 = vld [vmem:[%s1720_s1 + $0x98] sm:$0xff]   ;;  %v1289_v19 = vld [vmem:[%s1720_s1 + $0xa0] sm:$0xff]   ;;  %v1293_v23 = vld [vmem:[%s1720_s1 + $0xa8] sm:$0xff]  }
   0x9   :  { %1165 = vmatpush3.bf16.msra.mxu1 %v1277_v7  ;;  %1102 = vmatprep.subr.bf16.mxu0 %v1278_v8  ;;  %v1294_v24 = vld [vmem:[%s1720_s1 + $0x70] sm:$0xff]   ;;  %v1298_v28 = vld [vmem:[%s1720_s1 + $0x78] sm:$0xff]   ;;  %v1307_v35 = vld [vmem:[%s1721_s0 + $0xc] ss:$20 sps:$4 sm:$0xff]  }
   0xa   :  { %1166 = vmatprep.subr.bf16.mxu1 %v1279_v9  ;;  %v1295_v25 = vld [vmem:[%s1720_s1 + $0xf0] sm:$0xff]   ;;  %v1299_v29 = vld [vmem:[%s1720_s1 + $0xf8] sm:$0xff]   ;;  %v1308_v36 = vld [vmem:[%s1720_s1 + $0x100] sm:$0xff]   ;;  %741 = vmatprep.mubr.bf16.mxu1 %v1307_v35 }
   0xb   :  { %v1296_v26 = vld [vmem:[%s1720_s1 + $0x30] sm:$0xff]   ;;  %v1300_v30 = vld [vmem:[%s1720_s1 + $0x38] sm:$0xff]   ;;  %v1309_v37 = vld [vmem:[%s1721_s0 + $0x2c] ss:$20 sps:$4 sm:$0xff]  }
   0xc   :  { %1103 = vmatpush3.bf16.msra.mxu0 %v1280_v10  ;;  %v1297_v27 = vld [vmem:[%s1720_s1 + $0xb0] sm:$0xff]   ;;  %v1301_v31 = vld [vmem:[%s1720_s1 + $0xb8] sm:$0xff]   ;;  %v1321_v42 = vld [vmem:[%s1720_s1 + $0x108] sm:$0xff]  }
   0xd   :  { %1167 = vmatpush3.bf16.msra.mxu1 %v1281_v11  ;;  %1104 = vmatprep.subr.bf16.mxu0 %v1282_v12  ;;  %v1302_v32 = vld [vmem:[%s1721_s0] ss:$20 sps:$4 sm:$0xff]   ;;  %v1304_v33 = vld [vmem:[%s1721_s0 + $0x4] ss:$20 sps:$4 sm:$0xff]   ;;  %v1305_v34 = vld [vmem:[%s1721_s0 + $0x8] ss:$20 sps:$4 sm:$0xff]  }
   0xe   :  { %1168 = vmatprep.subr.bf16.mxu1 %v1283_v13  ;;  %644 = vmatprep.mubr.bf16.mxu0 %v1304_v33  ;;  %v1311_v38 = vld [vmem:[%s1721_s0 + $0x34] ss:$20 sps:$4 sm:$0xff]   ;;  %v1314_v40 = vld [vmem:[%s1721_s0 + $0x30] ss:$20 sps:$4 sm:$0xff]   ;;  %v1320_v45 = vld [vmem:[%s1721_s0 + $0x58] ss:$20 sps:$4 sm:$0xff]  }
   0xf   :  { %v1313_v39 = vld [vmem:[%s1721_s0 + $0x28] ss:$20 sps:$4 sm:$0xff]   ;;  %v1319_v44 = vld [vmem:[%s1721_s0 + $0x50] ss:$20 sps:$4 sm:$0xff]   ;;  %v1326_v50 = vld [vmem:[%s1721_s0 + $0x78] ss:$20 sps:$4 sm:$0xff]  }
  0x10   :  { %1105 = vmatpush3.bf16.msra.mxu0 %v1284_v14  ;;  %v1315_v41 = vld [vmem:[%s1721_s0 + $0x54] ss:$20 sps:$4 sm:$0xff]   ;;  %v1317_v43 = vld [vmem:[%s1721_s0 + $0x5c] ss:$20 sps:$4 sm:$0xff]   ;;  %v1324_v48 = vld [vmem:[%s1721_s0 + $0x84] ss:$20 sps:$4 sm:$0xff]  }
  0x11   :  { %1169 = vmatpush3.bf16.msra.mxu1 %v1285_v15  ;;  %1106 = vmatprep.subr.bf16.mxu0 %v1286_v16  ;;  %v1334_v46 = vld [vmem:[%s1720_s1 + $0x110] sm:$0xff]   ;;  %v1347_v49 = vld [vmem:[%s1720_s1 + $0x118] sm:$0xff]   ;;  %v1330_v53 = vld [vmem:[%s1721_s0 + $0xac] ss:$20 sps:$4 sm:$0xff]  }
  0x12   :  { %1170 = vmatprep.subr.bf16.mxu1 %v1287_v17  ;;  %v1322_v47 = vld [vmem:[%s1721_s0 + $0x7c] ss:$20 sps:$4 sm:$0xff]   ;;  %v1327_v51 = vld [vmem:[%s1721_s0 + $0x80] ss:$20 sps:$4 sm:$0xff]   ;;  %v1328_v52 = vld [vmem:[%s1721_s0 + $0xa4] ss:$20 sps:$4 sm:$0xff]  }
  0x13   :  { %v1332_v54 = vld [vmem:[%s1721_s0 + $0xa0] ss:$20 sps:$4 sm:$0xff]   ;;  %v1333_v55 = vld [vmem:[%s1721_s0 + $0xa8] ss:$20 sps:$4 sm:$0xff]   ;;  %v1340_v59 = vld [vmem:[%s1721_s0 + $0xd0] ss:$20 sps:$4 sm:$0xff]  }
  0x14   :  { %1107 = vmatpush3.bf16.msra.mxu0 %v1288_v18  ;;  %v1335_v56 = vld [vmem:[%s1721_s0 + $0xcc] ss:$20 sps:$4 sm:$0xff]   ;;  %v1337_v57 = vld [vmem:[%s1721_s0 + $0xd4] ss:$20 sps:$4 sm:$0xff]   ;;  %v1343_v61 = vld [vmem:[%s1721_s0 + $0xfc] ss:$20 sps:$4 sm:$0xff]  }
  0x15   :  { %1171 = vmatpush3.bf16.msra.mxu1 %v1289_v19  ;;  %1108 = vmatprep.subr.bf16.mxu0 %v1290_v20  ;;  %v1339_v58 = vld [vmem:[%s1721_s0 + $0xc8] ss:$20 sps:$4 sm:$0xff]   ;;  %v1345_v62 = vld [vmem:[%s1721_s0 + $0xf0] ss:$20 sps:$4 sm:$0xff]   ;;  %v1346_v63 = vld [vmem:[%s1721_s0 + $0xf8] ss:$20 sps:$4 sm:$0xff]  }
  0x16   :  { %1172 = vmatprep.subr.bf16.mxu1 %v1291_v21  ;;  %v1341_v60 = vld [vmem:[%s1721_s0 + $0xf4] ss:$20 sps:$4 sm:$0xff]   ;;  %v1348_v0 = vld [vmem:[%s1721_s0 + $0x11c] ss:$20 sps:$4 sm:$0xff]   ;;  %v1350_v1 = vld [vmem:[%s1721_s0 + $0x124] ss:$20 sps:$4 sm:$0xff]  }
  0x17   :  { %v1352_v2 = vld [vmem:[%s1721_s0 + $0x118] ss:$20 sps:$4 sm:$0xff]   ;;  %v1353_v3 = vld [vmem:[%s1721_s0 + $0x120] ss:$20 sps:$4 sm:$0xff]   ;;  %v1354_v4 = vld [vmem:[%s1721_s0 + $0x10] ss:$20 sps:$4 sm:$0xff]  }
  0x18   :  { %1109 = vmatpush3.bf16.msra.mxu0 %v1292_v22  ;;  %v1355_v5 = vld [vmem:[%s1721_s0 + $0xb0] ss:$20 sps:$4 sm:$0xff]   ;;  %v1356_v6 = vld [vmem:[%s1721_s0 + $0x38] ss:$20 sps:$4 sm:$0xff]   ;;  %v1358_v8 = vld [vmem:[%s1721_s0 + $0x60] ss:$20 sps:$4 sm:$0xff]  }
  0x19   :  { %1173 = vmatpush3.bf16.msra.mxu1 %v1293_v23  ;;  %1110 = vmatprep.subr.bf16.mxu0 %v1294_v24  ;;  %v1357_v7 = vld [vmem:[%s1721_s0 + $0xd8] ss:$20 sps:$4 sm:$0xff]   ;;  %v1359_v9 = vld [vmem:[%s1721_s0 + $0x100] ss:$20 sps:$4 sm:$0xff]   ;;  %v1360_v10 = vld [vmem:[%s1721_s0 + $0x88] ss:$20 sps:$4 sm:$0xff]  }
  0x1a   :  { %1174 = vmatprep.subr.bf16.mxu1 %v1295_v25  ;;  %v1361_v11 = vld [vmem:[%s1721_s0 + $0x128] ss:$20 sps:$4 sm:$0xff]  }
  0x1c   :  { %1111 = vmatpush3.bf16.msra.mxu0 %v1296_v26 }
  0x1d   :  { %1175 = vmatpush3.bf16.msra.mxu1 %v1297_v27  ;;  %1112 = vmatprep.subr.bf16.mxu0 %v1298_v28 }
  0x1e   :  { %1176 = vmatprep.subr.bf16.mxu1 %v1299_v29 }
  0x20   :  { %1113 = vmatpush3.bf16.msra.mxu0 %v1300_v30 }
  0x21   :  { %1177 = vmatpush3.bf16.msra.mxu1 %v1301_v31  ;;  %1238 = vmatprep.subr.bf16.mxu0 %v1308_v36 }
  0x22   :  { %1262 = vmatprep.subr.bf16.mxu1 %v1308_v36 }
  0x23   :  { %645 = vmatmul.mubr.bf16.vlgmr.msra.gmra.mrb[0].mxu0 %v1302_v32 }
  0x24   :  { %742 = vmatmul.mubr.bf16.vlgmr.msra.gmra.mrb[0].mxu1 %v1305_v34  ;;  %1239 = vmatpush3.bf16.msra.mxu0 %v1308_v36 }
  0x25   :  { %1266 = vmatpush3.bf16.msra.mxu1 %v1308_v36  ;;  %652 = vmatprep.mubr.bf16.mxu0 %v1309_v37 }
  0x26   :  { %749 = vmatprep.mubr.bf16.mxu1 %v1311_v38  ;;  %1240 = vmatprep.subr.bf16.mxu0 %v1321_v42 }
  0x27   :  { %1263 = vmatprep.subr.bf16.mxu1 %v1321_v42 }
  0x28   :  { %1241 = vmatpush3.bf16.msra.mxu0 %v1321_v42 }
  0x29   :  { %1267 = vmatpush3.bf16.msra.mxu1 %v1321_v42  ;;  %1242 = vmatprep.subr.bf16.mxu0 %v1334_v46 }
  0x2a   :  { %1264 = vmatprep.subr.bf16.mxu1 %v1334_v46 }
  0x2b   :  { %653 = vmatmul.mubr.bf16.gmra.mrb[4].mxu0 %v1313_v39 }
  0x2c   :  { %750 = vmatmul.mubr.bf16.gmra.mrb[4].mxu1 %v1314_v40  ;;  %660 = vmatprep.mubr.bf16.mxu0 %v1315_v41 }
  0x2d   :  { %757 = vmatprep.mubr.bf16.mxu1 %v1317_v43  ;;  %1243 = vmatpush3.bf16.msra.mxu0 %v1334_v46 }
  0x2e   :  { %1268 = vmatpush3.bf16.msra.mxu1 %v1334_v46  ;;  %1244 = vmatprep.subr.bf16.mxu0 %v1347_v49 }
  0x2f   :  { %1265 = vmatprep.subr.bf16.mxu1 %v1347_v49 }
  0x31   :  { %1245 = vmatpush3.bf16.msra.mxu0 %v1347_v49 }
  0x32   :  { %1269 = vmatpush3.bf16.msra.mxu1 %v1347_v49 }
  0x33   :  { %661 = vmatmul.mubr.bf16.gmra.mrb[8].mxu0 %v1319_v44 }
  0x34   :  { %758 = vmatmul.mubr.bf16.gmra.mrb[8].mxu1 %v1320_v45  ;;  %668 = vmatprep.mubr.bf16.mxu0 %v1322_v47 }
  0x35   :  { %765 = vmatprep.mubr.bf16.mxu1 %v1324_v48 }
  0x3b   :  { %669 = vmatmul.mubr.bf16.gmra.mrb[12].mxu0 %v1326_v50 }
  0x3c   :  { %766 = vmatmul.mubr.bf16.gmra.mrb[12].mxu1 %v1327_v51  ;;  %676 = vmatprep.mubr.bf16.mxu0 %v1328_v52 }
  0x3d   :  { %773 = vmatprep.mubr.bf16.mxu1 %v1330_v53 }
  0x43   :  { %677 = vmatmul.mubr.bf16.gmra.mrb[16].mxu0 %v1332_v54 }
  0x44   :  { %774 = vmatmul.mubr.bf16.gmra.mrb[16].mxu1 %v1333_v55  ;;  %684 = vmatprep.mubr.bf16.mxu0 %v1335_v56 }
  0x45   :  { %781 = vmatprep.mubr.bf16.mxu1 %v1337_v57 }
  0x4b   :  { %685 = vmatmul.mubr.bf16.gmra.mrb[20].mxu0 %v1339_v58 }
  0x4c   :  { %782 = vmatmul.mubr.bf16.gmra.mrb[20].mxu1 %v1340_v59  ;;  %692 = vmatprep.mubr.bf16.mxu0 %v1341_v60 }
  0x4d   :  { %789 = vmatprep.mubr.bf16.mxu1 %v1343_v61 }
  0x53   :  { %693 = vmatmul.mubr.bf16.gmra.mrb[24].mxu0 %v1345_v62 }
  0x54   :  { %790 = vmatmul.mubr.bf16.gmra.mrb[24].mxu1 %v1346_v63  ;;  %700 = vmatprep.mubr.bf16.mxu0 %v1348_v0 }
  0x55   :  { %797 = vmatprep.mubr.bf16.mxu1 %v1350_v1 }
  0x5b   :  { %701 = vmatmul.mubr.bf16.gmra.mrb[28].mxu0 %v1352_v2 }
  0x5c   :  { %798 = vmatmul.mubr.bf16.gmra.mrb[28].mxu1 %v1353_v3  ;;  %1246 = vmatprep.mubr.msk.bf16.mxu0 %vm587_vm0, %v1354_v4 }
  0x5d   :  { %1254 = vmatprep.mubr.msk.bf16.mxu1 %vm587_vm0, %v1355_v5 }
  0x63   :  { %1247 = vmatmul.mubr.msk.bf16.vlgmr.msra.gmra.mrb[32].mxu0 %vm587_vm0, %v1356_v6 }
  0x64   :  { %1255 = vmatmul.mubr.msk.bf16.vlgmr.msra.gmra.mrb[32].mxu1 %vm587_vm0, %v1357_v7  ;;  %1250 = vmatprep.mubr.msk.bf16.mxu0 %vm587_vm0, %v1358_v8 }
  0x65   :  { %1258 = vmatprep.mubr.msk.bf16.mxu1 %vm587_vm0, %v1359_v9 }
  0x6b   :  { %1251 = vmatmul.mubr.msk.bf16.gmra.mrb[36].mxu0 %vm587_vm0, %v1360_v10 }
  0x6c   :  { %1259 = vmatmul.mubr.msk.bf16.gmra.mrb[36].mxu1 %vm587_vm0, %v1361_v11 }
  0xf6   :  { %v1114_v12 = vpop.f32.mrb[0].mxu0 }
  0xf7   :  { %v1178_v13 = vpop.f32.mrb[0].mxu1  ;;  %v1115_v14 = vpop.f32.mrb[1].mxu0 }
  0xf8   :  { %v1116_v15 = vadd.f32 %v1115_v14, %v1114_v12  ;;  %v1179_v16 = vpop.f32.mrb[1].mxu1  ;;  %v1117_v17 = vpop.f32.mrb[2].mxu0 }
  0xf9   :  { %v1180_v18 = vadd.f32 %v1179_v16, %v1178_v13  ;;  %v1181_v19 = vpop.f32.mrb[2].mxu1  ;;  %v1118_v20 = vpop.f32.mrb[3].mxu0 }
  0xfa   :  { %v1119_v21 = vadd.f32 %v1118_v20, %v1117_v17  ;;  %v1182_v22 = vpop.f32.mrb[3].mxu1 }
  0xfb   :  { %v1183_v23 = vadd.f32 %v1182_v22, %v1181_v19  ;;  %v1618_v24 = vadd.f32 %v1180_v18, %v1116_v15 }
  0xfd   :  { %v1620_v25 = vadd.f32 %v1183_v23, %v1119_v21 }
  0xfe   :  { %v1120_v26 = vpop.f32.mrb[4].mxu0 }
  0xff   :  { %v1184_v27 = vpop.f32.mrb[4].mxu1  ;;  %v1121_v28 = vpop.f32.mrb[5].mxu0 }
 0x100   :  { %v1122_v29 = vadd.f32 %v1121_v28, %v1120_v26  ;;  %v1185_v30 = vpop.f32.mrb[5].mxu1  ;;  %v1123_v31 = vpop.f32.mrb[6].mxu0 }
 0x101   :  { %v1186_v32 = vadd.f32 %v1185_v30, %v1184_v27  ;;  %v1187_v33 = vpop.f32.mrb[6].mxu1  ;;  %v1124_v34 = vpop.f32.mrb[7].mxu0 }
 0x102   :  { %v1125_v35 = vadd.f32 %v1124_v34, %v1123_v31  ;;  %v1188_v36 = vpop.f32.mrb[7].mxu1 }
 0x103   :  { %v1189_v37 = vadd.f32 %v1188_v36, %v1187_v33  ;;  %v1622_v38 = vadd.f32 %v1186_v32, %v1122_v29 }
 0x105   :  { %v1624_v39 = vadd.f32 %v1189_v37, %v1125_v35 }
 0x106   :  { %v1126_v40 = vpop.f32.mrb[8].mxu0 }
 0x107   :  { %v1190_v41 = vpop.f32.mrb[8].mxu1  ;;  %v1127_v42 = vpop.f32.mrb[9].mxu0 }
 0x108   :  { %v1128_v43 = vadd.f32 %v1127_v42, %v1126_v40  ;;  %v1191_v44 = vpop.f32.mrb[9].mxu1  ;;  %v1129_v45 = vpop.f32.mrb[10].mxu0 }
 0x109   :  { %v1192_v46 = vadd.f32 %v1191_v44, %v1190_v41  ;;  %v1193_v47 = vpop.f32.mrb[10].mxu1  ;;  %v1130_v48 = vpop.f32.mrb[11].mxu0 }
 0x10a   :  { %v1131_v49 = vadd.f32 %v1130_v48, %v1129_v45  ;;  %v1194_v50 = vpop.f32.mrb[11].mxu1 }
 0x10b   :  { %v1195_v51 = vadd.f32 %v1194_v50, %v1193_v47  ;;  %v1626_v52 = vadd.f32 %v1192_v46, %v1128_v43 }
 0x10d   :  { %v1628_v53 = vadd.f32 %v1195_v51, %v1131_v49 }
 0x10e   :  { %v1132_v54 = vpop.f32.mrb[12].mxu0 }
 0x10f   :  { %v1196_v55 = vpop.f32.mrb[12].mxu1  ;;  %v1133_v56 = vpop.f32.mrb[13].mxu0 }
 0x110   :  { %v1134_v57 = vadd.f32 %v1133_v56, %v1132_v54  ;;  %v1197_v58 = vpop.f32.mrb[13].mxu1  ;;  %v1135_v59 = vpop.f32.mrb[14].mxu0 }
 0x111   :  { %v1198_v60 = vadd.f32 %v1197_v58, %v1196_v55  ;;  %v1199_v61 = vpop.f32.mrb[14].mxu1  ;;  %v1136_v62 = vpop.f32.mrb[15].mxu0 }
 0x112   :  { %v1137_v63 = vadd.f32 %v1136_v62, %v1135_v59  ;;  %v1200_v0 = vpop.f32.mrb[15].mxu1 }
 0x113   :  { %v1201_v1 = vadd.f32 %v1200_v0, %v1199_v61  ;;  %v1630_v2 = vadd.f32 %v1198_v60, %v1134_v57 }
 0x115   :  { %v1632_v3 = vadd.f32 %v1201_v1, %v1137_v63 }
 0x116   :  { %v1138_v4 = vpop.f32.mrb[16].mxu0 }
 0x117   :  { %v1202_v5 = vpop.f32.mrb[16].mxu1  ;;  %v1139_v6 = vpop.f32.mrb[17].mxu0 }
 0x118   :  { %v1140_v7 = vadd.f32 %v1139_v6, %v1138_v4  ;;  %v1203_v8 = vpop.f32.mrb[17].mxu1  ;;  %v1141_v9 = vpop.f32.mrb[18].mxu0 }
 0x119   :  { %v1204_v10 = vadd.f32 %v1203_v8, %v1202_v5  ;;  %v1205_v11 = vpop.f32.mrb[18].mxu1  ;;  %v1142_v12 = vpop.f32.mrb[19].mxu0  ;;  %v1643_v5 = vld [vmem:[%s1722_s2] ss:$0 sm:$0xff] }
 0x11a   :  { %v1143_v13 = vadd.f32 %v1142_v12, %v1141_v9  ;;  %v1206_v14 = vpop.f32.mrb[19].mxu1 }
 0x11b   :  { %v1207_v15 = vadd.f32 %v1206_v14, %v1205_v11  ;;  %v776_v16 = vadd.f32 %v1204_v10, %v1140_v7 }
 0x11d   :  { %v1634_v17 = vadd.f32 %v1207_v15, %v1143_v13 }
 0x11e   :  { %v1144_v18 = vpop.f32.mrb[20].mxu0 }
 0x11f   :  { %v1208_v19 = vpop.f32.mrb[20].mxu1  ;;  %v1145_v20 = vpop.f32.mrb[21].mxu0 }
 0x120   :  { %v1146_v21 = vadd.f32 %v1145_v20, %v1144_v18  ;;  %v1209_v22 = vpop.f32.mrb[21].mxu1  ;;  %v1147_v23 = vpop.f32.mrb[22].mxu0 }
 0x121   :  { %v1210_v26 = vadd.f32 %v1209_v22, %v1208_v19  ;;  %v1211_v27 = vpop.f32.mrb[22].mxu1  ;;  %v1148_v28 = vpop.f32.mrb[23].mxu0 }
 0x122   :  { %v1149_v29 = vadd.f32 %v1148_v28, %v1147_v23  ;;  %v1212_v30 = vpop.f32.mrb[23].mxu1 }
 0x123   :  { %v1213_v31 = vadd.f32 %v1212_v30, %v1211_v27  ;;  %v784_v32 = vadd.f32 %v1210_v26, %v1146_v21 }
 0x125   :  { %v787_v33 = vadd.f32 %v1213_v31, %v1149_v29 }
 0x126   :  { %v1150_v34 = vpop.f32.mrb[24].mxu0 }
 0x127   :  { %v1214_v35 = vpop.f32.mrb[24].mxu1  ;;  %v1151_v36 = vpop.f32.mrb[25].mxu0 }
 0x128   :  { %v1152_v37 = vadd.f32 %v1151_v36, %v1150_v34  ;;  %v1215_v40 = vpop.f32.mrb[25].mxu1  ;;  %v1153_v41 = vpop.f32.mrb[26].mxu0 }
 0x129   :  { %v1216_v42 = vadd.f32 %v1215_v40, %v1214_v35  ;;  %v1217_v43 = vpop.f32.mrb[26].mxu1  ;;  %v1154_v44 = vpop.f32.mrb[27].mxu0 }
 0x12a   :  { %v1155_v45 = vadd.f32 %v1154_v44, %v1153_v41  ;;  %v1218_v46 = vpop.f32.mrb[27].mxu1 }
 0x12b   :  { %v1219_v47 = vadd.f32 %v1218_v46, %v1217_v43  ;;  %v1636_v48 = vadd.f32 %v1216_v42, %v1152_v37 }
 0x12d   :  { %v1638_v49 = vadd.f32 %v1219_v47, %v1155_v45 }
 0x12e   :  { %v1156_v50 = vpop.f32.mrb[28].mxu0 }
 0x12f   :  { %v1220_v51 = vpop.f32.mrb[28].mxu1  ;;  %v1157_v54 = vpop.f32.mrb[29].mxu0 }
 0x130   :  { %v1158_v55 = vadd.f32 %v1157_v54, %v1156_v50  ;;  %v1221_v56 = vpop.f32.mrb[29].mxu1  ;;  %v1159_v57 = vpop.f32.mrb[30].mxu0 }
 0x131   :  { %v1222_v58 = vadd.f32 %v1221_v56, %v1220_v51  ;;  %v1223_v59 = vpop.f32.mrb[30].mxu1  ;;  %v1160_v60 = vpop.f32.mrb[31].mxu0 }
 0x132   :  { %v1161_v61 = vadd.f32 %v1160_v60, %v1159_v57  ;;  %v1224_v62 = vpop.f32.mrb[31].mxu1 }
 0x133   :  { %v1225_v63 = vadd.f32 %v1224_v62, %v1223_v59  ;;  %v800_v0 = vadd.f32 %v1222_v58, %v1158_v55 }
 0x135   :  { %v803_v1 = vadd.f32 %v1225_v63, %v1161_v61 }
 0x136   :  { %v1248_v4 = vpop.f32.mrb[32].mxu0 }
 0x137   :  { %v849_v6 = vadd.f32 %v1248_v4, %v1622_v38  ;;  %v1256_v7 = vpop.f32.mrb[32].mxu1  ;;  %v840_v8 = vpop.f32.mrb[33].mxu0 }
 0x138   :  { %v881_v9 = vadd.f32 %v1256_v7, %v784_v32  ;;  %v841_v10 = vadd.f32 %v840_v8, %v1618_v24  ;;  %v872_v11 = vpop.f32.mrb[33].mxu1  ;;  %v1249_v12 = vpop.f32.mrb[34].mxu0 }
 0x139   :  { %v963_v13 = vadd.f32 %v1643_v5, %v849_v6  ;;  %v873_v14 = vadd.f32 %v872_v11, %v776_v16  ;;  %v852_v15 = vadd.f32 %v1249_v12, %v1624_v39  ;;  %v1257_v18 = vpop.f32.mrb[34].mxu1  ;;  %v843_v19 = vpop.f32.mrb[35].mxu0 }
 0x13a   :  { %v971_v20 = vadd.f32 %v1643_v5, %v881_v9  ;;  %v961_v21 = vadd.f32 %v1643_v5, %v841_v10  ;;  %v884_v22 = vadd.f32 %v1257_v18, %v787_v33  ;;  %v844_v38 = vadd.f32 %v843_v19, %v1620_v25  ;;  %v875_v23 = vpop.f32.mrb[35].mxu1 }
 0x13b   :  { %v979_v26 = vmax.f32 %v963_v13, 0.0  ;;  %v969_v24 = vadd.f32 %v1643_v5, %v873_v14  ;;  %v964_v27 = vadd.f32 %v1643_v5, %v852_v15  ;;  %v876_v28 = vadd.f32 %v875_v23, %v1634_v17 }
 0x13c   :  { %v987_v16 = vmax.f32 %v971_v20, 0.0  ;;  %v977_v29 = vmax.f32 %v961_v21, 0.0  ;;  %v972_v39 = vadd.f32 %v1643_v5, %v884_v22  ;;  %v962_v30 = vadd.f32 %v1643_v5, %v844_v38 }
 0x13d   :  { %995 = vst [vmem:[%s1723_s3 + $0x10] sm:$0xff] %v979_v26  ;;  %v985_v31 = vmax.f32 %v969_v24, 0.0  ;;  %v980_v25 = vmax.f32 %v964_v27, 0.0  ;;  %v970_v32 = vadd.f32 %v1643_v5, %v876_v28 }
 0x13e   :  { %1003 = vst [vmem:[%s1723_s3 + $0x50] sm:$0xff] %v987_v16  ;;  %993 = vst [vmem:[%s1723_s3] sm:$0xff] %v977_v29  ;;  %v988_v17 = vmax.f32 %v972_v39, 0.0  ;;  %v978_v33 = vmax.f32 %v962_v30, 0.0  ;;  %v1252_v34 = vpop.f32.mrb[36].mxu0 }
 0x13f   :  { %1001 = vst [vmem:[%s1723_s3 + $0x40] sm:$0xff] %v985_v31  ;;  %996 = vst [vmem:[%s1723_s3 + $0x18] sm:$0xff] %v980_v25  ;;  %v986_v35 = vmax.f32 %v970_v32, 0.0  ;;  %v865_v36 = vadd.f32 %v1252_v34, %v1630_v2  ;;  %v1260_v37 = vpop.f32.mrb[36].mxu1  ;;  %v856_v40 = vpop.f32.mrb[37].mxu0 }
 0x140   :  { %1004 = vst [vmem:[%s1723_s3 + $0x58] sm:$0xff] %v988_v17  ;;  %994 = vst [vmem:[%s1723_s3 + $0x8] sm:$0xff] %v978_v33  ;;  %v897_v41 = vadd.f32 %v1260_v37, %v800_v0  ;;  %v857_v42 = vadd.f32 %v856_v40, %v1626_v52  ;;  %v888_v43 = vpop.f32.mrb[37].mxu1  ;;  %v1253_v44 = vpop.f32.mrb[38].mxu0 }
 0x141   :  { %1002 = vst [vmem:[%s1723_s3 + $0x48] sm:$0xff] %v986_v35  ;;  %v967_v2 = vadd.f32 %v1643_v5, %v865_v36  ;;  %v889_v45 = vadd.f32 %v888_v43, %v1636_v48  ;;  %v868_v46 = vadd.f32 %v1253_v44, %v1632_v3  ;;  %v1261_v47 = vpop.f32.mrb[38].mxu1  ;;  %v859_v50 = vpop.f32.mrb[39].mxu0 }
 0x142   :  { %v975_v51 = vadd.f32 %v1643_v5, %v897_v41  ;;  %v965_v54 = vadd.f32 %v1643_v5, %v857_v42  ;;  %v900_v55 = vadd.f32 %v1261_v47, %v803_v1  ;;  %v860_v52 = vadd.f32 %v859_v50, %v1628_v53  ;;  %v891_v56 = vpop.f32.mrb[39].mxu1 }
 0x143   :  { %v983_v57 = vmax.f32 %v967_v2, 0.0  ;;  %v973_v58 = vadd.f32 %v1643_v5, %v889_v45  ;;  %v968_v59 = vadd.f32 %v1643_v5, %v868_v46  ;;  %v892_v60 = vadd.f32 %v891_v56, %v1638_v49 }
 0x144   :  { %v991_v48 = vmax.f32 %v975_v51, 0.0  ;;  %v981_v61 = vmax.f32 %v965_v54, 0.0  ;;  %v976_v3 = vadd.f32 %v1643_v5, %v900_v55  ;;  %v966_v62 = vadd.f32 %v1643_v5, %v860_v52 }
 0x145   :  { %999 = vst [vmem:[%s1723_s3 + $0x30] sm:$0xff] %v983_v57  ;;  %v989_v63 = vmax.f32 %v973_v58, 0.0  ;;  %v984_v53 = vmax.f32 %v968_v59, 0.0  ;;  %v974_v0 = vadd.f32 %v1643_v5, %v892_v60 }
 0x146   :  { %1007 = vst [vmem:[%s1723_s3 + $0x70] sm:$0xff] %v991_v48  ;;  %997 = vst [vmem:[%s1723_s3 + $0x20] sm:$0xff] %v981_v61  ;;  %v992_v49 = vmax.f32 %v976_v3, 0.0  ;;  %v982_v1 = vmax.f32 %v966_v62, 0.0 }
 0x147   :  { %1005 = vst [vmem:[%s1723_s3 + $0x60] sm:$0xff] %v989_v63  ;;  %1000 = vst [vmem:[%s1723_s3 + $0x38] sm:$0xff] %v984_v53  ;;  %v990_v4 = vmax.f32 %v974_v0, 0.0 }
 0x148   :  { %1008 = vst [vmem:[%s1723_s3 + $0x78] sm:$0xff] %v992_v49  ;;  %998 = vst [vmem:[%s1723_s3 + $0x28] sm:$0xff] %v982_v1 }
 0x149   :  { %1006 = vst [vmem:[%s1723_s3 + $0x68] sm:$0xff] %v990_v4 }

// kernel: frontal_cls_forward.45
= control target key start
LH: loop header
LB: loop body
LE: loop exit
PB: predicated region body
PF: predicated region fallthrough
CT: control target
= control target key end

     0   :  { %vm139_vm0 = vcmask 523264   ;;  %s547_s1 = inlined_call_operand.vmem [shape: bf16[64,128], index: 1, kind: input, shape index: {}]   ;;  %s548_s0 = inlined_call_operand.vmem [shape: bf16[128,64], index: 0, kind: input, shape index: {}]   ;;  %s549_s2 = inlined_call_operand.vmem [shape: f32[1,128], index: 2, kind: input, shape index: {}]   ;;  %s550_s3 = inlined_call_operand.vmem [shape: f32[128,128], index: 3, kind: output, shape index: {}]  }
   0x1   :  { %v420_v0 = vld [vmem:[%s547_s1] sm:$0xff]   ;;  %v421_v1 = vld [vmem:[%s547_s1 + $0x8] sm:$0xff]   ;;  %v422_v2 = vld [vmem:[%s547_s1 + $0x10] sm:$0xff]  }
   0x2   :  { %388 = vmatprep.subr.bf16.mxu0 %v420_v0  ;;  %412 = vmatprep.subr.bf16.mxu1 %v420_v0  ;;  %v424_v3 = vld [vmem:[%s548_s0] sm:$0xff]   ;;  %v423_v5 = vld [vmem:[%s547_s1 + $0x18] sm:$0xff]   ;;  %v426_v6 = vld [vmem:[%s548_s0 + $0x8] sm:$0xff]  }
   0x3   :  { %389 = vmatpush3.bf16.msra.mxu0 %v420_v0  ;;  %416 = vmatpush3.bf16.msra.mxu1 %v420_v0  ;;  %v425_v4 = vld [vmem:[%s548_s0 + $0x20] sm:$0xff]   ;;  %v427_v7 = vld [vmem:[%s548_s0 + $0x28] sm:$0xff]   ;;  %v428_v8 = vld [vmem:[%s548_s0 + $0x10] sm:$0xff]  }
   0x4   :  { %390 = vmatprep.subr.bf16.mxu0 %v421_v1  ;;  %413 = vmatprep.subr.bf16.mxu1 %v421_v1  ;;  %v429_v9 = vld [vmem:[%s548_s0 + $0x30] sm:$0xff]   ;;  %v430_v10 = vld [vmem:[%s548_s0 + $0x18] sm:$0xff]   ;;  %v375_v12 = vld [vmem:[%s549_s2] ss:$0 sm:$0xff] }
   0x5   :  { %396 = vmatprep.mubr.msk.bf16.mxu0 %vm139_vm0, %v424_v3  ;;  %404 = vmatprep.mubr.msk.bf16.mxu1 %vm139_vm0, %v425_v4  ;;  %v431_v11 = vld [vmem:[%s548_s0 + $0x38] sm:$0xff]  }
   0x7   :  { %391 = vmatpush3.bf16.msra.mxu0 %v421_v1  ;;  %417 = vmatpush3.bf16.msra.mxu1 %v421_v1 }
   0x8   :  { %392 = vmatprep.subr.bf16.mxu0 %v422_v2  ;;  %414 = vmatprep.subr.bf16.mxu1 %v422_v2 }
   0xb   :  { %393 = vmatpush3.bf16.msra.mxu0 %v422_v2  ;;  %418 = vmatpush3.bf16.msra.mxu1 %v422_v2 }
   0xc   :  { %394 = vmatprep.subr.bf16.mxu0 %v423_v5  ;;  %415 = vmatprep.subr.bf16.mxu1 %v423_v5 }
   0xf   :  { %395 = vmatpush3.bf16.msra.mxu0 %v423_v5  ;;  %419 = vmatpush3.bf16.msra.mxu1 %v423_v5 }
  0x12   :  { %397 = vmatmul.mubr.msk.bf16.vlgmr.msra.gmra.mrb[0].mxu0 %vm139_vm0, %v426_v6  ;;  %405 = vmatmul.mubr.msk.bf16.vlgmr.msra.gmra.mrb[0].mxu1 %vm139_vm0, %v427_v7 }
  0x13   :  { %400 = vmatprep.mubr.msk.bf16.mxu0 %vm139_vm0, %v428_v8  ;;  %408 = vmatprep.mubr.msk.bf16.mxu1 %vm139_vm0, %v429_v9 }
  0x1a   :  { %401 = vmatmul.mubr.msk.bf16.gmra.mrb[4].mxu0 %vm139_vm0, %v430_v10  ;;  %409 = vmatmul.mubr.msk.bf16.gmra.mrb[4].mxu1 %vm139_vm0, %v431_v11 }
  0xe5   :  { %v398_v13 = vpop.f32.mrb[0].mxu0  ;;  %v406_v14 = vpop.f32.mrb[0].mxu1 }
  0xe6   :  { %v321_v15 = vadd.f32 %v398_v13, %v375_v12  ;;  %v329_v16 = vadd.f32 %v406_v14, %v375_v12  ;;  %v198_v17 = vpop.f32.mrb[1].mxu0  ;;  %v230_v18 = vpop.f32.mrb[1].mxu1 }
  0xe7   :  { %v319_v19 = vadd.f32 %v375_v12, %v198_v17  ;;  %v327_v20 = vadd.f32 %v375_v12, %v230_v18  ;;  %v399_v21 = vpop.f32.mrb[2].mxu0  ;;  %v407_v22 = vpop.f32.mrb[2].mxu1 }
  0xe8   :  { %337 = vst [vmem:[%s550_s3 + $0x10] sm:$0xff] %v321_v15  ;;  %345 = vst [vmem:[%s550_s3 + $0x50] sm:$0xff] %v329_v16  ;;  %v322_v23 = vadd.f32 %v399_v21, %v375_v12  ;;  %v330_v24 = vadd.f32 %v407_v22, %v375_v12  ;;  %v201_v25 = vpop.f32.mrb[3].mxu0  ;;  %v233_v26 = vpop.f32.mrb[3].mxu1 }
  0xe9   :  { %335 = vst [vmem:[%s550_s3] sm:$0xff] %v319_v19  ;;  %343 = vst [vmem:[%s550_s3 + $0x40] sm:$0xff] %v327_v20  ;;  %v320_v27 = vadd.f32 %v375_v12, %v201_v25  ;;  %v328_v28 = vadd.f32 %v375_v12, %v233_v26 }
  0xea   :  { %338 = vst [vmem:[%s550_s3 + $0x18] sm:$0xff] %v322_v23  ;;  %346 = vst [vmem:[%s550_s3 + $0x58] sm:$0xff] %v330_v24 }
  0xeb   :  { %336 = vst [vmem:[%s550_s3 + $0x8] sm:$0xff] %v320_v27  ;;  %344 = vst [vmem:[%s550_s3 + $0x48] sm:$0xff] %v328_v28 }
  0xed   :  { %v402_v29 = vpop.f32.mrb[4].mxu0  ;;  %v410_v30 = vpop.f32.mrb[4].mxu1 }
  0xee   :  { %v325_v31 = vadd.f32 %v402_v29, %v375_v12  ;;  %v333_v32 = vadd.f32 %v410_v30, %v375_v12  ;;  %v214_v33 = vpop.f32.mrb[5].mxu0  ;;  %v246_v34 = vpop.f32.mrb[5].mxu1 }
  0xef   :  { %v323_v35 = vadd.f32 %v375_v12, %v214_v33  ;;  %v331_v36 = vadd.f32 %v375_v12, %v246_v34  ;;  %v403_v37 = vpop.f32.mrb[6].mxu0  ;;  %v411_v38 = vpop.f32.mrb[6].mxu1 }
  0xf0   :  { %341 = vst [vmem:[%s550_s3 + $0x30] sm:$0xff] %v325_v31  ;;  %349 = vst [vmem:[%s550_s3 + $0x70] sm:$0xff] %v333_v32  ;;  %v326_v39 = vadd.f32 %v403_v37, %v375_v12  ;;  %v334_v40 = vadd.f32 %v411_v38, %v375_v12  ;;  %v217_v41 = vpop.f32.mrb[7].mxu0  ;;  %v249_v42 = vpop.f32.mrb[7].mxu1 }
  0xf1   :  { %339 = vst [vmem:[%s550_s3 + $0x20] sm:$0xff] %v323_v35  ;;  %347 = vst [vmem:[%s550_s3 + $0x60] sm:$0xff] %v331_v36  ;;  %v324_v43 = vadd.f32 %v375_v12, %v217_v41  ;;  %v332_v44 = vadd.f32 %v375_v12, %v249_v42 }
  0xf2   :  { %342 = vst [vmem:[%s550_s3 + $0x38] sm:$0xff] %v326_v39  ;;  %350 = vst [vmem:[%s550_s3 + $0x78] sm:$0xff] %v334_v40 }
  0xf3   :  { %340 = vst [vmem:[%s550_s3 + $0x28] sm:$0xff] %v324_v43  ;;  %348 = vst [vmem:[%s550_s3 + $0x68] sm:$0xff] %v332_v44 }

// kernel: frontal_cls_forward.46
= control target key start
LH: loop header
LB: loop body
LE: loop exit
PB: predicated region body
PF: predicated region fallthrough
CT: control target
= control target key end

     0   :  { %s1163_s15 = smov 0   ;;  %s1165_s16 = smov 0   ;;  %s1385_s0 = inlined_call_operand.vmem [shape: bf16[128,1152], index: 0, kind: input, shape index: {}]   ;;  %s1386_s1 = inlined_call_operand.vmem [shape: bf16[1152,128], index: 1, kind: input, shape index: {}]   ;;  %s1387_s2 = inlined_call_operand.vmem [shape: f32[1,128], index: 2, kind: input, shape index: {}]   ;;  %s1388_s3 = inlined_call_operand.vmem [shape: f32[128,128], index: 3, kind: input, shape index: {}]   ;;  %s1389_s4 = inlined_call_operand.vmem [shape: f32[128,128], index: 4, kind: output, shape index: {}]  }
   0x1   :  { %s1167_s17 = smov 0   ;;  %s1169_s18 = smov 0  }
   0x2   :  { %s1171_s19 = smov 0  }
   0x3 LB: > { %s26_s20 = sadd.s32 1, %s1131_s18  ;;  %p49_p1 = scmp.ne.s32.totalorder %s1123_s16, %s1119_s15  ;;  %s1135_s19 = sphi %s1171_s19, %s14_s19   ;;  %s1131_s18 = sphi %s1169_s18, %s1393_s18   ;;  %s1127_s17 = sphi %s1167_s17, %s1392_s17   ;;  %s1123_s16 = sphi %s1165_s16, %s1391_s16   ;;  %s1119_s15 = sphi %s1163_s15, %s1390_s15  }
   0x4   : > { %p27_p0 = scmp.ge.s32.totalorder %s26_s20, 9  ;;  %p50_p2 = scmp.eq.s32.totalorder %s1135_s19, 0 }
   0x5   : > { %s42_s22 = sadd.s32 1, %s1123_s16  ;;  %p946_p5 = scmp.ge.s32.totalorder %s1135_s19, 9 }
   0x6   : > { %s1395_s20 = smov (%p27_p0, %s26_s20), 0  ;;  %p51_p3 = por %p50_p2, %p49_p1 }
   0x7   : > { %s38_s21 = ssub.s32 %s1131_s18, %s1395_s20  ;;  %203 = sbr.rel (%p946_p5) target bundleno = 28 (0x1c), region = 24 }
   0x8   : > { %p40_p4 = scmp.eq.s32.totalorder %s38_s21, 0 }
   0xa   : > { %s1198_s23 = scalar_select %p40_p4, %s1123_s16, %s42_s22  }
   0xe   : > { %206 = sbr.rel (!%p51_p3) target bundleno = 28 (0x1c), region = 28  ;;  %s208_s24 = sand.u32 (%p51_p3), 1, %s1123_s16  }
   0xf   : > { %s948_s25 = sshll.u32 (%p51_p3), %s1131_s18, 2  ;;  %s947_s26 = sshll.u32 (%p51_p3), %s208_s24, 6 }
  0x10   : > { %s1206_s29 = scalar_lea.vmem (%p51_p3), %s1385_s0, %s948_s25  ;;  %s210_s30 = scalar_lea.vmem (%p51_p3), [#allocation3], %s947_s26 }
  0x11   : > { %v231_v0 = vld [vmem:[%s1206_s29] sm:$0xf] (%p51_p3)  ;;  %v233_v1 = vld [vmem:[%s1206_s29 + $0x24] sm:$0xf] (%p51_p3)  ;;  %v235_v2 = vld [vmem:[%s1206_s29 + $0x48] sm:$0xf] (%p51_p3) }
  0x12   : > { %232 = vst [vmem:[%s210_s30] sm:$0xf] (%p51_p3), %v231_v0  ;;  %234 = vst [vmem:[%s210_s30 + $0x4] sm:$0xf] (%p51_p3), %v233_v1  ;;  %v237_v3 = vld [vmem:[%s1206_s29 + $0x6c] sm:$0xf] (%p51_p3) }
  0x13   : > { %v239_v4 = vld [vmem:[%s1206_s29 + $0x90] sm:$0xf] (%p51_p3)  ;;  %236 = vst [vmem:[%s210_s30 + $0x8] sm:$0xf] (%p51_p3), %v235_v2  ;;  %238 = vst [vmem:[%s210_s30 + $0xc] sm:$0xf] (%p51_p3), %v237_v3 }
  0x14   : > { %240 = vst [vmem:[%s210_s30 + $0x10] sm:$0xf] (%p51_p3), %v239_v4  ;;  %v241_v5 = vld [vmem:[%s1206_s29 + $0xb4] sm:$0xf] (%p51_p3)  ;;  %v243_v6 = vld [vmem:[%s1206_s29 + $0xd8] sm:$0xf] (%p51_p3) }
  0x15   : > { %v245_v7 = vld [vmem:[%s1206_s29 + $0xfc] sm:$0xf]  ;;  %242 = vst [vmem:[%s210_s30 + $0x14] sm:$0xf] %v241_v5  ;;  %244 = vst [vmem:[%s210_s30 + $0x18] sm:$0xf] %v243_v6 }
  0x16   : > { %246 = vst [vmem:[%s210_s30 + $0x1c] sm:$0xf] %v245_v7  ;;  %v247_v8 = vld [vmem:[%s1206_s29 + $0x120] sm:$0xf]  ;;  %v249_v9 = vld [vmem:[%s1206_s29 + $0x144] sm:$0xf] }
  0x17   : > { %v251_v10 = vld [vmem:[%s1206_s29 + $0x168] sm:$0xf]  ;;  %248 = vst [vmem:[%s210_s30 + $0x20] sm:$0xf] %v247_v8  ;;  %250 = vst [vmem:[%s210_s30 + $0x24] sm:$0xf] %v249_v9 }
  0x18   : > { %252 = vst [vmem:[%s210_s30 + $0x28] sm:$0xf] %v251_v10  ;;  %v253_v11 = vld [vmem:[%s1206_s29 + $0x18c] sm:$0xf]  ;;  %v255_v12 = vld [vmem:[%s1206_s29 + $0x1b0] sm:$0xf] }
  0x19   : > { %v257_v13 = vld [vmem:[%s1206_s29 + $0x1d4] sm:$0xf]  ;;  %254 = vst [vmem:[%s210_s30 + $0x2c] sm:$0xf] %v253_v11  ;;  %256 = vst [vmem:[%s210_s30 + $0x30] sm:$0xf] %v255_v12 }
  0x1a   : > { %258 = vst [vmem:[%s210_s30 + $0x34] sm:$0xf] %v257_v13  ;;  %v259_v14 = vld [vmem:[%s1206_s29 + $0x1f8] sm:$0xf]  ;;  %v261_v15 = vld [vmem:[%s1206_s29 + $0x21c] sm:$0xf] }
  0x1b   : > { %260 = vst [vmem:[%s210_s30 + $0x38] sm:$0xf] %v259_v14  ;;  %262 = vst [vmem:[%s210_s30 + $0x3c] sm:$0xf] %v261_v15 }
  0x1c PF: > { %p949_p6 = scmp.ge.s32.totalorder %s1135_s19, 1  ;;  %p328_p7 = scmp.lt.s32.totalorder %s1135_s19, 10 }
  0x1e   : > { %p329_p8 = pnand %p949_p6, %p328_p7 }
  0x1f   : > { %s335_s5 = sand.u32 (!%p329_p8), 1, %s1119_s15   ;;  %s951_s6 = sshll.u32 (!%p329_p8), %s1127_s17, 4 }
  0x20   : > { %332 = sbr.rel (%p329_p8) target bundleno = 323 (0x143), region = 73  ;;  %s950_s7 = sshll.u32 (!%p329_p8), %s335_s5, 6 }
  0x21   : > { %p384_p9 = scmp.lt.s32.totalorder (!%p329_p8), %s951_s6, 143  ;;  %s1233_s12 = scalar_lea.vmem (!%p329_p8), [#allocation3], %s950_s7 }
  0x22   : > { %p953_p10 = scmp.ne.s32.totalorder (!%p329_p8), %s1127_s17, 0 }
  0x27   : > { %s1397_s6 = smov (!%p384_p9, %s951_s6), 143  ;;  %417 = sbr.rel (%p953_p10) target bundleno = 49 (0x31), region = 81 }
  0x28   : > { %s952_s8 = sshll.u32 %s1397_s6, 2  ;;  %v1137_v16 = vmov (!%p953_p10), 0.0  }
  0x29   : > { %s1231_s11 = scalar_lea.vmem %s1386_s1, %s952_s8  ;;  %418 = vst [vmem:[#allocation2] sm:$0xff] (!%p953_p10), %v1137_v16  ;;  %419 = vst [vmem:[#allocation2 + $0x8] sm:$0xff] (!%p953_p10), %v1137_v16 }
  0x2a   : > { %420 = vst [vmem:[#allocation2 + $0x10] sm:$0xff] (!%p953_p10), %v1137_v16  ;;  %421 = vst [vmem:[#allocation2 + $0x18] sm:$0xff] (!%p953_p10), %v1137_v16 }
  0x2b   : > { %422 = vst [vmem:[#allocation2 + $0x20] sm:$0xff] (!%p953_p10), %v1137_v16  ;;  %423 = vst [vmem:[#allocation2 + $0x28] sm:$0xff] (!%p953_p10), %v1137_v16 }
  0x2c   : > { %424 = vst [vmem:[#allocation2 + $0x30] sm:$0xff] (!%p953_p10), %v1137_v16  ;;  %425 = vst [vmem:[#allocation2 + $0x38] sm:$0xff] (!%p953_p10), %v1137_v16 }
  0x2d   : > { %426 = vst [vmem:[#allocation2 + $0x40] sm:$0xff] (!%p953_p10), %v1137_v16  ;;  %427 = vst [vmem:[#allocation2 + $0x48] sm:$0xff] (!%p953_p10), %v1137_v16 }
  0x2e   : > { %428 = vst [vmem:[#allocation2 + $0x50] sm:$0xff] %v1137_v16  ;;  %429 = vst [vmem:[#allocation2 + $0x58] sm:$0xff] %v1137_v16 }
  0x2f   : > { %430 = vst [vmem:[#allocation2 + $0x60] sm:$0xff] %v1137_v16  ;;  %431 = vst [vmem:[#allocation2 + $0x68] sm:$0xff] %v1137_v16 }
  0x30   : > { %432 = vst [vmem:[#allocation2 + $0x70] sm:$0xff] %v1137_v16  ;;  %433 = vst [vmem:[#allocation2 + $0x78] sm:$0xff] %v1137_v16 }
  0x31 PF: > { %v1081_v17 = vld [vmem:[%s1231_s11] sm:$0xff]   ;;  %v1082_v18 = vld [vmem:[%s1231_s11 + $0x8] sm:$0xff]   ;;  %v1083_v19 = vld [vmem:[%s1231_s11 + $0x10] sm:$0xff]   ;;  %p970_p11 = scmp.ne.s32.totalorder %s1127_s17, 8 }
  0x32   : > { %992 = vmatprep.subr.bf16.mxu0 %v1081_v17  ;;  %1024 = vmatprep.subr.bf16.mxu1 %v1081_v17  ;;  %v1084_v20 = vld [vmem:[%s1231_s11 + $0x18] sm:$0xff]   ;;  %v1089_v21 = vld [vmem:[%s1233_s12] sm:$0xff]   ;;  %v1086_v24 = vld [vmem:[%s1231_s11 + $0x28] sm:$0xff]  }
  0x33   : > { %993 = vmatpush3.bf16.msra.mxu0 %v1081_v17  ;;  %1032 = vmatpush3.bf16.msra.mxu1 %v1081_v17  ;;  %v1090_v22 = vld [vmem:[%s1233_s12 + $0x20] sm:$0xff]   ;;  %v1087_v25 = vld [vmem:[%s1231_s11 + $0x30] sm:$0xff]   ;;  %v1088_v26 = vld [vmem:[%s1231_s11 + $0x38] sm:$0xff]  }
  0x34   : > { %994 = vmatprep.subr.bf16.mxu0 %v1082_v18  ;;  %1025 = vmatprep.subr.bf16.mxu1 %v1082_v18  ;;  %v1085_v23 = vld [vmem:[%s1231_s11 + $0x20] sm:$0xff]   ;;  %v1091_v27 = vld [vmem:[%s1233_s12 + $0x8] sm:$0xff]   ;;  %v1093_v29 = vld [vmem:[%s1233_s12 + $0x10] sm:$0xff]  }
  0x35   : > { %1008 = vmatprep.mubr.bf16.mxu0 %v1089_v21  ;;  %1016 = vmatprep.mubr.bf16.mxu1 %v1090_v22  ;;  %v1092_v28 = vld [vmem:[%s1233_s12 + $0x28] sm:$0xff]   ;;  %v1094_v30 = vld [vmem:[%s1233_s12 + $0x30] sm:$0xff]   ;;  %v1095_v31 = vld [vmem:[%s1233_s12 + $0x18] sm:$0xff]  }
  0x36   : > { %v1096_v32 = vld [vmem:[%s1233_s12 + $0x38] sm:$0xff]   ;;  %v436_v33 = vld [vmem:[#allocation2 + $0x10] sm:$0xff]  ;;  %v434_v35 = vld [vmem:[#allocation2] sm:$0xff] }
  0x37   : > { %995 = vmatpush3.bf16.msra.mxu0 %v1082_v18  ;;  %1033 = vmatpush3.bf16.msra.mxu1 %v1082_v18  ;;  %v444_v34 = vld [vmem:[#allocation2 + $0x50] sm:$0xff]  ;;  %v442_v36 = vld [vmem:[#allocation2 + $0x40] sm:$0xff]  ;;  %v437_v39 = vld [vmem:[#allocation2 + $0x18] sm:$0xff] }
  0x38   : > { %996 = vmatprep.subr.bf16.mxu0 %v1083_v19  ;;  %1026 = vmatprep.subr.bf16.mxu1 %v1083_v19  ;;  %v445_v40 = vld [vmem:[#allocation2 + $0x58] sm:$0xff]  ;;  %v435_v45 = vld [vmem:[#allocation2 + $0x8] sm:$0xff]  ;;  %v440_v57 = vld [vmem:[#allocation2 + $0x30] sm:$0xff] }
  0x39   : > { %v443_v46 = vld [vmem:[#allocation2 + $0x48] sm:$0xff]  ;;  %v448_v58 = vld [vmem:[#allocation2 + $0x70] sm:$0xff]  ;;  %v438_v59 = vld [vmem:[#allocation2 + $0x20] sm:$0xff] }
  0x3a   : > { %v446_v60 = vld [vmem:[#allocation2 + $0x60] sm:$0xff]  ;;  %v441_v63 = vld [vmem:[#allocation2 + $0x38] sm:$0xff]  ;;  %v439_v5 = vld [vmem:[#allocation2 + $0x28] sm:$0xff] }
  0x3b   : > { %997 = vmatpush3.bf16.msra.mxu0 %v1083_v19  ;;  %1034 = vmatpush3.bf16.msra.mxu1 %v1083_v19  ;;  %v449_v0 = vld [vmem:[#allocation2 + $0x78] sm:$0xff]  ;;  %v447_v6 = vld [vmem:[#allocation2 + $0x68] sm:$0xff]  ;;  %v1256_v18 = vld [vmem:[%s1387_s2] ss:$0 sm:$0xff] (!%p970_p11) }
  0x3c   : > { %998 = vmatprep.subr.bf16.mxu0 %v1084_v20  ;;  %1027 = vmatprep.subr.bf16.mxu1 %v1084_v20  ;;  %v750_v19 = vld [vmem:[%s1388_s3] sm:$0xff] (!%p970_p11)  ;;  %v751_v22 = vld [vmem:[%s1388_s3 + $0x8] sm:$0xff] (!%p970_p11) }
  0x3f   : > { %999 = vmatpush3.bf16.msra.mxu0 %v1084_v20  ;;  %1035 = vmatpush3.bf16.msra.mxu1 %v1084_v20 }
  0x40   : > { %1000 = vmatprep.subr.bf16.mxu0 %v1085_v23  ;;  %1028 = vmatprep.subr.bf16.mxu1 %v1085_v23 }
  0x43   : > { %1001 = vmatpush3.bf16.msra.mxu0 %v1085_v23  ;;  %1036 = vmatpush3.bf16.msra.mxu1 %v1085_v23 }
  0x44   : > { %1002 = vmatprep.subr.bf16.mxu0 %v1086_v24  ;;  %1029 = vmatprep.subr.bf16.mxu1 %v1086_v24 }
  0x47   : > { %1003 = vmatpush3.bf16.msra.mxu0 %v1086_v24  ;;  %1037 = vmatpush3.bf16.msra.mxu1 %v1086_v24 }
  0x48   : > { %1004 = vmatprep.subr.bf16.mxu0 %v1087_v25  ;;  %1030 = vmatprep.subr.bf16.mxu1 %v1087_v25 }
  0x4b   : > { %1005 = vmatpush3.bf16.msra.mxu0 %v1087_v25  ;;  %1038 = vmatpush3.bf16.msra.mxu1 %v1087_v25 }
  0x4c   : > { %1006 = vmatprep.subr.bf16.mxu0 %v1088_v26  ;;  %1031 = vmatprep.subr.bf16.mxu1 %v1088_v26 }
  0x4f   : > { %1007 = vmatpush3.bf16.msra.mxu0 %v1088_v26  ;;  %1039 = vmatpush3.bf16.msra.mxu1 %v1088_v26  ;;  %v752_v26 = vld [vmem:[%s1388_s3 + $0x10] sm:$0xff] (!%p970_p11) }
  0x52   : > { %1009 = vmatmul.mubr.bf16.vlgmr.msra.gmra.mrb[0].mxu0 %v1091_v27  ;;  %1017 = vmatmul.mubr.bf16.vlgmr.msra.gmra.mrb[0].mxu1 %v1092_v28  ;;  %v753_v28 = vld [vmem:[%s1388_s3 + $0x18] sm:$0xff] (!%p970_p11) }
  0x53   : > { %1012 = vmatprep.mubr.bf16.mxu0 %v1093_v29  ;;  %1020 = vmatprep.mubr.bf16.mxu1 %v1094_v30 }
  0x5a   : > { %1013 = vmatmul.mubr.bf16.gmra.mrb[4].mxu0 %v1095_v31  ;;  %1021 = vmatmul.mubr.bf16.gmra.mrb[4].mxu1 %v1096_v32  ;;  %v754_v32 = vld [vmem:[%s1388_s3 + $0x20] sm:$0xff] (!%p970_p11) }
 0x125   : > { %v1010_v37 = vpop.f32.mrb[0].mxu0  ;;  %v1018_v38 = vpop.f32.mrb[0].mxu1 }
 0x126   : > { %v677_v41 = vadd.f32 %v1010_v37, %v436_v33  ;;  %v685_v42 = vadd.f32 %v1018_v38, %v444_v34  ;;  %v612_v43 = vpop.f32.mrb[1].mxu0  ;;  %v644_v44 = vpop.f32.mrb[1].mxu1  ;;  %v755_v38 = vld [vmem:[%s1388_s3 + $0x28] sm:$0xff] (!%p970_p11) }
 0x127   : > { %v675_v47 = vadd.f32 %v612_v43, %v434_v35  ;;  %v683_v48 = vadd.f32 %v644_v44, %v442_v36  ;;  %v1011_v49 = vpop.f32.mrb[2].mxu0  ;;  %v1019_v50 = vpop.f32.mrb[2].mxu1 }
 0x128   : > { %693 = vst [vmem:[#allocation2 + $0x10] sm:$0xff] %v677_v41  ;;  %701 = vst [vmem:[#allocation2 + $0x50] sm:$0xff] %v685_v42  ;;  %v678_v51 = vadd.f32 %v1011_v49, %v437_v39  ;;  %v686_v52 = vadd.f32 %v1019_v50, %v445_v40  ;;  %v615_v53 = vpop.f32.mrb[3].mxu0  ;;  %v647_v54 = vpop.f32.mrb[3].mxu1  ;;  %v756_v40 = vld [vmem:[%s1388_s3 + $0x30] sm:$0xff] (!%p970_p11) }
 0x129   : > { %691 = vst [vmem:[#allocation2] sm:$0xff] %v675_v47  ;;  %699 = vst [vmem:[#allocation2 + $0x40] sm:$0xff] %v683_v48  ;;  %v676_v55 = vadd.f32 %v615_v53, %v435_v45  ;;  %v684_v56 = vadd.f32 %v647_v54, %v443_v46  ;;  %v757_v45 = vld [vmem:[%s1388_s3 + $0x38] sm:$0xff] (!%p970_p11)  ;;  %v759_v53 = vld [vmem:[%s1388_s3 + $0x48] sm:$0xff] (!%p970_p11) }
 0x12a   : > { %694 = vst [vmem:[#allocation2 + $0x18] sm:$0xff] %v678_v51  ;;  %702 = vst [vmem:[#allocation2 + $0x58] sm:$0xff] %v686_v52  ;;  %v758_v51 = vld [vmem:[%s1388_s3 + $0x40] sm:$0xff] (!%p970_p11) }
 0x12b   : > { %692 = vst [vmem:[#allocation2 + $0x8] sm:$0xff] %v676_v55  ;;  %700 = vst [vmem:[#allocation2 + $0x48] sm:$0xff] %v684_v56 }
 0x12d   : > { %v1014_v61 = vpop.f32.mrb[4].mxu0  ;;  %v1022_v62 = vpop.f32.mrb[4].mxu1  ;;  %710 = sbr.rel (%p970_p11) target bundleno = 323 (0x143), region = 85 }
 0x12e   : > { %v681_v1 = vadd.f32 %v1014_v61, %v440_v57  ;;  %v689_v2 = vadd.f32 %v1022_v62, %v448_v58  ;;  %v628_v3 = vpop.f32.mrb[5].mxu0  ;;  %v660_v4 = vpop.f32.mrb[5].mxu1 }
 0x12f   : > { %v679_v7 = vadd.f32 %v628_v3, %v438_v59  ;;  %v687_v8 = vadd.f32 %v660_v4, %v446_v60  ;;  %v1015_v9 = vpop.f32.mrb[6].mxu0  ;;  %v1023_v10 = vpop.f32.mrb[6].mxu1  ;;  %v713_v23 = vld [vmem:[#allocation2 + $0x10] sm:$0xff] (!%p970_p11)  ;;  %v762_v3 = vld [vmem:[%s1388_s3 + $0x60] sm:$0xff] (!%p970_p11) }
 0x130   : > { %697 = vst [vmem:[#allocation2 + $0x30] sm:$0xff] %v681_v1  ;;  %705 = vst [vmem:[#allocation2 + $0x70] sm:$0xff] %v689_v2  ;;  %v682_v11 = vadd.f32 %v1015_v9, %v441_v63  ;;  %v690_v12 = vadd.f32 %v1023_v10, %v449_v0  ;;  %v631_v13 = vpop.f32.mrb[7].mxu0  ;;  %v663_v14 = vpop.f32.mrb[7].mxu1  ;;  %v711_v17 = vld [vmem:[#allocation2] sm:$0xff] (!%p970_p11)  ;;  %v736_v25 = vadd.f32 (!%p970_p11), %v1256_v18, %v713_v23  ;;  %v721_v58 = vld [vmem:[#allocation2 + $0x50] sm:$0xff] (!%p970_p11) }
 0x131   : > { %695 = vst [vmem:[#allocation2 + $0x20] sm:$0xff] %v679_v7  ;;  %703 = vst [vmem:[#allocation2 + $0x60] sm:$0xff] %v687_v8  ;;  %v680_v15 = vadd.f32 %v631_v13, %v439_v5  ;;  %v688_v16 = vadd.f32 %v663_v14, %v447_v6  ;;  %v734_v20 = vadd.f32 (!%p970_p11), %v1256_v18, %v711_v17  ;;  %v714_v27 = vld [vmem:[#allocation2 + $0x18] sm:$0xff] (!%p970_p11)  ;;  %v719_v46 = vld [vmem:[#allocation2 + $0x40] sm:$0xff] (!%p970_p11) }
 0x132   : > { %698 = vst [vmem:[#allocation2 + $0x38] sm:$0xff] %v682_v11  ;;  %706 = vst [vmem:[#allocation2 + $0x78] sm:$0xff] %v690_v12  ;;  %v712_v21 = vld [vmem:[#allocation2 + $0x8] sm:$0xff] (!%p970_p11)  ;;  %v737_v30 = vadd.f32 (!%p970_p11), %v1256_v18, %v714_v27  ;;  %v768_v35 = vadd.f32 (!%p970_p11), %v752_v26, %v736_v25  ;;  %v742_v57 = vadd.f32 (!%p970_p11), %v1256_v18, %v719_v46  ;;  %v760_v59 = vld [vmem:[%s1388_s3 + $0x50] sm:$0xff] (!%p970_p11) }
 0x133   : > { %696 = vst [vmem:[#allocation2 + $0x28] sm:$0xff] %v680_v15  ;;  %704 = vst [vmem:[#allocation2 + $0x68] sm:$0xff] %v688_v16  ;;  %v735_v24 = vadd.f32 (!%p970_p11), %v1256_v18, %v712_v21  ;;  %v766_v29 = vadd.f32 (!%p970_p11), %v750_v19, %v734_v20  ;;  %v720_v52 = vld [vmem:[#allocation2 + $0x48] sm:$0xff] (!%p970_p11)  ;;  %v722_v60 = vld [vmem:[#allocation2 + $0x58] sm:$0xff] (!%p970_p11)  ;;  %v744_v0 = vadd.f32 (!%p970_p11), %v1256_v18, %v721_v58 }
 0x134   : > { %v769_v42 = vadd.f32 %v753_v28, %v737_v30  ;;  %v784_v48 = vmax.f32 %v768_v35, 0.0  ;;  %v743_v63 = vadd.f32 %v1256_v18, %v720_v52  ;;  %v761_v1 = vld [vmem:[%s1388_s3 + $0x58] sm:$0xff]  ;;  %v774_v6 = vadd.f32 %v758_v51, %v742_v57  ;;  %v763_v9 = vld [vmem:[%s1388_s3 + $0x68] sm:$0xff]  ;;  %v764_v15 = vld [vmem:[%s1388_s3 + $0x70] sm:$0xff] }
 0x135   : > { %v767_v34 = vadd.f32 %v751_v22, %v735_v24  ;;  %v782_v41 = vmax.f32 %v766_v29, 0.0  ;;  %v745_v7 = vadd.f32 %v1256_v18, %v722_v60  ;;  %v776_v12 = vadd.f32 %v760_v59, %v744_v0  ;;  %v765_v26 = vld [vmem:[%s1388_s3 + $0x78] sm:$0xff] }
 0x136   : > { %v785_v54 = vmax.f32 %v769_v42, 0.0  ;;  %800 = vst [vmem:[%s1389_s4 + $0x10] sm:$0xff] %v784_v48  ;;  %v775_v11 = vadd.f32 %v759_v53, %v743_v63  ;;  %v790_v19 = vmax.f32 %v774_v6, 0.0 }
 0x137   : > { %v717_v39 = vld [vmem:[#allocation2 + $0x30] sm:$0xff]  ;;  %v783_v47 = vmax.f32 %v767_v34, 0.0  ;;  %798 = vst [vmem:[%s1389_s4] sm:$0xff] %v782_v41  ;;  %v777_v20 = vadd.f32 %v761_v1, %v745_v7  ;;  %v792_v23 = vmax.f32 %v776_v12, 0.0 }
 0x138   : > { %v715_v31 = vld [vmem:[#allocation2 + $0x20] sm:$0xff]  ;;  %v740_v43 = vadd.f32 %v1256_v18, %v717_v39  ;;  %801 = vst [vmem:[%s1389_s4 + $0x18] sm:$0xff] %v785_v54  ;;  %v725_v10 = vld [vmem:[#allocation2 + $0x70] sm:$0xff]  ;;  %v791_v22 = vmax.f32 %v775_v11, 0.0  ;;  %806 = vst [vmem:[%s1389_s4 + $0x40] sm:$0xff] %v790_v19 }
 0x139   : > { %v738_v36 = vadd.f32 %v1256_v18, %v715_v31  ;;  %v718_v44 = vld [vmem:[#allocation2 + $0x38] sm:$0xff]  ;;  %799 = vst [vmem:[%s1389_s4 + $0x8] sm:$0xff] %v783_v47  ;;  %v723_v2 = vld [vmem:[#allocation2 + $0x60] sm:$0xff]  ;;  %v748_v21 = vadd.f32 %v1256_v18, %v725_v10  ;;  %v793_v27 = vmax.f32 %v777_v20, 0.0  ;;  %808 = vst [vmem:[%s1389_s4 + $0x50] sm:$0xff] %v792_v23 }
 0x13a   : > { %v716_v33 = vld [vmem:[#allocation2 + $0x28] sm:$0xff]  ;;  %v772_v55 = vadd.f32 %v756_v40, %v740_v43  ;;  %v741_v56 = vadd.f32 %v1256_v18, %v718_v44  ;;  %v746_v13 = vadd.f32 %v1256_v18, %v723_v2  ;;  %v726_v16 = vld [vmem:[#allocation2 + $0x78] sm:$0xff]  ;;  %807 = vst [vmem:[%s1389_s4 + $0x48] sm:$0xff] %v791_v22 }
 0x13b   : > { %v739_v37 = vadd.f32 %v1256_v18, %v716_v33  ;;  %v770_v49 = vadd.f32 %v754_v32, %v738_v36  ;;  %v724_v8 = vld [vmem:[#allocation2 + $0x68] sm:$0xff]  ;;  %v780_v28 = vadd.f32 %v764_v15, %v748_v21  ;;  %v749_v29 = vadd.f32 %v1256_v18, %v726_v16  ;;  %809 = vst [vmem:[%s1389_s4 + $0x58] sm:$0xff] %v793_v27 }
 0x13c   : > { %v788_v4 = vmax.f32 %v772_v55, 0.0  ;;  %v773_v5 = vadd.f32 %v757_v45, %v741_v56  ;;  %v747_v14 = vadd.f32 %v1256_v18, %v724_v8  ;;  %v778_v24 = vadd.f32 %v762_v3, %v746_v13 }
 0x13d   : > { %v771_v50 = vadd.f32 %v755_v38, %v739_v37  ;;  %v786_v61 = vmax.f32 %v770_v49, 0.0  ;;  %v796_v32 = vmax.f32 %v780_v28, 0.0  ;;  %v781_v33 = vadd.f32 %v765_v26, %v749_v29 }
 0x13e   : > { %804 = vst [vmem:[%s1389_s4 + $0x30] sm:$0xff] %v788_v4  ;;  %v789_v17 = vmax.f32 %v773_v5, 0.0  ;;  %v779_v25 = vadd.f32 %v763_v9, %v747_v14  ;;  %v794_v30 = vmax.f32 %v778_v24, 0.0 }
 0x13f   : > { %v787_v62 = vmax.f32 %v771_v50, 0.0  ;;  %802 = vst [vmem:[%s1389_s4 + $0x20] sm:$0xff] %v786_v61  ;;  %812 = vst [vmem:[%s1389_s4 + $0x70] sm:$0xff] %v796_v32  ;;  %v797_v18 = vmax.f32 %v781_v33, 0.0 }
 0x140   : > { %805 = vst [vmem:[%s1389_s4 + $0x38] sm:$0xff] %v789_v17  ;;  %v795_v31 = vmax.f32 %v779_v25, 0.0  ;;  %810 = vst [vmem:[%s1389_s4 + $0x60] sm:$0xff] %v794_v30 }
 0x141   : > { %803 = vst [vmem:[%s1389_s4 + $0x28] sm:$0xff] %v787_v62  ;;  %813 = vst [vmem:[%s1389_s4 + $0x78] sm:$0xff] %v797_v18 }
 0x142   : > { %811 = vst [vmem:[%s1389_s4 + $0x68] sm:$0xff] %v795_v31 }
 0x143 PF: > { %s14_s19 = sadd.s32 1, %s1135_s19   ;;  %s1390_s15 = smov %s1123_s16 }
 0x144   : > { %p11_p12 = scmp.ge.s32.totalorder %s14_s19, 11   ;;  %s1391_s16 = smov %s1198_s23 }
 0x145   : > { %s1392_s17 = smov %s1131_s18  ;;  %s1393_s18 = smov %s1395_s20 }
 0x146   :  { %13 = sbr.rel (!%p11_p12) target bundleno = 3 (0x3), region = 129 }

// kernel: frontal_cls_forward.47
= control target key start
LH: loop header
LB: loop body
LE: loop exit
PB: predicated region body
PF: predicated region fallthrough
CT: control target
= control target key end

     0   :  { %s1047_s12 = smov 0   ;;  %s1049_s13 = smov 0   ;;  %s1203_s0 = inlined_call_operand.vmem [shape: bf16[128,1152], index: 0, kind: input, shape index: {}]   ;;  %s1204_s1 = inlined_call_operand.vmem [shape: bf16[1152,128], index: 1, kind: input, shape index: {}]   ;;  %s1205_s2 = inlined_call_operand.vmem [shape: f32[1,128], index: 2, kind: input, shape index: {}]   ;;  %s1206_s3 = inlined_call_operand.vmem [shape: f32[128,128], index: 3, kind: output, shape index: {}]  }
   0x1   :  { %s1051_s14 = smov 0   ;;  %s1053_s15 = smov 0  }
   0x2   :  { %s1055_s16 = smov 0  }
   0x3 LB: > { %s25_s17 = sadd.s32 1, %s1020_s15  ;;  %p48_p1 = scmp.ne.s32.totalorder %s1012_s13, %s1008_s12  ;;  %s1024_s16 = sphi %s1055_s16, %s13_s16   ;;  %s1020_s15 = sphi %s1053_s15, %s1210_s15   ;;  %s1016_s14 = sphi %s1051_s14, %s1209_s14   ;;  %s1012_s13 = sphi %s1049_s13, %s1208_s13   ;;  %s1008_s12 = sphi %s1047_s12, %s1207_s12  }
   0x4   : > { %p26_p0 = scmp.ge.s32.totalorder %s25_s17, 9  ;;  %p49_p2 = scmp.eq.s32.totalorder %s1024_s16, 0 }
   0x5   : > { %s41_s19 = sadd.s32 1, %s1012_s13  ;;  %p835_p5 = scmp.ge.s32.totalorder %s1024_s16, 9 }
   0x6   : > { %s1212_s17 = smov (%p26_p0, %s25_s17), 0  ;;  %p50_p3 = por %p49_p2, %p48_p1 }
   0x7   : > { %s37_s18 = ssub.s32 %s1020_s15, %s1212_s17  ;;  %162 = sbr.rel (%p835_p5) target bundleno = 28 (0x1c), region = 20 }
   0x8   : > { %p39_p4 = scmp.eq.s32.totalorder %s37_s18, 0 }
   0xa   : > { %s1082_s20 = scalar_select %p39_p4, %s1012_s13, %s41_s19  }
   0xe   : > { %165 = sbr.rel (!%p50_p3) target bundleno = 28 (0x1c), region = 24  ;;  %s167_s21 = sand.u32 (%p50_p3), 1, %s1012_s13  }
   0xf   : > { %s837_s22 = sshll.u32 (%p50_p3), %s1020_s15, 2  ;;  %s836_s23 = sshll.u32 (%p50_p3), %s167_s21, 6 }
  0x10   : > { %s1090_s26 = scalar_lea.vmem (%p50_p3), %s1203_s0, %s837_s22  ;;  %s169_s27 = scalar_lea.vmem (%p50_p3), [#allocation3], %s836_s23 }
  0x11   : > { %v190_v0 = vld [vmem:[%s1090_s26] sm:$0xf] (%p50_p3)  ;;  %v192_v1 = vld [vmem:[%s1090_s26 + $0x24] sm:$0xf] (%p50_p3)  ;;  %v194_v2 = vld [vmem:[%s1090_s26 + $0x48] sm:$0xf] (%p50_p3) }
  0x12   : > { %191 = vst [vmem:[%s169_s27] sm:$0xf] (%p50_p3), %v190_v0  ;;  %193 = vst [vmem:[%s169_s27 + $0x4] sm:$0xf] (%p50_p3), %v192_v1  ;;  %v196_v3 = vld [vmem:[%s1090_s26 + $0x6c] sm:$0xf] (%p50_p3) }
  0x13   : > { %v198_v4 = vld [vmem:[%s1090_s26 + $0x90] sm:$0xf] (%p50_p3)  ;;  %195 = vst [vmem:[%s169_s27 + $0x8] sm:$0xf] (%p50_p3), %v194_v2  ;;  %197 = vst [vmem:[%s169_s27 + $0xc] sm:$0xf] (%p50_p3), %v196_v3 }
  0x14   : > { %199 = vst [vmem:[%s169_s27 + $0x10] sm:$0xf] (%p50_p3), %v198_v4  ;;  %v200_v5 = vld [vmem:[%s1090_s26 + $0xb4] sm:$0xf] (%p50_p3)  ;;  %v202_v6 = vld [vmem:[%s1090_s26 + $0xd8] sm:$0xf] (%p50_p3) }
  0x15   : > { %v204_v7 = vld [vmem:[%s1090_s26 + $0xfc] sm:$0xf]  ;;  %201 = vst [vmem:[%s169_s27 + $0x14] sm:$0xf] %v200_v5  ;;  %203 = vst [vmem:[%s169_s27 + $0x18] sm:$0xf] %v202_v6 }
  0x16   : > { %205 = vst [vmem:[%s169_s27 + $0x1c] sm:$0xf] %v204_v7  ;;  %v206_v8 = vld [vmem:[%s1090_s26 + $0x120] sm:$0xf]  ;;  %v208_v9 = vld [vmem:[%s1090_s26 + $0x144] sm:$0xf] }
  0x17   : > { %v210_v10 = vld [vmem:[%s1090_s26 + $0x168] sm:$0xf]  ;;  %207 = vst [vmem:[%s169_s27 + $0x20] sm:$0xf] %v206_v8  ;;  %209 = vst [vmem:[%s169_s27 + $0x24] sm:$0xf] %v208_v9 }
  0x18   : > { %211 = vst [vmem:[%s169_s27 + $0x28] sm:$0xf] %v210_v10  ;;  %v212_v11 = vld [vmem:[%s1090_s26 + $0x18c] sm:$0xf]  ;;  %v214_v12 = vld [vmem:[%s1090_s26 + $0x1b0] sm:$0xf] }
  0x19   : > { %v216_v13 = vld [vmem:[%s1090_s26 + $0x1d4] sm:$0xf]  ;;  %213 = vst [vmem:[%s169_s27 + $0x2c] sm:$0xf] %v212_v11  ;;  %215 = vst [vmem:[%s169_s27 + $0x30] sm:$0xf] %v214_v12 }
  0x1a   : > { %217 = vst [vmem:[%s169_s27 + $0x34] sm:$0xf] %v216_v13  ;;  %v218_v14 = vld [vmem:[%s1090_s26 + $0x1f8] sm:$0xf]  ;;  %v220_v15 = vld [vmem:[%s1090_s26 + $0x21c] sm:$0xf] }
  0x1b   : > { %219 = vst [vmem:[%s169_s27 + $0x38] sm:$0xf] %v218_v14  ;;  %221 = vst [vmem:[%s169_s27 + $0x3c] sm:$0xf] %v220_v15 }
  0x1c PF: > { %p838_p6 = scmp.ge.s32.totalorder %s1024_s16, 1  ;;  %p287_p7 = scmp.lt.s32.totalorder %s1024_s16, 10 }
  0x1e   : > { %p288_p8 = pnand %p838_p6, %p287_p7 }
  0x1f   : > { %s294_s28 = sand.u32 (!%p288_p8), 1, %s1008_s12   ;;  %s840_s29 = sshll.u32 (!%p288_p8), %s1016_s14, 4 }
  0x20   : > { %291 = sbr.rel (%p288_p8) target bundleno = 321 (0x141), region = 69  ;;  %s839_s30 = sshll.u32 (!%p288_p8), %s294_s28, 6 }
  0x21   : > { %p333_p9 = scmp.lt.s32.totalorder (!%p288_p8), %s840_s29, 143  ;;  %s1117_s8 = scalar_lea.vmem (!%p288_p8), [#allocation3], %s839_s30 }
  0x22   : > { %p842_p10 = scmp.ne.s32.totalorder (!%p288_p8), %s1016_s14, 0 }
  0x27   : > { %s1214_s29 = smov (!%p333_p9, %s840_s29), 143  ;;  %357 = sbr.rel (%p842_p10) target bundleno = 49 (0x31), region = 77 }
  0x28   : > { %s841_s4 = sshll.u32 %s1214_s29, 2  ;;  %v1026_v16 = vmov (!%p842_p10), 0.0  }
  0x29   : > { %s1115_s7 = scalar_lea.vmem %s1204_s1, %s841_s4  ;;  %358 = vst [vmem:[#allocation2] sm:$0xff] (!%p842_p10), %v1026_v16  ;;  %359 = vst [vmem:[#allocation2 + $0x8] sm:$0xff] (!%p842_p10), %v1026_v16 }
  0x2a   : > { %360 = vst [vmem:[#allocation2 + $0x10] sm:$0xff] (!%p842_p10), %v1026_v16  ;;  %361 = vst [vmem:[#allocation2 + $0x18] sm:$0xff] (!%p842_p10), %v1026_v16 }
  0x2b   : > { %362 = vst [vmem:[#allocation2 + $0x20] sm:$0xff] (!%p842_p10), %v1026_v16  ;;  %363 = vst [vmem:[#allocation2 + $0x28] sm:$0xff] (!%p842_p10), %v1026_v16 }
  0x2c   : > { %364 = vst [vmem:[#allocation2 + $0x30] sm:$0xff] (!%p842_p10), %v1026_v16  ;;  %365 = vst [vmem:[#allocation2 + $0x38] sm:$0xff] (!%p842_p10), %v1026_v16 }
  0x2d   : > { %366 = vst [vmem:[#allocation2 + $0x40] sm:$0xff] (!%p842_p10), %v1026_v16  ;;  %367 = vst [vmem:[#allocation2 + $0x48] sm:$0xff] (!%p842_p10), %v1026_v16 }
  0x2e   : > { %368 = vst [vmem:[#allocation2 + $0x50] sm:$0xff] %v1026_v16  ;;  %369 = vst [vmem:[#allocation2 + $0x58] sm:$0xff] %v1026_v16 }
  0x2f   : > { %370 = vst [vmem:[#allocation2 + $0x60] sm:$0xff] %v1026_v16  ;;  %371 = vst [vmem:[#allocation2 + $0x68] sm:$0xff] %v1026_v16 }
  0x30   : > { %372 = vst [vmem:[#allocation2 + $0x70] sm:$0xff] %v1026_v16  ;;  %373 = vst [vmem:[#allocation2 + $0x78] sm:$0xff] %v1026_v16 }
  0x31 PF: > { %v970_v17 = vld [vmem:[%s1115_s7] sm:$0xff]   ;;  %v971_v18 = vld [vmem:[%s1115_s7 + $0x8] sm:$0xff]   ;;  %v972_v19 = vld [vmem:[%s1115_s7 + $0x10] sm:$0xff]   ;;  %p859_p11 = scmp.ne.s32.totalorder %s1016_s14, 8 }
  0x32   : > { %881 = vmatprep.subr.bf16.mxu0 %v970_v17  ;;  %913 = vmatprep.subr.bf16.mxu1 %v970_v17  ;;  %v973_v20 = vld [vmem:[%s1115_s7 + $0x18] sm:$0xff]   ;;  %v978_v21 = vld [vmem:[%s1117_s8] sm:$0xff]   ;;  %v975_v24 = vld [vmem:[%s1115_s7 + $0x28] sm:$0xff]  }
  0x33   : > { %882 = vmatpush3.bf16.msra.mxu0 %v970_v17  ;;  %921 = vmatpush3.bf16.msra.mxu1 %v970_v17  ;;  %v979_v22 = vld [vmem:[%s1117_s8 + $0x20] sm:$0xff]   ;;  %v976_v25 = vld [vmem:[%s1115_s7 + $0x30] sm:$0xff]   ;;  %v977_v26 = vld [vmem:[%s1115_s7 + $0x38] sm:$0xff]  }
  0x34   : > { %883 = vmatprep.subr.bf16.mxu0 %v971_v18  ;;  %914 = vmatprep.subr.bf16.mxu1 %v971_v18  ;;  %v974_v23 = vld [vmem:[%s1115_s7 + $0x20] sm:$0xff]   ;;  %v980_v27 = vld [vmem:[%s1117_s8 + $0x8] sm:$0xff]   ;;  %v982_v29 = vld [vmem:[%s1117_s8 + $0x10] sm:$0xff]  }
  0x35   : > { %897 = vmatprep.mubr.bf16.mxu0 %v978_v21  ;;  %905 = vmatprep.mubr.bf16.mxu1 %v979_v22  ;;  %v981_v28 = vld [vmem:[%s1117_s8 + $0x28] sm:$0xff]   ;;  %v983_v30 = vld [vmem:[%s1117_s8 + $0x30] sm:$0xff]   ;;  %v984_v31 = vld [vmem:[%s1117_s8 + $0x18] sm:$0xff]  }
  0x36   : > { %v985_v32 = vld [vmem:[%s1117_s8 + $0x38] sm:$0xff]   ;;  %v376_v33 = vld [vmem:[#allocation2 + $0x10] sm:$0xff]  ;;  %v374_v35 = vld [vmem:[#allocation2] sm:$0xff] }
  0x37   : > { %884 = vmatpush3.bf16.msra.mxu0 %v971_v18  ;;  %922 = vmatpush3.bf16.msra.mxu1 %v971_v18  ;;  %v384_v34 = vld [vmem:[#allocation2 + $0x50] sm:$0xff]  ;;  %v382_v36 = vld [vmem:[#allocation2 + $0x40] sm:$0xff]  ;;  %v377_v39 = vld [vmem:[#allocation2 + $0x18] sm:$0xff] }
  0x38   : > { %885 = vmatprep.subr.bf16.mxu0 %v972_v19  ;;  %915 = vmatprep.subr.bf16.mxu1 %v972_v19  ;;  %v385_v40 = vld [vmem:[#allocation2 + $0x58] sm:$0xff]  ;;  %v375_v45 = vld [vmem:[#allocation2 + $0x8] sm:$0xff]  ;;  %v380_v57 = vld [vmem:[#allocation2 + $0x30] sm:$0xff] }
  0x39   : > { %v383_v46 = vld [vmem:[#allocation2 + $0x48] sm:$0xff]  ;;  %v388_v58 = vld [vmem:[#allocation2 + $0x70] sm:$0xff]  ;;  %v378_v59 = vld [vmem:[#allocation2 + $0x20] sm:$0xff] }
  0x3a   : > { %v386_v60 = vld [vmem:[#allocation2 + $0x60] sm:$0xff]  ;;  %v381_v63 = vld [vmem:[#allocation2 + $0x38] sm:$0xff]  ;;  %v379_v5 = vld [vmem:[#allocation2 + $0x28] sm:$0xff] }
  0x3b   : > { %886 = vmatpush3.bf16.msra.mxu0 %v972_v19  ;;  %923 = vmatpush3.bf16.msra.mxu1 %v972_v19  ;;  %v389_v0 = vld [vmem:[#allocation2 + $0x78] sm:$0xff]  ;;  %v387_v6 = vld [vmem:[#allocation2 + $0x68] sm:$0xff]  ;;  %v860_v18 = vld [vmem:[%s1205_s2] ss:$0 sm:$0xff] (!%p859_p11) }
  0x3c   : > { %887 = vmatprep.subr.bf16.mxu0 %v973_v20  ;;  %916 = vmatprep.subr.bf16.mxu1 %v973_v20 }
  0x3f   : > { %888 = vmatpush3.bf16.msra.mxu0 %v973_v20  ;;  %924 = vmatpush3.bf16.msra.mxu1 %v973_v20 }
  0x40   : > { %889 = vmatprep.subr.bf16.mxu0 %v974_v23  ;;  %917 = vmatprep.subr.bf16.mxu1 %v974_v23 }
  0x43   : > { %890 = vmatpush3.bf16.msra.mxu0 %v974_v23  ;;  %925 = vmatpush3.bf16.msra.mxu1 %v974_v23 }
  0x44   : > { %891 = vmatprep.subr.bf16.mxu0 %v975_v24  ;;  %918 = vmatprep.subr.bf16.mxu1 %v975_v24 }
  0x47   : > { %892 = vmatpush3.bf16.msra.mxu0 %v975_v24  ;;  %926 = vmatpush3.bf16.msra.mxu1 %v975_v24 }
  0x48   : > { %893 = vmatprep.subr.bf16.mxu0 %v976_v25  ;;  %919 = vmatprep.subr.bf16.mxu1 %v976_v25 }
  0x4b   : > { %894 = vmatpush3.bf16.msra.mxu0 %v976_v25  ;;  %927 = vmatpush3.bf16.msra.mxu1 %v976_v25 }
  0x4c   : > { %895 = vmatprep.subr.bf16.mxu0 %v977_v26  ;;  %920 = vmatprep.subr.bf16.mxu1 %v977_v26 }
  0x4f   : > { %896 = vmatpush3.bf16.msra.mxu0 %v977_v26  ;;  %928 = vmatpush3.bf16.msra.mxu1 %v977_v26 }
  0x52   : > { %898 = vmatmul.mubr.bf16.vlgmr.msra.gmra.mrb[0].mxu0 %v980_v27  ;;  %906 = vmatmul.mubr.bf16.vlgmr.msra.gmra.mrb[0].mxu1 %v981_v28 }
  0x53   : > { %901 = vmatprep.mubr.bf16.mxu0 %v982_v29  ;;  %909 = vmatprep.mubr.bf16.mxu1 %v983_v30 }
  0x5a   : > { %902 = vmatmul.mubr.bf16.gmra.mrb[4].mxu0 %v984_v31  ;;  %910 = vmatmul.mubr.bf16.gmra.mrb[4].mxu1 %v985_v32 }
 0x125   : > { %v899_v37 = vpop.f32.mrb[0].mxu0  ;;  %v907_v38 = vpop.f32.mrb[0].mxu1 }
 0x126   : > { %v617_v41 = vadd.f32 %v899_v37, %v376_v33  ;;  %v625_v42 = vadd.f32 %v907_v38, %v384_v34  ;;  %v552_v43 = vpop.f32.mrb[1].mxu0  ;;  %v584_v44 = vpop.f32.mrb[1].mxu1 }
 0x127   : > { %v615_v47 = vadd.f32 %v552_v43, %v374_v35  ;;  %v623_v48 = vadd.f32 %v584_v44, %v382_v36  ;;  %v900_v49 = vpop.f32.mrb[2].mxu0  ;;  %v908_v50 = vpop.f32.mrb[2].mxu1 }
 0x128   : > { %633 = vst [vmem:[#allocation2 + $0x10] sm:$0xff] %v617_v41  ;;  %641 = vst [vmem:[#allocation2 + $0x50] sm:$0xff] %v625_v42  ;;  %v618_v51 = vadd.f32 %v900_v49, %v377_v39  ;;  %v626_v52 = vadd.f32 %v908_v50, %v385_v40  ;;  %v555_v53 = vpop.f32.mrb[3].mxu0  ;;  %v587_v54 = vpop.f32.mrb[3].mxu1 }
 0x129   : > { %631 = vst [vmem:[#allocation2] sm:$0xff] %v615_v47  ;;  %639 = vst [vmem:[#allocation2 + $0x40] sm:$0xff] %v623_v48  ;;  %v616_v55 = vadd.f32 %v555_v53, %v375_v45  ;;  %v624_v56 = vadd.f32 %v587_v54, %v383_v46 }
 0x12a   : > { %634 = vst [vmem:[#allocation2 + $0x18] sm:$0xff] %v618_v51  ;;  %642 = vst [vmem:[#allocation2 + $0x58] sm:$0xff] %v626_v52 }
 0x12b   : > { %632 = vst [vmem:[#allocation2 + $0x8] sm:$0xff] %v616_v55  ;;  %640 = vst [vmem:[#allocation2 + $0x48] sm:$0xff] %v624_v56 }
 0x12d   : > { %v903_v61 = vpop.f32.mrb[4].mxu0  ;;  %v911_v62 = vpop.f32.mrb[4].mxu1  ;;  %650 = sbr.rel (%p859_p11) target bundleno = 321 (0x141), region = 81 }
 0x12e   : > { %v621_v1 = vadd.f32 %v903_v61, %v380_v57  ;;  %v629_v2 = vadd.f32 %v911_v62, %v388_v58  ;;  %v568_v3 = vpop.f32.mrb[5].mxu0  ;;  %v600_v4 = vpop.f32.mrb[5].mxu1 }
 0x12f   : > { %v619_v7 = vadd.f32 %v568_v3, %v378_v59  ;;  %v627_v8 = vadd.f32 %v600_v4, %v386_v60  ;;  %v904_v9 = vpop.f32.mrb[6].mxu0  ;;  %v912_v10 = vpop.f32.mrb[6].mxu1  ;;  %v653_v22 = vld [vmem:[#allocation2 + $0x10] sm:$0xff] (!%p859_p11) }
 0x130   : > { %637 = vst [vmem:[#allocation2 + $0x30] sm:$0xff] %v621_v1  ;;  %645 = vst [vmem:[#allocation2 + $0x70] sm:$0xff] %v629_v2  ;;  %v622_v11 = vadd.f32 %v904_v9, %v381_v63  ;;  %v630_v12 = vadd.f32 %v912_v10, %v389_v0  ;;  %v571_v13 = vpop.f32.mrb[7].mxu0  ;;  %v603_v14 = vpop.f32.mrb[7].mxu1  ;;  %v651_v17 = vld [vmem:[#allocation2] sm:$0xff] (!%p859_p11)  ;;  %v676_v25 = vadd.f32 (!%p859_p11), %v860_v18, %v653_v22  ;;  %v661_v37 = vld [vmem:[#allocation2 + $0x50] sm:$0xff] (!%p859_p11) }
 0x131   : > { %635 = vst [vmem:[#allocation2 + $0x20] sm:$0xff] %v619_v7  ;;  %643 = vst [vmem:[#allocation2 + $0x60] sm:$0xff] %v627_v8  ;;  %v620_v15 = vadd.f32 %v571_v13, %v379_v5  ;;  %v628_v16 = vadd.f32 %v603_v14, %v387_v6  ;;  %v674_v20 = vadd.f32 (!%p859_p11), %v860_v18, %v651_v17  ;;  %v654_v23 = vld [vmem:[#allocation2 + $0x18] sm:$0xff] (!%p859_p11)  ;;  %v659_v35 = vld [vmem:[#allocation2 + $0x40] sm:$0xff] (!%p859_p11) }
 0x132   : > { %638 = vst [vmem:[#allocation2 + $0x38] sm:$0xff] %v622_v11  ;;  %646 = vst [vmem:[#allocation2 + $0x78] sm:$0xff] %v630_v12  ;;  %v652_v19 = vld [vmem:[#allocation2 + $0x8] sm:$0xff] (!%p859_p11)  ;;  %v677_v26 = vadd.f32 (!%p859_p11), %v860_v18, %v654_v23  ;;  %v692_v38 = vmax.f32 (!%p859_p11), %v676_v25, 0.0  ;;  %v662_v42 = vld [vmem:[#allocation2 + $0x58] sm:$0xff] (!%p859_p11)  ;;  %v682_v47 = vadd.f32 (!%p859_p11), %v860_v18, %v659_v35  ;;  %v684_v52 = vadd.f32 (!%p859_p11), %v860_v18, %v661_v37 }
 0x133   : > { %636 = vst [vmem:[#allocation2 + $0x28] sm:$0xff] %v620_v15  ;;  %644 = vst [vmem:[#allocation2 + $0x68] sm:$0xff] %v628_v16  ;;  %v675_v21 = vadd.f32 (!%p859_p11), %v860_v18, %v652_v19  ;;  %v690_v31 = vmax.f32 (!%p859_p11), %v674_v20, 0.0  ;;  %v660_v36 = vld [vmem:[#allocation2 + $0x48] sm:$0xff] (!%p859_p11)  ;;  %v685_v53 = vadd.f32 (!%p859_p11), %v860_v18, %v662_v42 }
 0x134   : > { %v693_v39 = vmax.f32 %v677_v26, 0.0  ;;  %v683_v48 = vadd.f32 %v860_v18, %v660_v36  ;;  %708 = vst [vmem:[%s1206_s3 + $0x10] sm:$0xff] %v692_v38  ;;  %v698_v55 = vmax.f32 %v682_v47, 0.0  ;;  %v700_v59 = vmax.f32 %v684_v52, 0.0 }
 0x135   : > { %v691_v32 = vmax.f32 %v675_v21, 0.0  ;;  %706 = vst [vmem:[%s1206_s3] sm:$0xff] %v690_v31  ;;  %v701_v60 = vmax.f32 %v685_v53, 0.0 }
 0x136   : > { %709 = vst [vmem:[%s1206_s3 + $0x18] sm:$0xff] %v693_v39  ;;  %v699_v56 = vmax.f32 %v683_v48, 0.0  ;;  %714 = vst [vmem:[%s1206_s3 + $0x40] sm:$0xff] %v698_v55 }
 0x137   : > { %v657_v29 = vld [vmem:[#allocation2 + $0x30] sm:$0xff]  ;;  %707 = vst [vmem:[%s1206_s3 + $0x8] sm:$0xff] %v691_v32  ;;  %716 = vst [vmem:[%s1206_s3 + $0x50] sm:$0xff] %v700_v59 }
 0x138   : > { %v655_v24 = vld [vmem:[#allocation2 + $0x20] sm:$0xff]  ;;  %v680_v34 = vadd.f32 %v860_v18, %v657_v29  ;;  %v665_v49 = vld [vmem:[#allocation2 + $0x70] sm:$0xff]  ;;  %715 = vst [vmem:[%s1206_s3 + $0x48] sm:$0xff] %v699_v56  ;;  %717 = vst [vmem:[%s1206_s3 + $0x58] sm:$0xff] %v701_v60 }
 0x139   : > { %v678_v27 = vadd.f32 %v860_v18, %v655_v24  ;;  %v658_v30 = vld [vmem:[#allocation2 + $0x38] sm:$0xff]  ;;  %v663_v43 = vld [vmem:[#allocation2 + $0x60] sm:$0xff]  ;;  %v688_v58 = vadd.f32 %v860_v18, %v665_v49 }
 0x13a   : > { %v656_v28 = vld [vmem:[#allocation2 + $0x28] sm:$0xff]  ;;  %v681_v41 = vadd.f32 %v860_v18, %v658_v30  ;;  %v696_v46 = vmax.f32 %v680_v34, 0.0  ;;  %v666_v50 = vld [vmem:[#allocation2 + $0x78] sm:$0xff]  ;;  %v686_v54 = vadd.f32 %v860_v18, %v663_v43 }
 0x13b   : > { %v679_v33 = vadd.f32 %v860_v18, %v656_v28  ;;  %v694_v40 = vmax.f32 %v678_v27, 0.0  ;;  %v664_v44 = vld [vmem:[#allocation2 + $0x68] sm:$0xff]  ;;  %v689_v62 = vadd.f32 %v860_v18, %v666_v50  ;;  %v704_v0 = vmax.f32 %v688_v58, 0.0 }
 0x13c   : > { %v697_v51 = vmax.f32 %v681_v41, 0.0  ;;  %712 = vst [vmem:[%s1206_s3 + $0x30] sm:$0xff] %v696_v46  ;;  %v687_v57 = vadd.f32 %v860_v18, %v664_v44  ;;  %v702_v61 = vmax.f32 %v686_v54, 0.0 }
 0x13d   : > { %v695_v45 = vmax.f32 %v679_v33, 0.0  ;;  %710 = vst [vmem:[%s1206_s3 + $0x20] sm:$0xff] %v694_v40  ;;  %v705_v1 = vmax.f32 %v689_v62, 0.0  ;;  %720 = vst [vmem:[%s1206_s3 + $0x70] sm:$0xff] %v704_v0 }
 0x13e   : > { %713 = vst [vmem:[%s1206_s3 + $0x38] sm:$0xff] %v697_v51  ;;  %v703_v63 = vmax.f32 %v687_v57, 0.0  ;;  %718 = vst [vmem:[%s1206_s3 + $0x60] sm:$0xff] %v702_v61 }
 0x13f   : > { %711 = vst [vmem:[%s1206_s3 + $0x28] sm:$0xff] %v695_v45  ;;  %721 = vst [vmem:[%s1206_s3 + $0x78] sm:$0xff] %v705_v1 }
 0x140   : > { %719 = vst [vmem:[%s1206_s3 + $0x68] sm:$0xff] %v703_v63 }
 0x141 PF: > { %s13_s16 = sadd.s32 1, %s1024_s16   ;;  %s1207_s12 = smov %s1012_s13 }
 0x142   : > { %p10_p12 = scmp.ge.s32.totalorder %s13_s16, 11   ;;  %s1208_s13 = smov %s1082_s20 }
 0x143   : > { %s1209_s14 = smov %s1020_s15  ;;  %s1210_s15 = smov %s1212_s17 }
 0x144   :  { %12 = sbr.rel (!%p10_p12) target bundleno = 3 (0x3), region = 122 }

// kernel: frontal_cls_forward.53
= control target key start
LH: loop header
LB: loop body
LE: loop exit
PB: predicated region body
PF: predicated region fallthrough
CT: control target
= control target key end

     0   :  { %s877_s12 = smov 0   ;;  %s879_s13 = smov 0   ;;  %s996_s0 = inlined_call_operand.vmem [shape: bf16[32,1152], index: 0, kind: input, shape index: {}]   ;;  %s997_s1 = inlined_call_operand.vmem [shape: bf16[1152,256], index: 1, kind: input, shape index: {}]   ;;  %s998_s2 = inlined_call_operand.vmem [shape: f32[1,256], index: 2, kind: input, shape index: {}]   ;;  %s999_s3 = inlined_call_operand.vmem [shape: f32[32,256], index: 3, kind: output, shape index: {}]  }
   0x1   :  { %s881_s14 = smov 0   ;;  %s883_s15 = smov 0  }
   0x2   :  { %s885_s16 = smov 0  }
   0x3 LB: > { %s25_s17 = sadd.s32 1, %s849_s15  ;;  %p48_p1 = scmp.ne.s32.totalorder %s841_s13, %s837_s12  ;;  %s853_s16 = sphi %s885_s16, %s13_s16   ;;  %s849_s15 = sphi %s883_s15, %s1003_s15   ;;  %s845_s14 = sphi %s881_s14, %s1002_s14   ;;  %s841_s13 = sphi %s879_s13, %s1001_s13   ;;  %s837_s12 = sphi %s877_s12, %s1000_s12  }
   0x4   : > { %p26_p0 = scmp.ge.s32.totalorder %s25_s17, 9  ;;  %p49_p2 = scmp.eq.s32.totalorder %s853_s16, 0 }
   0x5   : > { %s41_s19 = sadd.s32 1, %s841_s13  ;;  %p698_p5 = scmp.ge.s32.totalorder %s853_s16, 9 }
   0x6   : > { %s1005_s17 = smov (%p26_p0, %s25_s17), 0  ;;  %p50_p3 = por %p49_p2, %p48_p1 }
   0x7   : > { %s37_s18 = ssub.s32 %s849_s15, %s1005_s17  ;;  %164 = sbr.rel (%p698_p5) target bundleno = 21 (0x15), region = 20 }
   0x8   : > { %p39_p4 = scmp.eq.s32.totalorder %s37_s18, 0 }
   0xa   : > { %s912_s20 = scalar_select %p39_p4, %s841_s13, %s41_s19  }
   0xe   : > { %167 = sbr.rel (!%p50_p3) target bundleno = 21 (0x15), region = 24  ;;  %s169_s21 = sand.u32 (%p50_p3), 1, %s841_s13  }
   0xf   : > { %s700_s22 = sshll.u32 (%p50_p3), %s849_s15, 2  ;;  %s699_s23 = sshll.u32 (%p50_p3), %s169_s21, 4 }
  0x10   : > { %s176_s26 = scalar_lea.vmem (%p50_p3), %s996_s0, %s700_s22  ;;  %s171_s27 = scalar_lea.vmem (%p50_p3), [#allocation3], %s699_s23 }
  0x11   : > { %v192_v0 = vld [vmem:[%s176_s26] sm:$0xf] (%p50_p3)  ;;  %v194_v1 = vld [vmem:[%s176_s26 + $0x24] sm:$0xf] (%p50_p3)  ;;  %v196_v2 = vld [vmem:[%s176_s26 + $0x48] sm:$0xf] (%p50_p3) }
  0x12   : > { %193 = vst [vmem:[%s171_s27] sm:$0xf] (%p50_p3), %v192_v0  ;;  %195 = vst [vmem:[%s171_s27 + $0x4] sm:$0xf] (%p50_p3), %v194_v1  ;;  %v198_v3 = vld [vmem:[%s176_s26 + $0x6c] sm:$0xf] (%p50_p3) }
  0x13   : > { %197 = vst [vmem:[%s171_s27 + $0x8] sm:$0xf] (%p50_p3), %v196_v2  ;;  %199 = vst [vmem:[%s171_s27 + $0xc] sm:$0xf] (%p50_p3), %v198_v3 }
  0x15 PF: > { %p701_p6 = scmp.ge.s32.totalorder %s853_s16, 1  ;;  %p244_p7 = scmp.lt.s32.totalorder %s853_s16, 10 }
  0x17   : > { %p245_p8 = pnand %p701_p6, %p244_p7 }
  0x18   : > { %s251_s28 = sand.u32 (!%p245_p8), 1, %s837_s12   ;;  %s703_s29 = sshll.u32 (!%p245_p8), %s845_s14, 4 }
  0x19   : > { %248 = sbr.rel (%p245_p8) target bundleno = 304 (0x130), region = 69  ;;  %s924_s30 = sshll.u32 (!%p245_p8), %s251_s28, 4 }
  0x1a   : > { %p296_p9 = scmp.lt.s32.totalorder (!%p245_p8), %s703_s29, 143  ;;  %s253_s8 = scalar_lea.vmem (!%p245_p8), [#allocation3], %s924_s30 }
  0x1b   : > { %p706_p10 = scmp.ne.s32.totalorder (!%p245_p8), %s845_s14, 0 }
  0x20   : > { %s1007_s29 = smov (!%p296_p9, %s703_s29), 143  ;;  %327 = sbr.rel (%p706_p10) target bundleno = 39 (0x27), region = 77 }
  0x21   : > { %s730_s4 = sshll.u32 %s1007_s29, 3  ;;  %v855_v4 = vmov (!%p706_p10), 0.0  }
  0x22   : > { %s929_s7 = scalar_lea.vmem %s997_s1, %s730_s4  ;;  %328 = vst [vmem:[#allocation2] sm:$0xff] (!%p706_p10), %v855_v4  ;;  %329 = vst [vmem:[#allocation2 + $0x8] sm:$0xff] (!%p706_p10), %v855_v4 }
  0x23   : > { %330 = vst [vmem:[#allocation2 + $0x10] sm:$0xff] (!%p706_p10), %v855_v4  ;;  %331 = vst [vmem:[#allocation2 + $0x18] sm:$0xff] (!%p706_p10), %v855_v4 }
  0x24   : > { %332 = vst [vmem:[#allocation2 + $0x20] sm:$0xff] (!%p706_p10), %v855_v4  ;;  %333 = vst [vmem:[#allocation2 + $0x28] sm:$0xff] (!%p706_p10), %v855_v4 }
  0x25   : > { %334 = vst [vmem:[#allocation2 + $0x30] sm:$0xff] (!%p706_p10), %v855_v4  ;;  %335 = vst [vmem:[#allocation2 + $0x38] sm:$0xff] (!%p706_p10), %v855_v4 }
  0x27 PF: > { %v789_v5 = vld [vmem:[%s929_s7 + $0x4] ss:$8 sps:$4 sm:$0xff]   ;;  %v791_v6 = vld [vmem:[%s929_s7] ss:$8 sps:$4 sm:$0xff]   ;;  %v856_v7 = vmov 0   ;;  %p725_p11 = scmp.ne.s32.totalorder %s845_s14, 8 }
  0x28   : > { %488 = vmatprep.mubr.bf16.mxu0 %v856_v7  ;;  %498 = vmatprep.mubr.bf16.mxu1 %v856_v7  ;;  %v792_v8 = vld [vmem:[%s929_s7 + $0x14] ss:$8 sps:$4 sm:$0xff]   ;;  %v794_v9 = vld [vmem:[%s929_s7 + $0x10] ss:$8 sps:$4 sm:$0xff]   ;;  %v795_v10 = vld [vmem:[%s929_s7 + $0x24] ss:$8 sps:$4 sm:$0xff]   ;;  %v539_v48 = vlaneseq (!%p725_p11) }
  0x29   : > { %456 = vmatprep.subr.bf16.mxu0 %v789_v5  ;;  %731 = vmatprep.subr.bf16.mxu1 %v789_v5  ;;  %v797_v11 = vld [vmem:[%s929_s7 + $0x20] ss:$8 sps:$4 sm:$0xff]   ;;  %v798_v12 = vld [vmem:[%s929_s7 + $0x34] ss:$8 sps:$4 sm:$0xff]   ;;  %v800_v13 = vld [vmem:[%s929_s7 + $0x30] ss:$8 sps:$4 sm:$0xff]  }
  0x2a   : > { %457 = vmatpush1.bf16.msra.mxu0 %v791_v6  ;;  %739 = vmatpush1.bf16.msra.mxu1 %v791_v6  ;;  %v801_v14 = vld [vmem:[%s929_s7 + $0x44] ss:$8 sps:$4 sm:$0xff]   ;;  %v803_v15 = vld [vmem:[%s929_s7 + $0x40] ss:$8 sps:$4 sm:$0xff]   ;;  %v804_v16 = vld [vmem:[%s929_s7 + $0x54] ss:$8 sps:$4 sm:$0xff]  }
  0x2b   : > { %458 = vmatprep.subr.bf16.mxu0 %v792_v8  ;;  %732 = vmatprep.subr.bf16.mxu1 %v792_v8  ;;  %v806_v17 = vld [vmem:[%s929_s7 + $0x50] ss:$8 sps:$4 sm:$0xff]   ;;  %v807_v18 = vld [vmem:[%s929_s7 + $0x64] ss:$8 sps:$4 sm:$0xff]   ;;  %v809_v19 = vld [vmem:[%s929_s7 + $0x60] ss:$8 sps:$4 sm:$0xff]  }
  0x2c   : > { %v810_v20 = vld [vmem:[%s929_s7 + $0x74] ss:$8 sps:$4 sm:$0xff]   ;;  %v812_v21 = vld [vmem:[%s929_s7 + $0x70] ss:$8 sps:$4 sm:$0xff]   ;;  %v336_v24 = vld [vmem:[#allocation2] sm:$0xff]  ;;  %v540_v49 = vshrl.u32 (!%p725_p11), %v539_v48, 7 }
  0x2d   : > { %v813_v22 = vld [vmem:[%s253_s8] sm:$0xff]   ;;  %v814_v23 = vld [vmem:[%s253_s8 + $0x8] sm:$0xff]  }
  0x2e   : > { %459 = vmatpush1.bf16.msra.mxu0 %v794_v9  ;;  %740 = vmatpush1.bf16.msra.mxu1 %v794_v9  ;;  %v340_v25 = vld [vmem:[#allocation2 + $0x20] sm:$0xff]  ;;  %v337_v26 = vld [vmem:[#allocation2 + $0x8] sm:$0xff]  ;;  %v338_v30 = vld [vmem:[#allocation2 + $0x10] sm:$0xff]  ;;  %v541_v52 = vsub.s32 (!%p725_p11), 0, %v540_v49  ;;  %v545_v54 = vsub.s32 (!%p725_p11), 1, %v540_v49 }
  0x2f   : > { %460 = vmatprep.subr.bf16.mxu0 %v795_v10  ;;  %733 = vmatprep.subr.bf16.mxu1 %v795_v10  ;;  %v341_v27 = vld [vmem:[#allocation2 + $0x28] sm:$0xff]  ;;  %v342_v31 = vld [vmem:[#allocation2 + $0x30] sm:$0xff]  ;;  %v339_v36 = vld [vmem:[#allocation2 + $0x18] sm:$0xff] }
  0x30   : > { %v343_v37 = vld [vmem:[#allocation2 + $0x38] sm:$0xff]  ;;  %v537_v50 = vld [vmem:[%s998_s2] sm:$0x3] (!%p725_p11) }
  0x31   : > { %v542_v58 = vrot.slane (!%p725_p11), %v537_v50, %v541_v52  ;;  %v546_v59 = vrot.slane (!%p725_p11), %v537_v50, %v545_v54 }
  0x32   : > { %461 = vmatpush1.bf16.msra.mxu0 %v797_v11  ;;  %741 = vmatpush1.bf16.msra.mxu1 %v797_v11 }
  0x33   : > { %462 = vmatprep.subr.bf16.mxu0 %v798_v12  ;;  %734 = vmatprep.subr.bf16.mxu1 %v798_v12 }
  0x36   : > { %463 = vmatpush1.bf16.msra.mxu0 %v800_v13  ;;  %742 = vmatpush1.bf16.msra.mxu1 %v800_v13 }
  0x37   : > { %464 = vmatprep.subr.bf16.mxu0 %v801_v14  ;;  %735 = vmatprep.subr.bf16.mxu1 %v801_v14 }
  0x3a   : > { %465 = vmatpush1.bf16.msra.mxu0 %v803_v15  ;;  %743 = vmatpush1.bf16.msra.mxu1 %v803_v15 }
  0x3b   : > { %466 = vmatprep.subr.bf16.mxu0 %v804_v16  ;;  %736 = vmatprep.subr.bf16.mxu1 %v804_v16 }
  0x3e   : > { %467 = vmatpush1.bf16.msra.mxu0 %v806_v17  ;;  %744 = vmatpush1.bf16.msra.mxu1 %v806_v17 }
  0x3f   : > { %468 = vmatprep.subr.bf16.mxu0 %v807_v18  ;;  %737 = vmatprep.subr.bf16.mxu1 %v807_v18 }
  0x42   : > { %469 = vmatpush1.bf16.msra.mxu0 %v809_v19  ;;  %745 = vmatpush1.bf16.msra.mxu1 %v809_v19 }
  0x43   : > { %470 = vmatprep.subr.bf16.mxu0 %v810_v20  ;;  %738 = vmatprep.subr.bf16.mxu1 %v810_v20 }
  0x46   : > { %471 = vmatpush1.bf16.msra.mxu0 %v812_v21  ;;  %746 = vmatpush1.bf16.msra.mxu1 %v812_v21 }
  0x49   : > { %489 = vmatmul.mubr.bf16.vlgmr.msra.gmra.mrb[0].mxu0 %v813_v22  ;;  %499 = vmatmul.mubr.bf16.vlgmr.msra.gmra.mrb[0].mxu1 %v814_v23 }
 0x11c   : > { %v490_v28 = vpop.f32.mrb[0].mxu0  ;;  %v500_v29 = vpop.f32.mrb[0].mxu1  ;;  %528 = sbr.rel (%p725_p11) target bundleno = 304 (0x130), region = 81 }
 0x11d   : > { %v509_v32 = vadd.f32 %v490_v28, %v336_v24  ;;  %v513_v33 = vadd.f32 %v500_v29, %v340_v25  ;;  %v492_v34 = vpop.f32.mrb[1].mxu0  ;;  %v502_v35 = vpop.f32.mrb[1].mxu1 }
 0x11e   : > { %v510_v38 = vadd.f32 %v492_v34, %v337_v26  ;;  %v514_v39 = vadd.f32 %v502_v35, %v341_v27  ;;  %v494_v40 = vpop.f32.mrb[2].mxu0  ;;  %v504_v41 = vpop.f32.mrb[2].mxu1 }
 0x11f   : > { %517 = vst [vmem:[#allocation2] sm:$0xff] %v509_v32  ;;  %521 = vst [vmem:[#allocation2 + $0x20] sm:$0xff] %v513_v33  ;;  %v511_v42 = vadd.f32 %v494_v40, %v338_v30  ;;  %v515_v43 = vadd.f32 %v504_v41, %v342_v31  ;;  %v496_v44 = vpop.f32.mrb[3].mxu0  ;;  %v506_v45 = vpop.f32.mrb[3].mxu1 }
 0x120   : > { %518 = vst [vmem:[#allocation2 + $0x8] sm:$0xff] %v510_v38  ;;  %522 = vst [vmem:[#allocation2 + $0x28] sm:$0xff] %v514_v39  ;;  %v512_v46 = vadd.f32 %v496_v44, %v339_v36  ;;  %v516_v47 = vadd.f32 %v506_v45, %v343_v37 }
 0x121   : > { %519 = vst [vmem:[#allocation2 + $0x10] sm:$0xff] %v511_v42  ;;  %523 = vst [vmem:[#allocation2 + $0x30] sm:$0xff] %v515_v43 }
 0x122   : > { %520 = vst [vmem:[#allocation2 + $0x18] sm:$0xff] %v512_v46  ;;  %524 = vst [vmem:[#allocation2 + $0x38] sm:$0xff] %v516_v47 }
 0x126   : > { %v529_v51 = vld [vmem:[#allocation2] sm:$0xff] }
 0x127   : > { %v530_v53 = vld [vmem:[#allocation2 + $0x8] sm:$0xff]  ;;  %v533_v57 = vld [vmem:[#allocation2 + $0x20] sm:$0xff]  ;;  %v549_v63 = vadd.f32 %v542_v58, %v529_v51 }
 0x128   : > { %v531_v55 = vld [vmem:[#allocation2 + $0x10] sm:$0xff]  ;;  %v534_v60 = vld [vmem:[#allocation2 + $0x28] sm:$0xff]  ;;  %v550_v0 = vadd.f32 %v546_v59, %v530_v53  ;;  %v553_v3 = vadd.f32 %v542_v58, %v533_v57 }
 0x129   : > { %v532_v56 = vld [vmem:[#allocation2 + $0x18] sm:$0xff]  ;;  %v535_v61 = vld [vmem:[#allocation2 + $0x30] sm:$0xff]  ;;  %v551_v1 = vadd.f32 %v542_v58, %v531_v55  ;;  %v554_v4 = vadd.f32 %v546_v59, %v534_v60  ;;  %v557_v7 = vmax.f32 %v549_v63, 0.0 }
 0x12a   : > { %v536_v62 = vld [vmem:[#allocation2 + $0x38] sm:$0xff]  ;;  %v552_v2 = vadd.f32 %v546_v59, %v532_v56  ;;  %v555_v5 = vadd.f32 %v542_v58, %v535_v61  ;;  %v558_v8 = vmax.f32 %v550_v0, 0.0  ;;  %v561_v11 = vmax.f32 %v553_v3, 0.0 }
 0x12b   : > { %v556_v6 = vadd.f32 %v546_v59, %v536_v62  ;;  %v559_v9 = vmax.f32 %v551_v1, 0.0  ;;  %v562_v12 = vmax.f32 %v554_v4, 0.0  ;;  %565 = vst [vmem:[%s999_s3] sm:$0xff] %v557_v7 }
 0x12c   : > { %v560_v10 = vmax.f32 %v552_v2, 0.0  ;;  %v563_v13 = vmax.f32 %v555_v5, 0.0  ;;  %566 = vst [vmem:[%s999_s3 + $0x8] sm:$0xff] %v558_v8  ;;  %569 = vst [vmem:[%s999_s3 + $0x20] sm:$0xff] %v561_v11 }
 0x12d   : > { %v564_v14 = vmax.f32 %v556_v6, 0.0  ;;  %567 = vst [vmem:[%s999_s3 + $0x10] sm:$0xff] %v559_v9  ;;  %570 = vst [vmem:[%s999_s3 + $0x28] sm:$0xff] %v562_v12 }
 0x12e   : > { %568 = vst [vmem:[%s999_s3 + $0x18] sm:$0xff] %v560_v10  ;;  %571 = vst [vmem:[%s999_s3 + $0x30] sm:$0xff] %v563_v13 }
 0x12f   : > { %572 = vst [vmem:[%s999_s3 + $0x38] sm:$0xff] %v564_v14 }
 0x130 PF: > { %s13_s16 = sadd.s32 1, %s853_s16   ;;  %s1000_s12 = smov %s841_s13 }
 0x131   : > { %p10_p12 = scmp.ge.s32.totalorder %s13_s16, 11   ;;  %s1001_s13 = smov %s912_s20 }
 0x132   : > { %s1002_s14 = smov %s849_s15  ;;  %s1003_s15 = smov %s1005_s17 }
 0x133   :  { %12 = sbr.rel (!%p10_p12) target bundleno = 3 (0x3), region = 122 }

// kernel: frontal_cls_forward.54
= control target key start
LH: loop header
LB: loop body
LE: loop exit
PB: predicated region body
PF: predicated region fallthrough
CT: control target
= control target key end

     0   :  { %v320_v1 = vmov 0   ;;  %v229_v19 = vlaneseq  ;;  %s422_s1 = inlined_call_operand.vmem [shape: bf16[128,256], index: 1, kind: input, shape index: {}]   ;;  %s423_s0 = inlined_call_operand.vmem [shape: bf16[32,128], index: 0, kind: input, shape index: {}]   ;;  %s424_s2 = inlined_call_operand.vmem [shape: f32[1,256], index: 2, kind: input, shape index: {}]   ;;  %s425_s3 = inlined_call_operand.vmem [shape: f32[32,256], index: 3, kind: output, shape index: {}]  }
   0x1   :  { %v294_v0 = vld [vmem:[%s422_s1 + $0x4] ss:$8 sps:$4 sm:$0xff]   ;;  %179 = vmatprep.mubr.bf16.mxu0 %v320_v1  ;;  %189 = vmatprep.mubr.bf16.mxu1 %v320_v1  ;;  %v296_v2 = vld [vmem:[%s422_s1] ss:$8 sps:$4 sm:$0xff]   ;;  %v297_v3 = vld [vmem:[%s422_s1 + $0x14] ss:$8 sps:$4 sm:$0xff]  }
   0x2   :  { %147 = vmatprep.subr.bf16.mxu0 %v294_v0  ;;  %277 = vmatprep.subr.bf16.mxu1 %v294_v0  ;;  %v299_v4 = vld [vmem:[%s422_s1 + $0x10] ss:$8 sps:$4 sm:$0xff]   ;;  %v300_v5 = vld [vmem:[%s422_s1 + $0x24] ss:$8 sps:$4 sm:$0xff]   ;;  %v302_v6 = vld [vmem:[%s422_s1 + $0x20] ss:$8 sps:$4 sm:$0xff]  }
   0x3   :  { %148 = vmatpush1.bf16.msra.mxu0 %v296_v2  ;;  %285 = vmatpush1.bf16.msra.mxu1 %v296_v2  ;;  %v303_v7 = vld [vmem:[%s422_s1 + $0x34] ss:$8 sps:$4 sm:$0xff]   ;;  %v305_v8 = vld [vmem:[%s422_s1 + $0x30] ss:$8 sps:$4 sm:$0xff]   ;;  %v306_v9 = vld [vmem:[%s422_s1 + $0x44] ss:$8 sps:$4 sm:$0xff]  }
   0x4   :  { %149 = vmatprep.subr.bf16.mxu0 %v297_v3  ;;  %278 = vmatprep.subr.bf16.mxu1 %v297_v3  ;;  %v308_v10 = vld [vmem:[%s422_s1 + $0x40] ss:$8 sps:$4 sm:$0xff]   ;;  %v309_v11 = vld [vmem:[%s422_s1 + $0x54] ss:$8 sps:$4 sm:$0xff]   ;;  %v311_v12 = vld [vmem:[%s422_s1 + $0x50] ss:$8 sps:$4 sm:$0xff]  }
   0x5   :  { %v312_v13 = vld [vmem:[%s422_s1 + $0x64] ss:$8 sps:$4 sm:$0xff]   ;;  %v314_v14 = vld [vmem:[%s422_s1 + $0x60] ss:$8 sps:$4 sm:$0xff]   ;;  %v315_v15 = vld [vmem:[%s422_s1 + $0x74] ss:$8 sps:$4 sm:$0xff]  }
   0x6   :  { %v317_v16 = vld [vmem:[%s422_s1 + $0x70] ss:$8 sps:$4 sm:$0xff]   ;;  %v318_v17 = vld [vmem:[%s423_s0] sm:$0xff]   ;;  %v319_v18 = vld [vmem:[%s423_s0 + $0x8] sm:$0xff]   ;;  %v230_v20 = vshrl.u32 %v229_v19, 7 }
   0x7   :  { %150 = vmatpush1.bf16.msra.mxu0 %v299_v4  ;;  %286 = vmatpush1.bf16.msra.mxu1 %v299_v4  ;;  %v227_v22 = vld [vmem:[%s424_s2] sm:$0x3] }
   0x8   :  { %151 = vmatprep.subr.bf16.mxu0 %v300_v5  ;;  %279 = vmatprep.subr.bf16.mxu1 %v300_v5  ;;  %v231_v21 = vsub.s32 0, %v230_v20  ;;  %v235_v23 = vsub.s32 1, %v230_v20 }
   0xa   :  { %v232_v24 = vrot.slane %v227_v22, %v231_v21  ;;  %v236_v25 = vrot.slane %v227_v22, %v235_v23 }
   0xb   :  { %152 = vmatpush1.bf16.msra.mxu0 %v302_v6  ;;  %287 = vmatpush1.bf16.msra.mxu1 %v302_v6 }
   0xc   :  { %153 = vmatprep.subr.bf16.mxu0 %v303_v7  ;;  %280 = vmatprep.subr.bf16.mxu1 %v303_v7 }
   0xf   :  { %154 = vmatpush1.bf16.msra.mxu0 %v305_v8  ;;  %288 = vmatpush1.bf16.msra.mxu1 %v305_v8 }
  0x10   :  { %155 = vmatprep.subr.bf16.mxu0 %v306_v9  ;;  %281 = vmatprep.subr.bf16.mxu1 %v306_v9 }
  0x13   :  { %156 = vmatpush1.bf16.msra.mxu0 %v308_v10  ;;  %289 = vmatpush1.bf16.msra.mxu1 %v308_v10 }
  0x14   :  { %157 = vmatprep.subr.bf16.mxu0 %v309_v11  ;;  %282 = vmatprep.subr.bf16.mxu1 %v309_v11 }
  0x17   :  { %158 = vmatpush1.bf16.msra.mxu0 %v311_v12  ;;  %290 = vmatpush1.bf16.msra.mxu1 %v311_v12 }
  0x18   :  { %159 = vmatprep.subr.bf16.mxu0 %v312_v13  ;;  %283 = vmatprep.subr.bf16.mxu1 %v312_v13 }
  0x1b   :  { %160 = vmatpush1.bf16.msra.mxu0 %v314_v14  ;;  %291 = vmatpush1.bf16.msra.mxu1 %v314_v14 }
  0x1c   :  { %161 = vmatprep.subr.bf16.mxu0 %v315_v15  ;;  %284 = vmatprep.subr.bf16.mxu1 %v315_v15 }
  0x1f   :  { %162 = vmatpush1.bf16.msra.mxu0 %v317_v16  ;;  %292 = vmatpush1.bf16.msra.mxu1 %v317_v16 }
  0x22   :  { %180 = vmatmul.mubr.bf16.vlgmr.msra.gmra.mrb[0].mxu0 %v318_v17  ;;  %190 = vmatmul.mubr.bf16.vlgmr.msra.gmra.mrb[0].mxu1 %v319_v18 }
  0xf5   :  { %v181_v26 = vpop.f32.mrb[0].mxu0  ;;  %v191_v27 = vpop.f32.mrb[0].mxu1 }
  0xf6   :  { %v239_v28 = vadd.f32 %v232_v24, %v181_v26  ;;  %v243_v29 = vadd.f32 %v232_v24, %v191_v27  ;;  %v183_v30 = vpop.f32.mrb[1].mxu0  ;;  %v193_v31 = vpop.f32.mrb[1].mxu1 }
  0xf7   :  { %v240_v32 = vadd.f32 %v236_v25, %v183_v30  ;;  %v244_v33 = vadd.f32 %v236_v25, %v193_v31  ;;  %v185_v34 = vpop.f32.mrb[2].mxu0  ;;  %v195_v35 = vpop.f32.mrb[2].mxu1 }
  0xf8   :  { %247 = vst [vmem:[%s425_s3] sm:$0xff] %v239_v28  ;;  %251 = vst [vmem:[%s425_s3 + $0x20] sm:$0xff] %v243_v29  ;;  %v241_v36 = vadd.f32 %v232_v24, %v185_v34  ;;  %v245_v37 = vadd.f32 %v232_v24, %v195_v35  ;;  %v187_v38 = vpop.f32.mrb[3].mxu0  ;;  %v197_v39 = vpop.f32.mrb[3].mxu1 }
  0xf9   :  { %248 = vst [vmem:[%s425_s3 + $0x8] sm:$0xff] %v240_v32  ;;  %252 = vst [vmem:[%s425_s3 + $0x28] sm:$0xff] %v244_v33  ;;  %v242_v40 = vadd.f32 %v236_v25, %v187_v38  ;;  %v246_v41 = vadd.f32 %v236_v25, %v197_v39 }
  0xfa   :  { %249 = vst [vmem:[%s425_s3 + $0x10] sm:$0xff] %v241_v36  ;;  %253 = vst [vmem:[%s425_s3 + $0x30] sm:$0xff] %v245_v37 }
  0xfb   :  { %250 = vst [vmem:[%s425_s3 + $0x18] sm:$0xff] %v242_v40  ;;  %254 = vst [vmem:[%s425_s3 + $0x38] sm:$0xff] %v246_v41 }

// kernel: frontal_cls_forward.55
= control target key start
LH: loop header
LB: loop body
LE: loop exit
PB: predicated region body
PF: predicated region fallthrough
CT: control target
= control target key end

     0   :  { %s1149_s15 = smov 0   ;;  %s1151_s16 = smov 0   ;;  %s1307_s0 = inlined_call_operand.vmem [shape: bf16[32,2304], index: 0, kind: input, shape index: {}]   ;;  %s1308_s1 = inlined_call_operand.vmem [shape: bf16[2304,256], index: 1, kind: input, shape index: {}]   ;;  %s1309_s2 = inlined_call_operand.vmem [shape: f32[1,256], index: 2, kind: input, shape index: {}]   ;;  %s1310_s3 = inlined_call_operand.vmem [shape: f32[32,256], index: 3, kind: input, shape index: {}]   ;;  %s1311_s4 = inlined_call_operand.vmem [shape: f32[32,256], index: 4, kind: output, shape index: {}]  }
   0x1   :  { %s1153_s17 = smov 0   ;;  %s1155_s18 = smov 0  }
   0x2   :  { %s1157_s19 = smov 0  }
   0x3 LB: > { %s26_s20 = sadd.s32 1, %s1117_s18  ;;  %p49_p1 = scmp.ne.s32.totalorder %s1109_s16, %s1105_s15  ;;  %s1121_s19 = sphi %s1157_s19, %s14_s19   ;;  %s1117_s18 = sphi %s1155_s18, %s1315_s18   ;;  %s1113_s17 = sphi %s1153_s17, %s1314_s17   ;;  %s1109_s16 = sphi %s1151_s16, %s1313_s16   ;;  %s1105_s15 = sphi %s1149_s15, %s1312_s15  }
   0x4   : > { %p27_p0 = scmp.ge.s32.totalorder %s26_s20, 9  ;;  %p50_p2 = scmp.eq.s32.totalorder %s1121_s19, 0 }
   0x5   : > { %s42_s22 = sadd.s32 1, %s1109_s16  ;;  %p903_p5 = scmp.ge.s32.totalorder %s1121_s19, 9 }
   0x6   : > { %s1317_s20 = smov (%p27_p0, %s26_s20), 0  ;;  %p51_p3 = por %p50_p2, %p49_p1 }
   0x7   : > { %s38_s21 = ssub.s32 %s1117_s18, %s1317_s20  ;;  %208 = sbr.rel (%p903_p5) target bundleno = 21 (0x15), region = 24 }
   0x8   : > { %p40_p4 = scmp.eq.s32.totalorder %s38_s21, 0 }
   0xa   : > { %s1184_s23 = scalar_select %p40_p4, %s1109_s16, %s42_s22  }
   0xe   : > { %211 = sbr.rel (!%p51_p3) target bundleno = 21 (0x15), region = 28  ;;  %s213_s24 = sand.u32 (%p51_p3), 1, %s1109_s16  }
   0xf   : > { %s954_s25 = sshll.u32 (%p51_p3), %s1117_s18, 3  ;;  %s904_s26 = sshll.u32 (%p51_p3), %s213_s24, 5 }
  0x10   : > { %s221_s29 = scalar_lea.vmem (%p51_p3), %s1307_s0, %s954_s25  ;;  %s215_s30 = scalar_lea.vmem (%p51_p3), [#allocation3], %s904_s26 }
  0x11   : > { %v255_v0 = vld [vmem:[%s221_s29] sm:$0xff] (%p51_p3)  ;;  %v257_v1 = vld [vmem:[%s221_s29 + $0x48] sm:$0xff] (%p51_p3)  ;;  %v259_v2 = vld [vmem:[%s221_s29 + $0x90] sm:$0xff] (%p51_p3) }
  0x12   : > { %256 = vst [vmem:[%s215_s30] sm:$0xff] (%p51_p3), %v255_v0  ;;  %258 = vst [vmem:[%s215_s30 + $0x8] sm:$0xff] (%p51_p3), %v257_v1  ;;  %v261_v3 = vld [vmem:[%s221_s29 + $0xd8] sm:$0xff] (%p51_p3) }
  0x13   : > { %260 = vst [vmem:[%s215_s30 + $0x10] sm:$0xff] (%p51_p3), %v259_v2  ;;  %262 = vst [vmem:[%s215_s30 + $0x18] sm:$0xff] (%p51_p3), %v261_v3 }
  0x15 PF: > { %p907_p6 = scmp.ge.s32.totalorder %s1121_s19, 1  ;;  %p282_p7 = scmp.lt.s32.totalorder %s1121_s19, 10 }
  0x17   : > { %p283_p8 = pnand %p907_p6, %p282_p7 }
  0x18   : > { %s289_s5 = sand.u32 (!%p283_p8), 1, %s1105_s15   ;;  %s909_s6 = sshll.u32 (!%p283_p8), %s1113_s17, 5 }
  0x19   : > { %286 = sbr.rel (%p283_p8) target bundleno = 337 (0x151), region = 70  ;;  %s908_s7 = sshll.u32 (!%p283_p8), %s289_s5, 5 }
  0x1a   : > { %p347_p9 = scmp.lt.s32.totalorder (!%p283_p8), %s909_s6, 287  ;;  %s1201_s12 = scalar_lea.vmem (!%p283_p8), [#allocation3], %s908_s7 }
  0x1b   : > { %p912_p10 = scmp.ne.s32.totalorder (!%p283_p8), %s1113_s17, 0 }
  0x20   : > { %s1319_s6 = smov (!%p347_p9, %s909_s6), 287  ;;  %389 = sbr.rel (%p912_p10) target bundleno = 39 (0x27), region = 78 }
  0x21   : > { %s955_s8 = sshll.u32 %s1319_s6, 3  ;;  %v1123_v4 = vmov (!%p912_p10), 0.0  }
  0x22   : > { %s1199_s11 = scalar_lea.vmem %s1308_s1, %s955_s8  ;;  %390 = vst [vmem:[#allocation2] sm:$0xff] (!%p912_p10), %v1123_v4  ;;  %391 = vst [vmem:[#allocation2 + $0x8] sm:$0xff] (!%p912_p10), %v1123_v4 }
  0x23   : > { %392 = vst [vmem:[#allocation2 + $0x10] sm:$0xff] (!%p912_p10), %v1123_v4  ;;  %393 = vst [vmem:[#allocation2 + $0x18] sm:$0xff] (!%p912_p10), %v1123_v4 }
  0x24   : > { %394 = vst [vmem:[#allocation2 + $0x20] sm:$0xff] (!%p912_p10), %v1123_v4  ;;  %395 = vst [vmem:[#allocation2 + $0x28] sm:$0xff] (!%p912_p10), %v1123_v4 }
  0x25   : > { %396 = vst [vmem:[#allocation2 + $0x30] sm:$0xff] (!%p912_p10), %v1123_v4  ;;  %397 = vst [vmem:[#allocation2 + $0x38] sm:$0xff] (!%p912_p10), %v1123_v4 }
  0x27 PF: > { %v1029_v5 = vld [vmem:[%s1199_s11 + $0x4] ss:$8 sps:$4 sm:$0xff]   ;;  %v1031_v6 = vld [vmem:[%s1199_s11] ss:$8 sps:$4 sm:$0xff]   ;;  %v1032_v7 = vld [vmem:[%s1199_s11 + $0x14] ss:$8 sps:$4 sm:$0xff]  }
  0x28   : > { %622 = vmatprep.subr.bf16.mxu0 %v1029_v5  ;;  %956 = vmatprep.subr.bf16.mxu1 %v1029_v5  ;;  %v1034_v8 = vld [vmem:[%s1199_s11 + $0x10] ss:$8 sps:$4 sm:$0xff]   ;;  %v1035_v9 = vld [vmem:[%s1199_s11 + $0x24] ss:$8 sps:$4 sm:$0xff]   ;;  %v1037_v10 = vld [vmem:[%s1199_s11 + $0x20] ss:$8 sps:$4 sm:$0xff]  }
  0x29   : > { %623 = vmatpush1.bf16.msra.mxu0 %v1031_v6  ;;  %972 = vmatpush1.bf16.msra.mxu1 %v1031_v6  ;;  %v1038_v11 = vld [vmem:[%s1199_s11 + $0x34] ss:$8 sps:$4 sm:$0xff]   ;;  %v1040_v12 = vld [vmem:[%s1199_s11 + $0x30] ss:$8 sps:$4 sm:$0xff]   ;;  %v1041_v13 = vld [vmem:[%s1199_s11 + $0x44] ss:$8 sps:$4 sm:$0xff]  }
  0x2a   : > { %624 = vmatprep.subr.bf16.mxu0 %v1032_v7  ;;  %957 = vmatprep.subr.bf16.mxu1 %v1032_v7  ;;  %v1043_v14 = vld [vmem:[%s1199_s11 + $0x40] ss:$8 sps:$4 sm:$0xff]   ;;  %v1044_v15 = vld [vmem:[%s1199_s11 + $0x54] ss:$8 sps:$4 sm:$0xff]   ;;  %v1046_v16 = vld [vmem:[%s1199_s11 + $0x50] ss:$8 sps:$4 sm:$0xff]  }
  0x2b   : > { %v1047_v17 = vld [vmem:[%s1199_s11 + $0x64] ss:$8 sps:$4 sm:$0xff]   ;;  %v1049_v19 = vld [vmem:[%s1199_s11 + $0x60] ss:$8 sps:$4 sm:$0xff]   ;;  %v1082_v20 = vld [vmem:[%s1201_s12 + $0x14] ss:$8 sps:$4 sm:$0xff]  }
  0x2c   : > { %v1079_v18 = vld [vmem:[%s1201_s12 + $0x4] ss:$8 sps:$4 sm:$0xff]   ;;  %v1050_v21 = vld [vmem:[%s1199_s11 + $0x74] ss:$8 sps:$4 sm:$0xff]   ;;  %664 = vmatprep.mubr.bf16.mxu1 %v1082_v20  ;;  %v1052_v22 = vld [vmem:[%s1199_s11 + $0x70] ss:$8 sps:$4 sm:$0xff]  }
  0x2d   : > { %625 = vmatpush1.bf16.msra.mxu0 %v1034_v8  ;;  %973 = vmatpush1.bf16.msra.mxu1 %v1034_v8  ;;  %v1053_v23 = vld [vmem:[%s1199_s11 + $0x84] ss:$8 sps:$4 sm:$0xff]   ;;  %v1055_v24 = vld [vmem:[%s1199_s11 + $0x80] ss:$8 sps:$4 sm:$0xff]   ;;  %v1056_v25 = vld [vmem:[%s1199_s11 + $0x94] ss:$8 sps:$4 sm:$0xff]  }
  0x2e   : > { %626 = vmatprep.subr.bf16.mxu0 %v1035_v9  ;;  %958 = vmatprep.subr.bf16.mxu1 %v1035_v9  ;;  %v1058_v26 = vld [vmem:[%s1199_s11 + $0x90] ss:$8 sps:$4 sm:$0xff]   ;;  %v1059_v27 = vld [vmem:[%s1199_s11 + $0xa4] ss:$8 sps:$4 sm:$0xff]   ;;  %v1061_v28 = vld [vmem:[%s1199_s11 + $0xa0] ss:$8 sps:$4 sm:$0xff]  }
  0x2f   : > { %654 = vmatprep.mubr.bf16.mxu0 %v1079_v18  ;;  %v1062_v29 = vld [vmem:[%s1199_s11 + $0xb4] ss:$8 sps:$4 sm:$0xff]   ;;  %v1064_v30 = vld [vmem:[%s1199_s11 + $0xb0] ss:$8 sps:$4 sm:$0xff]   ;;  %v1065_v31 = vld [vmem:[%s1199_s11 + $0xc4] ss:$8 sps:$4 sm:$0xff]  }
  0x30   : > { %v1067_v32 = vld [vmem:[%s1199_s11 + $0xc0] ss:$8 sps:$4 sm:$0xff]   ;;  %v1068_v33 = vld [vmem:[%s1199_s11 + $0xd4] ss:$8 sps:$4 sm:$0xff]   ;;  %v1070_v34 = vld [vmem:[%s1199_s11 + $0xd0] ss:$8 sps:$4 sm:$0xff]  }
  0x31   : > { %627 = vmatpush1.bf16.msra.mxu0 %v1037_v10  ;;  %974 = vmatpush1.bf16.msra.mxu1 %v1037_v10  ;;  %v1071_v35 = vld [vmem:[%s1199_s11 + $0xe4] ss:$8 sps:$4 sm:$0xff]   ;;  %v1073_v36 = vld [vmem:[%s1199_s11 + $0xe0] ss:$8 sps:$4 sm:$0xff]   ;;  %v1074_v37 = vld [vmem:[%s1199_s11 + $0xf4] ss:$8 sps:$4 sm:$0xff]  }
  0x32   : > { %628 = vmatprep.subr.bf16.mxu0 %v1038_v11  ;;  %959 = vmatprep.subr.bf16.mxu1 %v1038_v11  ;;  %v1076_v38 = vld [vmem:[%s1199_s11 + $0xf0] ss:$8 sps:$4 sm:$0xff]   ;;  %v1077_v39 = vld [vmem:[%s1201_s12] ss:$8 sps:$4 sm:$0xff]   ;;  %p949_p11 = scmp.ne.s32.totalorder %s1113_s17, 8 }
  0x33   : > { %v1080_v40 = vld [vmem:[%s1201_s12 + $0x10] ss:$8 sps:$4 sm:$0xff]   ;;  %v398_v41 = vld [vmem:[#allocation2] sm:$0xff]  ;;  %v399_v43 = vld [vmem:[#allocation2 + $0x8] sm:$0xff]  ;;  %v705_v1 = vlaneseq (!%p949_p11) }
  0x34   : > { %v402_v42 = vld [vmem:[#allocation2 + $0x20] sm:$0xff]  ;;  %v403_v44 = vld [vmem:[#allocation2 + $0x28] sm:$0xff]  ;;  %v400_v47 = vld [vmem:[#allocation2 + $0x10] sm:$0xff] }
  0x35   : > { %629 = vmatpush1.bf16.msra.mxu0 %v1040_v12  ;;  %975 = vmatpush1.bf16.msra.mxu1 %v1040_v12  ;;  %v404_v48 = vld [vmem:[#allocation2 + $0x30] sm:$0xff]  ;;  %v401_v53 = vld [vmem:[#allocation2 + $0x18] sm:$0xff]  ;;  %v706_v2 = vshrl.u32 (!%p949_p11), %v705_v1, 7  ;;  %v703_v3 = vld [vmem:[%s1309_s2] sm:$0x3] (!%p949_p11) }
  0x36   : > { %630 = vmatprep.subr.bf16.mxu0 %v1041_v13  ;;  %960 = vmatprep.subr.bf16.mxu1 %v1041_v13  ;;  %v405_v54 = vld [vmem:[#allocation2 + $0x38] sm:$0xff]  ;;  %v723_v8 = vld [vmem:[%s1310_s3] sm:$0xff] (!%p949_p11)  ;;  %v724_v9 = vld [vmem:[%s1310_s3 + $0x8] sm:$0xff] (!%p949_p11) }
  0x37   : > { %v707_v5 = vsub.s32 (!%p949_p11), 0, %v706_v2  ;;  %v711_v7 = vsub.s32 (!%p949_p11), 1, %v706_v2  ;;  %v725_v18 = vld [vmem:[%s1310_s3 + $0x10] sm:$0xff] (!%p949_p11)  ;;  %v727_v20 = vld [vmem:[%s1310_s3 + $0x20] sm:$0xff] (!%p949_p11) }
  0x39   : > { %631 = vmatpush1.bf16.msra.mxu0 %v1043_v14  ;;  %976 = vmatpush1.bf16.msra.mxu1 %v1043_v14  ;;  %v708_v13 = vrot.slane (!%p949_p11), %v703_v3, %v707_v5  ;;  %v712_v14 = vrot.slane (!%p949_p11), %v703_v3, %v711_v7 }
  0x3a   : > { %632 = vmatprep.subr.bf16.mxu0 %v1044_v15  ;;  %961 = vmatprep.subr.bf16.mxu1 %v1044_v15 }
  0x3d   : > { %633 = vmatpush1.bf16.msra.mxu0 %v1046_v16  ;;  %977 = vmatpush1.bf16.msra.mxu1 %v1046_v16 }
  0x3e   : > { %634 = vmatprep.subr.bf16.mxu0 %v1047_v17  ;;  %962 = vmatprep.subr.bf16.mxu1 %v1047_v17 }
  0x41   : > { %635 = vmatpush1.bf16.msra.mxu0 %v1049_v19  ;;  %978 = vmatpush1.bf16.msra.mxu1 %v1049_v19  ;;  %v726_v19 = vld [vmem:[%s1310_s3 + $0x18] sm:$0xff] (!%p949_p11) }
  0x42   : > { %636 = vmatprep.subr.bf16.mxu0 %v1050_v21  ;;  %963 = vmatprep.subr.bf16.mxu1 %v1050_v21 }
  0x45   : > { %637 = vmatpush1.bf16.msra.mxu0 %v1052_v22  ;;  %979 = vmatpush1.bf16.msra.mxu1 %v1052_v22 }
  0x46   : > { %638 = vmatprep.subr.bf16.mxu0 %v1053_v23  ;;  %964 = vmatprep.subr.bf16.mxu1 %v1053_v23 }
  0x49   : > { %639 = vmatpush1.bf16.msra.mxu0 %v1055_v24  ;;  %980 = vmatpush1.bf16.msra.mxu1 %v1055_v24 }
  0x4a   : > { %640 = vmatprep.subr.bf16.mxu0 %v1056_v25  ;;  %965 = vmatprep.subr.bf16.mxu1 %v1056_v25  ;;  %v728_v25 = vld [vmem:[%s1310_s3 + $0x28] sm:$0xff] (!%p949_p11) }
  0x4d   : > { %641 = vmatpush1.bf16.msra.mxu0 %v1058_v26  ;;  %981 = vmatpush1.bf16.msra.mxu1 %v1058_v26  ;;  %v729_v26 = vld [vmem:[%s1310_s3 + $0x30] sm:$0xff] (!%p949_p11) }
  0x4e   : > { %642 = vmatprep.subr.bf16.mxu0 %v1059_v27  ;;  %966 = vmatprep.subr.bf16.mxu1 %v1059_v27  ;;  %v730_v27 = vld [vmem:[%s1310_s3 + $0x38] sm:$0xff] (!%p949_p11) }
  0x51   : > { %643 = vmatpush1.bf16.msra.mxu0 %v1061_v28  ;;  %982 = vmatpush1.bf16.msra.mxu1 %v1061_v28 }
  0x52   : > { %644 = vmatprep.subr.bf16.mxu0 %v1062_v29  ;;  %967 = vmatprep.subr.bf16.mxu1 %v1062_v29 }
  0x55   : > { %645 = vmatpush1.bf16.msra.mxu0 %v1064_v30  ;;  %983 = vmatpush1.bf16.msra.mxu1 %v1064_v30 }
  0x56   : > { %646 = vmatprep.subr.bf16.mxu0 %v1065_v31  ;;  %968 = vmatprep.subr.bf16.mxu1 %v1065_v31 }
  0x59   : > { %647 = vmatpush1.bf16.msra.mxu0 %v1067_v32  ;;  %984 = vmatpush1.bf16.msra.mxu1 %v1067_v32 }
  0x5a   : > { %648 = vmatprep.subr.bf16.mxu0 %v1068_v33  ;;  %969 = vmatprep.subr.bf16.mxu1 %v1068_v33 }
  0x5d   : > { %649 = vmatpush1.bf16.msra.mxu0 %v1070_v34  ;;  %985 = vmatpush1.bf16.msra.mxu1 %v1070_v34 }
  0x5e   : > { %650 = vmatprep.subr.bf16.mxu0 %v1071_v35  ;;  %970 = vmatprep.subr.bf16.mxu1 %v1071_v35 }
  0x61   : > { %651 = vmatpush1.bf16.msra.mxu0 %v1073_v36  ;;  %986 = vmatpush1.bf16.msra.mxu1 %v1073_v36 }
  0x62   : > { %652 = vmatprep.subr.bf16.mxu0 %v1074_v37  ;;  %971 = vmatprep.subr.bf16.mxu1 %v1074_v37 }
  0x65   : > { %653 = vmatpush1.bf16.msra.mxu0 %v1076_v38  ;;  %987 = vmatpush1.bf16.msra.mxu1 %v1076_v38 }
  0x68   : > { %655 = vmatmul.mubr.bf16.vlgmr.msra.gmra.mrb[0].mxu0 %v1077_v39  ;;  %665 = vmatmul.mubr.bf16.vlgmr.msra.gmra.mrb[0].mxu1 %v1080_v40 }
 0x13b   : > { %v656_v45 = vpop.f32.mrb[0].mxu0  ;;  %v666_v46 = vpop.f32.mrb[0].mxu1  ;;  %694 = sbr.rel (%p949_p11) target bundleno = 337 (0x151), region = 82 }
 0x13c   : > { %v675_v49 = vadd.f32 %v656_v45, %v398_v41  ;;  %v679_v50 = vadd.f32 %v666_v46, %v402_v42  ;;  %v658_v51 = vpop.f32.mrb[1].mxu0  ;;  %v668_v52 = vpop.f32.mrb[1].mxu1 }
 0x13d   : > { %v676_v55 = vadd.f32 %v658_v51, %v399_v43  ;;  %v680_v56 = vadd.f32 %v668_v52, %v403_v44  ;;  %v660_v57 = vpop.f32.mrb[2].mxu0  ;;  %v670_v58 = vpop.f32.mrb[2].mxu1 }
 0x13e   : > { %683 = vst [vmem:[#allocation2] sm:$0xff] %v675_v49  ;;  %687 = vst [vmem:[#allocation2 + $0x20] sm:$0xff] %v679_v50  ;;  %v677_v59 = vadd.f32 %v660_v57, %v400_v47  ;;  %v681_v60 = vadd.f32 %v670_v58, %v404_v48  ;;  %v662_v61 = vpop.f32.mrb[3].mxu0  ;;  %v672_v62 = vpop.f32.mrb[3].mxu1 }
 0x13f   : > { %684 = vst [vmem:[#allocation2 + $0x8] sm:$0xff] %v676_v55  ;;  %688 = vst [vmem:[#allocation2 + $0x28] sm:$0xff] %v680_v56  ;;  %v678_v63 = vadd.f32 %v662_v61, %v401_v53  ;;  %v682_v0 = vadd.f32 %v672_v62, %v405_v54 }
 0x140   : > { %685 = vst [vmem:[#allocation2 + $0x10] sm:$0xff] %v677_v59  ;;  %689 = vst [vmem:[#allocation2 + $0x30] sm:$0xff] %v681_v60 }
 0x141   : > { %686 = vst [vmem:[#allocation2 + $0x18] sm:$0xff] %v678_v63  ;;  %690 = vst [vmem:[#allocation2 + $0x38] sm:$0xff] %v682_v0 }
 0x145   : > { %v695_v4 = vld [vmem:[#allocation2] sm:$0xff] }
 0x146   : > { %v696_v6 = vld [vmem:[#allocation2 + $0x8] sm:$0xff]  ;;  %v699_v12 = vld [vmem:[#allocation2 + $0x20] sm:$0xff]  ;;  %v715_v21 = vadd.f32 %v708_v13, %v695_v4 }
 0x147   : > { %v697_v10 = vld [vmem:[#allocation2 + $0x10] sm:$0xff]  ;;  %v700_v15 = vld [vmem:[#allocation2 + $0x28] sm:$0xff]  ;;  %v716_v22 = vadd.f32 %v712_v14, %v696_v6  ;;  %v719_v28 = vadd.f32 %v708_v13, %v699_v12 }
 0x148   : > { %v698_v11 = vld [vmem:[#allocation2 + $0x18] sm:$0xff]  ;;  %v701_v16 = vld [vmem:[#allocation2 + $0x30] sm:$0xff]  ;;  %v717_v23 = vadd.f32 %v708_v13, %v697_v10  ;;  %v720_v29 = vadd.f32 %v712_v14, %v700_v15  ;;  %v731_v32 = vadd.f32 %v723_v8, %v715_v21 }
 0x149   : > { %v702_v17 = vld [vmem:[#allocation2 + $0x38] sm:$0xff]  ;;  %v718_v24 = vadd.f32 %v712_v14, %v698_v11  ;;  %v721_v30 = vadd.f32 %v708_v13, %v701_v16  ;;  %v732_v33 = vadd.f32 %v724_v9, %v716_v22  ;;  %v735_v36 = vadd.f32 %v727_v20, %v719_v28 }
 0x14a   : > { %v722_v31 = vadd.f32 %v712_v14, %v702_v17  ;;  %v733_v34 = vadd.f32 %v725_v18, %v717_v23  ;;  %v736_v37 = vadd.f32 %v728_v25, %v720_v29  ;;  %v739_v40 = vmax.f32 %v731_v32, 0.0 }
 0x14b   : > { %v734_v35 = vadd.f32 %v726_v19, %v718_v24  ;;  %v737_v38 = vadd.f32 %v729_v26, %v721_v30  ;;  %v740_v41 = vmax.f32 %v732_v33, 0.0  ;;  %v743_v44 = vmax.f32 %v735_v36, 0.0 }
 0x14c   : > { %v738_v39 = vadd.f32 %v730_v27, %v722_v31  ;;  %v741_v42 = vmax.f32 %v733_v34, 0.0  ;;  %v744_v45 = vmax.f32 %v736_v37, 0.0  ;;  %747 = vst [vmem:[%s1311_s4] sm:$0xff] %v739_v40 }
 0x14d   : > { %v742_v43 = vmax.f32 %v734_v35, 0.0  ;;  %v745_v46 = vmax.f32 %v737_v38, 0.0  ;;  %748 = vst [vmem:[%s1311_s4 + $0x8] sm:$0xff] %v740_v41  ;;  %751 = vst [vmem:[%s1311_s4 + $0x20] sm:$0xff] %v743_v44 }
 0x14e   : > { %v746_v47 = vmax.f32 %v738_v39, 0.0  ;;  %749 = vst [vmem:[%s1311_s4 + $0x10] sm:$0xff] %v741_v42  ;;  %752 = vst [vmem:[%s1311_s4 + $0x28] sm:$0xff] %v744_v45 }
 0x14f   : > { %750 = vst [vmem:[%s1311_s4 + $0x18] sm:$0xff] %v742_v43  ;;  %753 = vst [vmem:[%s1311_s4 + $0x30] sm:$0xff] %v745_v46 }
 0x150   : > { %754 = vst [vmem:[%s1311_s4 + $0x38] sm:$0xff] %v746_v47 }
 0x151 PF: > { %s14_s19 = sadd.s32 1, %s1121_s19   ;;  %s1312_s15 = smov %s1109_s16 }
 0x152   : > { %p11_p12 = scmp.ge.s32.totalorder %s14_s19, 11   ;;  %s1313_s16 = smov %s1184_s23 }
 0x153   : > { %s1314_s17 = smov %s1117_s18  ;;  %s1315_s18 = smov %s1317_s20 }
 0x154   :  { %13 = sbr.rel (!%p11_p12) target bundleno = 3 (0x3), region = 126 }

// kernel: frontal_cls_forward.56
= control target key start
LH: loop header
LB: loop body
LE: loop exit
PB: predicated region body
PF: predicated region fallthrough
CT: control target
= control target key end

     0   :  { %s1038_s12 = smov 0   ;;  %s1040_s13 = smov 0   ;;  %s1172_s0 = inlined_call_operand.vmem [shape: bf16[32,2304], index: 0, kind: input, shape index: {}]   ;;  %s1173_s1 = inlined_call_operand.vmem [shape: bf16[2304,256], index: 1, kind: input, shape index: {}]   ;;  %s1174_s2 = inlined_call_operand.vmem [shape: f32[1,256], index: 2, kind: input, shape index: {}]   ;;  %s1175_s3 = inlined_call_operand.vmem [shape: f32[32,256], index: 3, kind: output, shape index: {}]  }
   0x1   :  { %s1042_s14 = smov 0   ;;  %s1044_s15 = smov 0  }
   0x2   :  { %s1046_s16 = smov 0  }
   0x3 LB: > { %s25_s17 = sadd.s32 1, %s1011_s15  ;;  %p48_p1 = scmp.ne.s32.totalorder %s1003_s13, %s999_s12  ;;  %s1015_s16 = sphi %s1046_s16, %s13_s16   ;;  %s1011_s15 = sphi %s1044_s15, %s1179_s15   ;;  %s1007_s14 = sphi %s1042_s14, %s1178_s14   ;;  %s1003_s13 = sphi %s1040_s13, %s1177_s13   ;;  %s999_s12 = sphi %s1038_s12, %s1176_s12  }
   0x4   : > { %p26_p0 = scmp.ge.s32.totalorder %s25_s17, 9  ;;  %p49_p2 = scmp.eq.s32.totalorder %s1015_s16, 0 }
   0x5   : > { %s41_s19 = sadd.s32 1, %s1003_s13  ;;  %p797_p5 = scmp.ge.s32.totalorder %s1015_s16, 9 }
   0x6   : > { %s1181_s17 = smov (%p26_p0, %s25_s17), 0  ;;  %p50_p3 = por %p49_p2, %p48_p1 }
   0x7   : > { %s37_s18 = ssub.s32 %s1011_s15, %s1181_s17  ;;  %164 = sbr.rel (%p797_p5) target bundleno = 21 (0x15), region = 20 }
   0x8   : > { %p39_p4 = scmp.eq.s32.totalorder %s37_s18, 0 }
   0xa   : > { %s1073_s20 = scalar_select %p39_p4, %s1003_s13, %s41_s19  }
   0xe   : > { %167 = sbr.rel (!%p50_p3) target bundleno = 21 (0x15), region = 24  ;;  %s169_s21 = sand.u32 (%p50_p3), 1, %s1003_s13  }
   0xf   : > { %s848_s22 = sshll.u32 (%p50_p3), %s1011_s15, 3  ;;  %s798_s23 = sshll.u32 (%p50_p3), %s169_s21, 5 }
  0x10   : > { %s177_s26 = scalar_lea.vmem (%p50_p3), %s1172_s0, %s848_s22  ;;  %s171_s27 = scalar_lea.vmem (%p50_p3), [#allocation3], %s798_s23 }
  0x11   : > { %v211_v0 = vld [vmem:[%s177_s26] sm:$0xff] (%p50_p3)  ;;  %v213_v1 = vld [vmem:[%s177_s26 + $0x48] sm:$0xff] (%p50_p3)  ;;  %v215_v2 = vld [vmem:[%s177_s26 + $0x90] sm:$0xff] (%p50_p3) }
  0x12   : > { %212 = vst [vmem:[%s171_s27] sm:$0xff] (%p50_p3), %v211_v0  ;;  %214 = vst [vmem:[%s171_s27 + $0x8] sm:$0xff] (%p50_p3), %v213_v1  ;;  %v217_v3 = vld [vmem:[%s177_s26 + $0xd8] sm:$0xff] (%p50_p3) }
  0x13   : > { %216 = vst [vmem:[%s171_s27 + $0x10] sm:$0xff] (%p50_p3), %v215_v2  ;;  %218 = vst [vmem:[%s171_s27 + $0x18] sm:$0xff] (%p50_p3), %v217_v3 }
  0x15 PF: > { %p801_p6 = scmp.ge.s32.totalorder %s1015_s16, 1  ;;  %p238_p7 = scmp.lt.s32.totalorder %s1015_s16, 10 }
  0x17   : > { %p239_p8 = pnand %p801_p6, %p238_p7 }
  0x18   : > { %s245_s28 = sand.u32 (!%p239_p8), 1, %s999_s12   ;;  %s803_s29 = sshll.u32 (!%p239_p8), %s1007_s14, 5 }
  0x19   : > { %242 = sbr.rel (%p239_p8) target bundleno = 335 (0x14f), region = 66  ;;  %s802_s30 = sshll.u32 (!%p239_p8), %s245_s28, 5 }
  0x1a   : > { %p291_p9 = scmp.lt.s32.totalorder (!%p239_p8), %s803_s29, 287  ;;  %s1090_s8 = scalar_lea.vmem (!%p239_p8), [#allocation3], %s802_s30 }
  0x1b   : > { %p806_p10 = scmp.ne.s32.totalorder (!%p239_p8), %s1007_s14, 0 }
  0x20   : > { %s1183_s29 = smov (!%p291_p9, %s803_s29), 287  ;;  %321 = sbr.rel (%p806_p10) target bundleno = 39 (0x27), region = 74 }
  0x21   : > { %s849_s4 = sshll.u32 %s1183_s29, 3  ;;  %v1017_v4 = vmov (!%p806_p10), 0.0  }
  0x22   : > { %s1088_s7 = scalar_lea.vmem %s1173_s1, %s849_s4  ;;  %322 = vst [vmem:[#allocation2] sm:$0xff] (!%p806_p10), %v1017_v4  ;;  %323 = vst [vmem:[#allocation2 + $0x8] sm:$0xff] (!%p806_p10), %v1017_v4 }
  0x23   : > { %324 = vst [vmem:[#allocation2 + $0x10] sm:$0xff] (!%p806_p10), %v1017_v4  ;;  %325 = vst [vmem:[#allocation2 + $0x18] sm:$0xff] (!%p806_p10), %v1017_v4 }
  0x24   : > { %326 = vst [vmem:[#allocation2 + $0x20] sm:$0xff] (!%p806_p10), %v1017_v4  ;;  %327 = vst [vmem:[#allocation2 + $0x28] sm:$0xff] (!%p806_p10), %v1017_v4 }
  0x25   : > { %328 = vst [vmem:[#allocation2 + $0x30] sm:$0xff] (!%p806_p10), %v1017_v4  ;;  %329 = vst [vmem:[#allocation2 + $0x38] sm:$0xff] (!%p806_p10), %v1017_v4 }
  0x27 PF: > { %v923_v5 = vld [vmem:[%s1088_s7 + $0x4] ss:$8 sps:$4 sm:$0xff]   ;;  %v925_v6 = vld [vmem:[%s1088_s7] ss:$8 sps:$4 sm:$0xff]   ;;  %v926_v7 = vld [vmem:[%s1088_s7 + $0x14] ss:$8 sps:$4 sm:$0xff]  }
  0x28   : > { %554 = vmatprep.subr.bf16.mxu0 %v923_v5  ;;  %850 = vmatprep.subr.bf16.mxu1 %v923_v5  ;;  %v928_v8 = vld [vmem:[%s1088_s7 + $0x10] ss:$8 sps:$4 sm:$0xff]   ;;  %v929_v9 = vld [vmem:[%s1088_s7 + $0x24] ss:$8 sps:$4 sm:$0xff]   ;;  %v931_v10 = vld [vmem:[%s1088_s7 + $0x20] ss:$8 sps:$4 sm:$0xff]  }
  0x29   : > { %555 = vmatpush1.bf16.msra.mxu0 %v925_v6  ;;  %866 = vmatpush1.bf16.msra.mxu1 %v925_v6  ;;  %v932_v11 = vld [vmem:[%s1088_s7 + $0x34] ss:$8 sps:$4 sm:$0xff]   ;;  %v934_v12 = vld [vmem:[%s1088_s7 + $0x30] ss:$8 sps:$4 sm:$0xff]   ;;  %v935_v13 = vld [vmem:[%s1088_s7 + $0x44] ss:$8 sps:$4 sm:$0xff]  }
  0x2a   : > { %556 = vmatprep.subr.bf16.mxu0 %v926_v7  ;;  %851 = vmatprep.subr.bf16.mxu1 %v926_v7  ;;  %v937_v14 = vld [vmem:[%s1088_s7 + $0x40] ss:$8 sps:$4 sm:$0xff]   ;;  %v938_v15 = vld [vmem:[%s1088_s7 + $0x54] ss:$8 sps:$4 sm:$0xff]   ;;  %v940_v16 = vld [vmem:[%s1088_s7 + $0x50] ss:$8 sps:$4 sm:$0xff]  }
  0x2b   : > { %v941_v17 = vld [vmem:[%s1088_s7 + $0x64] ss:$8 sps:$4 sm:$0xff]   ;;  %v943_v19 = vld [vmem:[%s1088_s7 + $0x60] ss:$8 sps:$4 sm:$0xff]   ;;  %v976_v20 = vld [vmem:[%s1090_s8 + $0x14] ss:$8 sps:$4 sm:$0xff]  }
  0x2c   : > { %v973_v18 = vld [vmem:[%s1090_s8 + $0x4] ss:$8 sps:$4 sm:$0xff]   ;;  %v944_v21 = vld [vmem:[%s1088_s7 + $0x74] ss:$8 sps:$4 sm:$0xff]   ;;  %596 = vmatprep.mubr.bf16.mxu1 %v976_v20  ;;  %v946_v22 = vld [vmem:[%s1088_s7 + $0x70] ss:$8 sps:$4 sm:$0xff]  }
  0x2d   : > { %557 = vmatpush1.bf16.msra.mxu0 %v928_v8  ;;  %867 = vmatpush1.bf16.msra.mxu1 %v928_v8  ;;  %v947_v23 = vld [vmem:[%s1088_s7 + $0x84] ss:$8 sps:$4 sm:$0xff]   ;;  %v949_v24 = vld [vmem:[%s1088_s7 + $0x80] ss:$8 sps:$4 sm:$0xff]   ;;  %v950_v25 = vld [vmem:[%s1088_s7 + $0x94] ss:$8 sps:$4 sm:$0xff]  }
  0x2e   : > { %558 = vmatprep.subr.bf16.mxu0 %v929_v9  ;;  %852 = vmatprep.subr.bf16.mxu1 %v929_v9  ;;  %v952_v26 = vld [vmem:[%s1088_s7 + $0x90] ss:$8 sps:$4 sm:$0xff]   ;;  %v953_v27 = vld [vmem:[%s1088_s7 + $0xa4] ss:$8 sps:$4 sm:$0xff]   ;;  %v955_v28 = vld [vmem:[%s1088_s7 + $0xa0] ss:$8 sps:$4 sm:$0xff]  }
  0x2f   : > { %586 = vmatprep.mubr.bf16.mxu0 %v973_v18  ;;  %v956_v29 = vld [vmem:[%s1088_s7 + $0xb4] ss:$8 sps:$4 sm:$0xff]   ;;  %v958_v30 = vld [vmem:[%s1088_s7 + $0xb0] ss:$8 sps:$4 sm:$0xff]   ;;  %v959_v31 = vld [vmem:[%s1088_s7 + $0xc4] ss:$8 sps:$4 sm:$0xff]  }
  0x30   : > { %v961_v32 = vld [vmem:[%s1088_s7 + $0xc0] ss:$8 sps:$4 sm:$0xff]   ;;  %v962_v33 = vld [vmem:[%s1088_s7 + $0xd4] ss:$8 sps:$4 sm:$0xff]   ;;  %v964_v34 = vld [vmem:[%s1088_s7 + $0xd0] ss:$8 sps:$4 sm:$0xff]  }
  0x31   : > { %559 = vmatpush1.bf16.msra.mxu0 %v931_v10  ;;  %868 = vmatpush1.bf16.msra.mxu1 %v931_v10  ;;  %v965_v35 = vld [vmem:[%s1088_s7 + $0xe4] ss:$8 sps:$4 sm:$0xff]   ;;  %v967_v36 = vld [vmem:[%s1088_s7 + $0xe0] ss:$8 sps:$4 sm:$0xff]   ;;  %v968_v37 = vld [vmem:[%s1088_s7 + $0xf4] ss:$8 sps:$4 sm:$0xff]  }
  0x32   : > { %560 = vmatprep.subr.bf16.mxu0 %v932_v11  ;;  %853 = vmatprep.subr.bf16.mxu1 %v932_v11  ;;  %v970_v38 = vld [vmem:[%s1088_s7 + $0xf0] ss:$8 sps:$4 sm:$0xff]   ;;  %v971_v39 = vld [vmem:[%s1090_s8] ss:$8 sps:$4 sm:$0xff]   ;;  %p843_p11 = scmp.ne.s32.totalorder %s1007_s14, 8 }
  0x33   : > { %v974_v40 = vld [vmem:[%s1090_s8 + $0x10] ss:$8 sps:$4 sm:$0xff]   ;;  %v330_v41 = vld [vmem:[#allocation2] sm:$0xff]  ;;  %v331_v43 = vld [vmem:[#allocation2 + $0x8] sm:$0xff]  ;;  %v637_v1 = vlaneseq (!%p843_p11) }
  0x34   : > { %v334_v42 = vld [vmem:[#allocation2 + $0x20] sm:$0xff]  ;;  %v335_v44 = vld [vmem:[#allocation2 + $0x28] sm:$0xff]  ;;  %v332_v47 = vld [vmem:[#allocation2 + $0x10] sm:$0xff] }
  0x35   : > { %561 = vmatpush1.bf16.msra.mxu0 %v934_v12  ;;  %869 = vmatpush1.bf16.msra.mxu1 %v934_v12  ;;  %v336_v48 = vld [vmem:[#allocation2 + $0x30] sm:$0xff]  ;;  %v333_v53 = vld [vmem:[#allocation2 + $0x18] sm:$0xff]  ;;  %v638_v2 = vshrl.u32 (!%p843_p11), %v637_v1, 7  ;;  %v635_v3 = vld [vmem:[%s1174_s2] sm:$0x3] (!%p843_p11) }
  0x36   : > { %562 = vmatprep.subr.bf16.mxu0 %v935_v13  ;;  %854 = vmatprep.subr.bf16.mxu1 %v935_v13  ;;  %v337_v54 = vld [vmem:[#allocation2 + $0x38] sm:$0xff] }
  0x37   : > { %v639_v5 = vsub.s32 (!%p843_p11), 0, %v638_v2  ;;  %v643_v7 = vsub.s32 (!%p843_p11), 1, %v638_v2 }
  0x39   : > { %563 = vmatpush1.bf16.msra.mxu0 %v937_v14  ;;  %870 = vmatpush1.bf16.msra.mxu1 %v937_v14  ;;  %v640_v11 = vrot.slane (!%p843_p11), %v635_v3, %v639_v5  ;;  %v644_v12 = vrot.slane (!%p843_p11), %v635_v3, %v643_v7 }
  0x3a   : > { %564 = vmatprep.subr.bf16.mxu0 %v938_v15  ;;  %855 = vmatprep.subr.bf16.mxu1 %v938_v15 }
  0x3d   : > { %565 = vmatpush1.bf16.msra.mxu0 %v940_v16  ;;  %871 = vmatpush1.bf16.msra.mxu1 %v940_v16 }
  0x3e   : > { %566 = vmatprep.subr.bf16.mxu0 %v941_v17  ;;  %856 = vmatprep.subr.bf16.mxu1 %v941_v17 }
  0x41   : > { %567 = vmatpush1.bf16.msra.mxu0 %v943_v19  ;;  %872 = vmatpush1.bf16.msra.mxu1 %v943_v19 }
  0x42   : > { %568 = vmatprep.subr.bf16.mxu0 %v944_v21  ;;  %857 = vmatprep.subr.bf16.mxu1 %v944_v21 }
  0x45   : > { %569 = vmatpush1.bf16.msra.mxu0 %v946_v22  ;;  %873 = vmatpush1.bf16.msra.mxu1 %v946_v22 }
  0x46   : > { %570 = vmatprep.subr.bf16.mxu0 %v947_v23  ;;  %858 = vmatprep.subr.bf16.mxu1 %v947_v23 }
  0x49   : > { %571 = vmatpush1.bf16.msra.mxu0 %v949_v24  ;;  %874 = vmatpush1.bf16.msra.mxu1 %v949_v24 }
  0x4a   : > { %572 = vmatprep.subr.bf16.mxu0 %v950_v25  ;;  %859 = vmatprep.subr.bf16.mxu1 %v950_v25 }
  0x4d   : > { %573 = vmatpush1.bf16.msra.mxu0 %v952_v26  ;;  %875 = vmatpush1.bf16.msra.mxu1 %v952_v26 }
  0x4e   : > { %574 = vmatprep.subr.bf16.mxu0 %v953_v27  ;;  %860 = vmatprep.subr.bf16.mxu1 %v953_v27 }
  0x51   : > { %575 = vmatpush1.bf16.msra.mxu0 %v955_v28  ;;  %876 = vmatpush1.bf16.msra.mxu1 %v955_v28 }
  0x52   : > { %576 = vmatprep.subr.bf16.mxu0 %v956_v29  ;;  %861 = vmatprep.subr.bf16.mxu1 %v956_v29 }
  0x55   : > { %577 = vmatpush1.bf16.msra.mxu0 %v958_v30  ;;  %877 = vmatpush1.bf16.msra.mxu1 %v958_v30 }
  0x56   : > { %578 = vmatprep.subr.bf16.mxu0 %v959_v31  ;;  %862 = vmatprep.subr.bf16.mxu1 %v959_v31 }
  0x59   : > { %579 = vmatpush1.bf16.msra.mxu0 %v961_v32  ;;  %878 = vmatpush1.bf16.msra.mxu1 %v961_v32 }
  0x5a   : > { %580 = vmatprep.subr.bf16.mxu0 %v962_v33  ;;  %863 = vmatprep.subr.bf16.mxu1 %v962_v33 }
  0x5d   : > { %581 = vmatpush1.bf16.msra.mxu0 %v964_v34  ;;  %879 = vmatpush1.bf16.msra.mxu1 %v964_v34 }
  0x5e   : > { %582 = vmatprep.subr.bf16.mxu0 %v965_v35  ;;  %864 = vmatprep.subr.bf16.mxu1 %v965_v35 }
  0x61   : > { %583 = vmatpush1.bf16.msra.mxu0 %v967_v36  ;;  %880 = vmatpush1.bf16.msra.mxu1 %v967_v36 }
  0x62   : > { %584 = vmatprep.subr.bf16.mxu0 %v968_v37  ;;  %865 = vmatprep.subr.bf16.mxu1 %v968_v37 }
  0x65   : > { %585 = vmatpush1.bf16.msra.mxu0 %v970_v38  ;;  %881 = vmatpush1.bf16.msra.mxu1 %v970_v38 }
  0x68   : > { %587 = vmatmul.mubr.bf16.vlgmr.msra.gmra.mrb[0].mxu0 %v971_v39  ;;  %597 = vmatmul.mubr.bf16.vlgmr.msra.gmra.mrb[0].mxu1 %v974_v40 }
 0x13b   : > { %v588_v45 = vpop.f32.mrb[0].mxu0  ;;  %v598_v46 = vpop.f32.mrb[0].mxu1  ;;  %626 = sbr.rel (%p843_p11) target bundleno = 335 (0x14f), region = 78 }
 0x13c   : > { %v607_v49 = vadd.f32 %v588_v45, %v330_v41  ;;  %v611_v50 = vadd.f32 %v598_v46, %v334_v42  ;;  %v590_v51 = vpop.f32.mrb[1].mxu0  ;;  %v600_v52 = vpop.f32.mrb[1].mxu1 }
 0x13d   : > { %v608_v55 = vadd.f32 %v590_v51, %v331_v43  ;;  %v612_v56 = vadd.f32 %v600_v52, %v335_v44  ;;  %v592_v57 = vpop.f32.mrb[2].mxu0  ;;  %v602_v58 = vpop.f32.mrb[2].mxu1 }
 0x13e   : > { %615 = vst [vmem:[#allocation2] sm:$0xff] %v607_v49  ;;  %619 = vst [vmem:[#allocation2 + $0x20] sm:$0xff] %v611_v50  ;;  %v609_v59 = vadd.f32 %v592_v57, %v332_v47  ;;  %v613_v60 = vadd.f32 %v602_v58, %v336_v48  ;;  %v594_v61 = vpop.f32.mrb[3].mxu0  ;;  %v604_v62 = vpop.f32.mrb[3].mxu1 }
 0x13f   : > { %616 = vst [vmem:[#allocation2 + $0x8] sm:$0xff] %v608_v55  ;;  %620 = vst [vmem:[#allocation2 + $0x28] sm:$0xff] %v612_v56  ;;  %v610_v63 = vadd.f32 %v594_v61, %v333_v53  ;;  %v614_v0 = vadd.f32 %v604_v62, %v337_v54 }
 0x140   : > { %617 = vst [vmem:[#allocation2 + $0x10] sm:$0xff] %v609_v59  ;;  %621 = vst [vmem:[#allocation2 + $0x30] sm:$0xff] %v613_v60 }
 0x141   : > { %618 = vst [vmem:[#allocation2 + $0x18] sm:$0xff] %v610_v63  ;;  %622 = vst [vmem:[#allocation2 + $0x38] sm:$0xff] %v614_v0 }
 0x145   : > { %v627_v4 = vld [vmem:[#allocation2] sm:$0xff] }
 0x146   : > { %v628_v6 = vld [vmem:[#allocation2 + $0x8] sm:$0xff]  ;;  %v631_v10 = vld [vmem:[#allocation2 + $0x20] sm:$0xff]  ;;  %v647_v16 = vadd.f32 %v640_v11, %v627_v4 }
 0x147   : > { %v629_v8 = vld [vmem:[#allocation2 + $0x10] sm:$0xff]  ;;  %v632_v13 = vld [vmem:[#allocation2 + $0x28] sm:$0xff]  ;;  %v648_v17 = vadd.f32 %v644_v12, %v628_v6  ;;  %v651_v20 = vadd.f32 %v640_v11, %v631_v10 }
 0x148   : > { %v630_v9 = vld [vmem:[#allocation2 + $0x18] sm:$0xff]  ;;  %v633_v14 = vld [vmem:[#allocation2 + $0x30] sm:$0xff]  ;;  %v649_v18 = vadd.f32 %v640_v11, %v629_v8  ;;  %v652_v21 = vadd.f32 %v644_v12, %v632_v13  ;;  %v655_v24 = vmax.f32 %v647_v16, 0.0 }
 0x149   : > { %v634_v15 = vld [vmem:[#allocation2 + $0x38] sm:$0xff]  ;;  %v650_v19 = vadd.f32 %v644_v12, %v630_v9  ;;  %v653_v22 = vadd.f32 %v640_v11, %v633_v14  ;;  %v656_v25 = vmax.f32 %v648_v17, 0.0  ;;  %v659_v28 = vmax.f32 %v651_v20, 0.0 }
 0x14a   : > { %v654_v23 = vadd.f32 %v644_v12, %v634_v15  ;;  %v657_v26 = vmax.f32 %v649_v18, 0.0  ;;  %v660_v29 = vmax.f32 %v652_v21, 0.0  ;;  %663 = vst [vmem:[%s1175_s3] sm:$0xff] %v655_v24 }
 0x14b   : > { %v658_v27 = vmax.f32 %v650_v19, 0.0  ;;  %v661_v30 = vmax.f32 %v653_v22, 0.0  ;;  %664 = vst [vmem:[%s1175_s3 + $0x8] sm:$0xff] %v656_v25  ;;  %667 = vst [vmem:[%s1175_s3 + $0x20] sm:$0xff] %v659_v28 }
 0x14c   : > { %v662_v31 = vmax.f32 %v654_v23, 0.0  ;;  %665 = vst [vmem:[%s1175_s3 + $0x10] sm:$0xff] %v657_v26  ;;  %668 = vst [vmem:[%s1175_s3 + $0x28] sm:$0xff] %v660_v29 }
 0x14d   : > { %666 = vst [vmem:[%s1175_s3 + $0x18] sm:$0xff] %v658_v27  ;;  %669 = vst [vmem:[%s1175_s3 + $0x30] sm:$0xff] %v661_v30 }
 0x14e   : > { %670 = vst [vmem:[%s1175_s3 + $0x38] sm:$0xff] %v662_v31 }
 0x14f PF: > { %s13_s16 = sadd.s32 1, %s1015_s16   ;;  %s1176_s12 = smov %s1003_s13 }
 0x150   : > { %p10_p12 = scmp.ge.s32.totalorder %s13_s16, 11   ;;  %s1177_s13 = smov %s1073_s20 }
 0x151   : > { %s1178_s14 = smov %s1011_s15  ;;  %s1179_s15 = smov %s1181_s17 }
 0x152   :  { %12 = sbr.rel (!%p10_p12) target bundleno = 3 (0x3), region = 119 }

// kernel: frontal_cls_forward.66
= control target key start
LH: loop header
LB: loop body
LE: loop exit
PB: predicated region body
PF: predicated region fallthrough
CT: control target
= control target key end

     0   :  { %s1061_s12 = smov 0   ;;  %s1063_s13 = smov 0   ;;  %s1276_s0 = inlined_call_operand.vmem [shape: bf16[8,2304], index: 0, kind: input, shape index: {}]   ;;  %s1277_s1 = inlined_call_operand.vmem [shape: bf16[2304,512], index: 1, kind: input, shape index: {}]   ;;  %s1278_s2 = inlined_call_operand.vmem [shape: f32[1,512], index: 2, kind: input, shape index: {}]   ;;  %s1279_s3 = inlined_call_operand.vmem [shape: f32[8,512], index: 3, kind: output, shape index: {}]  }
   0x1   :  { %s1065_s14 = smov 0   ;;  %s1067_s15 = smov 0  }
   0x2   :  { %s1069_s16 = smov 0   ;;  %s1071_s17 = smov 0  }
   0x3   :  { %s1073_s18 = smov 0  }
   0x4 LB: > { %s25_s19 = sadd.s32 1, %s1030_s16  ;;  %s28_s20 = sadd.s32 1, %s1034_s17  ;;  %s1038_s18 = sphi %s1073_s18, %s13_s18   ;;  %s1034_s17 = sphi %s1071_s17, %s1285_s17   ;;  %s1030_s16 = sphi %s1069_s16, %s1284_s16   ;;  %s1026_s15 = sphi %s1067_s15, %s1283_s15   ;;  %s1022_s14 = sphi %s1065_s14, %s1282_s14   ;;  %s1018_s13 = sphi %s1063_s13, %s1281_s13   ;;  %s1014_s12 = sphi %s1061_s12, %s1280_s12  }
   0x5   : > { %p26_p0 = scmp.ge.s32.totalorder %s25_s19, 9  ;;  %p76_p1 = scmp.ne.s32.totalorder %s1018_s13, %s1014_s12 }
   0x6   : > { %p77_p2 = scmp.eq.s32.totalorder %s1038_s18, 0  ;;  %s69_s24 = sadd.s32 1, %s1018_s13 }
   0x7   : > { %s1287_s19 = smov (%p26_p0, %s25_s19), 0  ;;  %s1289_s20 = smov (!%p26_p0, %s28_s20), %s1034_s17 }
   0x8   : > { %p78_p3 = por %p77_p2, %p76_p1  ;;  %p30_p4 = scmp.ge.s32.totalorder %s1289_s20, 2 }
   0x9   : > { %s64_s21 = ssub.s32 %s1030_s16, %s1287_s19  ;;  %p825_p6 = scmp.ge.s32.totalorder %s1038_s18, 18 }
   0xa   : > { %s1291_s20 = smov (%p30_p4, %s1289_s20), 0 }
   0xb   : > { %s65_s22 = ssub.s32 %s1034_s17, %s1291_s20  ;;  %156 = sbr.rel (%p825_p6) target bundleno = 41 (0x29), region = 16 }
   0xc   : > { %s66_s23 = sor.u32 %s65_s22, %s64_s21 }
   0xd   : > { %p67_p5 = scmp.eq.s32.totalorder %s66_s23, 0 }
   0xf   : > { %s1112_s25 = scalar_select %p67_p5, %s1018_s13, %s69_s24  }
  0x12   : > { %172 = sbr.rel (!%p78_p3) target bundleno = 41 (0x29), region = 24  ;;  %s174_s26 = sand.u32 (%p78_p3), 1, %s1018_s13  }
  0x13   : > { %s828_s27 = sshll.u32 (%p78_p3), %s1034_s17, 1  ;;  %s826_s28 = sshll.u32 (%p78_p3), %s174_s26, 8 }
  0x14   : > { %s876_s29 = sshll.u32 (%p78_p3), %s1030_s16, 7  ;;  %s1126_s8 = scalar_lea.vmem (%p78_p3), [#allocation3], %s826_s28 }
  0x15   : > { %s180_s30 = sadd.s32 (%p78_p3), %s876_s29, %s828_s27 }
  0x16   : > { %s830_s4 = sshll.u32 (%p78_p3), %s180_s30, 2 }
  0x17   : > { %s1121_s7 = scalar_lea.vmem (%p78_p3), %s1277_s1, %s830_s4 }
  0x18   : > { %v272_v0 = vld [vmem:[%s1121_s7] sm:$0xff] (%p78_p3)  ;;  %v274_v1 = vld [vmem:[%s1121_s7 + $0x10] sm:$0xff] (%p78_p3) }
  0x19   : > { %v276_v2 = vld [vmem:[%s1121_s7 + $0x20] sm:$0xff]  ;;  %273 = vst [vmem:[%s1126_s8] sm:$0xff] %v272_v0  ;;  %275 = vst [vmem:[%s1126_s8 + $0x8] sm:$0xff] %v274_v1  ;;  %v278_v3 = vld [vmem:[%s1121_s7 + $0x30] sm:$0xff] }
  0x1a   : > { %277 = vst [vmem:[%s1126_s8 + $0x10] sm:$0xff] %v276_v2  ;;  %v280_v4 = vld [vmem:[%s1121_s7 + $0x40] sm:$0xff]  ;;  %v282_v5 = vld [vmem:[%s1121_s7 + $0x50] sm:$0xff]  ;;  %279 = vst [vmem:[%s1126_s8 + $0x18] sm:$0xff] %v278_v3 }
  0x1b   : > { %281 = vst [vmem:[%s1126_s8 + $0x20] sm:$0xff] %v280_v4  ;;  %283 = vst [vmem:[%s1126_s8 + $0x28] sm:$0xff] %v282_v5  ;;  %v284_v6 = vld [vmem:[%s1121_s7 + $0x60] sm:$0xff]  ;;  %v286_v7 = vld [vmem:[%s1121_s7 + $0x70] sm:$0xff] }
  0x1c   : > { %v288_v8 = vld [vmem:[%s1121_s7 + $0x80] sm:$0xff]  ;;  %285 = vst [vmem:[%s1126_s8 + $0x30] sm:$0xff] %v284_v6  ;;  %287 = vst [vmem:[%s1126_s8 + $0x38] sm:$0xff] %v286_v7  ;;  %v290_v9 = vld [vmem:[%s1121_s7 + $0x90] sm:$0xff] }
  0x1d   : > { %289 = vst [vmem:[%s1126_s8 + $0x40] sm:$0xff] %v288_v8  ;;  %v292_v10 = vld [vmem:[%s1121_s7 + $0xa0] sm:$0xff]  ;;  %v294_v11 = vld [vmem:[%s1121_s7 + $0xb0] sm:$0xff]  ;;  %291 = vst [vmem:[%s1126_s8 + $0x48] sm:$0xff] %v290_v9 }
  0x1e   : > { %293 = vst [vmem:[%s1126_s8 + $0x50] sm:$0xff] %v292_v10  ;;  %295 = vst [vmem:[%s1126_s8 + $0x58] sm:$0xff] %v294_v11  ;;  %v296_v12 = vld [vmem:[%s1121_s7 + $0xc0] sm:$0xff]  ;;  %v298_v13 = vld [vmem:[%s1121_s7 + $0xd0] sm:$0xff] }
  0x1f   : > { %v300_v14 = vld [vmem:[%s1121_s7 + $0xe0] sm:$0xff]  ;;  %297 = vst [vmem:[%s1126_s8 + $0x60] sm:$0xff] %v296_v12  ;;  %299 = vst [vmem:[%s1126_s8 + $0x68] sm:$0xff] %v298_v13  ;;  %v302_v15 = vld [vmem:[%s1121_s7 + $0xf0] sm:$0xff] }
  0x20   : > { %301 = vst [vmem:[%s1126_s8 + $0x70] sm:$0xff] %v300_v14  ;;  %v304_v16 = vld [vmem:[%s1121_s7 + $0x100] sm:$0xff]  ;;  %v306_v17 = vld [vmem:[%s1121_s7 + $0x110] sm:$0xff]  ;;  %303 = vst [vmem:[%s1126_s8 + $0x78] sm:$0xff] %v302_v15 }
  0x21   : > { %305 = vst [vmem:[%s1126_s8 + $0x80] sm:$0xff] %v304_v16  ;;  %307 = vst [vmem:[%s1126_s8 + $0x88] sm:$0xff] %v306_v17  ;;  %v308_v18 = vld [vmem:[%s1121_s7 + $0x120] sm:$0xff]  ;;  %v310_v19 = vld [vmem:[%s1121_s7 + $0x130] sm:$0xff] }
  0x22   : > { %v312_v20 = vld [vmem:[%s1121_s7 + $0x140] sm:$0xff]  ;;  %309 = vst [vmem:[%s1126_s8 + $0x90] sm:$0xff] %v308_v18  ;;  %311 = vst [vmem:[%s1126_s8 + $0x98] sm:$0xff] %v310_v19  ;;  %v314_v21 = vld [vmem:[%s1121_s7 + $0x150] sm:$0xff] }
  0x23   : > { %313 = vst [vmem:[%s1126_s8 + $0xa0] sm:$0xff] %v312_v20  ;;  %v316_v22 = vld [vmem:[%s1121_s7 + $0x160] sm:$0xff]  ;;  %v318_v23 = vld [vmem:[%s1121_s7 + $0x170] sm:$0xff]  ;;  %315 = vst [vmem:[%s1126_s8 + $0xa8] sm:$0xff] %v314_v21 }
  0x24   : > { %317 = vst [vmem:[%s1126_s8 + $0xb0] sm:$0xff] %v316_v22  ;;  %319 = vst [vmem:[%s1126_s8 + $0xb8] sm:$0xff] %v318_v23  ;;  %v320_v24 = vld [vmem:[%s1121_s7 + $0x180] sm:$0xff]  ;;  %v322_v25 = vld [vmem:[%s1121_s7 + $0x190] sm:$0xff] }
  0x25   : > { %v324_v26 = vld [vmem:[%s1121_s7 + $0x1a0] sm:$0xff]  ;;  %321 = vst [vmem:[%s1126_s8 + $0xc0] sm:$0xff] %v320_v24  ;;  %323 = vst [vmem:[%s1126_s8 + $0xc8] sm:$0xff] %v322_v25  ;;  %v326_v27 = vld [vmem:[%s1121_s7 + $0x1b0] sm:$0xff] }
  0x26   : > { %325 = vst [vmem:[%s1126_s8 + $0xd0] sm:$0xff] %v324_v26  ;;  %v328_v28 = vld [vmem:[%s1121_s7 + $0x1c0] sm:$0xff]  ;;  %v330_v29 = vld [vmem:[%s1121_s7 + $0x1d0] sm:$0xff]  ;;  %327 = vst [vmem:[%s1126_s8 + $0xd8] sm:$0xff] %v326_v27 }
  0x27   : > { %329 = vst [vmem:[%s1126_s8 + $0xe0] sm:$0xff] %v328_v28  ;;  %331 = vst [vmem:[%s1126_s8 + $0xe8] sm:$0xff] %v330_v29  ;;  %v332_v30 = vld [vmem:[%s1121_s7 + $0x1e0] sm:$0xff]  ;;  %v334_v31 = vld [vmem:[%s1121_s7 + $0x1f0] sm:$0xff] }
  0x28   : > { %333 = vst [vmem:[%s1126_s8 + $0xf0] sm:$0xff] %v332_v30  ;;  %335 = vst [vmem:[%s1126_s8 + $0xf8] sm:$0xff] %v334_v31 }
  0x29 PF: > { %p831_p7 = scmp.ge.s32.totalorder %s1038_s18, 1  ;;  %p348_p8 = scmp.lt.s32.totalorder %s1038_s18, 19 }
  0x2b   : > { %p349_p9 = pnand %p831_p7, %p348_p8 }
  0x2c   : > { %s355_s9 = sand.u32 (!%p349_p9), 1, %s1014_s12   ;;  %s833_s10 = sshll.u32 (!%p349_p9), %s1022_s14, 1 }
  0x2d   : > { %352 = sbr.rel (%p349_p9) target bundleno = 355 (0x163), region = 66  ;;  %s832_s11 = sshll.u32 (!%p349_p9), %s355_s9, 8 }
  0x2e   : > { %p398_p10 = scmp.lt.s32.totalorder (!%p349_p9), %s833_s10, 17  ;;  %s835_s21 = sshll.u32 (!%p349_p9), %s1026_s15, 1 }
  0x2f   : > { %p408_p11 = scmp.lt.s32.totalorder (!%p349_p9), %s835_s21, 3  ;;  %s1211_s5 = scalar_lea.vmem (!%p349_p9), [#allocation3], %s832_s11 }
  0x30   : > { %p838_p12 = scmp.ne.s32.totalorder (!%p349_p9), %s1022_s14, 0 }
  0x34   : > { %s1293_s10 = smov (!%p398_p10, %s833_s10), 17  ;;  %s1295_s21 = smov (!%p408_p11, %s835_s21), 3 }
  0x35   : > { %s834_s22 = sshll.u32 %s1293_s10, 2  ;;  %s410_s12 = scalar_lea.vmem %s1278_s2, %s1295_s21  ;;  %v1040_v32 = vmov (!%p838_p12), 0.0  }
  0x36   : > { %s1197_s26 = scalar_lea.vmem %s1276_s0, %s834_s22  ;;  %s837_s29 = sshll.u32 %s1295_s21, 3  ;;  %426 = vst [vmem:[#allocation2] sm:$0xff] (!%p838_p12), %v1040_v32  ;;  %427 = vst [vmem:[#allocation2 + $0x8] sm:$0xff] (!%p838_p12), %v1040_v32 }
  0x37   : > { %s1209_s15 = scalar_lea.vmem %s1279_s3, %s837_s29  ;;  %425 = sbr.rel (%p838_p12) target bundleno = 62 (0x3e), region = 74 }
  0x3e PF: > { %v934_v33 = vld [vmem:[%s1211_s5 + $0x4] ss:$8 sps:$4 sm:$0xff]   ;;  %v936_v34 = vld [vmem:[%s1211_s5] ss:$8 sps:$4 sm:$0xff]   ;;  %v937_v35 = vld [vmem:[%s1211_s5 + $0x14] ss:$8 sps:$4 sm:$0xff]  }
  0x3f   : > { %630 = vmatprep.subr.bf16.mxu0 %v934_v33  ;;  %v939_v36 = vld [vmem:[%s1211_s5 + $0x10] ss:$8 sps:$4 sm:$0xff]   ;;  %v940_v37 = vld [vmem:[%s1211_s5 + $0x24] ss:$8 sps:$4 sm:$0xff]   ;;  %v942_v38 = vld [vmem:[%s1211_s5 + $0x20] ss:$8 sps:$4 sm:$0xff]  }
  0x40   : > { %631 = vmatpush1.bf16.msra.mxu0 %v936_v34  ;;  %v943_v39 = vld [vmem:[%s1211_s5 + $0x34] ss:$8 sps:$4 sm:$0xff]   ;;  %v945_v40 = vld [vmem:[%s1211_s5 + $0x30] ss:$8 sps:$4 sm:$0xff]   ;;  %v946_v41 = vld [vmem:[%s1211_s5 + $0x44] ss:$8 sps:$4 sm:$0xff]  }
  0x41   : > { %632 = vmatprep.subr.bf16.mxu0 %v937_v35  ;;  %v948_v42 = vld [vmem:[%s1211_s5 + $0x40] ss:$8 sps:$4 sm:$0xff]   ;;  %v949_v43 = vld [vmem:[%s1211_s5 + $0x54] ss:$8 sps:$4 sm:$0xff]   ;;  %v951_v44 = vld [vmem:[%s1211_s5 + $0x50] ss:$8 sps:$4 sm:$0xff]  }
  0x42   : > { %v952_v45 = vld [vmem:[%s1211_s5 + $0x64] ss:$8 sps:$4 sm:$0xff]   ;;  %v430_v46 = vld [vmem:[%s1197_s26] sm:$0xff]  ;;  %v954_v48 = vld [vmem:[%s1211_s5 + $0x60] ss:$8 sps:$4 sm:$0xff]   ;;  %p873_p13 = scmp.ne.s32.totalorder %s1022_s14, 8 }
  0x43   : > { %v840_v47 = vcombine.high %v430_v46, %v430_v46  ;;  %v955_v49 = vld [vmem:[%s1211_s5 + $0x74] ss:$8 sps:$4 sm:$0xff]   ;;  %v957_v50 = vld [vmem:[%s1211_s5 + $0x70] ss:$8 sps:$4 sm:$0xff]   ;;  %v958_v51 = vld [vmem:[%s1211_s5 + $0x84] ss:$8 sps:$4 sm:$0xff]   ;;  %v839_v3 = vcombine.low %v430_v46, %v430_v46  ;;  %v683_v12 = vlaneseq (!%p873_p13) }
  0x44   : > { %633 = vmatpush1.bf16.msra.mxu0 %v939_v36  ;;  %v960_v52 = vld [vmem:[%s1211_s5 + $0x80] ss:$8 sps:$4 sm:$0xff]   ;;  %v961_v53 = vld [vmem:[%s1211_s5 + $0x94] ss:$8 sps:$4 sm:$0xff]   ;;  %v963_v54 = vld [vmem:[%s1211_s5 + $0x90] ss:$8 sps:$4 sm:$0xff]  }
  0x45   : > { %634 = vmatprep.subr.bf16.mxu0 %v940_v37  ;;  %662 = vmatprep.mubr.bf16.mxu0 %v840_v47  ;;  %v964_v55 = vld [vmem:[%s1211_s5 + $0xa4] ss:$8 sps:$4 sm:$0xff]   ;;  %v966_v56 = vld [vmem:[%s1211_s5 + $0xa0] ss:$8 sps:$4 sm:$0xff]   ;;  %v967_v57 = vld [vmem:[%s1211_s5 + $0xb4] ss:$8 sps:$4 sm:$0xff]  }
  0x46   : > { %v969_v58 = vld [vmem:[%s1211_s5 + $0xb0] ss:$8 sps:$4 sm:$0xff]   ;;  %v970_v59 = vld [vmem:[%s1211_s5 + $0xc4] ss:$8 sps:$4 sm:$0xff]   ;;  %v972_v60 = vld [vmem:[%s1211_s5 + $0xc0] ss:$8 sps:$4 sm:$0xff]  }
  0x47   : > { %v973_v61 = vld [vmem:[%s1211_s5 + $0xd4] ss:$8 sps:$4 sm:$0xff]   ;;  %v975_v62 = vld [vmem:[%s1211_s5 + $0xd0] ss:$8 sps:$4 sm:$0xff]   ;;  %v976_v63 = vld [vmem:[%s1211_s5 + $0xe4] ss:$8 sps:$4 sm:$0xff]  }
  0x48   : > { %635 = vmatpush1.bf16.msra.mxu0 %v942_v38  ;;  %v978_v0 = vld [vmem:[%s1211_s5 + $0xe0] ss:$8 sps:$4 sm:$0xff]   ;;  %v979_v1 = vld [vmem:[%s1211_s5 + $0xf4] ss:$8 sps:$4 sm:$0xff]   ;;  %v981_v2 = vld [vmem:[%s1211_s5 + $0xf0] ss:$8 sps:$4 sm:$0xff]  }
  0x49   : > { %636 = vmatprep.subr.bf16.mxu0 %v943_v39  ;;  %v428_v4 = vld [vmem:[#allocation2] sm:$0xff]  ;;  %v429_v5 = vld [vmem:[#allocation2 + $0x8] sm:$0xff]  ;;  %v684_v13 = vshrl.u32 (!%p873_p13), %v683_v12, 7 }
  0x4a   : > { %v681_v14 = vld [vmem:[%s410_s12] sm:$0x3] (!%p873_p13) }
  0x4b   : > { %v685_v15 = vsub.s32 (!%p873_p13), 0, %v684_v13  ;;  %v689_v16 = vsub.s32 (!%p873_p13), 1, %v684_v13 }
  0x4c   : > { %637 = vmatpush1.bf16.msra.mxu0 %v945_v40 }
  0x4d   : > { %638 = vmatprep.subr.bf16.mxu0 %v946_v41  ;;  %v686_v19 = vrot.slane (!%p873_p13), %v681_v14, %v685_v15  ;;  %v690_v20 = vrot.slane (!%p873_p13), %v681_v14, %v689_v16 }
  0x50   : > { %639 = vmatpush1.bf16.msra.mxu0 %v948_v42 }
  0x51   : > { %640 = vmatprep.subr.bf16.mxu0 %v949_v43 }
  0x54   : > { %641 = vmatpush1.bf16.msra.mxu0 %v951_v44 }
  0x55   : > { %642 = vmatprep.subr.bf16.mxu0 %v952_v45 }
  0x58   : > { %643 = vmatpush1.bf16.msra.mxu0 %v954_v48 }
  0x59   : > { %644 = vmatprep.subr.bf16.mxu0 %v955_v49 }
  0x5c   : > { %645 = vmatpush1.bf16.msra.mxu0 %v957_v50 }
  0x5d   : > { %646 = vmatprep.subr.bf16.mxu0 %v958_v51 }
  0x60   : > { %647 = vmatpush1.bf16.msra.mxu0 %v960_v52 }
  0x61   : > { %648 = vmatprep.subr.bf16.mxu0 %v961_v53 }
  0x64   : > { %649 = vmatpush1.bf16.msra.mxu0 %v963_v54 }
  0x65   : > { %650 = vmatprep.subr.bf16.mxu0 %v964_v55 }
  0x68   : > { %651 = vmatpush1.bf16.msra.mxu0 %v966_v56 }
  0x69   : > { %652 = vmatprep.subr.bf16.mxu0 %v967_v57 }
  0x6c   : > { %653 = vmatpush1.bf16.msra.mxu0 %v969_v58 }
  0x6d   : > { %654 = vmatprep.subr.bf16.mxu0 %v970_v59 }
  0x70   : > { %655 = vmatpush1.bf16.msra.mxu0 %v972_v60 }
  0x71   : > { %656 = vmatprep.subr.bf16.mxu0 %v973_v61 }
  0x74   : > { %657 = vmatpush1.bf16.msra.mxu0 %v975_v62 }
  0x75   : > { %658 = vmatprep.subr.bf16.mxu0 %v976_v63 }
  0x78   : > { %659 = vmatpush1.bf16.msra.mxu0 %v978_v0 }
  0x79   : > { %660 = vmatprep.subr.bf16.mxu0 %v979_v1 }
  0x7c   : > { %661 = vmatpush1.bf16.msra.mxu0 %v981_v2 }
  0x7f   : > { %663 = vmatmul.mubr.bf16.vlgmr.msra.gmra.mrb[0].mxu0 %v839_v3 }
 0x150   : > { %678 = sbr.rel (%p873_p13) target bundleno = 355 (0x163), region = 78 }
 0x152   : > { %v664_v6 = vpop.f32.mrb[0].mxu0 }
 0x153   : > { %v671_v7 = vadd.f32 %v664_v6, %v428_v4  ;;  %v666_v8 = vpop.f32.mrb[1].mxu0 }
 0x154   : > { %v672_v9 = vadd.f32 %v666_v8, %v429_v5  ;;  %v668_v10 = vpop.f32.mrb[2].mxu0 }
 0x155   : > { %673 = vst [vmem:[#allocation2] sm:$0xff] %v671_v7  ;;  %v669_v11 = vpop.f32.mrb[3].mxu0 }
 0x156   : > { %674 = vst [vmem:[#allocation2 + $0x8] sm:$0xff] %v672_v9 }
 0x15c   : > { %v679_v17 = vld [vmem:[#allocation2] sm:$0xff] }
 0x15d   : > { %v680_v18 = vld [vmem:[#allocation2 + $0x8] sm:$0xff]  ;;  %v693_v21 = vadd.f32 %v686_v19, %v679_v17 }
 0x15e   : > { %v694_v22 = vadd.f32 %v690_v20, %v680_v18 }
 0x15f   : > { %v695_v23 = vmax.f32 %v693_v21, 0.0 }
 0x160   : > { %v696_v24 = vmax.f32 %v694_v22, 0.0 }
 0x161   : > { %697 = vst [vmem:[%s1209_s15] sm:$0xff] %v695_v23 }
 0x162   : > { %698 = vst [vmem:[%s1209_s15 + $0x8] sm:$0xff] %v696_v24 }
 0x163 PF: > { %s13_s18 = sadd.s32 1, %s1038_s18   ;;  %s1280_s12 = smov %s1018_s13 }
 0x164   : > { %p10_p0 = scmp.ge.s32.totalorder %s13_s18, 20   ;;  %s1281_s13 = smov %s1112_s25 }
 0x165   : > { %s1282_s14 = smov %s1030_s16  ;;  %s1283_s15 = smov %s1034_s17 }
 0x166   : > { %s1284_s16 = smov %s1287_s19  ;;  %s1285_s17 = smov %s1291_s20 }
 0x167   :  { %12 = sbr.rel (!%p10_p0) target bundleno = 4 (0x4), region = 119 }

// kernel: frontal_cls_forward.67
= control target key start
LH: loop header
LB: loop body
LE: loop exit
PB: predicated region body
PF: predicated region fallthrough
CT: control target
= control target key end

     0   :  { %s1019_s12 = smov 0   ;;  %s1021_s13 = smov 0   ;;  %s1198_s0 = inlined_call_operand.vmem [shape: bf16[8,256], index: 0, kind: input, shape index: {}]   ;;  %s1199_s1 = inlined_call_operand.vmem [shape: bf16[256,512], index: 1, kind: input, shape index: {}]   ;;  %s1200_s2 = inlined_call_operand.vmem [shape: f32[1,512], index: 2, kind: input, shape index: {}]   ;;  %s1201_s3 = inlined_call_operand.vmem [shape: f32[8,512], index: 3, kind: output, shape index: {}]  }
   0x1   :  { %s1023_s14 = smov 0   ;;  %s1025_s15 = smov 0  }
   0x2   :  { %s1027_s16 = smov 0  }
   0x3 LB: > { %s28_s17 = sadd.s32 1, %s993_s15  ;;  %p76_p1 = scmp.ne.s32.totalorder %s985_s13, %s981_s12  ;;  %s997_s16 = sphi %s1027_s16, %s13_s16   ;;  %s993_s15 = sphi %s1025_s15, %s1205_s15   ;;  %s989_s14 = sphi %s1023_s14, %s1204_s14   ;;  %s985_s13 = sphi %s1021_s13, %s1203_s13   ;;  %s981_s12 = sphi %s1019_s12, %s1202_s12  }
   0x4   : > { %p30_p0 = scmp.ge.s32.totalorder %s28_s17, 2  ;;  %p77_p2 = scmp.eq.s32.totalorder %s997_s16, 0 }
   0x5   : > { %s69_s19 = sadd.s32 1, %s985_s13  ;;  %p823_p5 = scmp.ge.s32.totalorder %s997_s16, 2 }
   0x6   : > { %s1207_s17 = smov (%p30_p0, %s28_s17), 0  ;;  %p78_p3 = por %p77_p2, %p76_p1 }
   0x7   : > { %s65_s18 = ssub.s32 %s993_s15, %s1207_s17  ;;  %169 = sbr.rel (%p823_p5) target bundleno = 34 (0x22), region = 20 }
   0x8   : > { %p67_p4 = scmp.eq.s32.totalorder %s65_s18, 0 }
   0xa   : > { %s1054_s20 = scalar_select %p67_p4, %s985_s13, %s69_s19  }
   0xe   : > { %172 = sbr.rel (!%p78_p3) target bundleno = 34 (0x22), region = 24  ;;  %s174_s21 = sand.u32 (%p78_p3), 1, %s985_s13  }
   0xf   : > { %s868_s22 = sshll.u32 (%p78_p3), %s993_s15, 3  ;;  %s824_s23 = sshll.u32 (%p78_p3), %s174_s21, 8 }
  0x10   : > { %s1062_s26 = scalar_lea.vmem (%p78_p3), %s1199_s1, %s868_s22  ;;  %s1067_s27 = scalar_lea.vmem (%p78_p3), [#allocation3], %s824_s23 }
  0x11   : > { %v272_v0 = vld [vmem:[%s1062_s26] sm:$0xff] (%p78_p3)  ;;  %v274_v1 = vld [vmem:[%s1062_s26 + $0x10] sm:$0xff] (%p78_p3) }
  0x12   : > { %v276_v2 = vld [vmem:[%s1062_s26 + $0x20] sm:$0xff] (%p78_p3)  ;;  %273 = vst [vmem:[%s1067_s27] sm:$0xff] (%p78_p3), %v272_v0  ;;  %275 = vst [vmem:[%s1067_s27 + $0x8] sm:$0xff] (%p78_p3), %v274_v1  ;;  %v278_v3 = vld [vmem:[%s1062_s26 + $0x30] sm:$0xff] (%p78_p3) }
  0x13   : > { %277 = vst [vmem:[%s1067_s27 + $0x10] sm:$0xff] (%p78_p3), %v276_v2  ;;  %v280_v4 = vld [vmem:[%s1062_s26 + $0x40] sm:$0xff] (%p78_p3)  ;;  %v282_v5 = vld [vmem:[%s1062_s26 + $0x50] sm:$0xff] (%p78_p3)  ;;  %279 = vst [vmem:[%s1067_s27 + $0x18] sm:$0xff] (%p78_p3), %v278_v3 }
  0x14   : > { %281 = vst [vmem:[%s1067_s27 + $0x20] sm:$0xff] (%p78_p3), %v280_v4  ;;  %283 = vst [vmem:[%s1067_s27 + $0x28] sm:$0xff] (%p78_p3), %v282_v5  ;;  %v284_v6 = vld [vmem:[%s1062_s26 + $0x60] sm:$0xff] (%p78_p3)  ;;  %v286_v7 = vld [vmem:[%s1062_s26 + $0x70] sm:$0xff] (%p78_p3) }
  0x15   : > { %v288_v8 = vld [vmem:[%s1062_s26 + $0x80] sm:$0xff]  ;;  %285 = vst [vmem:[%s1067_s27 + $0x30] sm:$0xff] %v284_v6  ;;  %287 = vst [vmem:[%s1067_s27 + $0x38] sm:$0xff] %v286_v7  ;;  %v290_v9 = vld [vmem:[%s1062_s26 + $0x90] sm:$0xff] }
  0x16   : > { %289 = vst [vmem:[%s1067_s27 + $0x40] sm:$0xff] %v288_v8  ;;  %v292_v10 = vld [vmem:[%s1062_s26 + $0xa0] sm:$0xff]  ;;  %v294_v11 = vld [vmem:[%s1062_s26 + $0xb0] sm:$0xff]  ;;  %291 = vst [vmem:[%s1067_s27 + $0x48] sm:$0xff] %v290_v9 }
  0x17   : > { %293 = vst [vmem:[%s1067_s27 + $0x50] sm:$0xff] %v292_v10  ;;  %295 = vst [vmem:[%s1067_s27 + $0x58] sm:$0xff] %v294_v11  ;;  %v296_v12 = vld [vmem:[%s1062_s26 + $0xc0] sm:$0xff]  ;;  %v298_v13 = vld [vmem:[%s1062_s26 + $0xd0] sm:$0xff] }
  0x18   : > { %v300_v14 = vld [vmem:[%s1062_s26 + $0xe0] sm:$0xff]  ;;  %297 = vst [vmem:[%s1067_s27 + $0x60] sm:$0xff] %v296_v12  ;;  %299 = vst [vmem:[%s1067_s27 + $0x68] sm:$0xff] %v298_v13  ;;  %v302_v15 = vld [vmem:[%s1062_s26 + $0xf0] sm:$0xff] }
  0x19   : > { %301 = vst [vmem:[%s1067_s27 + $0x70] sm:$0xff] %v300_v14  ;;  %v304_v16 = vld [vmem:[%s1062_s26 + $0x100] sm:$0xff]  ;;  %v306_v17 = vld [vmem:[%s1062_s26 + $0x110] sm:$0xff]  ;;  %303 = vst [vmem:[%s1067_s27 + $0x78] sm:$0xff] %v302_v15 }
  0x1a   : > { %305 = vst [vmem:[%s1067_s27 + $0x80] sm:$0xff] %v304_v16  ;;  %307 = vst [vmem:[%s1067_s27 + $0x88] sm:$0xff] %v306_v17  ;;  %v308_v18 = vld [vmem:[%s1062_s26 + $0x120] sm:$0xff]  ;;  %v310_v19 = vld [vmem:[%s1062_s26 + $0x130] sm:$0xff] }
  0x1b   : > { %v312_v20 = vld [vmem:[%s1062_s26 + $0x140] sm:$0xff]  ;;  %309 = vst [vmem:[%s1067_s27 + $0x90] sm:$0xff] %v308_v18  ;;  %311 = vst [vmem:[%s1067_s27 + $0x98] sm:$0xff] %v310_v19  ;;  %v314_v21 = vld [vmem:[%s1062_s26 + $0x150] sm:$0xff] }
  0x1c   : > { %313 = vst [vmem:[%s1067_s27 + $0xa0] sm:$0xff] %v312_v20  ;;  %v316_v22 = vld [vmem:[%s1062_s26 + $0x160] sm:$0xff]  ;;  %v318_v23 = vld [vmem:[%s1062_s26 + $0x170] sm:$0xff]  ;;  %315 = vst [vmem:[%s1067_s27 + $0xa8] sm:$0xff] %v314_v21 }
  0x1d   : > { %317 = vst [vmem:[%s1067_s27 + $0xb0] sm:$0xff] %v316_v22  ;;  %319 = vst [vmem:[%s1067_s27 + $0xb8] sm:$0xff] %v318_v23  ;;  %v320_v24 = vld [vmem:[%s1062_s26 + $0x180] sm:$0xff]  ;;  %v322_v25 = vld [vmem:[%s1062_s26 + $0x190] sm:$0xff] }
  0x1e   : > { %v324_v26 = vld [vmem:[%s1062_s26 + $0x1a0] sm:$0xff]  ;;  %321 = vst [vmem:[%s1067_s27 + $0xc0] sm:$0xff] %v320_v24  ;;  %323 = vst [vmem:[%s1067_s27 + $0xc8] sm:$0xff] %v322_v25  ;;  %v326_v27 = vld [vmem:[%s1062_s26 + $0x1b0] sm:$0xff] }
  0x1f   : > { %325 = vst [vmem:[%s1067_s27 + $0xd0] sm:$0xff] %v324_v26  ;;  %v328_v28 = vld [vmem:[%s1062_s26 + $0x1c0] sm:$0xff]  ;;  %v330_v29 = vld [vmem:[%s1062_s26 + $0x1d0] sm:$0xff]  ;;  %327 = vst [vmem:[%s1067_s27 + $0xd8] sm:$0xff] %v326_v27 }
  0x20   : > { %329 = vst [vmem:[%s1067_s27 + $0xe0] sm:$0xff] %v328_v28  ;;  %331 = vst [vmem:[%s1067_s27 + $0xe8] sm:$0xff] %v330_v29  ;;  %v332_v30 = vld [vmem:[%s1062_s26 + $0x1e0] sm:$0xff]  ;;  %v334_v31 = vld [vmem:[%s1062_s26 + $0x1f0] sm:$0xff] }
  0x21   : > { %333 = vst [vmem:[%s1067_s27 + $0xf0] sm:$0xff] %v332_v30  ;;  %335 = vst [vmem:[%s1067_s27 + $0xf8] sm:$0xff] %v334_v31 }
  0x22 PF: > { %p827_p6 = scmp.ge.s32.totalorder %s997_s16, 1  ;;  %p348_p7 = scmp.lt.s32.totalorder %s997_s16, 3 }
  0x24   : > { %p349_p8 = pnand %p827_p6, %p348_p7 }
  0x25   : > { %s355_s28 = sand.u32 (!%p349_p8), 1, %s981_s12   ;;  %v1136_v32 = vld [vmem:[%s1198_s0] sm:$0xff] (!%p349_p8)  ;;  %s829_s6 = sshll.u32 (!%p349_p8), %s989_s14, 1  ;;  %v682_v3 = vlaneseq (!%p349_p8) }
  0x26   : > { %352 = sbr.rel (%p349_p8) target bundleno = 321 (0x141), region = 66  ;;  %s828_s4 = sshll.u32 (!%p349_p8), %s355_s28, 8  ;;  %v833_v33 = vcombine.high (!%p349_p8), %v1136_v32, %v1136_v32  ;;  %v832_v2 = vcombine.low (!%p349_p8), %v1136_v32, %v1136_v32 }
  0x27   : > { %s1140_s5 = scalar_lea.vmem (!%p349_p8), [#allocation3], %s828_s4  ;;  %p408_p9 = scmp.lt.s32.totalorder (!%p349_p8), %s829_s6, 3  ;;  %v683_v4 = vshrl.u32 (!%p349_p8), %v682_v3, 7 }
  0x28   : > { %v909_v34 = vld [vmem:[%s1140_s5 + $0x4] ss:$8 sps:$4 sm:$0xff] (!%p349_p8)   ;;  %662 = vmatprep.mubr.bf16.mxu0 (!%p349_p8), %v833_v33  ;;  %v911_v35 = vld [vmem:[%s1140_s5] ss:$8 sps:$4 sm:$0xff] (!%p349_p8)   ;;  %v912_v36 = vld [vmem:[%s1140_s5 + $0x14] ss:$8 sps:$4 sm:$0xff] (!%p349_p8)  }
  0x29   : > { %630 = vmatprep.subr.bf16.mxu0 (!%p349_p8), %v909_v34  ;;  %v914_v37 = vld [vmem:[%s1140_s5 + $0x10] ss:$8 sps:$4 sm:$0xff] (!%p349_p8)   ;;  %v915_v38 = vld [vmem:[%s1140_s5 + $0x24] ss:$8 sps:$4 sm:$0xff] (!%p349_p8)   ;;  %v917_v39 = vld [vmem:[%s1140_s5 + $0x20] ss:$8 sps:$4 sm:$0xff] (!%p349_p8)  }
  0x2a   : > { %631 = vmatpush1.bf16.msra.mxu0 (!%p349_p8), %v911_v35  ;;  %v918_v40 = vld [vmem:[%s1140_s5 + $0x34] ss:$8 sps:$4 sm:$0xff] (!%p349_p8)   ;;  %v920_v41 = vld [vmem:[%s1140_s5 + $0x30] ss:$8 sps:$4 sm:$0xff] (!%p349_p8)   ;;  %v921_v42 = vld [vmem:[%s1140_s5 + $0x44] ss:$8 sps:$4 sm:$0xff] (!%p349_p8)  }
  0x2b   : > { %632 = vmatprep.subr.bf16.mxu0 (!%p349_p8), %v912_v36  ;;  %v923_v43 = vld [vmem:[%s1140_s5 + $0x40] ss:$8 sps:$4 sm:$0xff] (!%p349_p8)   ;;  %v924_v44 = vld [vmem:[%s1140_s5 + $0x54] ss:$8 sps:$4 sm:$0xff] (!%p349_p8)   ;;  %v926_v45 = vld [vmem:[%s1140_s5 + $0x50] ss:$8 sps:$4 sm:$0xff] (!%p349_p8)  }
  0x2c   : > { %v927_v46 = vld [vmem:[%s1140_s5 + $0x64] ss:$8 sps:$4 sm:$0xff] (!%p349_p8)   ;;  %v929_v47 = vld [vmem:[%s1140_s5 + $0x60] ss:$8 sps:$4 sm:$0xff] (!%p349_p8)   ;;  %v930_v48 = vld [vmem:[%s1140_s5 + $0x74] ss:$8 sps:$4 sm:$0xff] (!%p349_p8)  }
  0x2d   : > { %v932_v49 = vld [vmem:[%s1140_s5 + $0x70] ss:$8 sps:$4 sm:$0xff]   ;;  %v933_v50 = vld [vmem:[%s1140_s5 + $0x84] ss:$8 sps:$4 sm:$0xff]   ;;  %v935_v51 = vld [vmem:[%s1140_s5 + $0x80] ss:$8 sps:$4 sm:$0xff]  }
  0x2e   : > { %633 = vmatpush1.bf16.msra.mxu0 %v914_v37  ;;  %v936_v52 = vld [vmem:[%s1140_s5 + $0x94] ss:$8 sps:$4 sm:$0xff]   ;;  %v938_v53 = vld [vmem:[%s1140_s5 + $0x90] ss:$8 sps:$4 sm:$0xff]   ;;  %v939_v54 = vld [vmem:[%s1140_s5 + $0xa4] ss:$8 sps:$4 sm:$0xff]  }
  0x2f   : > { %634 = vmatprep.subr.bf16.mxu0 %v915_v38  ;;  %v941_v55 = vld [vmem:[%s1140_s5 + $0xa0] ss:$8 sps:$4 sm:$0xff]   ;;  %v942_v56 = vld [vmem:[%s1140_s5 + $0xb4] ss:$8 sps:$4 sm:$0xff]   ;;  %v944_v57 = vld [vmem:[%s1140_s5 + $0xb0] ss:$8 sps:$4 sm:$0xff]  }
  0x30   : > { %v945_v58 = vld [vmem:[%s1140_s5 + $0xc4] ss:$8 sps:$4 sm:$0xff]   ;;  %v947_v59 = vld [vmem:[%s1140_s5 + $0xc0] ss:$8 sps:$4 sm:$0xff]   ;;  %v948_v60 = vld [vmem:[%s1140_s5 + $0xd4] ss:$8 sps:$4 sm:$0xff]  }
  0x31   : > { %v950_v61 = vld [vmem:[%s1140_s5 + $0xd0] ss:$8 sps:$4 sm:$0xff]   ;;  %v951_v62 = vld [vmem:[%s1140_s5 + $0xe4] ss:$8 sps:$4 sm:$0xff]   ;;  %v953_v63 = vld [vmem:[%s1140_s5 + $0xe0] ss:$8 sps:$4 sm:$0xff]  }
  0x32   : > { %635 = vmatpush1.bf16.msra.mxu0 %v917_v39  ;;  %v954_v0 = vld [vmem:[%s1140_s5 + $0xf4] ss:$8 sps:$4 sm:$0xff]   ;;  %v956_v1 = vld [vmem:[%s1140_s5 + $0xf0] ss:$8 sps:$4 sm:$0xff]   ;;  %s1209_s6 = smov (!%p408_p9, %s829_s6), 3  ;;  %v684_v5 = vsub.s32 0, %v683_v4 }
  0x33   : > { %636 = vmatprep.subr.bf16.mxu0 %v918_v40  ;;  %s410_s9 = scalar_lea.vmem %s1200_s2, %s1209_s6  ;;  %v688_v7 = vsub.s32 1, %v683_v4  ;;  %s831_s10 = sshll.u32 %s1209_s6, 3 }
  0x34   : > { %v680_v6 = vld [vmem:[%s410_s9] sm:$0x3]  ;;  %s420_s18 = scalar_lea.vmem %s1201_s3, %s831_s10 }
  0x35   : > { %v685_v8 = vrot.slane %v680_v6, %v684_v5  ;;  %v689_v9 = vrot.slane %v680_v6, %v688_v7 }
  0x36   : > { %637 = vmatpush1.bf16.msra.mxu0 %v920_v41 }
  0x37   : > { %638 = vmatprep.subr.bf16.mxu0 %v921_v42 }
  0x3a   : > { %639 = vmatpush1.bf16.msra.mxu0 %v923_v43 }
  0x3b   : > { %640 = vmatprep.subr.bf16.mxu0 %v924_v44 }
  0x3e   : > { %641 = vmatpush1.bf16.msra.mxu0 %v926_v45 }
  0x3f   : > { %642 = vmatprep.subr.bf16.mxu0 %v927_v46 }
  0x42   : > { %643 = vmatpush1.bf16.msra.mxu0 %v929_v47 }
  0x43   : > { %644 = vmatprep.subr.bf16.mxu0 %v930_v48 }
  0x46   : > { %645 = vmatpush1.bf16.msra.mxu0 %v932_v49 }
  0x47   : > { %646 = vmatprep.subr.bf16.mxu0 %v933_v50 }
  0x4a   : > { %647 = vmatpush1.bf16.msra.mxu0 %v935_v51 }
  0x4b   : > { %648 = vmatprep.subr.bf16.mxu0 %v936_v52 }
  0x4e   : > { %649 = vmatpush1.bf16.msra.mxu0 %v938_v53 }
  0x4f   : > { %650 = vmatprep.subr.bf16.mxu0 %v939_v54 }
  0x52   : > { %651 = vmatpush1.bf16.msra.mxu0 %v941_v55 }
  0x53   : > { %652 = vmatprep.subr.bf16.mxu0 %v942_v56 }
  0x56   : > { %653 = vmatpush1.bf16.msra.mxu0 %v944_v57 }
  0x57   : > { %654 = vmatprep.subr.bf16.mxu0 %v945_v58 }
  0x5a   : > { %655 = vmatpush1.bf16.msra.mxu0 %v947_v59 }
  0x5b   : > { %656 = vmatprep.subr.bf16.mxu0 %v948_v60 }
  0x5e   : > { %657 = vmatpush1.bf16.msra.mxu0 %v950_v61 }
  0x5f   : > { %658 = vmatprep.subr.bf16.mxu0 %v951_v62 }
  0x62   : > { %659 = vmatpush1.bf16.msra.mxu0 %v953_v63 }
  0x63   : > { %660 = vmatprep.subr.bf16.mxu0 %v954_v0 }
  0x66   : > { %661 = vmatpush1.bf16.msra.mxu0 %v956_v1 }
  0x69   : > { %663 = vmatmul.mubr.bf16.vlgmr.msra.gmra.mrb[0].mxu0 %v832_v2 }
 0x13c   : > { %v664_v10 = vpop.f32.mrb[0].mxu0 }
 0x13d   : > { %v692_v11 = vadd.f32 %v685_v8, %v664_v10  ;;  %v666_v12 = vpop.f32.mrb[1].mxu0 }
 0x13e   : > { %v693_v13 = vadd.f32 %v689_v9, %v666_v12  ;;  %v668_v14 = vpop.f32.mrb[2].mxu0 }
 0x13f   : > { %694 = vst [vmem:[%s420_s18] sm:$0xff] %v692_v11  ;;  %v669_v15 = vpop.f32.mrb[3].mxu0 }
 0x140   : > { %695 = vst [vmem:[%s420_s18 + $0x8] sm:$0xff] %v693_v13 }
 0x141 PF: > { %s13_s16 = sadd.s32 1, %s997_s16   ;;  %s1202_s12 = smov %s985_s13 }
 0x142   : > { %p10_p10 = scmp.ge.s32.totalorder %s13_s16, 4   ;;  %s1203_s13 = smov %s1054_s20 }
 0x143   : > { %s1204_s14 = smov %s993_s15  ;;  %s1205_s15 = smov %s1207_s17 }
 0x144   :  { %12 = sbr.rel (!%p10_p10) target bundleno = 3 (0x3), region = 119 }

// kernel: frontal_cls_forward.68
= control target key start
LH: loop header
LB: loop body
LE: loop exit
PB: predicated region body
PF: predicated region fallthrough
CT: control target
= control target key end

     0   :  { %s1606_s15 = smov 0   ;;  %s1608_s16 = smov 0   ;;  %s1925_s0 = inlined_call_operand.vmem [shape: bf16[8,4608], index: 0, kind: input, shape index: {}]   ;;  %s1926_s1 = inlined_call_operand.vmem [shape: bf16[4608,512], index: 1, kind: input, shape index: {}]   ;;  %s1927_s2 = inlined_call_operand.vmem [shape: f32[1,512], index: 2, kind: input, shape index: {}]   ;;  %s1928_s3 = inlined_call_operand.vmem [shape: f32[8,512], index: 3, kind: input, shape index: {}]   ;;  %s1929_s4 = inlined_call_operand.vmem [shape: f32[8,512], index: 4, kind: output, shape index: {}]  }
   0x1   :  { %s1610_s17 = smov 0   ;;  %s1612_s18 = smov 0  }
   0x2   :  { %s1614_s19 = smov 0   ;;  %s1616_s20 = smov 0  }
   0x3   :  { %s1618_s21 = smov 0  }
   0x4 LB: > { %s26_s22 = sadd.s32 1, %s1570_s19  ;;  %s29_s23 = sadd.s32 1, %s1574_s20  ;;  %s1578_s21 = sphi %s1618_s21, %s14_s21   ;;  %s1574_s20 = sphi %s1616_s20, %s1935_s20   ;;  %s1570_s19 = sphi %s1614_s19, %s1934_s19   ;;  %s1566_s18 = sphi %s1612_s18, %s1933_s18   ;;  %s1562_s17 = sphi %s1610_s17, %s1932_s17   ;;  %s1558_s16 = sphi %s1608_s16, %s1931_s16   ;;  %s1554_s15 = sphi %s1606_s15, %s1930_s15  }
   0x5   : > { %p27_p0 = scmp.ge.s32.totalorder %s26_s22, 9  ;;  %p77_p1 = scmp.ne.s32.totalorder %s1558_s16, %s1554_s15 }
   0x6   : > { %p78_p2 = scmp.eq.s32.totalorder %s1578_s21, 0  ;;  %s70_s27 = sadd.s32 1, %s1558_s16 }
   0x7   : > { %s1937_s22 = smov (%p27_p0, %s26_s22), 0  ;;  %s1939_s23 = smov (!%p27_p0, %s29_s23), %s1574_s20 }
   0x8   : > { %p79_p3 = por %p78_p2, %p77_p1  ;;  %p31_p4 = scmp.ge.s32.totalorder %s1939_s23, 2 }
   0x9   : > { %s65_s24 = ssub.s32 %s1570_s19, %s1937_s22  ;;  %p1279_p6 = scmp.ge.s32.totalorder %s1578_s21, 18 }
   0xa   : > { %s1941_s23 = smov (%p31_p4, %s1939_s23), 0 }
   0xb   : > { %s66_s25 = ssub.s32 %s1574_s20, %s1941_s23  ;;  %185 = sbr.rel (%p1279_p6) target bundleno = 57 (0x39), region = 16 }
   0xc   : > { %s67_s26 = sor.u32 %s66_s25, %s65_s24 }
   0xd   : > { %p68_p5 = scmp.eq.s32.totalorder %s67_s26, 0 }
   0xf   : > { %s1657_s28 = scalar_select %p68_p5, %s1558_s16, %s70_s27  }
  0x12   : > { %201 = sbr.rel (!%p79_p3) target bundleno = 57 (0x39), region = 24  ;;  %s203_s29 = sand.u32 (%p79_p3), 1, %s1558_s16  }
  0x13   : > { %s1282_s30 = sshll.u32 (%p79_p3), %s1574_s20, 1  ;;  %s1280_s5 = sshll.u32 (%p79_p3), %s203_s29, 9 }
  0x14   : > { %s1366_s6 = sshll.u32 (%p79_p3), %s1570_s19, 8  ;;  %s1671_s12 = scalar_lea.vmem (%p79_p3), [#allocation3], %s1280_s5 }
  0x15   : > { %s209_s7 = sadd.s32 (%p79_p3), %s1366_s6, %s1282_s30 }
  0x16   : > { %s1284_s8 = sshll.u32 (%p79_p3), %s209_s7, 2 }
  0x17   : > { %s1666_s11 = scalar_lea.vmem (%p79_p3), %s1926_s1, %s1284_s8 }
  0x18   : > { %v365_v0 = vld [vmem:[%s1666_s11] sm:$0xff] (%p79_p3)  ;;  %v367_v1 = vld [vmem:[%s1666_s11 + $0x10] sm:$0xff] (%p79_p3) }
  0x19   : > { %v369_v2 = vld [vmem:[%s1666_s11 + $0x20] sm:$0xff]  ;;  %366 = vst [vmem:[%s1671_s12] sm:$0xff] %v365_v0  ;;  %368 = vst [vmem:[%s1671_s12 + $0x8] sm:$0xff] %v367_v1  ;;  %v371_v3 = vld [vmem:[%s1666_s11 + $0x30] sm:$0xff] }
  0x1a   : > { %370 = vst [vmem:[%s1671_s12 + $0x10] sm:$0xff] %v369_v2  ;;  %v373_v4 = vld [vmem:[%s1666_s11 + $0x40] sm:$0xff]  ;;  %v375_v5 = vld [vmem:[%s1666_s11 + $0x50] sm:$0xff]  ;;  %372 = vst [vmem:[%s1671_s12 + $0x18] sm:$0xff] %v371_v3 }
  0x1b   : > { %374 = vst [vmem:[%s1671_s12 + $0x20] sm:$0xff] %v373_v4  ;;  %376 = vst [vmem:[%s1671_s12 + $0x28] sm:$0xff] %v375_v5  ;;  %v377_v6 = vld [vmem:[%s1666_s11 + $0x60] sm:$0xff]  ;;  %v379_v7 = vld [vmem:[%s1666_s11 + $0x70] sm:$0xff] }
  0x1c   : > { %v381_v8 = vld [vmem:[%s1666_s11 + $0x80] sm:$0xff]  ;;  %378 = vst [vmem:[%s1671_s12 + $0x30] sm:$0xff] %v377_v6  ;;  %380 = vst [vmem:[%s1671_s12 + $0x38] sm:$0xff] %v379_v7  ;;  %v383_v9 = vld [vmem:[%s1666_s11 + $0x90] sm:$0xff] }
  0x1d   : > { %382 = vst [vmem:[%s1671_s12 + $0x40] sm:$0xff] %v381_v8  ;;  %v385_v10 = vld [vmem:[%s1666_s11 + $0xa0] sm:$0xff]  ;;  %v387_v11 = vld [vmem:[%s1666_s11 + $0xb0] sm:$0xff]  ;;  %384 = vst [vmem:[%s1671_s12 + $0x48] sm:$0xff] %v383_v9 }
  0x1e   : > { %386 = vst [vmem:[%s1671_s12 + $0x50] sm:$0xff] %v385_v10  ;;  %388 = vst [vmem:[%s1671_s12 + $0x58] sm:$0xff] %v387_v11  ;;  %v389_v12 = vld [vmem:[%s1666_s11 + $0xc0] sm:$0xff]  ;;  %v391_v13 = vld [vmem:[%s1666_s11 + $0xd0] sm:$0xff] }
  0x1f   : > { %v393_v14 = vld [vmem:[%s1666_s11 + $0xe0] sm:$0xff]  ;;  %390 = vst [vmem:[%s1671_s12 + $0x60] sm:$0xff] %v389_v12  ;;  %392 = vst [vmem:[%s1671_s12 + $0x68] sm:$0xff] %v391_v13  ;;  %v395_v15 = vld [vmem:[%s1666_s11 + $0xf0] sm:$0xff] }
  0x20   : > { %394 = vst [vmem:[%s1671_s12 + $0x70] sm:$0xff] %v393_v14  ;;  %v397_v16 = vld [vmem:[%s1666_s11 + $0x100] sm:$0xff]  ;;  %v399_v17 = vld [vmem:[%s1666_s11 + $0x110] sm:$0xff]  ;;  %396 = vst [vmem:[%s1671_s12 + $0x78] sm:$0xff] %v395_v15 }
  0x21   : > { %398 = vst [vmem:[%s1671_s12 + $0x80] sm:$0xff] %v397_v16  ;;  %400 = vst [vmem:[%s1671_s12 + $0x88] sm:$0xff] %v399_v17  ;;  %v401_v18 = vld [vmem:[%s1666_s11 + $0x120] sm:$0xff]  ;;  %v403_v19 = vld [vmem:[%s1666_s11 + $0x130] sm:$0xff] }
  0x22   : > { %v405_v20 = vld [vmem:[%s1666_s11 + $0x140] sm:$0xff]  ;;  %402 = vst [vmem:[%s1671_s12 + $0x90] sm:$0xff] %v401_v18  ;;  %404 = vst [vmem:[%s1671_s12 + $0x98] sm:$0xff] %v403_v19  ;;  %v407_v21 = vld [vmem:[%s1666_s11 + $0x150] sm:$0xff] }
  0x23   : > { %406 = vst [vmem:[%s1671_s12 + $0xa0] sm:$0xff] %v405_v20  ;;  %v409_v22 = vld [vmem:[%s1666_s11 + $0x160] sm:$0xff]  ;;  %v411_v23 = vld [vmem:[%s1666_s11 + $0x170] sm:$0xff]  ;;  %408 = vst [vmem:[%s1671_s12 + $0xa8] sm:$0xff] %v407_v21 }
  0x24   : > { %410 = vst [vmem:[%s1671_s12 + $0xb0] sm:$0xff] %v409_v22  ;;  %412 = vst [vmem:[%s1671_s12 + $0xb8] sm:$0xff] %v411_v23  ;;  %v413_v24 = vld [vmem:[%s1666_s11 + $0x180] sm:$0xff]  ;;  %v415_v25 = vld [vmem:[%s1666_s11 + $0x190] sm:$0xff] }
  0x25   : > { %v417_v26 = vld [vmem:[%s1666_s11 + $0x1a0] sm:$0xff]  ;;  %414 = vst [vmem:[%s1671_s12 + $0xc0] sm:$0xff] %v413_v24  ;;  %416 = vst [vmem:[%s1671_s12 + $0xc8] sm:$0xff] %v415_v25  ;;  %v419_v27 = vld [vmem:[%s1666_s11 + $0x1b0] sm:$0xff] }
  0x26   : > { %418 = vst [vmem:[%s1671_s12 + $0xd0] sm:$0xff] %v417_v26  ;;  %v421_v28 = vld [vmem:[%s1666_s11 + $0x1c0] sm:$0xff]  ;;  %v423_v29 = vld [vmem:[%s1666_s11 + $0x1d0] sm:$0xff]  ;;  %420 = vst [vmem:[%s1671_s12 + $0xd8] sm:$0xff] %v419_v27 }
  0x27   : > { %422 = vst [vmem:[%s1671_s12 + $0xe0] sm:$0xff] %v421_v28  ;;  %424 = vst [vmem:[%s1671_s12 + $0xe8] sm:$0xff] %v423_v29  ;;  %v425_v30 = vld [vmem:[%s1666_s11 + $0x1e0] sm:$0xff]  ;;  %v427_v31 = vld [vmem:[%s1666_s11 + $0x1f0] sm:$0xff] }
  0x28   : > { %v429_v32 = vld [vmem:[%s1666_s11 + $0x200] sm:$0xff]  ;;  %426 = vst [vmem:[%s1671_s12 + $0xf0] sm:$0xff] %v425_v30  ;;  %428 = vst [vmem:[%s1671_s12 + $0xf8] sm:$0xff] %v427_v31  ;;  %v431_v33 = vld [vmem:[%s1666_s11 + $0x210] sm:$0xff] }
  0x29   : > { %430 = vst [vmem:[%s1671_s12 + $0x100] sm:$0xff] %v429_v32  ;;  %v433_v34 = vld [vmem:[%s1666_s11 + $0x220] sm:$0xff]  ;;  %v435_v35 = vld [vmem:[%s1666_s11 + $0x230] sm:$0xff]  ;;  %432 = vst [vmem:[%s1671_s12 + $0x108] sm:$0xff] %v431_v33 }
  0x2a   : > { %434 = vst [vmem:[%s1671_s12 + $0x110] sm:$0xff] %v433_v34  ;;  %436 = vst [vmem:[%s1671_s12 + $0x118] sm:$0xff] %v435_v35  ;;  %v437_v36 = vld [vmem:[%s1666_s11 + $0x240] sm:$0xff]  ;;  %v439_v37 = vld [vmem:[%s1666_s11 + $0x250] sm:$0xff] }
  0x2b   : > { %v441_v38 = vld [vmem:[%s1666_s11 + $0x260] sm:$0xff]  ;;  %438 = vst [vmem:[%s1671_s12 + $0x120] sm:$0xff] %v437_v36  ;;  %440 = vst [vmem:[%s1671_s12 + $0x128] sm:$0xff] %v439_v37  ;;  %v443_v39 = vld [vmem:[%s1666_s11 + $0x270] sm:$0xff] }
  0x2c   : > { %442 = vst [vmem:[%s1671_s12 + $0x130] sm:$0xff] %v441_v38  ;;  %v445_v40 = vld [vmem:[%s1666_s11 + $0x280] sm:$0xff]  ;;  %v447_v41 = vld [vmem:[%s1666_s11 + $0x290] sm:$0xff]  ;;  %444 = vst [vmem:[%s1671_s12 + $0x138] sm:$0xff] %v443_v39 }
  0x2d   : > { %446 = vst [vmem:[%s1671_s12 + $0x140] sm:$0xff] %v445_v40  ;;  %448 = vst [vmem:[%s1671_s12 + $0x148] sm:$0xff] %v447_v41  ;;  %v449_v42 = vld [vmem:[%s1666_s11 + $0x2a0] sm:$0xff]  ;;  %v451_v43 = vld [vmem:[%s1666_s11 + $0x2b0] sm:$0xff] }
  0x2e   : > { %v453_v44 = vld [vmem:[%s1666_s11 + $0x2c0] sm:$0xff]  ;;  %450 = vst [vmem:[%s1671_s12 + $0x150] sm:$0xff] %v449_v42  ;;  %452 = vst [vmem:[%s1671_s12 + $0x158] sm:$0xff] %v451_v43  ;;  %v455_v45 = vld [vmem:[%s1666_s11 + $0x2d0] sm:$0xff] }
  0x2f   : > { %454 = vst [vmem:[%s1671_s12 + $0x160] sm:$0xff] %v453_v44  ;;  %v457_v46 = vld [vmem:[%s1666_s11 + $0x2e0] sm:$0xff]  ;;  %v459_v47 = vld [vmem:[%s1666_s11 + $0x2f0] sm:$0xff]  ;;  %456 = vst [vmem:[%s1671_s12 + $0x168] sm:$0xff] %v455_v45 }
  0x30   : > { %458 = vst [vmem:[%s1671_s12 + $0x170] sm:$0xff] %v457_v46  ;;  %460 = vst [vmem:[%s1671_s12 + $0x178] sm:$0xff] %v459_v47  ;;  %v461_v48 = vld [vmem:[%s1666_s11 + $0x300] sm:$0xff]  ;;  %v463_v49 = vld [vmem:[%s1666_s11 + $0x310] sm:$0xff] }
  0x31   : > { %v465_v50 = vld [vmem:[%s1666_s11 + $0x320] sm:$0xff]  ;;  %462 = vst [vmem:[%s1671_s12 + $0x180] sm:$0xff] %v461_v48  ;;  %464 = vst [vmem:[%s1671_s12 + $0x188] sm:$0xff] %v463_v49  ;;  %v467_v51 = vld [vmem:[%s1666_s11 + $0x330] sm:$0xff] }
  0x32   : > { %466 = vst [vmem:[%s1671_s12 + $0x190] sm:$0xff] %v465_v50  ;;  %v469_v52 = vld [vmem:[%s1666_s11 + $0x340] sm:$0xff]  ;;  %v471_v53 = vld [vmem:[%s1666_s11 + $0x350] sm:$0xff]  ;;  %468 = vst [vmem:[%s1671_s12 + $0x198] sm:$0xff] %v467_v51 }
  0x33   : > { %470 = vst [vmem:[%s1671_s12 + $0x1a0] sm:$0xff] %v469_v52  ;;  %472 = vst [vmem:[%s1671_s12 + $0x1a8] sm:$0xff] %v471_v53  ;;  %v473_v54 = vld [vmem:[%s1666_s11 + $0x360] sm:$0xff]  ;;  %v475_v55 = vld [vmem:[%s1666_s11 + $0x370] sm:$0xff] }
  0x34   : > { %v477_v56 = vld [vmem:[%s1666_s11 + $0x380] sm:$0xff]  ;;  %474 = vst [vmem:[%s1671_s12 + $0x1b0] sm:$0xff] %v473_v54  ;;  %476 = vst [vmem:[%s1671_s12 + $0x1b8] sm:$0xff] %v475_v55  ;;  %v479_v57 = vld [vmem:[%s1666_s11 + $0x390] sm:$0xff] }
  0x35   : > { %478 = vst [vmem:[%s1671_s12 + $0x1c0] sm:$0xff] %v477_v56  ;;  %v481_v58 = vld [vmem:[%s1666_s11 + $0x3a0] sm:$0xff]  ;;  %v483_v59 = vld [vmem:[%s1666_s11 + $0x3b0] sm:$0xff]  ;;  %480 = vst [vmem:[%s1671_s12 + $0x1c8] sm:$0xff] %v479_v57 }
  0x36   : > { %482 = vst [vmem:[%s1671_s12 + $0x1d0] sm:$0xff] %v481_v58  ;;  %484 = vst [vmem:[%s1671_s12 + $0x1d8] sm:$0xff] %v483_v59  ;;  %v485_v60 = vld [vmem:[%s1666_s11 + $0x3c0] sm:$0xff]  ;;  %v487_v61 = vld [vmem:[%s1666_s11 + $0x3d0] sm:$0xff] }
  0x37   : > { %v489_v62 = vld [vmem:[%s1666_s11 + $0x3e0] sm:$0xff]  ;;  %486 = vst [vmem:[%s1671_s12 + $0x1e0] sm:$0xff] %v485_v60  ;;  %488 = vst [vmem:[%s1671_s12 + $0x1e8] sm:$0xff] %v487_v61  ;;  %v491_v63 = vld [vmem:[%s1666_s11 + $0x3f0] sm:$0xff] }
  0x38   : > { %490 = vst [vmem:[%s1671_s12 + $0x1f0] sm:$0xff] %v489_v62  ;;  %492 = vst [vmem:[%s1671_s12 + $0x1f8] sm:$0xff] %v491_v63 }
  0x39 PF: > { %p1285_p7 = scmp.ge.s32.totalorder %s1578_s21, 1  ;;  %p518_p8 = scmp.lt.s32.totalorder %s1578_s21, 19 }
  0x3b   : > { %p519_p9 = pnand %p1285_p7, %p518_p8 }
  0x3c   : > { %s525_s13 = sand.u32 (!%p519_p9), 1, %s1554_s15   ;;  %s1287_s14 = sshll.u32 (!%p519_p9), %s1562_s17, 2 }
  0x3d   : > { %522 = sbr.rel (%p519_p9) target bundleno = 377 (0x179), region = 70  ;;  %s1286_s24 = sshll.u32 (!%p519_p9), %s525_s13, 9 }
  0x3e   : > { %p579_p10 = scmp.lt.s32.totalorder (!%p519_p9), %s1287_s14, 35  ;;  %s1289_s25 = sshll.u32 (!%p519_p9), %s1566_s18, 1 }
  0x3f   : > { %p589_p11 = scmp.lt.s32.totalorder (!%p519_p9), %s1289_s25, 3  ;;  %s1825_s13 = scalar_lea.vmem (!%p519_p9), [#allocation3], %s1286_s24 }
  0x40   : > { %p1294_p12 = scmp.ne.s32.totalorder (!%p519_p9), %s1562_s17, 0 }
  0x44   : > { %s1943_s14 = smov (!%p579_p10, %s1287_s14), 35  ;;  %s1945_s25 = smov (!%p589_p11, %s1289_s25), 3 }
  0x45   : > { %s1288_s26 = sshll.u32 %s1943_s14, 2  ;;  %s591_s15 = scalar_lea.vmem %s1927_s2, %s1945_s25  ;;  %v1580_v0 = vmov (!%p1294_p12), 0.0  }
  0x46   : > { %s1806_s30 = scalar_lea.vmem %s1925_s0, %s1288_s26  ;;  %s1291_s7 = sshll.u32 %s1945_s25, 3  ;;  %617 = vst [vmem:[#allocation2] sm:$0xff] (!%p1294_p12), %v1580_v0  ;;  %618 = vst [vmem:[#allocation2 + $0x8] sm:$0xff] (!%p1294_p12), %v1580_v0 }
  0x47   : > { %s1818_s18 = scalar_lea.vmem %s1928_s3, %s1291_s7  ;;  %s1823_s12 = scalar_lea.vmem %s1929_s4, %s1291_s7 }
  0x48   : > { %616 = sbr.rel (%p1294_p12) target bundleno = 79 (0x4f), region = 78 }
  0x4f PF: > { %v1424_v1 = vld [vmem:[%s1825_s13 + $0x4] ss:$8 sps:$4 sm:$0xff]   ;;  %v1428_v3 = vld [vmem:[%s1825_s13] ss:$8 sps:$4 sm:$0xff]   ;;  %v1430_v5 = vld [vmem:[%s1825_s13 + $0x14] ss:$8 sps:$4 sm:$0xff]  }
  0x50   : > { %v1426_v2 = vld [vmem:[%s1825_s13 + $0x104] ss:$8 sps:$4 sm:$0xff]   ;;  %1021 = vmatprep.subr.bf16.mxu0 %v1424_v1  ;;  %v1429_v4 = vld [vmem:[%s1825_s13 + $0x100] ss:$8 sps:$4 sm:$0xff]   ;;  %v1432_v6 = vld [vmem:[%s1825_s13 + $0x114] ss:$8 sps:$4 sm:$0xff]  }
  0x51   : > { %1062 = vmatprep.subr.bf16.mxu1 %v1426_v2  ;;  %1022 = vmatpush1.bf16.msra.mxu0 %v1428_v3  ;;  %v1434_v7 = vld [vmem:[%s1825_s13 + $0x10] ss:$8 sps:$4 sm:$0xff]   ;;  %v1436_v9 = vld [vmem:[%s1825_s13 + $0x24] ss:$8 sps:$4 sm:$0xff]   ;;  %v1440_v11 = vld [vmem:[%s1825_s13 + $0x20] ss:$8 sps:$4 sm:$0xff]  }
  0x52   : > { %1063 = vmatpush1.bf16.msra.mxu1 %v1429_v4  ;;  %1023 = vmatprep.subr.bf16.mxu0 %v1430_v5  ;;  %v1435_v8 = vld [vmem:[%s1825_s13 + $0x110] ss:$8 sps:$4 sm:$0xff]   ;;  %v1438_v10 = vld [vmem:[%s1825_s13 + $0x124] ss:$8 sps:$4 sm:$0xff]   ;;  %v1441_v12 = vld [vmem:[%s1825_s13 + $0x120] ss:$8 sps:$4 sm:$0xff]  }
  0x53   : > { %1064 = vmatprep.subr.bf16.mxu1 %v1432_v6  ;;  %v1442_v13 = vld [vmem:[%s1825_s13 + $0x34] ss:$8 sps:$4 sm:$0xff]   ;;  %v1446_v15 = vld [vmem:[%s1825_s13 + $0x30] ss:$8 sps:$4 sm:$0xff]   ;;  %v1448_v17 = vld [vmem:[%s1825_s13 + $0x44] ss:$8 sps:$4 sm:$0xff]  }
  0x54   : > { %v1444_v14 = vld [vmem:[%s1825_s13 + $0x134] ss:$8 sps:$4 sm:$0xff]   ;;  %v1447_v16 = vld [vmem:[%s1825_s13 + $0x130] ss:$8 sps:$4 sm:$0xff]   ;;  %v1450_v18 = vld [vmem:[%s1825_s13 + $0x144] ss:$8 sps:$4 sm:$0xff]  }
  0x55   : > { %1024 = vmatpush1.bf16.msra.mxu0 %v1434_v7  ;;  %v1452_v19 = vld [vmem:[%s1825_s13 + $0x40] ss:$8 sps:$4 sm:$0xff]   ;;  %v1454_v21 = vld [vmem:[%s1825_s13 + $0x54] ss:$8 sps:$4 sm:$0xff]   ;;  %v1458_v23 = vld [vmem:[%s1825_s13 + $0x50] ss:$8 sps:$4 sm:$0xff]  }
  0x56   : > { %1065 = vmatpush1.bf16.msra.mxu1 %v1435_v8  ;;  %1025 = vmatprep.subr.bf16.mxu0 %v1436_v9  ;;  %v1453_v20 = vld [vmem:[%s1825_s13 + $0x140] ss:$8 sps:$4 sm:$0xff]   ;;  %v1456_v22 = vld [vmem:[%s1825_s13 + $0x154] ss:$8 sps:$4 sm:$0xff]   ;;  %v1459_v24 = vld [vmem:[%s1825_s13 + $0x150] ss:$8 sps:$4 sm:$0xff]  }
  0x57   : > { %1066 = vmatprep.subr.bf16.mxu1 %v1438_v10  ;;  %v1460_v25 = vld [vmem:[%s1825_s13 + $0x64] ss:$8 sps:$4 sm:$0xff]   ;;  %v1464_v27 = vld [vmem:[%s1825_s13 + $0x60] ss:$8 sps:$4 sm:$0xff]   ;;  %v1466_v29 = vld [vmem:[%s1825_s13 + $0x74] ss:$8 sps:$4 sm:$0xff]  }
  0x58   : > { %v1462_v26 = vld [vmem:[%s1825_s13 + $0x164] ss:$8 sps:$4 sm:$0xff]   ;;  %v1465_v28 = vld [vmem:[%s1825_s13 + $0x160] ss:$8 sps:$4 sm:$0xff]   ;;  %v1468_v30 = vld [vmem:[%s1825_s13 + $0x174] ss:$8 sps:$4 sm:$0xff]  }
  0x59   : > { %1026 = vmatpush1.bf16.msra.mxu0 %v1440_v11  ;;  %v1470_v31 = vld [vmem:[%s1825_s13 + $0x70] ss:$8 sps:$4 sm:$0xff]   ;;  %v1472_v33 = vld [vmem:[%s1825_s13 + $0x84] ss:$8 sps:$4 sm:$0xff]   ;;  %v1476_v35 = vld [vmem:[%s1825_s13 + $0x80] ss:$8 sps:$4 sm:$0xff]  }
  0x5a   : > { %1067 = vmatpush1.bf16.msra.mxu1 %v1441_v12  ;;  %1027 = vmatprep.subr.bf16.mxu0 %v1442_v13  ;;  %v1471_v32 = vld [vmem:[%s1825_s13 + $0x170] ss:$8 sps:$4 sm:$0xff]   ;;  %v1474_v34 = vld [vmem:[%s1825_s13 + $0x184] ss:$8 sps:$4 sm:$0xff]   ;;  %v1477_v36 = vld [vmem:[%s1825_s13 + $0x180] ss:$8 sps:$4 sm:$0xff]  }
  0x5b   : > { %1068 = vmatprep.subr.bf16.mxu1 %v1444_v14  ;;  %v1478_v37 = vld [vmem:[%s1825_s13 + $0x94] ss:$8 sps:$4 sm:$0xff]   ;;  %v1482_v39 = vld [vmem:[%s1825_s13 + $0x90] ss:$8 sps:$4 sm:$0xff]   ;;  %v1484_v41 = vld [vmem:[%s1825_s13 + $0xa4] ss:$8 sps:$4 sm:$0xff]  }
  0x5c   : > { %v1480_v38 = vld [vmem:[%s1825_s13 + $0x194] ss:$8 sps:$4 sm:$0xff]   ;;  %v1483_v40 = vld [vmem:[%s1825_s13 + $0x190] ss:$8 sps:$4 sm:$0xff]   ;;  %v1486_v42 = vld [vmem:[%s1825_s13 + $0x1a4] ss:$8 sps:$4 sm:$0xff]  }
  0x5d   : > { %1028 = vmatpush1.bf16.msra.mxu0 %v1446_v15  ;;  %v1488_v43 = vld [vmem:[%s1825_s13 + $0xa0] ss:$8 sps:$4 sm:$0xff]   ;;  %v1490_v45 = vld [vmem:[%s1825_s13 + $0xb4] ss:$8 sps:$4 sm:$0xff]   ;;  %v1494_v50 = vld [vmem:[%s1825_s13 + $0xb0] ss:$8 sps:$4 sm:$0xff]  }
  0x5e   : > { %1069 = vmatpush1.bf16.msra.mxu1 %v1447_v16  ;;  %1029 = vmatprep.subr.bf16.mxu0 %v1448_v17  ;;  %v1489_v44 = vld [vmem:[%s1825_s13 + $0x1a0] ss:$8 sps:$4 sm:$0xff]   ;;  %v1492_v46 = vld [vmem:[%s1825_s13 + $0x1b4] ss:$8 sps:$4 sm:$0xff]   ;;  %v1495_v51 = vld [vmem:[%s1825_s13 + $0x1b0] ss:$8 sps:$4 sm:$0xff]  }
  0x5f   : > { %1070 = vmatprep.subr.bf16.mxu1 %v1450_v18  ;;  %v621_v47 = vld [vmem:[%s1806_s30] sm:$0xff]  ;;  %v622_v49 = vld [vmem:[%s1806_s30 + $0x8] sm:$0xff]  ;;  %v1496_v53 = vld [vmem:[%s1825_s13 + $0xc4] ss:$8 sps:$4 sm:$0xff]   ;;  %p1363_p13 = scmp.ne.s32.totalorder %s1562_s17, 8 }
  0x60   : > { %v1296_v48 = vcombine.high %v621_v47, %v621_v47  ;;  %v1298_v52 = vcombine.high %v622_v49, %v622_v49  ;;  %v1498_v54 = vld [vmem:[%s1825_s13 + $0x1c4] ss:$8 sps:$4 sm:$0xff]   ;;  %v1500_v55 = vld [vmem:[%s1825_s13 + $0xc0] ss:$8 sps:$4 sm:$0xff]   ;;  %v1502_v57 = vld [vmem:[%s1825_s13 + $0xd4] ss:$8 sps:$4 sm:$0xff]   ;;  %v1295_v5 = vcombine.low %v621_v47, %v621_v47  ;;  %v1297_v6 = vcombine.low %v622_v49, %v622_v49 }
  0x61   : > { %1030 = vmatpush1.bf16.msra.mxu0 %v1452_v19  ;;  %v1501_v56 = vld [vmem:[%s1825_s13 + $0x1c0] ss:$8 sps:$4 sm:$0xff]   ;;  %v1504_v58 = vld [vmem:[%s1825_s13 + $0x1d4] ss:$8 sps:$4 sm:$0xff]   ;;  %v1506_v59 = vld [vmem:[%s1825_s13 + $0xd0] ss:$8 sps:$4 sm:$0xff]  }
  0x62   : > { %1071 = vmatpush1.bf16.msra.mxu1 %v1453_v20  ;;  %1031 = vmatprep.subr.bf16.mxu0 %v1454_v21  ;;  %v1507_v60 = vld [vmem:[%s1825_s13 + $0x1d0] ss:$8 sps:$4 sm:$0xff]   ;;  %v1508_v61 = vld [vmem:[%s1825_s13 + $0xe4] ss:$8 sps:$4 sm:$0xff]   ;;  %v1512_v63 = vld [vmem:[%s1825_s13 + $0xe0] ss:$8 sps:$4 sm:$0xff]   ;;  %v1115_v21 = vlaneseq (!%p1363_p13) }
  0x63   : > { %1072 = vmatprep.subr.bf16.mxu1 %v1456_v22  ;;  %1053 = vmatprep.mubr.bf16.mxu0 %v1296_v48  ;;  %v1510_v62 = vld [vmem:[%s1825_s13 + $0x1e4] ss:$8 sps:$4 sm:$0xff]   ;;  %v1513_v0 = vld [vmem:[%s1825_s13 + $0x1e0] ss:$8 sps:$4 sm:$0xff]   ;;  %v1514_v1 = vld [vmem:[%s1825_s13 + $0xf4] ss:$8 sps:$4 sm:$0xff]  }
  0x64   : > { %1094 = vmatprep.mubr.bf16.mxu1 %v1298_v52  ;;  %v1516_v2 = vld [vmem:[%s1825_s13 + $0x1f4] ss:$8 sps:$4 sm:$0xff]   ;;  %v1518_v3 = vld [vmem:[%s1825_s13 + $0xf0] ss:$8 sps:$4 sm:$0xff]   ;;  %v1116_v22 = vshrl.u32 (!%p1363_p13), %v1115_v21, 7 }
  0x65   : > { %1032 = vmatpush1.bf16.msra.mxu0 %v1458_v23  ;;  %v1519_v4 = vld [vmem:[%s1825_s13 + $0x1f0] ss:$8 sps:$4 sm:$0xff]  }
  0x66   : > { %1073 = vmatpush1.bf16.msra.mxu1 %v1459_v24  ;;  %1033 = vmatprep.subr.bf16.mxu0 %v1460_v25  ;;  %v619_v8 = vld [vmem:[#allocation2] sm:$0xff]  ;;  %v620_v12 = vld [vmem:[#allocation2 + $0x8] sm:$0xff]  ;;  %v1117_v24 = vsub.s32 (!%p1363_p13), 0, %v1116_v22  ;;  %v1121_v25 = vsub.s32 (!%p1363_p13), 1, %v1116_v22 }
  0x67   : > { %1074 = vmatprep.subr.bf16.mxu1 %v1462_v26  ;;  %v1113_v23 = vld [vmem:[%s591_s15] sm:$0x3] (!%p1363_p13) }
  0x69   : > { %1034 = vmatpush1.bf16.msra.mxu0 %v1464_v27 }
  0x6a   : > { %1075 = vmatpush1.bf16.msra.mxu1 %v1465_v28  ;;  %1035 = vmatprep.subr.bf16.mxu0 %v1466_v29  ;;  %v1118_v28 = vrot.slane (!%p1363_p13), %v1113_v23, %v1117_v24  ;;  %v1122_v29 = vrot.slane (!%p1363_p13), %v1113_v23, %v1121_v25 }
  0x6b   : > { %1076 = vmatprep.subr.bf16.mxu1 %v1468_v30  ;;  %v1127_v30 = vld [vmem:[%s1818_s18] sm:$0xff] (!%p1363_p13) }
  0x6d   : > { %1036 = vmatpush1.bf16.msra.mxu0 %v1470_v31  ;;  %v1128_v31 = vld [vmem:[%s1818_s18 + $0x8] sm:$0xff] (!%p1363_p13) }
  0x6e   : > { %1077 = vmatpush1.bf16.msra.mxu1 %v1471_v32  ;;  %1037 = vmatprep.subr.bf16.mxu0 %v1472_v33 }
  0x6f   : > { %1078 = vmatprep.subr.bf16.mxu1 %v1474_v34 }
  0x71   : > { %1038 = vmatpush1.bf16.msra.mxu0 %v1476_v35 }
  0x72   : > { %1079 = vmatpush1.bf16.msra.mxu1 %v1477_v36  ;;  %1039 = vmatprep.subr.bf16.mxu0 %v1478_v37 }
  0x73   : > { %1080 = vmatprep.subr.bf16.mxu1 %v1480_v38 }
  0x75   : > { %1040 = vmatpush1.bf16.msra.mxu0 %v1482_v39 }
  0x76   : > { %1081 = vmatpush1.bf16.msra.mxu1 %v1483_v40  ;;  %1041 = vmatprep.subr.bf16.mxu0 %v1484_v41 }
  0x77   : > { %1082 = vmatprep.subr.bf16.mxu1 %v1486_v42 }
  0x79   : > { %1042 = vmatpush1.bf16.msra.mxu0 %v1488_v43 }
  0x7a   : > { %1083 = vmatpush1.bf16.msra.mxu1 %v1489_v44  ;;  %1043 = vmatprep.subr.bf16.mxu0 %v1490_v45 }
  0x7b   : > { %1084 = vmatprep.subr.bf16.mxu1 %v1492_v46 }
  0x7d   : > { %1044 = vmatpush1.bf16.msra.mxu0 %v1494_v50 }
  0x7e   : > { %1085 = vmatpush1.bf16.msra.mxu1 %v1495_v51  ;;  %1045 = vmatprep.subr.bf16.mxu0 %v1496_v53 }
  0x7f   : > { %1086 = vmatprep.subr.bf16.mxu1 %v1498_v54 }
  0x81   : > { %1046 = vmatpush1.bf16.msra.mxu0 %v1500_v55 }
  0x82   : > { %1087 = vmatpush1.bf16.msra.mxu1 %v1501_v56  ;;  %1047 = vmatprep.subr.bf16.mxu0 %v1502_v57 }
  0x83   : > { %1088 = vmatprep.subr.bf16.mxu1 %v1504_v58 }
  0x85   : > { %1048 = vmatpush1.bf16.msra.mxu0 %v1506_v59 }
  0x86   : > { %1089 = vmatpush1.bf16.msra.mxu1 %v1507_v60  ;;  %1049 = vmatprep.subr.bf16.mxu0 %v1508_v61 }
  0x87   : > { %1090 = vmatprep.subr.bf16.mxu1 %v1510_v62 }
  0x89   : > { %1050 = vmatpush1.bf16.msra.mxu0 %v1512_v63 }
  0x8a   : > { %1091 = vmatpush1.bf16.msra.mxu1 %v1513_v0  ;;  %1051 = vmatprep.subr.bf16.mxu0 %v1514_v1 }
  0x8b   : > { %1092 = vmatprep.subr.bf16.mxu1 %v1516_v2 }
  0x8d   : > { %1052 = vmatpush1.bf16.msra.mxu0 %v1518_v3 }
  0x8e   : > { %1093 = vmatpush1.bf16.msra.mxu1 %v1519_v4 }
  0x90   : > { %1054 = vmatmul.mubr.bf16.vlgmr.msra.gmra.mrb[0].mxu0 %v1295_v5 }
  0x91   : > { %1095 = vmatmul.mubr.bf16.vlgmr.msra.gmra.mrb[0].mxu1 %v1297_v6 }
 0x163   : > { %v1055_v7 = vpop.f32.mrb[0].mxu0 }
 0x164   : > { %v1096_v9 = vpop.f32.mrb[0].mxu1  ;;  %v1057_v11 = vpop.f32.mrb[1].mxu0  ;;  %1110 = sbr.rel (%p1363_p13) target bundleno = 377 (0x179), region = 82 }
 0x165   : > { %v1097_v10 = vadd.f32 %v1096_v9, %v1055_v7  ;;  %v1098_v13 = vpop.f32.mrb[1].mxu1  ;;  %v1059_v15 = vpop.f32.mrb[2].mxu0 }
 0x166   : > { %v1099_v14 = vadd.f32 %v1098_v13, %v1057_v11  ;;  %v1100_v16 = vpop.f32.mrb[2].mxu1  ;;  %v1060_v18 = vpop.f32.mrb[3].mxu0 }
 0x167   : > { %v1103_v17 = vadd.f32 %v1097_v10, %v619_v8  ;;  %v1101_v19 = vpop.f32.mrb[3].mxu1 }
 0x168   : > { %v1104_v20 = vadd.f32 %v1099_v14, %v620_v12 }
 0x169   : > { %1105 = vst [vmem:[#allocation2] sm:$0xff] %v1103_v17 }
 0x16a   : > { %1106 = vst [vmem:[#allocation2 + $0x8] sm:$0xff] %v1104_v20 }
 0x170   : > { %v1111_v26 = vld [vmem:[#allocation2] sm:$0xff] }
 0x171   : > { %v1112_v27 = vld [vmem:[#allocation2 + $0x8] sm:$0xff]  ;;  %v1125_v32 = vadd.f32 %v1118_v28, %v1111_v26 }
 0x172   : > { %v1126_v33 = vadd.f32 %v1122_v29, %v1112_v27 }
 0x173   : > { %v1129_v34 = vadd.f32 %v1127_v30, %v1125_v32 }
 0x174   : > { %v1130_v35 = vadd.f32 %v1128_v31, %v1126_v33 }
 0x175   : > { %v1131_v36 = vmax.f32 %v1129_v34, 0.0 }
 0x176   : > { %v1132_v37 = vmax.f32 %v1130_v35, 0.0 }
 0x177   : > { %1133 = vst [vmem:[%s1823_s12] sm:$0xff] %v1131_v36 }
 0x178   : > { %1134 = vst [vmem:[%s1823_s12 + $0x8] sm:$0xff] %v1132_v37 }
 0x179 PF: > { %s14_s21 = sadd.s32 1, %s1578_s21   ;;  %s1930_s15 = smov %s1558_s16 }
 0x17a   : > { %p11_p0 = scmp.ge.s32.totalorder %s14_s21, 20   ;;  %s1931_s16 = smov %s1657_s28 }
 0x17b   : > { %s1932_s17 = smov %s1570_s19  ;;  %s1933_s18 = smov %s1574_s20 }
 0x17c   : > { %s1934_s19 = smov %s1937_s22  ;;  %s1935_s20 = smov %s1941_s23 }
 0x17d   :  { %13 = sbr.rel (!%p11_p0) target bundleno = 4 (0x4), region = 126 }

// kernel: frontal_cls_forward.69
= control target key start
LH: loop header
LB: loop body
LE: loop exit
PB: predicated region body
PF: predicated region fallthrough
CT: control target
= control target key end

     0   :  { %s1514_s12 = smov 0   ;;  %s1516_s13 = smov 0   ;;  %s1826_s0 = inlined_call_operand.vmem [shape: bf16[8,4608], index: 0, kind: input, shape index: {}]   ;;  %s1827_s1 = inlined_call_operand.vmem [shape: bf16[4608,512], index: 1, kind: input, shape index: {}]   ;;  %s1828_s2 = inlined_call_operand.vmem [shape: f32[1,512], index: 2, kind: input, shape index: {}]   ;;  %s1829_s3 = inlined_call_operand.vmem [shape: f32[8,512], index: 3, kind: output, shape index: {}]  }
   0x1   :  { %s1518_s14 = smov 0   ;;  %s1520_s15 = smov 0  }
   0x2   :  { %s1522_s16 = smov 0   ;;  %s1524_s17 = smov 0  }
   0x3   :  { %s1526_s18 = smov 0  }
   0x4 LB: > { %s25_s19 = sadd.s32 1, %s1483_s16  ;;  %s28_s20 = sadd.s32 1, %s1487_s17  ;;  %s1491_s18 = sphi %s1526_s18, %s13_s18   ;;  %s1487_s17 = sphi %s1524_s17, %s1835_s17   ;;  %s1483_s16 = sphi %s1522_s16, %s1834_s16   ;;  %s1479_s15 = sphi %s1520_s15, %s1833_s15   ;;  %s1475_s14 = sphi %s1518_s14, %s1832_s14   ;;  %s1471_s13 = sphi %s1516_s13, %s1831_s13   ;;  %s1467_s12 = sphi %s1514_s12, %s1830_s12  }
   0x5   : > { %p26_p0 = scmp.ge.s32.totalorder %s25_s19, 9  ;;  %p76_p1 = scmp.ne.s32.totalorder %s1471_s13, %s1467_s12 }
   0x6   : > { %p77_p2 = scmp.eq.s32.totalorder %s1491_s18, 0  ;;  %s69_s24 = sadd.s32 1, %s1471_s13 }
   0x7   : > { %s1837_s19 = smov (%p26_p0, %s25_s19), 0  ;;  %s1839_s20 = smov (!%p26_p0, %s28_s20), %s1487_s17 }
   0x8   : > { %p78_p3 = por %p77_p2, %p76_p1  ;;  %p30_p4 = scmp.ge.s32.totalorder %s1839_s20, 2 }
   0x9   : > { %s64_s21 = ssub.s32 %s1483_s16, %s1837_s19  ;;  %p1194_p6 = scmp.ge.s32.totalorder %s1491_s18, 18 }
   0xa   : > { %s1841_s20 = smov (%p30_p4, %s1839_s20), 0 }
   0xb   : > { %s65_s22 = ssub.s32 %s1487_s17, %s1841_s20  ;;  %156 = sbr.rel (%p1194_p6) target bundleno = 57 (0x39), region = 16 }
   0xc   : > { %s66_s23 = sor.u32 %s65_s22, %s64_s21 }
   0xd   : > { %p67_p5 = scmp.eq.s32.totalorder %s66_s23, 0 }
   0xf   : > { %s1565_s25 = scalar_select %p67_p5, %s1471_s13, %s69_s24  }
  0x12   : > { %172 = sbr.rel (!%p78_p3) target bundleno = 57 (0x39), region = 24  ;;  %s174_s26 = sand.u32 (%p78_p3), 1, %s1471_s13  }
  0x13   : > { %s1197_s27 = sshll.u32 (%p78_p3), %s1487_s17, 1  ;;  %s1195_s28 = sshll.u32 (%p78_p3), %s174_s26, 9 }
  0x14   : > { %s1279_s29 = sshll.u32 (%p78_p3), %s1483_s16, 8  ;;  %s1579_s8 = scalar_lea.vmem (%p78_p3), [#allocation3], %s1195_s28 }
  0x15   : > { %s180_s30 = sadd.s32 (%p78_p3), %s1279_s29, %s1197_s27 }
  0x16   : > { %s1199_s4 = sshll.u32 (%p78_p3), %s180_s30, 2 }
  0x17   : > { %s1574_s7 = scalar_lea.vmem (%p78_p3), %s1827_s1, %s1199_s4 }
  0x18   : > { %v336_v0 = vld [vmem:[%s1574_s7] sm:$0xff] (%p78_p3)  ;;  %v338_v1 = vld [vmem:[%s1574_s7 + $0x10] sm:$0xff] (%p78_p3) }
  0x19   : > { %v340_v2 = vld [vmem:[%s1574_s7 + $0x20] sm:$0xff]  ;;  %337 = vst [vmem:[%s1579_s8] sm:$0xff] %v336_v0  ;;  %339 = vst [vmem:[%s1579_s8 + $0x8] sm:$0xff] %v338_v1  ;;  %v342_v3 = vld [vmem:[%s1574_s7 + $0x30] sm:$0xff] }
  0x1a   : > { %341 = vst [vmem:[%s1579_s8 + $0x10] sm:$0xff] %v340_v2  ;;  %v344_v4 = vld [vmem:[%s1574_s7 + $0x40] sm:$0xff]  ;;  %v346_v5 = vld [vmem:[%s1574_s7 + $0x50] sm:$0xff]  ;;  %343 = vst [vmem:[%s1579_s8 + $0x18] sm:$0xff] %v342_v3 }
  0x1b   : > { %345 = vst [vmem:[%s1579_s8 + $0x20] sm:$0xff] %v344_v4  ;;  %347 = vst [vmem:[%s1579_s8 + $0x28] sm:$0xff] %v346_v5  ;;  %v348_v6 = vld [vmem:[%s1574_s7 + $0x60] sm:$0xff]  ;;  %v350_v7 = vld [vmem:[%s1574_s7 + $0x70] sm:$0xff] }
  0x1c   : > { %v352_v8 = vld [vmem:[%s1574_s7 + $0x80] sm:$0xff]  ;;  %349 = vst [vmem:[%s1579_s8 + $0x30] sm:$0xff] %v348_v6  ;;  %351 = vst [vmem:[%s1579_s8 + $0x38] sm:$0xff] %v350_v7  ;;  %v354_v9 = vld [vmem:[%s1574_s7 + $0x90] sm:$0xff] }
  0x1d   : > { %353 = vst [vmem:[%s1579_s8 + $0x40] sm:$0xff] %v352_v8  ;;  %v356_v10 = vld [vmem:[%s1574_s7 + $0xa0] sm:$0xff]  ;;  %v358_v11 = vld [vmem:[%s1574_s7 + $0xb0] sm:$0xff]  ;;  %355 = vst [vmem:[%s1579_s8 + $0x48] sm:$0xff] %v354_v9 }
  0x1e   : > { %357 = vst [vmem:[%s1579_s8 + $0x50] sm:$0xff] %v356_v10  ;;  %359 = vst [vmem:[%s1579_s8 + $0x58] sm:$0xff] %v358_v11  ;;  %v360_v12 = vld [vmem:[%s1574_s7 + $0xc0] sm:$0xff]  ;;  %v362_v13 = vld [vmem:[%s1574_s7 + $0xd0] sm:$0xff] }
  0x1f   : > { %v364_v14 = vld [vmem:[%s1574_s7 + $0xe0] sm:$0xff]  ;;  %361 = vst [vmem:[%s1579_s8 + $0x60] sm:$0xff] %v360_v12  ;;  %363 = vst [vmem:[%s1579_s8 + $0x68] sm:$0xff] %v362_v13  ;;  %v366_v15 = vld [vmem:[%s1574_s7 + $0xf0] sm:$0xff] }
  0x20   : > { %365 = vst [vmem:[%s1579_s8 + $0x70] sm:$0xff] %v364_v14  ;;  %v368_v16 = vld [vmem:[%s1574_s7 + $0x100] sm:$0xff]  ;;  %v370_v17 = vld [vmem:[%s1574_s7 + $0x110] sm:$0xff]  ;;  %367 = vst [vmem:[%s1579_s8 + $0x78] sm:$0xff] %v366_v15 }
  0x21   : > { %369 = vst [vmem:[%s1579_s8 + $0x80] sm:$0xff] %v368_v16  ;;  %371 = vst [vmem:[%s1579_s8 + $0x88] sm:$0xff] %v370_v17  ;;  %v372_v18 = vld [vmem:[%s1574_s7 + $0x120] sm:$0xff]  ;;  %v374_v19 = vld [vmem:[%s1574_s7 + $0x130] sm:$0xff] }
  0x22   : > { %v376_v20 = vld [vmem:[%s1574_s7 + $0x140] sm:$0xff]  ;;  %373 = vst [vmem:[%s1579_s8 + $0x90] sm:$0xff] %v372_v18  ;;  %375 = vst [vmem:[%s1579_s8 + $0x98] sm:$0xff] %v374_v19  ;;  %v378_v21 = vld [vmem:[%s1574_s7 + $0x150] sm:$0xff] }
  0x23   : > { %377 = vst [vmem:[%s1579_s8 + $0xa0] sm:$0xff] %v376_v20  ;;  %v380_v22 = vld [vmem:[%s1574_s7 + $0x160] sm:$0xff]  ;;  %v382_v23 = vld [vmem:[%s1574_s7 + $0x170] sm:$0xff]  ;;  %379 = vst [vmem:[%s1579_s8 + $0xa8] sm:$0xff] %v378_v21 }
  0x24   : > { %381 = vst [vmem:[%s1579_s8 + $0xb0] sm:$0xff] %v380_v22  ;;  %383 = vst [vmem:[%s1579_s8 + $0xb8] sm:$0xff] %v382_v23  ;;  %v384_v24 = vld [vmem:[%s1574_s7 + $0x180] sm:$0xff]  ;;  %v386_v25 = vld [vmem:[%s1574_s7 + $0x190] sm:$0xff] }
  0x25   : > { %v388_v26 = vld [vmem:[%s1574_s7 + $0x1a0] sm:$0xff]  ;;  %385 = vst [vmem:[%s1579_s8 + $0xc0] sm:$0xff] %v384_v24  ;;  %387 = vst [vmem:[%s1579_s8 + $0xc8] sm:$0xff] %v386_v25  ;;  %v390_v27 = vld [vmem:[%s1574_s7 + $0x1b0] sm:$0xff] }
  0x26   : > { %389 = vst [vmem:[%s1579_s8 + $0xd0] sm:$0xff] %v388_v26  ;;  %v392_v28 = vld [vmem:[%s1574_s7 + $0x1c0] sm:$0xff]  ;;  %v394_v29 = vld [vmem:[%s1574_s7 + $0x1d0] sm:$0xff]  ;;  %391 = vst [vmem:[%s1579_s8 + $0xd8] sm:$0xff] %v390_v27 }
  0x27   : > { %393 = vst [vmem:[%s1579_s8 + $0xe0] sm:$0xff] %v392_v28  ;;  %395 = vst [vmem:[%s1579_s8 + $0xe8] sm:$0xff] %v394_v29  ;;  %v396_v30 = vld [vmem:[%s1574_s7 + $0x1e0] sm:$0xff]  ;;  %v398_v31 = vld [vmem:[%s1574_s7 + $0x1f0] sm:$0xff] }
  0x28   : > { %v400_v32 = vld [vmem:[%s1574_s7 + $0x200] sm:$0xff]  ;;  %397 = vst [vmem:[%s1579_s8 + $0xf0] sm:$0xff] %v396_v30  ;;  %399 = vst [vmem:[%s1579_s8 + $0xf8] sm:$0xff] %v398_v31  ;;  %v402_v33 = vld [vmem:[%s1574_s7 + $0x210] sm:$0xff] }
  0x29   : > { %401 = vst [vmem:[%s1579_s8 + $0x100] sm:$0xff] %v400_v32  ;;  %v404_v34 = vld [vmem:[%s1574_s7 + $0x220] sm:$0xff]  ;;  %v406_v35 = vld [vmem:[%s1574_s7 + $0x230] sm:$0xff]  ;;  %403 = vst [vmem:[%s1579_s8 + $0x108] sm:$0xff] %v402_v33 }
  0x2a   : > { %405 = vst [vmem:[%s1579_s8 + $0x110] sm:$0xff] %v404_v34  ;;  %407 = vst [vmem:[%s1579_s8 + $0x118] sm:$0xff] %v406_v35  ;;  %v408_v36 = vld [vmem:[%s1574_s7 + $0x240] sm:$0xff]  ;;  %v410_v37 = vld [vmem:[%s1574_s7 + $0x250] sm:$0xff] }
  0x2b   : > { %v412_v38 = vld [vmem:[%s1574_s7 + $0x260] sm:$0xff]  ;;  %409 = vst [vmem:[%s1579_s8 + $0x120] sm:$0xff] %v408_v36  ;;  %411 = vst [vmem:[%s1579_s8 + $0x128] sm:$0xff] %v410_v37  ;;  %v414_v39 = vld [vmem:[%s1574_s7 + $0x270] sm:$0xff] }
  0x2c   : > { %413 = vst [vmem:[%s1579_s8 + $0x130] sm:$0xff] %v412_v38  ;;  %v416_v40 = vld [vmem:[%s1574_s7 + $0x280] sm:$0xff]  ;;  %v418_v41 = vld [vmem:[%s1574_s7 + $0x290] sm:$0xff]  ;;  %415 = vst [vmem:[%s1579_s8 + $0x138] sm:$0xff] %v414_v39 }
  0x2d   : > { %417 = vst [vmem:[%s1579_s8 + $0x140] sm:$0xff] %v416_v40  ;;  %419 = vst [vmem:[%s1579_s8 + $0x148] sm:$0xff] %v418_v41  ;;  %v420_v42 = vld [vmem:[%s1574_s7 + $0x2a0] sm:$0xff]  ;;  %v422_v43 = vld [vmem:[%s1574_s7 + $0x2b0] sm:$0xff] }
  0x2e   : > { %v424_v44 = vld [vmem:[%s1574_s7 + $0x2c0] sm:$0xff]  ;;  %421 = vst [vmem:[%s1579_s8 + $0x150] sm:$0xff] %v420_v42  ;;  %423 = vst [vmem:[%s1579_s8 + $0x158] sm:$0xff] %v422_v43  ;;  %v426_v45 = vld [vmem:[%s1574_s7 + $0x2d0] sm:$0xff] }
  0x2f   : > { %425 = vst [vmem:[%s1579_s8 + $0x160] sm:$0xff] %v424_v44  ;;  %v428_v46 = vld [vmem:[%s1574_s7 + $0x2e0] sm:$0xff]  ;;  %v430_v47 = vld [vmem:[%s1574_s7 + $0x2f0] sm:$0xff]  ;;  %427 = vst [vmem:[%s1579_s8 + $0x168] sm:$0xff] %v426_v45 }
  0x30   : > { %429 = vst [vmem:[%s1579_s8 + $0x170] sm:$0xff] %v428_v46  ;;  %431 = vst [vmem:[%s1579_s8 + $0x178] sm:$0xff] %v430_v47  ;;  %v432_v48 = vld [vmem:[%s1574_s7 + $0x300] sm:$0xff]  ;;  %v434_v49 = vld [vmem:[%s1574_s7 + $0x310] sm:$0xff] }
  0x31   : > { %v436_v50 = vld [vmem:[%s1574_s7 + $0x320] sm:$0xff]  ;;  %433 = vst [vmem:[%s1579_s8 + $0x180] sm:$0xff] %v432_v48  ;;  %435 = vst [vmem:[%s1579_s8 + $0x188] sm:$0xff] %v434_v49  ;;  %v438_v51 = vld [vmem:[%s1574_s7 + $0x330] sm:$0xff] }
  0x32   : > { %437 = vst [vmem:[%s1579_s8 + $0x190] sm:$0xff] %v436_v50  ;;  %v440_v52 = vld [vmem:[%s1574_s7 + $0x340] sm:$0xff]  ;;  %v442_v53 = vld [vmem:[%s1574_s7 + $0x350] sm:$0xff]  ;;  %439 = vst [vmem:[%s1579_s8 + $0x198] sm:$0xff] %v438_v51 }
  0x33   : > { %441 = vst [vmem:[%s1579_s8 + $0x1a0] sm:$0xff] %v440_v52  ;;  %443 = vst [vmem:[%s1579_s8 + $0x1a8] sm:$0xff] %v442_v53  ;;  %v444_v54 = vld [vmem:[%s1574_s7 + $0x360] sm:$0xff]  ;;  %v446_v55 = vld [vmem:[%s1574_s7 + $0x370] sm:$0xff] }
  0x34   : > { %v448_v56 = vld [vmem:[%s1574_s7 + $0x380] sm:$0xff]  ;;  %445 = vst [vmem:[%s1579_s8 + $0x1b0] sm:$0xff] %v444_v54  ;;  %447 = vst [vmem:[%s1579_s8 + $0x1b8] sm:$0xff] %v446_v55  ;;  %v450_v57 = vld [vmem:[%s1574_s7 + $0x390] sm:$0xff] }
  0x35   : > { %449 = vst [vmem:[%s1579_s8 + $0x1c0] sm:$0xff] %v448_v56  ;;  %v452_v58 = vld [vmem:[%s1574_s7 + $0x3a0] sm:$0xff]  ;;  %v454_v59 = vld [vmem:[%s1574_s7 + $0x3b0] sm:$0xff]  ;;  %451 = vst [vmem:[%s1579_s8 + $0x1c8] sm:$0xff] %v450_v57 }
  0x36   : > { %453 = vst [vmem:[%s1579_s8 + $0x1d0] sm:$0xff] %v452_v58  ;;  %455 = vst [vmem:[%s1579_s8 + $0x1d8] sm:$0xff] %v454_v59  ;;  %v456_v60 = vld [vmem:[%s1574_s7 + $0x3c0] sm:$0xff]  ;;  %v458_v61 = vld [vmem:[%s1574_s7 + $0x3d0] sm:$0xff] }
  0x37   : > { %v460_v62 = vld [vmem:[%s1574_s7 + $0x3e0] sm:$0xff]  ;;  %457 = vst [vmem:[%s1579_s8 + $0x1e0] sm:$0xff] %v456_v60  ;;  %459 = vst [vmem:[%s1579_s8 + $0x1e8] sm:$0xff] %v458_v61  ;;  %v462_v63 = vld [vmem:[%s1574_s7 + $0x3f0] sm:$0xff] }
  0x38   : > { %461 = vst [vmem:[%s1579_s8 + $0x1f0] sm:$0xff] %v460_v62  ;;  %463 = vst [vmem:[%s1579_s8 + $0x1f8] sm:$0xff] %v462_v63 }
  0x39 PF: > { %p1200_p7 = scmp.ge.s32.totalorder %s1491_s18, 1  ;;  %p476_p8 = scmp.lt.s32.totalorder %s1491_s18, 19 }
  0x3b   : > { %p477_p9 = pnand %p1200_p7, %p476_p8 }
  0x3c   : > { %s483_s9 = sand.u32 (!%p477_p9), 1, %s1467_s12   ;;  %s1202_s10 = sshll.u32 (!%p477_p9), %s1475_s14, 2 }
  0x3d   : > { %480 = sbr.rel (%p477_p9) target bundleno = 374 (0x176), region = 66  ;;  %s1201_s11 = sshll.u32 (!%p477_p9), %s483_s9, 9 }
  0x3e   : > { %p526_p10 = scmp.lt.s32.totalorder (!%p477_p9), %s1202_s10, 35  ;;  %s1204_s21 = sshll.u32 (!%p477_p9), %s1479_s15, 1 }
  0x3f   : > { %p536_p11 = scmp.lt.s32.totalorder (!%p477_p9), %s1204_s21, 3  ;;  %s1728_s5 = scalar_lea.vmem (!%p477_p9), [#allocation3], %s1201_s11 }
  0x40   : > { %p1207_p12 = scmp.ne.s32.totalorder (!%p477_p9), %s1475_s14, 0 }
  0x44   : > { %s1843_s10 = smov (!%p526_p10, %s1202_s10), 35  ;;  %s1845_s21 = smov (!%p536_p11, %s1204_s21), 3 }
  0x45   : > { %s1203_s22 = sshll.u32 %s1843_s10, 2  ;;  %s538_s12 = scalar_lea.vmem %s1828_s2, %s1845_s21  ;;  %v1493_v0 = vmov (!%p1207_p12), 0.0  }
  0x46   : > { %s1714_s26 = scalar_lea.vmem %s1826_s0, %s1203_s22  ;;  %s1206_s29 = sshll.u32 %s1845_s21, 3  ;;  %554 = vst [vmem:[#allocation2] sm:$0xff] (!%p1207_p12), %v1493_v0  ;;  %555 = vst [vmem:[#allocation2 + $0x8] sm:$0xff] (!%p1207_p12), %v1493_v0 }
  0x47   : > { %s1726_s15 = scalar_lea.vmem %s1829_s3, %s1206_s29  ;;  %553 = sbr.rel (%p1207_p12) target bundleno = 78 (0x4e), region = 74 }
  0x4e PF: > { %v1337_v1 = vld [vmem:[%s1728_s5 + $0x4] ss:$8 sps:$4 sm:$0xff]   ;;  %v1341_v3 = vld [vmem:[%s1728_s5] ss:$8 sps:$4 sm:$0xff]   ;;  %v1343_v5 = vld [vmem:[%s1728_s5 + $0x14] ss:$8 sps:$4 sm:$0xff]  }
  0x4f   : > { %v1339_v2 = vld [vmem:[%s1728_s5 + $0x104] ss:$8 sps:$4 sm:$0xff]   ;;  %958 = vmatprep.subr.bf16.mxu0 %v1337_v1  ;;  %v1342_v4 = vld [vmem:[%s1728_s5 + $0x100] ss:$8 sps:$4 sm:$0xff]   ;;  %v1345_v6 = vld [vmem:[%s1728_s5 + $0x114] ss:$8 sps:$4 sm:$0xff]  }
  0x50   : > { %999 = vmatprep.subr.bf16.mxu1 %v1339_v2  ;;  %959 = vmatpush1.bf16.msra.mxu0 %v1341_v3  ;;  %v1347_v7 = vld [vmem:[%s1728_s5 + $0x10] ss:$8 sps:$4 sm:$0xff]   ;;  %v1349_v9 = vld [vmem:[%s1728_s5 + $0x24] ss:$8 sps:$4 sm:$0xff]   ;;  %v1353_v11 = vld [vmem:[%s1728_s5 + $0x20] ss:$8 sps:$4 sm:$0xff]  }
  0x51   : > { %1000 = vmatpush1.bf16.msra.mxu1 %v1342_v4  ;;  %960 = vmatprep.subr.bf16.mxu0 %v1343_v5  ;;  %v1348_v8 = vld [vmem:[%s1728_s5 + $0x110] ss:$8 sps:$4 sm:$0xff]   ;;  %v1351_v10 = vld [vmem:[%s1728_s5 + $0x124] ss:$8 sps:$4 sm:$0xff]   ;;  %v1354_v12 = vld [vmem:[%s1728_s5 + $0x120] ss:$8 sps:$4 sm:$0xff]  }
  0x52   : > { %1001 = vmatprep.subr.bf16.mxu1 %v1345_v6  ;;  %v1355_v13 = vld [vmem:[%s1728_s5 + $0x34] ss:$8 sps:$4 sm:$0xff]   ;;  %v1359_v15 = vld [vmem:[%s1728_s5 + $0x30] ss:$8 sps:$4 sm:$0xff]   ;;  %v1361_v17 = vld [vmem:[%s1728_s5 + $0x44] ss:$8 sps:$4 sm:$0xff]  }
  0x53   : > { %v1357_v14 = vld [vmem:[%s1728_s5 + $0x134] ss:$8 sps:$4 sm:$0xff]   ;;  %v1360_v16 = vld [vmem:[%s1728_s5 + $0x130] ss:$8 sps:$4 sm:$0xff]   ;;  %v1363_v18 = vld [vmem:[%s1728_s5 + $0x144] ss:$8 sps:$4 sm:$0xff]  }
  0x54   : > { %961 = vmatpush1.bf16.msra.mxu0 %v1347_v7  ;;  %v1365_v19 = vld [vmem:[%s1728_s5 + $0x40] ss:$8 sps:$4 sm:$0xff]   ;;  %v1367_v21 = vld [vmem:[%s1728_s5 + $0x54] ss:$8 sps:$4 sm:$0xff]   ;;  %v1371_v23 = vld [vmem:[%s1728_s5 + $0x50] ss:$8 sps:$4 sm:$0xff]  }
  0x55   : > { %1002 = vmatpush1.bf16.msra.mxu1 %v1348_v8  ;;  %962 = vmatprep.subr.bf16.mxu0 %v1349_v9  ;;  %v1366_v20 = vld [vmem:[%s1728_s5 + $0x140] ss:$8 sps:$4 sm:$0xff]   ;;  %v1369_v22 = vld [vmem:[%s1728_s5 + $0x154] ss:$8 sps:$4 sm:$0xff]   ;;  %v1372_v24 = vld [vmem:[%s1728_s5 + $0x150] ss:$8 sps:$4 sm:$0xff]  }
  0x56   : > { %1003 = vmatprep.subr.bf16.mxu1 %v1351_v10  ;;  %v1373_v25 = vld [vmem:[%s1728_s5 + $0x64] ss:$8 sps:$4 sm:$0xff]   ;;  %v1377_v27 = vld [vmem:[%s1728_s5 + $0x60] ss:$8 sps:$4 sm:$0xff]   ;;  %v1379_v29 = vld [vmem:[%s1728_s5 + $0x74] ss:$8 sps:$4 sm:$0xff]  }
  0x57   : > { %v1375_v26 = vld [vmem:[%s1728_s5 + $0x164] ss:$8 sps:$4 sm:$0xff]   ;;  %v1378_v28 = vld [vmem:[%s1728_s5 + $0x160] ss:$8 sps:$4 sm:$0xff]   ;;  %v1381_v30 = vld [vmem:[%s1728_s5 + $0x174] ss:$8 sps:$4 sm:$0xff]  }
  0x58   : > { %963 = vmatpush1.bf16.msra.mxu0 %v1353_v11  ;;  %v1383_v31 = vld [vmem:[%s1728_s5 + $0x70] ss:$8 sps:$4 sm:$0xff]   ;;  %v1385_v33 = vld [vmem:[%s1728_s5 + $0x84] ss:$8 sps:$4 sm:$0xff]   ;;  %v1389_v35 = vld [vmem:[%s1728_s5 + $0x80] ss:$8 sps:$4 sm:$0xff]  }
  0x59   : > { %1004 = vmatpush1.bf16.msra.mxu1 %v1354_v12  ;;  %964 = vmatprep.subr.bf16.mxu0 %v1355_v13  ;;  %v1384_v32 = vld [vmem:[%s1728_s5 + $0x170] ss:$8 sps:$4 sm:$0xff]   ;;  %v1387_v34 = vld [vmem:[%s1728_s5 + $0x184] ss:$8 sps:$4 sm:$0xff]   ;;  %v1390_v36 = vld [vmem:[%s1728_s5 + $0x180] ss:$8 sps:$4 sm:$0xff]  }
  0x5a   : > { %1005 = vmatprep.subr.bf16.mxu1 %v1357_v14  ;;  %v1391_v37 = vld [vmem:[%s1728_s5 + $0x94] ss:$8 sps:$4 sm:$0xff]   ;;  %v1395_v39 = vld [vmem:[%s1728_s5 + $0x90] ss:$8 sps:$4 sm:$0xff]   ;;  %v1397_v41 = vld [vmem:[%s1728_s5 + $0xa4] ss:$8 sps:$4 sm:$0xff]  }
  0x5b   : > { %v1393_v38 = vld [vmem:[%s1728_s5 + $0x194] ss:$8 sps:$4 sm:$0xff]   ;;  %v1396_v40 = vld [vmem:[%s1728_s5 + $0x190] ss:$8 sps:$4 sm:$0xff]   ;;  %v1399_v42 = vld [vmem:[%s1728_s5 + $0x1a4] ss:$8 sps:$4 sm:$0xff]  }
  0x5c   : > { %965 = vmatpush1.bf16.msra.mxu0 %v1359_v15  ;;  %v1401_v43 = vld [vmem:[%s1728_s5 + $0xa0] ss:$8 sps:$4 sm:$0xff]   ;;  %v1403_v45 = vld [vmem:[%s1728_s5 + $0xb4] ss:$8 sps:$4 sm:$0xff]   ;;  %v1407_v50 = vld [vmem:[%s1728_s5 + $0xb0] ss:$8 sps:$4 sm:$0xff]  }
  0x5d   : > { %1006 = vmatpush1.bf16.msra.mxu1 %v1360_v16  ;;  %966 = vmatprep.subr.bf16.mxu0 %v1361_v17  ;;  %v1402_v44 = vld [vmem:[%s1728_s5 + $0x1a0] ss:$8 sps:$4 sm:$0xff]   ;;  %v1405_v46 = vld [vmem:[%s1728_s5 + $0x1b4] ss:$8 sps:$4 sm:$0xff]   ;;  %v1408_v51 = vld [vmem:[%s1728_s5 + $0x1b0] ss:$8 sps:$4 sm:$0xff]  }
  0x5e   : > { %1007 = vmatprep.subr.bf16.mxu1 %v1363_v18  ;;  %v558_v47 = vld [vmem:[%s1714_s26] sm:$0xff]  ;;  %v559_v49 = vld [vmem:[%s1714_s26 + $0x8] sm:$0xff]  ;;  %v1409_v53 = vld [vmem:[%s1728_s5 + $0xc4] ss:$8 sps:$4 sm:$0xff]   ;;  %p1276_p13 = scmp.ne.s32.totalorder %s1475_s14, 8 }
  0x5f   : > { %v1209_v48 = vcombine.high %v558_v47, %v558_v47  ;;  %v1211_v52 = vcombine.high %v559_v49, %v559_v49  ;;  %v1411_v54 = vld [vmem:[%s1728_s5 + $0x1c4] ss:$8 sps:$4 sm:$0xff]   ;;  %v1413_v55 = vld [vmem:[%s1728_s5 + $0xc0] ss:$8 sps:$4 sm:$0xff]   ;;  %v1415_v57 = vld [vmem:[%s1728_s5 + $0xd4] ss:$8 sps:$4 sm:$0xff]   ;;  %v1208_v5 = vcombine.low %v558_v47, %v558_v47  ;;  %v1210_v6 = vcombine.low %v559_v49, %v559_v49 }
  0x60   : > { %967 = vmatpush1.bf16.msra.mxu0 %v1365_v19  ;;  %v1414_v56 = vld [vmem:[%s1728_s5 + $0x1c0] ss:$8 sps:$4 sm:$0xff]   ;;  %v1417_v58 = vld [vmem:[%s1728_s5 + $0x1d4] ss:$8 sps:$4 sm:$0xff]   ;;  %v1419_v59 = vld [vmem:[%s1728_s5 + $0xd0] ss:$8 sps:$4 sm:$0xff]  }
  0x61   : > { %1008 = vmatpush1.bf16.msra.mxu1 %v1366_v20  ;;  %968 = vmatprep.subr.bf16.mxu0 %v1367_v21  ;;  %v1420_v60 = vld [vmem:[%s1728_s5 + $0x1d0] ss:$8 sps:$4 sm:$0xff]   ;;  %v1421_v61 = vld [vmem:[%s1728_s5 + $0xe4] ss:$8 sps:$4 sm:$0xff]   ;;  %v1425_v63 = vld [vmem:[%s1728_s5 + $0xe0] ss:$8 sps:$4 sm:$0xff]   ;;  %v1052_v21 = vlaneseq (!%p1276_p13) }
  0x62   : > { %1009 = vmatprep.subr.bf16.mxu1 %v1369_v22  ;;  %990 = vmatprep.mubr.bf16.mxu0 %v1209_v48  ;;  %v1423_v62 = vld [vmem:[%s1728_s5 + $0x1e4] ss:$8 sps:$4 sm:$0xff]   ;;  %v1426_v0 = vld [vmem:[%s1728_s5 + $0x1e0] ss:$8 sps:$4 sm:$0xff]   ;;  %v1427_v1 = vld [vmem:[%s1728_s5 + $0xf4] ss:$8 sps:$4 sm:$0xff]  }
  0x63   : > { %1031 = vmatprep.mubr.bf16.mxu1 %v1211_v52  ;;  %v1429_v2 = vld [vmem:[%s1728_s5 + $0x1f4] ss:$8 sps:$4 sm:$0xff]   ;;  %v1431_v3 = vld [vmem:[%s1728_s5 + $0xf0] ss:$8 sps:$4 sm:$0xff]   ;;  %v1053_v22 = vshrl.u32 (!%p1276_p13), %v1052_v21, 7 }
  0x64   : > { %969 = vmatpush1.bf16.msra.mxu0 %v1371_v23  ;;  %v1432_v4 = vld [vmem:[%s1728_s5 + $0x1f0] ss:$8 sps:$4 sm:$0xff]  }
  0x65   : > { %1010 = vmatpush1.bf16.msra.mxu1 %v1372_v24  ;;  %970 = vmatprep.subr.bf16.mxu0 %v1373_v25  ;;  %v556_v8 = vld [vmem:[#allocation2] sm:$0xff]  ;;  %v557_v12 = vld [vmem:[#allocation2 + $0x8] sm:$0xff]  ;;  %v1054_v24 = vsub.s32 (!%p1276_p13), 0, %v1053_v22  ;;  %v1058_v25 = vsub.s32 (!%p1276_p13), 1, %v1053_v22 }
  0x66   : > { %1011 = vmatprep.subr.bf16.mxu1 %v1375_v26  ;;  %v1050_v23 = vld [vmem:[%s538_s12] sm:$0x3] (!%p1276_p13) }
  0x68   : > { %971 = vmatpush1.bf16.msra.mxu0 %v1377_v27 }
  0x69   : > { %1012 = vmatpush1.bf16.msra.mxu1 %v1378_v28  ;;  %972 = vmatprep.subr.bf16.mxu0 %v1379_v29  ;;  %v1055_v28 = vrot.slane (!%p1276_p13), %v1050_v23, %v1054_v24  ;;  %v1059_v29 = vrot.slane (!%p1276_p13), %v1050_v23, %v1058_v25 }
  0x6a   : > { %1013 = vmatprep.subr.bf16.mxu1 %v1381_v30 }
  0x6c   : > { %973 = vmatpush1.bf16.msra.mxu0 %v1383_v31 }
  0x6d   : > { %1014 = vmatpush1.bf16.msra.mxu1 %v1384_v32  ;;  %974 = vmatprep.subr.bf16.mxu0 %v1385_v33 }
  0x6e   : > { %1015 = vmatprep.subr.bf16.mxu1 %v1387_v34 }
  0x70   : > { %975 = vmatpush1.bf16.msra.mxu0 %v1389_v35 }
  0x71   : > { %1016 = vmatpush1.bf16.msra.mxu1 %v1390_v36  ;;  %976 = vmatprep.subr.bf16.mxu0 %v1391_v37 }
  0x72   : > { %1017 = vmatprep.subr.bf16.mxu1 %v1393_v38 }
  0x74   : > { %977 = vmatpush1.bf16.msra.mxu0 %v1395_v39 }
  0x75   : > { %1018 = vmatpush1.bf16.msra.mxu1 %v1396_v40  ;;  %978 = vmatprep.subr.bf16.mxu0 %v1397_v41 }
  0x76   : > { %1019 = vmatprep.subr.bf16.mxu1 %v1399_v42 }
  0x78   : > { %979 = vmatpush1.bf16.msra.mxu0 %v1401_v43 }
  0x79   : > { %1020 = vmatpush1.bf16.msra.mxu1 %v1402_v44  ;;  %980 = vmatprep.subr.bf16.mxu0 %v1403_v45 }
  0x7a   : > { %1021 = vmatprep.subr.bf16.mxu1 %v1405_v46 }
  0x7c   : > { %981 = vmatpush1.bf16.msra.mxu0 %v1407_v50 }
  0x7d   : > { %1022 = vmatpush1.bf16.msra.mxu1 %v1408_v51  ;;  %982 = vmatprep.subr.bf16.mxu0 %v1409_v53 }
  0x7e   : > { %1023 = vmatprep.subr.bf16.mxu1 %v1411_v54 }
  0x80   : > { %983 = vmatpush1.bf16.msra.mxu0 %v1413_v55 }
  0x81   : > { %1024 = vmatpush1.bf16.msra.mxu1 %v1414_v56  ;;  %984 = vmatprep.subr.bf16.mxu0 %v1415_v57 }
  0x82   : > { %1025 = vmatprep.subr.bf16.mxu1 %v1417_v58 }
  0x84   : > { %985 = vmatpush1.bf16.msra.mxu0 %v1419_v59 }
  0x85   : > { %1026 = vmatpush1.bf16.msra.mxu1 %v1420_v60  ;;  %986 = vmatprep.subr.bf16.mxu0 %v1421_v61 }
  0x86   : > { %1027 = vmatprep.subr.bf16.mxu1 %v1423_v62 }
  0x88   : > { %987 = vmatpush1.bf16.msra.mxu0 %v1425_v63 }
  0x89   : > { %1028 = vmatpush1.bf16.msra.mxu1 %v1426_v0  ;;  %988 = vmatprep.subr.bf16.mxu0 %v1427_v1 }
  0x8a   : > { %1029 = vmatprep.subr.bf16.mxu1 %v1429_v2 }
  0x8c   : > { %989 = vmatpush1.bf16.msra.mxu0 %v1431_v3 }
  0x8d   : > { %1030 = vmatpush1.bf16.msra.mxu1 %v1432_v4 }
  0x8f   : > { %991 = vmatmul.mubr.bf16.vlgmr.msra.gmra.mrb[0].mxu0 %v1208_v5 }
  0x90   : > { %1032 = vmatmul.mubr.bf16.vlgmr.msra.gmra.mrb[0].mxu1 %v1210_v6 }
 0x162   : > { %v992_v7 = vpop.f32.mrb[0].mxu0 }
 0x163   : > { %v1033_v9 = vpop.f32.mrb[0].mxu1  ;;  %v994_v11 = vpop.f32.mrb[1].mxu0  ;;  %1047 = sbr.rel (%p1276_p13) target bundleno = 374 (0x176), region = 78 }
 0x164   : > { %v1034_v10 = vadd.f32 %v1033_v9, %v992_v7  ;;  %v1035_v13 = vpop.f32.mrb[1].mxu1  ;;  %v996_v15 = vpop.f32.mrb[2].mxu0 }
 0x165   : > { %v1036_v14 = vadd.f32 %v1035_v13, %v994_v11  ;;  %v1037_v16 = vpop.f32.mrb[2].mxu1  ;;  %v997_v18 = vpop.f32.mrb[3].mxu0 }
 0x166   : > { %v1040_v17 = vadd.f32 %v1034_v10, %v556_v8  ;;  %v1038_v19 = vpop.f32.mrb[3].mxu1 }
 0x167   : > { %v1041_v20 = vadd.f32 %v1036_v14, %v557_v12 }
 0x168   : > { %1042 = vst [vmem:[#allocation2] sm:$0xff] %v1040_v17 }
 0x169   : > { %1043 = vst [vmem:[#allocation2 + $0x8] sm:$0xff] %v1041_v20 }
 0x16f   : > { %v1048_v26 = vld [vmem:[#allocation2] sm:$0xff] }
 0x170   : > { %v1049_v27 = vld [vmem:[#allocation2 + $0x8] sm:$0xff]  ;;  %v1062_v30 = vadd.f32 %v1055_v28, %v1048_v26 }
 0x171   : > { %v1063_v31 = vadd.f32 %v1059_v29, %v1049_v27 }
 0x172   : > { %v1064_v32 = vmax.f32 %v1062_v30, 0.0 }
 0x173   : > { %v1065_v33 = vmax.f32 %v1063_v31, 0.0 }
 0x174   : > { %1066 = vst [vmem:[%s1726_s15] sm:$0xff] %v1064_v32 }
 0x175   : > { %1067 = vst [vmem:[%s1726_s15 + $0x8] sm:$0xff] %v1065_v33 }
 0x176 PF: > { %s13_s18 = sadd.s32 1, %s1491_s18   ;;  %s1830_s12 = smov %s1471_s13 }
 0x177   : > { %p10_p0 = scmp.ge.s32.totalorder %s13_s18, 20   ;;  %s1831_s13 = smov %s1565_s25 }
 0x178   : > { %s1832_s14 = smov %s1483_s16  ;;  %s1833_s15 = smov %s1487_s17 }
 0x179   : > { %s1834_s16 = smov %s1837_s19  ;;  %s1835_s17 = smov %s1841_s20 }
 0x17a   :  { %12 = sbr.rel (!%p10_p0) target bundleno = 4 (0x4), region = 119 }

// kernel: frontal_cls_forward.73
= control target key start
LH: loop header
LB: loop body
LE: loop exit
PB: predicated region body
PF: predicated region fallthrough
CT: control target
= control target key end

     0   :  { %vm32_vm0 = vcmask 1043456   ;;  %v100_v3 = vlaneseq  ;;  %vm137_vm1 = vcmask 1041409   ;;  %vm149_vm2 = vcmask 1041408   ;;  %s232_s0 = inlined_call_operand.vmem [shape: f32[2,4,512], index: 0, kind: input, shape index: {}]   ;;  %s233_s2 = inlined_call_operand.<no memory space> [shape: f32[1,1], index: 2, kind: input, shape index: {}]   ;;  %s234_s1 = inlined_call_operand.vmem [shape: f32[1,512], index: 1, kind: input, shape index: {}]   ;;  %s235_s3 = inlined_call_operand.vmem [shape: f32[2,1], index: 3, kind: output, shape index: {}]  }
   0x1   :  { %v16_v0 = vld [vmem:[%s232_s0] sm:$0xff]  ;;  %v17_v1 = vld [vmem:[%s232_s0 + $0x8] sm:$0xff]  ;;  %v18_v2 = vld [vmem:[%s232_s0 + $0x10] sm:$0xff]  ;;  %v8_v4 = vstv %s233_s2  ;;  %vm167_vm3 = vcmask 1024  }
   0x2   :  { %v19_v5 = vld [vmem:[%s232_s0 + $0x18] sm:$0xff]  ;;  %v24_v6 = vcombine.high %v16_v0, %v16_v0  ;;  %v25_v7 = vcombine.high %v17_v1, %v17_v1  ;;  %v26_v8 = vcombine.high %v18_v2, %v18_v2  ;;  %v33_v9 = vsel %vm32_vm0, %v16_v0, 0.0  ;;  %9 = vst [vmem:[#allocation2] sm:$0x1] %v8_v4 }
   0x3   :  { %v27_v10 = vcombine.high %v19_v5, %v19_v5  ;;  %v34_v11 = vrot.slane %v33_v9, 4  ;;  %v47_v12 = vsel %vm32_vm0, %v17_v1, 0.0  ;;  %v61_v13 = vsel %vm32_vm0, %v18_v2, 0.0 }
   0x4   :  { %v40_v14 = vsel %vm32_vm0, %v24_v6, 0.0  ;;  %v48_v15 = vrot.slane %v47_v12, 4  ;;  %v54_v16 = vsel %vm32_vm0, %v25_v7, 0.0  ;;  %v62_v17 = vrot.slane %v61_v13, 4  ;;  %v98_v7 = vld [vmem:[%s234_s1] sm:$0xf] }
   0x5   :  { %v35_v18 = vadd.f32 %v34_v11, %v33_v9  ;;  %v41_v19 = vrot.slane %v40_v14, 4  ;;  %v55_v20 = vrot.slane %v54_v16, 4  ;;  %v68_v21 = vsel %vm32_vm0, %v26_v8, 0.0 }
   0x6   :  { %v49_v22 = vadd.f32 %v48_v15, %v47_v12  ;;  %v63_v23 = vadd.f32 %v62_v17, %v61_v13  ;;  %v69_v24 = vrot.slane %v68_v21, 4  ;;  %v75_v25 = vsel %vm32_vm0, %v19_v5, 0.0 }
   0x7   :  { %v36_v26 = vrot.slane %v35_v18, 2  ;;  %v42_v27 = vadd.f32 %v41_v19, %v40_v14  ;;  %v56_v28 = vadd.f32 %v55_v20, %v54_v16  ;;  %v76_v29 = vrot.slane %v75_v25, 4 }
   0x8   :  { %v50_v30 = vrot.slane %v49_v22, 2  ;;  %v64_v31 = vrot.slane %v63_v23, 2  ;;  %v70_v32 = vadd.f32 %v69_v24, %v68_v21  ;;  %v82_v33 = vsel %vm32_vm0, %v27_v10, 0.0 }
   0x9   :  { %v37_v34 = vadd.f32 %v36_v26, %v35_v18  ;;  %v43_v35 = vrot.slane %v42_v27, 2  ;;  %v57_v36 = vrot.slane %v56_v28, 2  ;;  %v77_v37 = vadd.f32 %v76_v29, %v75_v25 }
   0xa   :  { %v51_v38 = vadd.f32 %v50_v30, %v49_v22  ;;  %v65_v39 = vadd.f32 %v64_v31, %v63_v23  ;;  %v71_v40 = vrot.slane %v70_v32, 2  ;;  %v83_v41 = vrot.slane %v82_v33, 4 }
   0xb   :  { %v38_v42 = vrot.slane %v37_v34, 1  ;;  %v44_v43 = vadd.f32 %v43_v35, %v42_v27  ;;  %v58_v44 = vadd.f32 %v57_v36, %v56_v28  ;;  %v78_v45 = vrot.slane %v77_v37, 2 }
   0xc   :  { %v52_v46 = vrot.slane %v51_v38, 1  ;;  %v66_v47 = vrot.slane %v65_v39, 1  ;;  %v72_v48 = vadd.f32 %v71_v40, %v70_v32  ;;  %v84_v49 = vadd.f32 %v83_v41, %v82_v33 }
   0xd   :  { %v39_v50 = vadd.f32 %v38_v42, %v37_v34  ;;  %v45_v51 = vrot.slane %v44_v43, 1  ;;  %v59_v52 = vrot.slane %v58_v44, 1  ;;  %v79_v53 = vadd.f32 %v78_v45, %v77_v37 }
   0xe   :  { %v53_v54 = vadd.f32 %v52_v46, %v51_v38  ;;  %v67_v55 = vadd.f32 %v66_v47, %v65_v39  ;;  %v73_v56 = vrot.slane %v72_v48, 1  ;;  %v85_v57 = vrot.slane %v84_v49, 2 }
   0xf   :  { %v46_v58 = vadd.f32 %v45_v51, %v44_v43  ;;  %v60_v59 = vadd.f32 %v59_v52, %v58_v44  ;;  %v80_v60 = vrot.slane %v79_v53, 1  ;;  %v90_v0 = vmul.f32 0.25, %v39_v50  ;;  %v173_v43 = vld [vmem:[#allocation2] ss:$0 sm:$0xff] }
  0x10   :  { %v74_v61 = vadd.f32 %v73_v56, %v72_v48  ;;  %v86_v62 = vadd.f32 %v85_v57, %v84_v49  ;;  %v101_v1 = vshrl.u32 %v100_v3, 7  ;;  %v92_v5 = vmul.f32 0.25, %v53_v54 }
  0x11   :  { %v81_v63 = vadd.f32 %v80_v60, %v79_v53  ;;  %v91_v4 = vmul.f32 0.25, %v46_v58  ;;  %v94_v6 = vmul.f32 0.25, %v67_v55  ;;  %v93_v8 = vmul.f32 0.25, %v60_v59 }
  0x12   :  { %v87_v2 = vrot.slane %v86_v62, 1  ;;  %v102_v9 = vsub.s32 0, %v101_v1  ;;  %v106_v10 = vsub.s32 1, %v101_v1  ;;  %v110_v11 = vsub.s32 2, %v101_v1 }
  0x13   :  { %v95_v13 = vmul.f32 0.25, %v74_v61  ;;  %v96_v14 = vmul.f32 0.25, %v81_v63  ;;  %v114_v15 = vsub.s32 3, %v101_v1 }
  0x14   :  { %v88_v12 = vadd.f32 %v87_v2, %v86_v62  ;;  %v103_v16 = vrot.slane %v98_v7, %v102_v9  ;;  %v107_v17 = vrot.slane %v98_v7, %v106_v10  ;;  %v111_v18 = vrot.slane %v98_v7, %v110_v11 }
  0x15   :  { %v115_v19 = vrot.slane %v98_v7, %v114_v15 }
  0x16   :  { %v97_v3 = vmul.f32 0.25, %v88_v12  ;;  %v120_v20 = vmul.f32 %v103_v16, %v90_v0  ;;  %v121_v21 = vmul.f32 %v107_v17, %v91_v4  ;;  %v122_v22 = vmul.f32 %v111_v18, %v92_v5 }
  0x17   :  { %v124_v23 = vmul.f32 %v103_v16, %v94_v6  ;;  %v123_v24 = vmul.f32 %v115_v19, %v93_v8  ;;  %v125_v25 = vmul.f32 %v107_v17, %v95_v13  ;;  %v126_v26 = vmul.f32 %v111_v18, %v96_v14 }
  0x18   :  { %v127_v27 = vmul.f32 %v115_v19, %v97_v3 }
  0x19   :  { %v136_v28 = vrot.slane %v124_v23, 7  ;;  %v139_v29 = vrot.slane %v125_v25, 7  ;;  %v141_v30 = vrot.slane %v126_v26, 7 }
  0x1a   :  { %v143_v31 = vrot.slane %v127_v27, 7 }
  0x1b   :  { %v138_v32 = vsel %vm137_vm1, %v136_v28, %v120_v20  ;;  %v140_v33 = vsel %vm137_vm1, %v139_v29, %v121_v21  ;;  %v142_v34 = vsel %vm137_vm1, %v141_v30, %v122_v22 }
  0x1c   :  { %v144_v35 = vsel %vm137_vm1, %v143_v31, %v123_v24  ;;  %v150_v36 = vsel %vm149_vm2, %v138_v32, 0.0  ;;  %v151_v37 = vsel %vm149_vm2, %v140_v33, 0.0  ;;  %v153_v38 = vsel %vm149_vm2, %v142_v34, 0.0 }
  0x1d   :  { %v152_v39 = vadd.f32 %v151_v37, %v150_v36  ;;  %v155_v40 = vsel %vm149_vm2, %v144_v35, 0.0 }
  0x1f   :  { %v154_v41 = vadd.f32 %v153_v38, %v152_v39 }
  0x21   :  { %v156_v42 = vadd.f32 %v155_v40, %v154_v41 }
  0x23   :  { %157 = vadd.xlane.f32.xlu0 %v156_v42 }
  0xb0   :  { %v158_v44 = vpop.xlane.xlu0 %157 }
  0xb1   :  { %v166_v45 = vadd.f32 %v173_v43, %v158_v44 }
  0xb3   :  { %168 = vst.msk [vmem:[%s235_s3] sm:$0x3] %vm167_vm3, %v166_v45 }

</bundles_post_ra>
